<compile_context>
chip_gen: v5e
topology: v5e:2x2
jax: 0.10.0
libtpu: 0.0.40
codegen_flags: <defaults>
</compile_context>

<pallas_src>
import jax
import jax.numpy as jnp
import numpy as np
from jax import lax
from jax.experimental import pallas as pl
from jax.experimental.pallas import tpu as pltpu


def _gelu_exact(x):
    # PyTorch nn.GELU() default (exact erf form), computed in f32 on the VPU.
    return 0.5 * x * (1.0 + lax.erf(x * jnp.float32(0.7071067811865476)))


def mixer_block_kernel(x_ref,
                       g1_ref, be1_ref,          # LayerNorm 1 (token mixer)
                       w1t_ref, b1_ref,          # token FF layer 1 (L -> H), (L, H) bf16
                       w2t_ref, b2_ref,          # token FF layer 2 (H -> L), (H, L) bf16
                       g2_ref, be2_ref,          # LayerNorm 2 (channel mixer)
                       w3t_ref, b3_ref,          # channel FF layer 1 (D -> H), (D, H) bf16
                       w4t_ref, b4_ref,          # channel FF layer 2 (H -> D), (H, D) bf16
                       w5f_ref, b5_ref,          # final linear, (L*D, D) bf16 (rows = l*D + d)
                       o_ref,
                       flat_ref):                # VMEM scratch (tb, L*D) bf16
    TB, L, D = x_ref.shape                       # static block shape
    eps = jnp.float32(1e-5)
    bf16 = jnp.bfloat16

    # x arrives in bf16 (half HBM traffic); LN / residual math in f32.
    x2d = x_ref[...].astype(jnp.float32).reshape(TB * L, D)     # (TB*L, D)

    # ---- token mixer: fused LayerNorm over D, FF along the token axis ----
    mu = jnp.mean(x2d, axis=-1, keepdims=True)
    var = jnp.mean(x2d * x2d, axis=-1, keepdims=True) - mu * mu
    y2d = (x2d - mu) * lax.rsqrt(var + eps) * g1_ref[...] + be1_ref[...]

    # Fold (batch, channel) into the matmul M dimension: (TB*D, L) @ (L, H).
    yt = jnp.swapaxes(y2d.reshape(TB, L, D), 1, 2).reshape(TB * D, L)
    h = jnp.dot(yt.astype(bf16), w1t_ref[...],
                preferred_element_type=jnp.float32) + b1_ref[...]          # (TB*D, H)
    h = _gelu_exact(h)
    t = jnp.dot(h.astype(bf16), w2t_ref[...],
                preferred_element_type=jnp.float32) + b2_ref[...]          # (TB*D, L)
    t_back = jnp.swapaxes(t.reshape(TB, D, L), 1, 2).reshape(TB * L, D)
    x1 = x2d + t_back                                                      # (TB*L, D)

    # ---- channel mixer: fused LayerNorm over D, FF along the channel axis ----
    mu2 = jnp.mean(x1, axis=-1, keepdims=True)
    var2 = jnp.mean(x1 * x1, axis=-1, keepdims=True) - mu2 * mu2
    z = (x1 - mu2) * lax.rsqrt(var2 + eps) * g2_ref[...] + be2_ref[...]
    h2 = jnp.dot(z.astype(bf16), w3t_ref[...],
                 preferred_element_type=jnp.float32) + b3_ref[...]         # (TB*L, H)
    h2 = _gelu_exact(h2)
    c = jnp.dot(h2.astype(bf16), w4t_ref[...],
                preferred_element_type=jnp.float32) + b4_ref[...]          # (TB*L, D)
    x2_3d = (x1 + c).reshape(TB, L, D)                                     # (TB, L, D)

    # ---- final linear: ONE matmul with K = L*D ----
    # Flatten (TB, L, D) -> (TB, L*D) through a VMEM scratch (static lane-slice
    # stores): out[b, o] = b5[o] + flat[b, :] @ w5f[:, o].
    for l in range(L):                                    # L small, static
        flat_ref[:, l * D:(l + 1) * D] = x2_3d[:, l, :].astype(bf16)
    o_ref[...] = jnp.dot(flat_ref[...], w5f_ref[...],
                         preferred_element_type=jnp.float32) + b5_ref[...]


def init_params(key, dim, window_size, hidden_dim):
    """Deterministic parameter init mirroring the PyTorch module's shapes."""
    def linear(k, fan_in, fan_out):
        bound = 1.0 / np.sqrt(fan_in)
        kw, kb = jax.random.split(k)
        w = jax.random.uniform(kw, (fan_out, fan_in), jnp.float32, -bound, bound)
        b = jax.random.uniform(kb, (fan_out,), jnp.float32, -bound, bound)
        return w, b

    k1, k2, k3, k4, k5 = jax.random.split(key, 5)
    params = {
        "g1": jnp.ones((dim,), jnp.float32),
        "be1": jnp.zeros((dim,), jnp.float32),
        "g2": jnp.ones((dim,), jnp.float32),
        "be2": jnp.zeros((dim,), jnp.float32),
    }
    params["w1"], params["b1"] = linear(k1, window_size, hidden_dim)   # (H, L), (H,)
    params["w2"], params["b2"] = linear(k2, hidden_dim, window_size)   # (L, H), (L,)
    params["w3"], params["b3"] = linear(k3, dim, hidden_dim)           # (H, D), (H,)
    params["w4"], params["b4"] = linear(k4, hidden_dim, dim)           # (D, H), (D,)
    params["w5"], params["b5"] = linear(k5, dim * window_size, dim)    # (D, L*D), (D,)
    return params


def _round_up(n, m):
    return ((n + m - 1) // m) * m


def _vmem_estimate_bytes(tb, L, D, H):
    """Rough per-tile VMEM footprint (lane-padded), used to cap the batch tile."""
    pad = lambda n: _round_up(n, 128)
    est = 2 * tb * L * pad(D) * 2            # x tile (bf16, double buffered)
    est += 2 * tb * pad(D) * 4               # output tile (f32, double buffered)
    est += 4 * tb * L * pad(D) * 4           # f32 residual / LN tensors
    est += 2 * tb * max(L, D) * pad(H) * 4   # hidden activations (largest live f32)
    est += 2 * tb * D * pad(L) * 4           # token-mixer transposed tensors
    est += tb * pad(L * D) * 2               # flatten scratch (bf16)
    est += 2 * (L * pad(H) + H * pad(L) + D * pad(H) + H * pad(D) + L * D * pad(D))
    return est


def mixer_block_pallas(x, params, *, dim, window_size, hidden_dim, block_b=256):
    B, L, D = x.shape
    assert L == window_size and D == dim
    H = hidden_dim
    # In-kernel transposes/reshapes rely on sublane-aligned token/channel dims.
    assert L % 8 == 0 and D % 8 == 0, "window_size and dim must be multiples of 8"
    assert block_b >= 8

    # ---- batch tile: divides the 8-rounded batch (<= 7 padded rows), fits VMEM,
    # and keeps >= 2 grid steps when possible (v7x has 2 TensorCores). ----
    b_pad = _round_up(B, 8)
    budget = 16 * 1024 * 1024                        # ~half the requested scoped VMEM
    cands = [t for t in range(8, min(block_b, b_pad) + 1, 8)
             if b_pad % t == 0 and _vmem_estimate_bytes(t, L, D, H) <= budget]
    if not cands:
        cands = [8]
    multi = [t for t in cands if b_pad // t >= 2]
    tb = max(multi) if multi else max(cands)

    f32, bf16 = jnp.float32, jnp.bfloat16
    # bf16 input DMA (halves HBM read); LN params / biases f32; weights bf16.
    xp = x.astype(bf16)
    if b_pad != B:
        xp = jnp.pad(xp, ((0, b_pad - B), (0, 0), (0, 0)))

    g1 = params["g1"].reshape(1, D).astype(f32)
    be1 = params["be1"].reshape(1, D).astype(f32)
    g2 = params["g2"].reshape(1, D).astype(f32)
    be2 = params["be2"].reshape(1, D).astype(f32)
    w1t = params["w1"].T.astype(bf16)                 # (L, H)
    b1 = params["b1"].reshape(1, H).astype(f32)
    w2t = params["w2"].T.astype(bf16)                 # (H, L)
    b2 = params["b2"].reshape(1, L).astype(f32)
    w3t = params["w3"].T.astype(bf16)                 # (D, H)
    b3 = params["b3"].reshape(1, H).astype(f32)
    w4t = params["w4"].T.astype(bf16)                 # (H, D)
    b4 = params["b4"].reshape(1, D).astype(f32)
    # Final linear: W5 is (D_out, L*D_in) over the row-major (l, d) flatten.
    w5f = params["w5"].T.astype(bf16)                 # (L*D, D), rows = l*D + d
    b5 = params["b5"].reshape(1, D).astype(f32)

    args = (xp, g1, be1, w1t, b1, w2t, b2, g2, be2, w3t, b3, w4t, b4, w5f, b5)

    def run(single_buffer_weights):
        def const_spec(a):
            nd = a.ndim
            idx = lambda b, _nd=nd: (0,) * _nd
            if single_buffer_weights:
                # Grid-invariant weights: no double buffering (saves VMEM,
                # matters on v7x 64 MiB / v5e 16 MiB-default scoped VMEM).
                return pl.BlockSpec(a.shape, idx, pipeline_mode=pl.Buffered(1))
            return pl.BlockSpec(a.shape, idx)

        in_specs = [pl.BlockSpec((tb, L, D), lambda b: (b, 0, 0))]
        in_specs += [const_spec(a) for a in args[1:]]

        out = pl.pallas_call(
            mixer_block_kernel,
            out_shape=jax.ShapeDtypeStruct((b_pad, D), jnp.float32),
            grid_spec=pltpu.PrefetchScalarGridSpec(
                num_scalar_prefetch=0,
                grid=(b_pad // tb,),
                in_specs=in_specs,
                out_specs=pl.BlockSpec((tb, D), lambda b: (b, 0)),
                scratch_shapes=[pltpu.VMEM((tb, L * D), bf16)]),
            compiler_params=pltpu.CompilerParams(
                dimension_semantics=("parallel",),
                vmem_limit_bytes=32 * 1024 * 1024),
        )(*args)
        return jax.block_until_ready(out)

    try:
        out = run(single_buffer_weights=True)
    except Exception:
        # Fallback for JAX versions that reject pipeline_mode on a top-level
        # pallas_call BlockSpec: identical kernel, default double buffering.
        out = run(single_buffer_weights=False)
    return out[:B]


def mixer_block_ref(x, params):
    """Pure-JAX reference matching the PyTorch forward exactly (f32)."""
    def layer_norm(v, g, b):
        mu = jnp.mean(v, axis=-1, keepdims=True)
        var = jnp.mean((v - mu) ** 2, axis=-1, keepdims=True)
        return (v - mu) / jnp.sqrt(var + 1e-5) * g + b

    gelu = lambda v: jax.nn.gelu(v, approximate=False)

    # token mixer
    y = layer_norm(x, params["g1"], params["be1"])              # (B, L, D)
    yt = jnp.swapaxes(y, 1, 2)                                  # (B, D, L)
    h = gelu(yt @ params["w1"].T + params["b1"])                # (B, D, H)
    t = h @ params["w2"].T + params["b2"]                       # (B, D, L)
    x1 = x + jnp.swapaxes(t, 1, 2)

    # channel mixer
    z = layer_norm(x1, params["g2"], params["be2"])
    h2 = gelu(z @ params["w3"].T + params["b3"])
    x2 = x1 + (h2 @ params["w4"].T + params["b4"])

    # flatten tokens and channels, final linear
    B = x.shape[0]
    flat = x2.reshape(B, -1)                                    # (B, L*D)
    return flat @ params["w5"].T + params["b5"]                 # (B, D)


if __name__ == "__main__":
    dim = 32
    window_size = 8
    hidden_dim = 64
    batch = 12          # not a multiple of 8: exercises the (<= 7 row) ragged pad

    key = jax.random.PRNGKey(0)
    kx, kp = jax.random.split(key)
    x = jax.random.normal(kx, (batch, window_size, dim), jnp.float32)
    params = init_params(kp, dim, window_size, hidden_dim)

    out = mixer_block_pallas(x, params, dim=dim, window_size=window_size,
                             hidden_dim=hidden_dim)
    out = jax.block_until_ready(out)

    # Reference uses the same bf16-quantized input the kernel consumes (f32 math),
    # so the tolerance only has to cover the bf16-MXU error.
    x_q = x.astype(jnp.bfloat16).astype(jnp.float32)
    ref = jax.block_until_ready(mixer_block_ref(x_q, params))
    np.testing.assert_allclose(np.asarray(out), np.asarray(ref), rtol=2e-2, atol=2e-2)

    print("KERNEL_OK")
</pallas_src>

<mosaic_0001>
module attributes {stable_mosaic.version = 11 : i64} {
  func.func @mixer_block_kernel(%arg0: i32, %arg1: memref<8x8x32xbf16, #tpu.memory_space<vmem>>, %arg2: memref<1x32xf32, #tpu.memory_space<vmem>>, %arg3: memref<1x32xf32, #tpu.memory_space<vmem>>, %arg4: memref<8x64xbf16, #tpu.memory_space<vmem>>, %arg5: memref<1x64xf32, #tpu.memory_space<vmem>>, %arg6: memref<64x8xbf16, #tpu.memory_space<vmem>>, %arg7: memref<1x8xf32, #tpu.memory_space<vmem>>, %arg8: memref<1x32xf32, #tpu.memory_space<vmem>>, %arg9: memref<1x32xf32, #tpu.memory_space<vmem>>, %arg10: memref<32x64xbf16, #tpu.memory_space<vmem>>, %arg11: memref<1x64xf32, #tpu.memory_space<vmem>>, %arg12: memref<64x32xbf16, #tpu.memory_space<vmem>>, %arg13: memref<1x32xf32, #tpu.memory_space<vmem>>, %arg14: memref<256x32xbf16, #tpu.memory_space<vmem>>, %arg15: memref<1x32xf32, #tpu.memory_space<vmem>>, %arg16: memref<8x32xf32, #tpu.memory_space<vmem>>, %arg17: memref<8x256xbf16, #tpu.memory_space<vmem>>) attributes {dimension_semantics = [#tpu.dimension_semantics<parallel>], iteration_bounds = array<i64: 2>, scalar_prefetch = 0 : i64, scratch_operands = 1 : i64, tpu.core_type = #tpu.core_type<tc>, window_params = [{transform_indices = @transform_0, window_bounds = array<i64: 8, 8, 32>}, {pipeline_mode = #tpu.pipeline_mode<synchronous>, transform_indices = @transform_1, window_bounds = array<i64: 1, 32>}, {pipeline_mode = #tpu.pipeline_mode<synchronous>, transform_indices = @transform_2, window_bounds = array<i64: 1, 32>}, {pipeline_mode = #tpu.pipeline_mode<synchronous>, transform_indices = @transform_3, window_bounds = array<i64: 8, 64>}, {pipeline_mode = #tpu.pipeline_mode<synchronous>, transform_indices = @transform_4, window_bounds = array<i64: 1, 64>}, {pipeline_mode = #tpu.pipeline_mode<synchronous>, transform_indices = @transform_5, window_bounds = array<i64: 64, 8>}, {pipeline_mode = #tpu.pipeline_mode<synchronous>, transform_indices = @transform_6, window_bounds = array<i64: 1, 8>}, {pipeline_mode = #tpu.pipeline_mode<synchronous>, transform_indices = @transform_7, window_bounds = array<i64: 1, 32>}, {pipeline_mode = #tpu.pipeline_mode<synchronous>, transform_indices = @transform_8, window_bounds = array<i64: 1, 32>}, {pipeline_mode = #tpu.pipeline_mode<synchronous>, transform_indices = @transform_9, window_bounds = array<i64: 32, 64>}, {pipeline_mode = #tpu.pipeline_mode<synchronous>, transform_indices = @transform_10, window_bounds = array<i64: 1, 64>}, {pipeline_mode = #tpu.pipeline_mode<synchronous>, transform_indices = @transform_11, window_bounds = array<i64: 64, 32>}, {pipeline_mode = #tpu.pipeline_mode<synchronous>, transform_indices = @transform_12, window_bounds = array<i64: 1, 32>}, {pipeline_mode = #tpu.pipeline_mode<synchronous>, transform_indices = @transform_13, window_bounds = array<i64: 256, 32>}, {pipeline_mode = #tpu.pipeline_mode<synchronous>, transform_indices = @transform_14, window_bounds = array<i64: 1, 32>}, {transform_indices = @transform_15, window_bounds = array<i64: 8, 32>}]} {
    %c0 = arith.constant 0 : index
    %c0_0 = arith.constant 0 : index
    %c0_1 = arith.constant 0 : index
    %0 = vector.load %arg1[%c0, %c0_0, %c0_1] : memref<8x8x32xbf16, #tpu.memory_space<vmem>>, vector<8x8x32xbf16>
    %1 = arith.extf %0 : vector<8x8x32xbf16> to vector<8x8x32xf32>
    %2 = vector.shape_cast %1 : vector<8x8x32xf32> to vector<64x32xf32>
    %cst = arith.constant dense<0.000000e+00> : vector<64xf32>
    %3 = vector.multi_reduction <add>, %2, %cst [1] : vector<64x32xf32> to vector<64xf32>
    %4 = vector.shape_cast %3 : vector<64xf32> to vector<64x1xf32>
    %cst_2 = arith.constant 3.200000e+01 : f32
    %5 = vector.broadcast %cst_2 : f32 to vector<64x1xf32>
    %6 = arith.divf %4, %5 : vector<64x1xf32>
    %7 = arith.mulf %2, %2 : vector<64x32xf32>
    %cst_3 = arith.constant dense<0.000000e+00> : vector<64xf32>
    %8 = vector.multi_reduction <add>, %7, %cst_3 [1] : vector<64x32xf32> to vector<64xf32>
    %9 = vector.shape_cast %8 : vector<64xf32> to vector<64x1xf32>
    %cst_4 = arith.constant 3.200000e+01 : f32
    %10 = vector.broadcast %cst_4 : f32 to vector<64x1xf32>
    %11 = arith.divf %9, %10 : vector<64x1xf32>
    %12 = arith.mulf %6, %6 : vector<64x1xf32>
    %13 = arith.subf %11, %12 : vector<64x1xf32>
    %14 = vector.broadcast %6 : vector<64x1xf32> to vector<64x32xf32>
    %15 = arith.subf %2, %14 : vector<64x32xf32>
    %cst_5 = arith.constant 9.99999974E-6 : f32
    %16 = vector.broadcast %cst_5 : f32 to vector<64x1xf32>
    %17 = arith.addf %13, %16 : vector<64x1xf32>
    %18 = math.rsqrt %17 : vector<64x1xf32>
    %19 = vector.broadcast %18 : vector<64x1xf32> to vector<64x32xf32>
    %20 = arith.mulf %15, %19 : vector<64x32xf32>
    %c0_6 = arith.constant 0 : index
    %c0_7 = arith.constant 0 : index
    %21 = vector.load %arg2[%c0_6, %c0_7] : memref<1x32xf32, #tpu.memory_space<vmem>>, vector<1x32xf32>
    %22 = vector.broadcast %21 : vector<1x32xf32> to vector<64x32xf32>
    %23 = arith.mulf %20, %22 : vector<64x32xf32>
    %c0_8 = arith.constant 0 : index
    %c0_9 = arith.constant 0 : index
    %24 = vector.load %arg3[%c0_8, %c0_9] : memref<1x32xf32, #tpu.memory_space<vmem>>, vector<1x32xf32>
    %25 = vector.broadcast %24 : vector<1x32xf32> to vector<64x32xf32>
    %26 = arith.addf %23, %25 : vector<64x32xf32>
    %27 = vector.shape_cast %26 : vector<64x32xf32> to vector<8x8x32xf32>
    %28 = tpu.transpose %27, [0, 2, 1] : vector<8x8x32xf32> -> vector<8x32x8xf32>
    %29 = vector.shape_cast %28 : vector<8x32x8xf32> to vector<256x8xf32>
    %30 = arith.truncf %29 : vector<256x8xf32> to vector<256x8xbf16>
    %c0_10 = arith.constant 0 : index
    %c0_11 = arith.constant 0 : index
    %31 = vector.load %arg4[%c0_10, %c0_11] : memref<8x64xbf16, #tpu.memory_space<vmem>>, vector<8x64xbf16>
    %cst_12 = arith.constant dense<0.000000e+00> : vector<256x64xf32>
    %32 = tpu.matmul %30, %31, %cst_12 {dimension_numbers = #tpu.dot_dimension_numbers<[1], [0], [0], [1], [0, 0, 1, 1], [], []>} : vector<256x8xbf16>, vector<8x64xbf16>, vector<256x64xf32> -> vector<256x64xf32>
    %c0_13 = arith.constant 0 : index
    %c0_14 = arith.constant 0 : index
    %33 = vector.load %arg5[%c0_13, %c0_14] : memref<1x64xf32, #tpu.memory_space<vmem>>, vector<1x64xf32>
    %34 = vector.broadcast %33 : vector<1x64xf32> to vector<256x64xf32>
    %35 = arith.addf %32, %34 : vector<256x64xf32>
    %cst_15 = arith.constant 5.000000e-01 : f32
    %36 = vector.broadcast %cst_15 : f32 to vector<256x64xf32>
    %37 = arith.mulf %36, %35 : vector<256x64xf32>
    %cst_16 = arith.constant 0.707106769 : f32
    %38 = vector.broadcast %cst_16 : f32 to vector<256x64xf32>
    %39 = arith.mulf %35, %38 : vector<256x64xf32>
    %40 = math.erf %39 : vector<256x64xf32>
    %cst_17 = arith.constant 1.000000e+00 : f32
    %41 = vector.broadcast %cst_17 : f32 to vector<256x64xf32>
    %42 = arith.addf %41, %40 : vector<256x64xf32>
    %43 = arith.mulf %37, %42 : vector<256x64xf32>
    %44 = arith.truncf %43 : vector<256x64xf32> to vector<256x64xbf16>
    %c0_18 = arith.constant 0 : index
    %c0_19 = arith.constant 0 : index
    %45 = vector.load %arg6[%c0_18, %c0_19] : memref<64x8xbf16, #tpu.memory_space<vmem>>, vector<64x8xbf16>
    %cst_20 = arith.constant dense<0.000000e+00> : vector<256x8xf32>
    %46 = tpu.matmul %44, %45, %cst_20 {dimension_numbers = #tpu.dot_dimension_numbers<[1], [0], [0], [1], [0, 0, 1, 1], [], []>} : vector<256x64xbf16>, vector<64x8xbf16>, vector<256x8xf32> -> vector<256x8xf32>
    %c0_21 = arith.constant 0 : index
    %c0_22 = arith.constant 0 : index
    %47 = vector.load %arg7[%c0_21, %c0_22] : memref<1x8xf32, #tpu.memory_space<vmem>>, vector<1x8xf32>
    %48 = vector.broadcast %47 : vector<1x8xf32> to vector<256x8xf32>
    %49 = arith.addf %46, %48 : vector<256x8xf32>
    %50 = vector.shape_cast %49 : vector<256x8xf32> to vector<8x32x8xf32>
    %51 = tpu.transpose %50, [0, 2, 1] : vector<8x32x8xf32> -> vector<8x8x32xf32>
    %52 = vector.shape_cast %51 : vector<8x8x32xf32> to vector<64x32xf32>
    %53 = arith.addf %2, %52 : vector<64x32xf32>
    %cst_23 = arith.constant dense<0.000000e+00> : vector<64xf32>
    %54 = vector.multi_reduction <add>, %53, %cst_23 [1] : vector<64x32xf32> to vector<64xf32>
    %55 = vector.shape_cast %54 : vector<64xf32> to vector<64x1xf32>
    %cst_24 = arith.constant 3.200000e+01 : f32
    %56 = vector.broadcast %cst_24 : f32 to vector<64x1xf32>
    %57 = arith.divf %55, %56 : vector<64x1xf32>
    %58 = arith.mulf %53, %53 : vector<64x32xf32>
    %cst_25 = arith.constant dense<0.000000e+00> : vector<64xf32>
    %59 = vector.multi_reduction <add>, %58, %cst_25 [1] : vector<64x32xf32> to vector<64xf32>
    %60 = vector.shape_cast %59 : vector<64xf32> to vector<64x1xf32>
    %cst_26 = arith.constant 3.200000e+01 : f32
    %61 = vector.broadcast %cst_26 : f32 to vector<64x1xf32>
    %62 = arith.divf %60, %61 : vector<64x1xf32>
    %63 = arith.mulf %57, %57 : vector<64x1xf32>
    %64 = arith.subf %62, %63 : vector<64x1xf32>
    %65 = vector.broadcast %57 : vector<64x1xf32> to vector<64x32xf32>
    %66 = arith.subf %53, %65 : vector<64x32xf32>
    %cst_27 = arith.constant 9.99999974E-6 : f32
    %67 = vector.broadcast %cst_27 : f32 to vector<64x1xf32>
    %68 = arith.addf %64, %67 : vector<64x1xf32>
    %69 = math.rsqrt %68 : vector<64x1xf32>
    %70 = vector.broadcast %69 : vector<64x1xf32> to vector<64x32xf32>
    %71 = arith.mulf %66, %70 : vector<64x32xf32>
    %c0_28 = arith.constant 0 : index
    %c0_29 = arith.constant 0 : index
    %72 = vector.load %arg8[%c0_28, %c0_29] : memref<1x32xf32, #tpu.memory_space<vmem>>, vector<1x32xf32>
    %73 = vector.broadcast %72 : vector<1x32xf32> to vector<64x32xf32>
    %74 = arith.mulf %71, %73 : vector<64x32xf32>
    %c0_30 = arith.constant 0 : index
    %c0_31 = arith.constant 0 : index
    %75 = vector.load %arg9[%c0_30, %c0_31] : memref<1x32xf32, #tpu.memory_space<vmem>>, vector<1x32xf32>
    %76 = vector.broadcast %75 : vector<1x32xf32> to vector<64x32xf32>
    %77 = arith.addf %74, %76 : vector<64x32xf32>
    %78 = arith.truncf %77 : vector<64x32xf32> to vector<64x32xbf16>
    %c0_32 = arith.constant 0 : index
    %c0_33 = arith.constant 0 : index
    %79 = vector.load %arg10[%c0_32, %c0_33] : memref<32x64xbf16, #tpu.memory_space<vmem>>, vector<32x64xbf16>
    %cst_34 = arith.constant dense<0.000000e+00> : vector<64x64xf32>
    %80 = tpu.matmul %78, %79, %cst_34 {dimension_numbers = #tpu.dot_dimension_numbers<[1], [0], [0], [1], [0, 0, 1, 1], [], []>} : vector<64x32xbf16>, vector<32x64xbf16>, vector<64x64xf32> -> vector<64x64xf32>
    %c0_35 = arith.constant 0 : index
    %c0_36 = arith.constant 0 : index
    %81 = vector.load %arg11[%c0_35, %c0_36] : memref<1x64xf32, #tpu.memory_space<vmem>>, vector<1x64xf32>
    %82 = vector.broadcast %81 : vector<1x64xf32> to vector<64x64xf32>
    %83 = arith.addf %80, %82 : vector<64x64xf32>
    %cst_37 = arith.constant 5.000000e-01 : f32
    %84 = vector.broadcast %cst_37 : f32 to vector<64x64xf32>
    %85 = arith.mulf %84, %83 : vector<64x64xf32>
    %cst_38 = arith.constant 0.707106769 : f32
    %86 = vector.broadcast %cst_38 : f32 to vector<64x64xf32>
    %87 = arith.mulf %83, %86 : vector<64x64xf32>
    %88 = math.erf %87 : vector<64x64xf32>
    %cst_39 = arith.constant 1.000000e+00 : f32
    %89 = vector.broadcast %cst_39 : f32 to vector<64x64xf32>
    %90 = arith.addf %89, %88 : vector<64x64xf32>
    %91 = arith.mulf %85, %90 : vector<64x64xf32>
    %92 = arith.truncf %91 : vector<64x64xf32> to vector<64x64xbf16>
    %c0_40 = arith.constant 0 : index
    %c0_41 = arith.constant 0 : index
    %93 = vector.load %arg12[%c0_40, %c0_41] : memref<64x32xbf16, #tpu.memory_space<vmem>>, vector<64x32xbf16>
    %cst_42 = arith.constant dense<0.000000e+00> : vector<64x32xf32>
    %94 = tpu.matmul %92, %93, %cst_42 {dimension_numbers = #tpu.dot_dimension_numbers<[1], [0], [0], [1], [0, 0, 1, 1], [], []>} : vector<64x64xbf16>, vector<64x32xbf16>, vector<64x32xf32> -> vector<64x32xf32>
    %c0_43 = arith.constant 0 : index
    %c0_44 = arith.constant 0 : index
    %95 = vector.load %arg13[%c0_43, %c0_44] : memref<1x32xf32, #tpu.memory_space<vmem>>, vector<1x32xf32>
    %96 = vector.broadcast %95 : vector<1x32xf32> to vector<64x32xf32>
    %97 = arith.addf %94, %96 : vector<64x32xf32>
    %98 = arith.addf %53, %97 : vector<64x32xf32>
    %99 = vector.shape_cast %98 : vector<64x32xf32> to vector<8x8x32xf32>
    %100 = vector.extract_strided_slice %99 {offsets = [0, 0, 0], sizes = [8, 1, 32], strides = [1, 1, 1]} : vector<8x8x32xf32> to vector<8x1x32xf32>
    %101 = vector.shape_cast %100 : vector<8x1x32xf32> to vector<8x32xf32>
    %102 = arith.truncf %101 : vector<8x32xf32> to vector<8x32xbf16>
    %c0_45 = arith.constant 0 : index
    %c0_46 = arith.constant 0 : index
    %103 = vector.load %arg17[%c0_45, %c0_46] : memref<8x256xbf16, #tpu.memory_space<vmem>>, vector<8x32xbf16>
    tpu.vector_store %arg17[%c0_45, %c0_46], %102 {strides = array<i32>} : memref<8x256xbf16, #tpu.memory_space<vmem>>, vector<8x32xbf16>,
    %104 = vector.extract_strided_slice %99 {offsets = [0, 1, 0], sizes = [8, 1, 32], strides = [1, 1, 1]} : vector<8x8x32xf32> to vector<8x1x32xf32>
    %105 = vector.shape_cast %104 : vector<8x1x32xf32> to vector<8x32xf32>
    %106 = arith.truncf %105 : vector<8x32xf32> to vector<8x32xbf16>
    %c0_47 = arith.constant 0 : index
    %c32 = arith.constant 32 : index
    %107 = vector.load %arg17[%c0_47, %c32] : memref<8x256xbf16, #tpu.memory_space<vmem>>, vector<8x32xbf16>
    tpu.vector_store %arg17[%c0_47, %c32], %106 {strides = array<i32>} : memref<8x256xbf16, #tpu.memory_space<vmem>>, vector<8x32xbf16>,
    %108 = vector.extract_strided_slice %99 {offsets = [0, 2, 0], sizes = [8, 1, 32], strides = [1, 1, 1]} : vector<8x8x32xf32> to vector<8x1x32xf32>
    %109 = vector.shape_cast %108 : vector<8x1x32xf32> to vector<8x32xf32>
    %110 = arith.truncf %109 : vector<8x32xf32> to vector<8x32xbf16>
    %c0_48 = arith.constant 0 : index
    %c64 = arith.constant 64 : index
    %111 = vector.load %arg17[%c0_48, %c64] : memref<8x256xbf16, #tpu.memory_space<vmem>>, vector<8x32xbf16>
    tpu.vector_store %arg17[%c0_48, %c64], %110 {strides = array<i32>} : memref<8x256xbf16, #tpu.memory_space<vmem>>, vector<8x32xbf16>,
    %112 = vector.extract_strided_slice %99 {offsets = [0, 3, 0], sizes = [8, 1, 32], strides = [1, 1, 1]} : vector<8x8x32xf32> to vector<8x1x32xf32>
    %113 = vector.shape_cast %112 : vector<8x1x32xf32> to vector<8x32xf32>
    %114 = arith.truncf %113 : vector<8x32xf32> to vector<8x32xbf16>
    %c0_49 = arith.constant 0 : index
    %c96 = arith.constant 96 : index
    %115 = vector.load %arg17[%c0_49, %c96] : memref<8x256xbf16, #tpu.memory_space<vmem>>, vector<8x32xbf16>
    tpu.vector_store %arg17[%c0_49, %c96], %114 {strides = array<i32>} : memref<8x256xbf16, #tpu.memory_space<vmem>>, vector<8x32xbf16>,
    %116 = vector.extract_strided_slice %99 {offsets = [0, 4, 0], sizes = [8, 1, 32], strides = [1, 1, 1]} : vector<8x8x32xf32> to vector<8x1x32xf32>
    %117 = vector.shape_cast %116 : vector<8x1x32xf32> to vector<8x32xf32>
    %118 = arith.truncf %117 : vector<8x32xf32> to vector<8x32xbf16>
    %c0_50 = arith.constant 0 : index
    %c128 = arith.constant 128 : index
    %119 = vector.load %arg17[%c0_50, %c128] : memref<8x256xbf16, #tpu.memory_space<vmem>>, vector<8x32xbf16>
    tpu.vector_store %arg17[%c0_50, %c128], %118 {strides = array<i32>} : memref<8x256xbf16, #tpu.memory_space<vmem>>, vector<8x32xbf16>,
    %120 = vector.extract_strided_slice %99 {offsets = [0, 5, 0], sizes = [8, 1, 32], strides = [1, 1, 1]} : vector<8x8x32xf32> to vector<8x1x32xf32>
    %121 = vector.shape_cast %120 : vector<8x1x32xf32> to vector<8x32xf32>
    %122 = arith.truncf %121 : vector<8x32xf32> to vector<8x32xbf16>
    %c0_51 = arith.constant 0 : index
    %c160 = arith.constant 160 : index
    %123 = vector.load %arg17[%c0_51, %c160] : memref<8x256xbf16, #tpu.memory_space<vmem>>, vector<8x32xbf16>
    tpu.vector_store %arg17[%c0_51, %c160], %122 {strides = array<i32>} : memref<8x256xbf16, #tpu.memory_space<vmem>>, vector<8x32xbf16>,
    %124 = vector.extract_strided_slice %99 {offsets = [0, 6, 0], sizes = [8, 1, 32], strides = [1, 1, 1]} : vector<8x8x32xf32> to vector<8x1x32xf32>
    %125 = vector.shape_cast %124 : vector<8x1x32xf32> to vector<8x32xf32>
    %126 = arith.truncf %125 : vector<8x32xf32> to vector<8x32xbf16>
    %c0_52 = arith.constant 0 : index
    %c192 = arith.constant 192 : index
    %127 = vector.load %arg17[%c0_52, %c192] : memref<8x256xbf16, #tpu.memory_space<vmem>>, vector<8x32xbf16>
    tpu.vector_store %arg17[%c0_52, %c192], %126 {strides = array<i32>} : memref<8x256xbf16, #tpu.memory_space<vmem>>, vector<8x32xbf16>,
    %128 = vector.extract_strided_slice %99 {offsets = [0, 7, 0], sizes = [8, 1, 32], strides = [1, 1, 1]} : vector<8x8x32xf32> to vector<8x1x32xf32>
    %129 = vector.shape_cast %128 : vector<8x1x32xf32> to vector<8x32xf32>
    %130 = arith.truncf %129 : vector<8x32xf32> to vector<8x32xbf16>
    %c0_53 = arith.constant 0 : index
    %c224 = arith.constant 224 : index
    %131 = vector.load %arg17[%c0_53, %c224] : memref<8x256xbf16, #tpu.memory_space<vmem>>, vector<8x32xbf16>
    tpu.vector_store %arg17[%c0_53, %c224], %130 {strides = array<i32>} : memref<8x256xbf16, #tpu.memory_space<vmem>>, vector<8x32xbf16>,
    %c0_54 = arith.constant 0 : index
    %c0_55 = arith.constant 0 : index
    %132 = vector.load %arg17[%c0_54, %c0_55] : memref<8x256xbf16, #tpu.memory_space<vmem>>, vector<8x256xbf16>
    %c0_56 = arith.constant 0 : index
    %c0_57 = arith.constant 0 : index
    %133 = vector.load %arg14[%c0_56, %c0_57] : memref<256x32xbf16, #tpu.memory_space<vmem>>, vector<256x32xbf16>
    %cst_58 = arith.constant dense<0.000000e+00> : vector<8x32xf32>
    %134 = tpu.matmul %132, %133, %cst_58 {dimension_numbers = #tpu.dot_dimension_numbers<[1], [0], [0], [1], [0, 0, 1, 1], [], []>} : vector<8x256xbf16>, vector<256x32xbf16>, vector<8x32xf32> -> vector<8x32xf32>
    %c0_59 = arith.constant 0 : index
    %c0_60 = arith.constant 0 : index
    %135 = vector.load %arg15[%c0_59, %c0_60] : memref<1x32xf32, #tpu.memory_space<vmem>>, vector<1x32xf32>
    %136 = vector.broadcast %135 : vector<1x32xf32> to vector<8x32xf32>
    %137 = arith.addf %134, %136 : vector<8x32xf32>
    %c0_61 = arith.constant 0 : index
    %c0_62 = arith.constant 0 : index
    %138 = vector.load %arg16[%c0_61, %c0_62] : memref<8x32xf32, #tpu.memory_space<vmem>>, vector<8x32xf32>
    tpu.vector_store %arg16[%c0_61, %c0_62], %137 {strides = array<i32>} : memref<8x32xf32, #tpu.memory_space<vmem>>, vector<8x32xf32>,
    return
  }
  func.func @transform_0(%arg0: i32) -> (i32, i32, i32) {
    %c0_i32 = arith.constant 0 : i32
    %c0_i32_0 = arith.constant 0 : i32
    %c0_i32_1 = arith.constant 0 : i32
    return %arg0, %c0_i32, %c0_i32_0 : i32, i32, i32
  }
  func.func @transform_1(%arg0: i32) -> (i32, i32) {
    %c0_i32 = arith.constant 0 : i32
    %c0_i32_0 = arith.constant 0 : i32
    %c0_i32_1 = arith.constant 0 : i32
    return %c0_i32, %c0_i32_0 : i32, i32
  }
  func.func @transform_2(%arg0: i32) -> (i32, i32) {
    %c0_i32 = arith.constant 0 : i32
    %c0_i32_0 = arith.constant 0 : i32
    %c0_i32_1 = arith.constant 0 : i32
    return %c0_i32, %c0_i32_0 : i32, i32
  }
  func.func @transform_3(%arg0: i32) -> (i32, i32) {
    %c0_i32 = arith.constant 0 : i32
    %c0_i32_0 = arith.constant 0 : i32
    %c0_i32_1 = arith.constant 0 : i32
    return %c0_i32, %c0_i32_0 : i32, i32
  }
  func.func @transform_4(%arg0: i32) -> (i32, i32) {
    %c0_i32 = arith.constant 0 : i32
    %c0_i32_0 = arith.constant 0 : i32
    %c0_i32_1 = arith.constant 0 : i32
    return %c0_i32, %c0_i32_0 : i32, i32
  }
  func.func @transform_5(%arg0: i32) -> (i32, i32) {
    %c0_i32 = arith.constant 0 : i32
    %c0_i32_0 = arith.constant 0 : i32
    %c0_i32_1 = arith.constant 0 : i32
    return %c0_i32, %c0_i32_0 : i32, i32
  }
  func.func @transform_6(%arg0: i32) -> (i32, i32) {
    %c0_i32 = arith.constant 0 : i32
    %c0_i32_0 = arith.constant 0 : i32
    %c0_i32_1 = arith.constant 0 : i32
    return %c0_i32, %c0_i32_0 : i32, i32
  }
  func.func @transform_7(%arg0: i32) -> (i32, i32) {
    %c0_i32 = arith.constant 0 : i32
    %c0_i32_0 = arith.constant 0 : i32
    %c0_i32_1 = arith.constant 0 : i32
    return %c0_i32, %c0_i32_0 : i32, i32
  }
  func.func @transform_8(%arg0: i32) -> (i32, i32) {
    %c0_i32 = arith.constant 0 : i32
    %c0_i32_0 = arith.constant 0 : i32
    %c0_i32_1 = arith.constant 0 : i32
    return %c0_i32, %c0_i32_0 : i32, i32
  }
  func.func @transform_9(%arg0: i32) -> (i32, i32) {
    %c0_i32 = arith.constant 0 : i32
    %c0_i32_0 = arith.constant 0 : i32
    %c0_i32_1 = arith.constant 0 : i32
    return %c0_i32, %c0_i32_0 : i32, i32
  }
  func.func @transform_10(%arg0: i32) -> (i32, i32) {
    %c0_i32 = arith.constant 0 : i32
    %c0_i32_0 = arith.constant 0 : i32
    %c0_i32_1 = arith.constant 0 : i32
    return %c0_i32, %c0_i32_0 : i32, i32
  }
  func.func @transform_11(%arg0: i32) -> (i32, i32) {
    %c0_i32 = arith.constant 0 : i32
    %c0_i32_0 = arith.constant 0 : i32
    %c0_i32_1 = arith.constant 0 : i32
    return %c0_i32, %c0_i32_0 : i32, i32
  }
  func.func @transform_12(%arg0: i32) -> (i32, i32) {
    %c0_i32 = arith.constant 0 : i32
    %c0_i32_0 = arith.constant 0 : i32
    %c0_i32_1 = arith.constant 0 : i32
    return %c0_i32, %c0_i32_0 : i32, i32
  }
  func.func @transform_13(%arg0: i32) -> (i32, i32) {
    %c0_i32 = arith.constant 0 : i32
    %c0_i32_0 = arith.constant 0 : i32
    %c0_i32_1 = arith.constant 0 : i32
    return %c0_i32, %c0_i32_0 : i32, i32
  }
  func.func @transform_14(%arg0: i32) -> (i32, i32) {
    %c0_i32 = arith.constant 0 : i32
    %c0_i32_0 = arith.constant 0 : i32
    %c0_i32_1 = arith.constant 0 : i32
    return %c0_i32, %c0_i32_0 : i32, i32
  }
  func.func @transform_15(%arg0: i32) -> (i32, i32) {
    %c0_i32 = arith.constant 0 : i32
    %c0_i32_0 = arith.constant 0 : i32
    return %arg0, %c0_i32 : i32, i32
  }
}

module attributes {stable_mosaic.version = 11 : i64} {
  func.func @mixer_block_kernel(%arg0: i32, %arg1: memref<8x8x32xbf16, #tpu.memory_space<vmem>>, %arg2: memref<1x32xf32, #tpu.memory_space<vmem>>, %arg3: memref<1x32xf32, #tpu.memory_space<vmem>>, %arg4: memref<8x64xbf16, #tpu.memory_space<vmem>>, %arg5: memref<1x64xf32, #tpu.memory_space<vmem>>, %arg6: memref<64x8xbf16, #tpu.memory_space<vmem>>, %arg7: memref<1x8xf32, #tpu.memory_space<vmem>>, %arg8: memref<1x32xf32, #tpu.memory_space<vmem>>, %arg9: memref<1x32xf32, #tpu.memory_space<vmem>>, %arg10: memref<32x64xbf16, #tpu.memory_space<vmem>>, %arg11: memref<1x64xf32, #tpu.memory_space<vmem>>, %arg12: memref<64x32xbf16, #tpu.memory_space<vmem>>, %arg13: memref<1x32xf32, #tpu.memory_space<vmem>>, %arg14: memref<256x32xbf16, #tpu.memory_space<vmem>>, %arg15: memref<1x32xf32, #tpu.memory_space<vmem>>, %arg16: memref<8x32xf32, #tpu.memory_space<vmem>>, %arg17: memref<8x256xbf16, #tpu.memory_space<vmem>>) attributes {dimension_semantics = [#tpu.dimension_semantics<parallel>], iteration_bounds = array<i64: 2>, scalar_prefetch = 0 : i64, scratch_operands = 1 : i64, tpu.core_type = #tpu.core_type<tc>, window_params = [{transform_indices = @transform_0, window_bounds = array<i64: 8, 8, 32>}, {pipeline_mode = #tpu.pipeline_mode<synchronous>, transform_indices = @transform_1, window_bounds = array<i64: 1, 32>}, {pipeline_mode = #tpu.pipeline_mode<synchronous>, transform_indices = @transform_2, window_bounds = array<i64: 1, 32>}, {pipeline_mode = #tpu.pipeline_mode<synchronous>, transform_indices = @transform_3, window_bounds = array<i64: 8, 64>}, {pipeline_mode = #tpu.pipeline_mode<synchronous>, transform_indices = @transform_4, window_bounds = array<i64: 1, 64>}, {pipeline_mode = #tpu.pipeline_mode<synchronous>, transform_indices = @transform_5, window_bounds = array<i64: 64, 8>}, {pipeline_mode = #tpu.pipeline_mode<synchronous>, transform_indices = @transform_6, window_bounds = array<i64: 1, 8>}, {pipeline_mode = #tpu.pipeline_mode<synchronous>, transform_indices = @transform_7, window_bounds = array<i64: 1, 32>}, {pipeline_mode = #tpu.pipeline_mode<synchronous>, transform_indices = @transform_8, window_bounds = array<i64: 1, 32>}, {pipeline_mode = #tpu.pipeline_mode<synchronous>, transform_indices = @transform_9, window_bounds = array<i64: 32, 64>}, {pipeline_mode = #tpu.pipeline_mode<synchronous>, transform_indices = @transform_10, window_bounds = array<i64: 1, 64>}, {pipeline_mode = #tpu.pipeline_mode<synchronous>, transform_indices = @transform_11, window_bounds = array<i64: 64, 32>}, {pipeline_mode = #tpu.pipeline_mode<synchronous>, transform_indices = @transform_12, window_bounds = array<i64: 1, 32>}, {pipeline_mode = #tpu.pipeline_mode<synchronous>, transform_indices = @transform_13, window_bounds = array<i64: 256, 32>}, {pipeline_mode = #tpu.pipeline_mode<synchronous>, transform_indices = @transform_14, window_bounds = array<i64: 1, 32>}, {transform_indices = @transform_15, window_bounds = array<i64: 8, 32>}]} {
    %c0 = arith.constant 0 : index
    %c0_0 = arith.constant 0 : index
    %c0_1 = arith.constant 0 : index
    %0 = vector.load %arg1[%c0, %c0_0, %c0_1] : memref<8x8x32xbf16, #tpu.memory_space<vmem>>, vector<8x8x32xbf16>
    %1 = arith.extf %0 : vector<8x8x32xbf16> to vector<8x8x32xf32>
    %2 = vector.shape_cast %1 : vector<8x8x32xf32> to vector<64x32xf32>
    %cst = arith.constant dense<0.000000e+00> : vector<64xf32>
    %3 = vector.multi_reduction <add>, %2, %cst [1] : vector<64x32xf32> to vector<64xf32>
    %4 = vector.shape_cast %3 : vector<64xf32> to vector<64x1xf32>
    %cst_2 = arith.constant 3.200000e+01 : f32
    %5 = vector.broadcast %cst_2 : f32 to vector<64x1xf32>
    %6 = arith.divf %4, %5 : vector<64x1xf32>
    %7 = arith.mulf %2, %2 : vector<64x32xf32>
    %cst_3 = arith.constant dense<0.000000e+00> : vector<64xf32>
    %8 = vector.multi_reduction <add>, %7, %cst_3 [1] : vector<64x32xf32> to vector<64xf32>
    %9 = vector.shape_cast %8 : vector<64xf32> to vector<64x1xf32>
    %cst_4 = arith.constant 3.200000e+01 : f32
    %10 = vector.broadcast %cst_4 : f32 to vector<64x1xf32>
    %11 = arith.divf %9, %10 : vector<64x1xf32>
    %12 = arith.mulf %6, %6 : vector<64x1xf32>
    %13 = arith.subf %11, %12 : vector<64x1xf32>
    %14 = vector.broadcast %6 : vector<64x1xf32> to vector<64x32xf32>
    %15 = arith.subf %2, %14 : vector<64x32xf32>
    %cst_5 = arith.constant 9.99999974E-6 : f32
    %16 = vector.broadcast %cst_5 : f32 to vector<64x1xf32>
    %17 = arith.addf %13, %16 : vector<64x1xf32>
    %18 = math.rsqrt %17 : vector<64x1xf32>
    %19 = vector.broadcast %18 : vector<64x1xf32> to vector<64x32xf32>
    %20 = arith.mulf %15, %19 : vector<64x32xf32>
    %c0_6 = arith.constant 0 : index
    %c0_7 = arith.constant 0 : index
    %21 = vector.load %arg2[%c0_6, %c0_7] : memref<1x32xf32, #tpu.memory_space<vmem>>, vector<1x32xf32>
    %22 = vector.broadcast %21 : vector<1x32xf32> to vector<64x32xf32>
    %23 = arith.mulf %20, %22 : vector<64x32xf32>
    %c0_8 = arith.constant 0 : index
    %c0_9 = arith.constant 0 : index
    %24 = vector.load %arg3[%c0_8, %c0_9] : memref<1x32xf32, #tpu.memory_space<vmem>>, vector<1x32xf32>
    %25 = vector.broadcast %24 : vector<1x32xf32> to vector<64x32xf32>
    %26 = arith.addf %23, %25 : vector<64x32xf32>
    %27 = vector.shape_cast %26 : vector<64x32xf32> to vector<8x8x32xf32>
    %28 = tpu.transpose %27, [0, 2, 1] : vector<8x8x32xf32> -> vector<8x32x8xf32>
    %29 = vector.shape_cast %28 : vector<8x32x8xf32> to vector<256x8xf32>
    %30 = arith.truncf %29 : vector<256x8xf32> to vector<256x8xbf16>
    %c0_10 = arith.constant 0 : index
    %c0_11 = arith.constant 0 : index
    %31 = vector.load %arg4[%c0_10, %c0_11] : memref<8x64xbf16, #tpu.memory_space<vmem>>, vector<8x64xbf16>
    %cst_12 = arith.constant dense<0.000000e+00> : vector<256x64xf32>
    %32 = tpu.matmul %30, %31, %cst_12 {dimension_numbers = #tpu.dot_dimension_numbers<[1], [0], [0], [1], [0, 0, 1, 1], [], []>} : vector<256x8xbf16>, vector<8x64xbf16>, vector<256x64xf32> -> vector<256x64xf32>
    %c0_13 = arith.constant 0 : index
    %c0_14 = arith.constant 0 : index
    %33 = vector.load %arg5[%c0_13, %c0_14] : memref<1x64xf32, #tpu.memory_space<vmem>>, vector<1x64xf32>
    %34 = vector.broadcast %33 : vector<1x64xf32> to vector<256x64xf32>
    %35 = arith.addf %32, %34 : vector<256x64xf32>
    %cst_15 = arith.constant 5.000000e-01 : f32
    %36 = vector.broadcast %cst_15 : f32 to vector<256x64xf32>
    %37 = arith.mulf %36, %35 : vector<256x64xf32>
    %cst_16 = arith.constant 0.707106769 : f32
    %38 = vector.broadcast %cst_16 : f32 to vector<256x64xf32>
    %39 = arith.mulf %35, %38 : vector<256x64xf32>
    %40 = math.erf %39 : vector<256x64xf32>
    %cst_17 = arith.constant 1.000000e+00 : f32
    %41 = vector.broadcast %cst_17 : f32 to vector<256x64xf32>
    %42 = arith.addf %41, %40 : vector<256x64xf32>
    %43 = arith.mulf %37, %42 : vector<256x64xf32>
    %44 = arith.truncf %43 : vector<256x64xf32> to vector<256x64xbf16>
    %c0_18 = arith.constant 0 : index
    %c0_19 = arith.constant 0 : index
    %45 = vector.load %arg6[%c0_18, %c0_19] : memref<64x8xbf16, #tpu.memory_space<vmem>>, vector<64x8xbf16>
    %cst_20 = arith.constant dense<0.000000e+00> : vector<256x8xf32>
    %46 = tpu.matmul %44, %45, %cst_20 {dimension_numbers = #tpu.dot_dimension_numbers<[1], [0], [0], [1], [0, 0, 1, 1], [], []>} : vector<256x64xbf16>, vector<64x8xbf16>, vector<256x8xf32> -> vector<256x8xf32>
    %c0_21 = arith.constant 0 : index
    %c0_22 = arith.constant 0 : index
    %47 = vector.load %arg7[%c0_21, %c0_22] : memref<1x8xf32, #tpu.memory_space<vmem>>, vector<1x8xf32>
    %48 = vector.broadcast %47 : vector<1x8xf32> to vector<256x8xf32>
    %49 = arith.addf %46, %48 : vector<256x8xf32>
    %50 = vector.shape_cast %49 : vector<256x8xf32> to vector<8x32x8xf32>
    %51 = tpu.transpose %50, [0, 2, 1] : vector<8x32x8xf32> -> vector<8x8x32xf32>
    %52 = vector.shape_cast %51 : vector<8x8x32xf32> to vector<64x32xf32>
    %53 = arith.addf %2, %52 : vector<64x32xf32>
    %cst_23 = arith.constant dense<0.000000e+00> : vector<64xf32>
    %54 = vector.multi_reduction <add>, %53, %cst_23 [1] : vector<64x32xf32> to vector<64xf32>
    %55 = vector.shape_cast %54 : vector<64xf32> to vector<64x1xf32>
    %cst_24 = arith.constant 3.200000e+01 : f32
    %56 = vector.broadcast %cst_24 : f32 to vector<64x1xf32>
    %57 = arith.divf %55, %56 : vector<64x1xf32>
    %58 = arith.mulf %53, %53 : vector<64x32xf32>
    %cst_25 = arith.constant dense<0.000000e+00> : vector<64xf32>
    %59 = vector.multi_reduction <add>, %58, %cst_25 [1] : vector<64x32xf32> to vector<64xf32>
    %60 = vector.shape_cast %59 : vector<64xf32> to vector<64x1xf32>
    %cst_26 = arith.constant 3.200000e+01 : f32
    %61 = vector.broadcast %cst_26 : f32 to vector<64x1xf32>
    %62 = arith.divf %60, %61 : vector<64x1xf32>
    %63 = arith.mulf %57, %57 : vector<64x1xf32>
    %64 = arith.subf %62, %63 : vector<64x1xf32>
    %65 = vector.broadcast %57 : vector<64x1xf32> to vector<64x32xf32>
    %66 = arith.subf %53, %65 : vector<64x32xf32>
    %cst_27 = arith.constant 9.99999974E-6 : f32
    %67 = vector.broadcast %cst_27 : f32 to vector<64x1xf32>
    %68 = arith.addf %64, %67 : vector<64x1xf32>
    %69 = math.rsqrt %68 : vector<64x1xf32>
    %70 = vector.broadcast %69 : vector<64x1xf32> to vector<64x32xf32>
    %71 = arith.mulf %66, %70 : vector<64x32xf32>
    %c0_28 = arith.constant 0 : index
    %c0_29 = arith.constant 0 : index
    %72 = vector.load %arg8[%c0_28, %c0_29] : memref<1x32xf32, #tpu.memory_space<vmem>>, vector<1x32xf32>
    %73 = vector.broadcast %72 : vector<1x32xf32> to vector<64x32xf32>
    %74 = arith.mulf %71, %73 : vector<64x32xf32>
    %c0_30 = arith.constant 0 : index
    %c0_31 = arith.constant 0 : index
    %75 = vector.load %arg9[%c0_30, %c0_31] : memref<1x32xf32, #tpu.memory_space<vmem>>, vector<1x32xf32>
    %76 = vector.broadcast %75 : vector<1x32xf32> to vector<64x32xf32>
    %77 = arith.addf %74, %76 : vector<64x32xf32>
    %78 = arith.truncf %77 : vector<64x32xf32> to vector<64x32xbf16>
    %c0_32 = arith.constant 0 : index
    %c0_33 = arith.constant 0 : index
    %79 = vector.load %arg10[%c0_32, %c0_33] : memref<32x64xbf16, #tpu.memory_space<vmem>>, vector<32x64xbf16>
    %cst_34 = arith.constant dense<0.000000e+00> : vector<64x64xf32>
    %80 = tpu.matmul %78, %79, %cst_34 {dimension_numbers = #tpu.dot_dimension_numbers<[1], [0], [0], [1], [0, 0, 1, 1], [], []>} : vector<64x32xbf16>, vector<32x64xbf16>, vector<64x64xf32> -> vector<64x64xf32>
    %c0_35 = arith.constant 0 : index
    %c0_36 = arith.constant 0 : index
    %81 = vector.load %arg11[%c0_35, %c0_36] : memref<1x64xf32, #tpu.memory_space<vmem>>, vector<1x64xf32>
    %82 = vector.broadcast %81 : vector<1x64xf32> to vector<64x64xf32>
    %83 = arith.addf %80, %82 : vector<64x64xf32>
    %cst_37 = arith.constant 5.000000e-01 : f32
    %84 = vector.broadcast %cst_37 : f32 to vector<64x64xf32>
    %85 = arith.mulf %84, %83 : vector<64x64xf32>
    %cst_38 = arith.constant 0.707106769 : f32
    %86 = vector.broadcast %cst_38 : f32 to vector<64x64xf32>
    %87 = arith.mulf %83, %86 : vector<64x64xf32>
    %88 = math.erf %87 : vector<64x64xf32>
    %cst_39 = arith.constant 1.000000e+00 : f32
    %89 = vector.broadcast %cst_39 : f32 to vector<64x64xf32>
    %90 = arith.addf %89, %88 : vector<64x64xf32>
    %91 = arith.mulf %85, %90 : vector<64x64xf32>
    %92 = arith.truncf %91 : vector<64x64xf32> to vector<64x64xbf16>
    %c0_40 = arith.constant 0 : index
    %c0_41 = arith.constant 0 : index
    %93 = vector.load %arg12[%c0_40, %c0_41] : memref<64x32xbf16, #tpu.memory_space<vmem>>, vector<64x32xbf16>
    %cst_42 = arith.constant dense<0.000000e+00> : vector<64x32xf32>
    %94 = tpu.matmul %92, %93, %cst_42 {dimension_numbers = #tpu.dot_dimension_numbers<[1], [0], [0], [1], [0, 0, 1, 1], [], []>} : vector<64x64xbf16>, vector<64x32xbf16>, vector<64x32xf32> -> vector<64x32xf32>
    %c0_43 = arith.constant 0 : index
    %c0_44 = arith.constant 0 : index
    %95 = vector.load %arg13[%c0_43, %c0_44] : memref<1x32xf32, #tpu.memory_space<vmem>>, vector<1x32xf32>
    %96 = vector.broadcast %95 : vector<1x32xf32> to vector<64x32xf32>
    %97 = arith.addf %94, %96 : vector<64x32xf32>
    %98 = arith.addf %53, %97 : vector<64x32xf32>
    %99 = vector.shape_cast %98 : vector<64x32xf32> to vector<8x8x32xf32>
    %100 = vector.extract_strided_slice %99 {offsets = [0, 0, 0], sizes = [8, 1, 32], strides = [1, 1, 1]} : vector<8x8x32xf32> to vector<8x1x32xf32>
    %101 = vector.shape_cast %100 : vector<8x1x32xf32> to vector<8x32xf32>
    %102 = arith.truncf %101 : vector<8x32xf32> to vector<8x32xbf16>
    %c0_45 = arith.constant 0 : index
    %c0_46 = arith.constant 0 : index
    %103 = vector.load %arg17[%c0_45, %c0_46] : memref<8x256xbf16, #tpu.memory_space<vmem>>, vector<8x32xbf16>
    tpu.vector_store %arg17[%c0_45, %c0_46], %102 {strides = array<i32>} : memref<8x256xbf16, #tpu.memory_space<vmem>>, vector<8x32xbf16>,
    %104 = vector.extract_strided_slice %99 {offsets = [0, 1, 0], sizes = [8, 1, 32], strides = [1, 1, 1]} : vector<8x8x32xf32> to vector<8x1x32xf32>
    %105 = vector.shape_cast %104 : vector<8x1x32xf32> to vector<8x32xf32>
    %106 = arith.truncf %105 : vector<8x32xf32> to vector<8x32xbf16>
    %c0_47 = arith.constant 0 : index
    %c32 = arith.constant 32 : index
    %107 = vector.load %arg17[%c0_47, %c32] : memref<8x256xbf16, #tpu.memory_space<vmem>>, vector<8x32xbf16>
    tpu.vector_store %arg17[%c0_47, %c32], %106 {strides = array<i32>} : memref<8x256xbf16, #tpu.memory_space<vmem>>, vector<8x32xbf16>,
    %108 = vector.extract_strided_slice %99 {offsets = [0, 2, 0], sizes = [8, 1, 32], strides = [1, 1, 1]} : vector<8x8x32xf32> to vector<8x1x32xf32>
    %109 = vector.shape_cast %108 : vector<8x1x32xf32> to vector<8x32xf32>
    %110 = arith.truncf %109 : vector<8x32xf32> to vector<8x32xbf16>
    %c0_48 = arith.constant 0 : index
    %c64 = arith.constant 64 : index
    %111 = vector.load %arg17[%c0_48, %c64] : memref<8x256xbf16, #tpu.memory_space<vmem>>, vector<8x32xbf16>
    tpu.vector_store %arg17[%c0_48, %c64], %110 {strides = array<i32>} : memref<8x256xbf16, #tpu.memory_space<vmem>>, vector<8x32xbf16>,
    %112 = vector.extract_strided_slice %99 {offsets = [0, 3, 0], sizes = [8, 1, 32], strides = [1, 1, 1]} : vector<8x8x32xf32> to vector<8x1x32xf32>
    %113 = vector.shape_cast %112 : vector<8x1x32xf32> to vector<8x32xf32>
    %114 = arith.truncf %113 : vector<8x32xf32> to vector<8x32xbf16>
    %c0_49 = arith.constant 0 : index
    %c96 = arith.constant 96 : index
    %115 = vector.load %arg17[%c0_49, %c96] : memref<8x256xbf16, #tpu.memory_space<vmem>>, vector<8x32xbf16>
    tpu.vector_store %arg17[%c0_49, %c96], %114 {strides = array<i32>} : memref<8x256xbf16, #tpu.memory_space<vmem>>, vector<8x32xbf16>,
    %116 = vector.extract_strided_slice %99 {offsets = [0, 4, 0], sizes = [8, 1, 32], strides = [1, 1, 1]} : vector<8x8x32xf32> to vector<8x1x32xf32>
    %117 = vector.shape_cast %116 : vector<8x1x32xf32> to vector<8x32xf32>
    %118 = arith.truncf %117 : vector<8x32xf32> to vector<8x32xbf16>
    %c0_50 = arith.constant 0 : index
    %c128 = arith.constant 128 : index
    %119 = vector.load %arg17[%c0_50, %c128] : memref<8x256xbf16, #tpu.memory_space<vmem>>, vector<8x32xbf16>
    tpu.vector_store %arg17[%c0_50, %c128], %118 {strides = array<i32>} : memref<8x256xbf16, #tpu.memory_space<vmem>>, vector<8x32xbf16>,
    %120 = vector.extract_strided_slice %99 {offsets = [0, 5, 0], sizes = [8, 1, 32], strides = [1, 1, 1]} : vector<8x8x32xf32> to vector<8x1x32xf32>
    %121 = vector.shape_cast %120 : vector<8x1x32xf32> to vector<8x32xf32>
    %122 = arith.truncf %121 : vector<8x32xf32> to vector<8x32xbf16>
    %c0_51 = arith.constant 0 : index
    %c160 = arith.constant 160 : index
    %123 = vector.load %arg17[%c0_51, %c160] : memref<8x256xbf16, #tpu.memory_space<vmem>>, vector<8x32xbf16>
    tpu.vector_store %arg17[%c0_51, %c160], %122 {strides = array<i32>} : memref<8x256xbf16, #tpu.memory_space<vmem>>, vector<8x32xbf16>,
    %124 = vector.extract_strided_slice %99 {offsets = [0, 6, 0], sizes = [8, 1, 32], strides = [1, 1, 1]} : vector<8x8x32xf32> to vector<8x1x32xf32>
    %125 = vector.shape_cast %124 : vector<8x1x32xf32> to vector<8x32xf32>
    %126 = arith.truncf %125 : vector<8x32xf32> to vector<8x32xbf16>
    %c0_52 = arith.constant 0 : index
    %c192 = arith.constant 192 : index
    %127 = vector.load %arg17[%c0_52, %c192] : memref<8x256xbf16, #tpu.memory_space<vmem>>, vector<8x32xbf16>
    tpu.vector_store %arg17[%c0_52, %c192], %126 {strides = array<i32>} : memref<8x256xbf16, #tpu.memory_space<vmem>>, vector<8x32xbf16>,
    %128 = vector.extract_strided_slice %99 {offsets = [0, 7, 0], sizes = [8, 1, 32], strides = [1, 1, 1]} : vector<8x8x32xf32> to vector<8x1x32xf32>
    %129 = vector.shape_cast %128 : vector<8x1x32xf32> to vector<8x32xf32>
    %130 = arith.truncf %129 : vector<8x32xf32> to vector<8x32xbf16>
    %c0_53 = arith.constant 0 : index
    %c224 = arith.constant 224 : index
    %131 = vector.load %arg17[%c0_53, %c224] : memref<8x256xbf16, #tpu.memory_space<vmem>>, vector<8x32xbf16>
    tpu.vector_store %arg17[%c0_53, %c224], %130 {strides = array<i32>} : memref<8x256xbf16, #tpu.memory_space<vmem>>, vector<8x32xbf16>,
    %c0_54 = arith.constant 0 : index
    %c0_55 = arith.constant 0 : index
    %132 = vector.load %arg17[%c0_54, %c0_55] : memref<8x256xbf16, #tpu.memory_space<vmem>>, vector<8x256xbf16>
    %c0_56 = arith.constant 0 : index
    %c0_57 = arith.constant 0 : index
    %133 = vector.load %arg14[%c0_56, %c0_57] : memref<256x32xbf16, #tpu.memory_space<vmem>>, vector<256x32xbf16>
    %cst_58 = arith.constant dense<0.000000e+00> : vector<8x32xf32>
    %134 = tpu.matmul %132, %133, %cst_58 {dimension_numbers = #tpu.dot_dimension_numbers<[1], [0], [0], [1], [0, 0, 1, 1], [], []>} : vector<8x256xbf16>, vector<256x32xbf16>, vector<8x32xf32> -> vector<8x32xf32>
    %c0_59 = arith.constant 0 : index
    %c0_60 = arith.constant 0 : index
    %135 = vector.load %arg15[%c0_59, %c0_60] : memref<1x32xf32, #tpu.memory_space<vmem>>, vector<1x32xf32>
    %136 = vector.broadcast %135 : vector<1x32xf32> to vector<8x32xf32>
    %137 = arith.addf %134, %136 : vector<8x32xf32>
    %c0_61 = arith.constant 0 : index
    %c0_62 = arith.constant 0 : index
    %138 = vector.load %arg16[%c0_61, %c0_62] : memref<8x32xf32, #tpu.memory_space<vmem>>, vector<8x32xf32>
    tpu.vector_store %arg16[%c0_61, %c0_62], %137 {strides = array<i32>} : memref<8x32xf32, #tpu.memory_space<vmem>>, vector<8x32xf32>,
    return
  }
  func.func @transform_0(%arg0: i32) -> (i32, i32, i32) {
    %c0_i32 = arith.constant 0 : i32
    %c0_i32_0 = arith.constant 0 : i32
    %c0_i32_1 = arith.constant 0 : i32
    return %arg0, %c0_i32, %c0_i32_0 : i32, i32, i32
  }
  func.func @transform_1(%arg0: i32) -> (i32, i32) {
    %c0_i32 = arith.constant 0 : i32
    %c0_i32_0 = arith.constant 0 : i32
    %c0_i32_1 = arith.constant 0 : i32
    return %c0_i32, %c0_i32_0 : i32, i32
  }
  func.func @transform_2(%arg0: i32) -> (i32, i32) {
    %c0_i32 = arith.constant 0 : i32
    %c0_i32_0 = arith.constant 0 : i32
    %c0_i32_1 = arith.constant 0 : i32
    return %c0_i32, %c0_i32_0 : i32, i32
  }
  func.func @transform_3(%arg0: i32) -> (i32, i32) {
    %c0_i32 = arith.constant 0 : i32
    %c0_i32_0 = arith.constant 0 : i32
    %c0_i32_1 = arith.constant 0 : i32
    return %c0_i32, %c0_i32_0 : i32, i32
  }
  func.func @transform_4(%arg0: i32) -> (i32, i32) {
    %c0_i32 = arith.constant 0 : i32
    %c0_i32_0 = arith.constant 0 : i32
    %c0_i32_1 = arith.constant 0 : i32
    return %c0_i32, %c0_i32_0 : i32, i32
  }
  func.func @transform_5(%arg0: i32) -> (i32, i32) {
    %c0_i32 = arith.constant 0 : i32
    %c0_i32_0 = arith.constant 0 : i32
    %c0_i32_1 = arith.constant 0 : i32
    return %c0_i32, %c0_i32_0 : i32, i32
  }
  func.func @transform_6(%arg0: i32) -> (i32, i32) {
    %c0_i32 = arith.constant 0 : i32
    %c0_i32_0 = arith.constant 0 : i32
    %c0_i32_1 = arith.constant 0 : i32
    return %c0_i32, %c0_i32_0 : i32, i32
  }
  func.func @transform_7(%arg0: i32) -> (i32, i32) {
    %c0_i32 = arith.constant 0 : i32
    %c0_i32_0 = arith.constant 0 : i32
    %c0_i32_1 = arith.constant 0 : i32
    return %c0_i32, %c0_i32_0 : i32, i32
  }
  func.func @transform_8(%arg0: i32) -> (i32, i32) {
    %c0_i32 = arith.constant 0 : i32
    %c0_i32_0 = arith.constant 0 : i32
    %c0_i32_1 = arith.constant 0 : i32
    return %c0_i32, %c0_i32_0 : i32, i32
  }
  func.func @transform_9(%arg0: i32) -> (i32, i32) {
    %c0_i32 = arith.constant 0 : i32
    %c0_i32_0 = arith.constant 0 : i32
    %c0_i32_1 = arith.constant 0 : i32
    return %c0_i32, %c0_i32_0 : i32, i32
  }
  func.func @transform_10(%arg0: i32) -> (i32, i32) {
    %c0_i32 = arith.constant 0 : i32
    %c0_i32_0 = arith.constant 0 : i32
    %c0_i32_1 = arith.constant 0 : i32
    return %c0_i32, %c0_i32_0 : i32, i32
  }
  func.func @transform_11(%arg0: i32) -> (i32, i32) {
    %c0_i32 = arith.constant 0 : i32
    %c0_i32_0 = arith.constant 0 : i32
    %c0_i32_1 = arith.constant 0 : i32
    return %c0_i32, %c0_i32_0 : i32, i32
  }
  func.func @transform_12(%arg0: i32) -> (i32, i32) {
    %c0_i32 = arith.constant 0 : i32
    %c0_i32_0 = arith.constant 0 : i32
    %c0_i32_1 = arith.constant 0 : i32
    return %c0_i32, %c0_i32_0 : i32, i32
  }
  func.func @transform_13(%arg0: i32) -> (i32, i32) {
    %c0_i32 = arith.constant 0 : i32
    %c0_i32_0 = arith.constant 0 : i32
    %c0_i32_1 = arith.constant 0 : i32
    return %c0_i32, %c0_i32_0 : i32, i32
  }
  func.func @transform_14(%arg0: i32) -> (i32, i32) {
    %c0_i32 = arith.constant 0 : i32
    %c0_i32_0 = arith.constant 0 : i32
    %c0_i32_1 = arith.constant 0 : i32
    return %c0_i32, %c0_i32_0 : i32, i32
  }
  func.func @transform_15(%arg0: i32) -> (i32, i32) {
    %c0_i32 = arith.constant 0 : i32
    %c0_i32_0 = arith.constant 0 : i32
    return %arg0, %c0_i32 : i32, i32
  }
}

</mosaic_0001>

<bundles_post_ra>
// kernel: tpu_custom_call.1
= control target key start
LH: loop header
LB: loop body
LE: loop exit
PB: predicated region body
PF: predicated region fallthrough
CT: control target
= control target key end

     0   :  { %s7109_s0 = inlined_call_operand.vmem [shape: bf16[16,8,32], index: 0, kind: input, shape index: {}]   ;;  %s7110_s1 = inlined_call_operand.vmem [shape: f32[1,32], index: 1, kind: input, shape index: {}]   ;;  %s7111_s2 = inlined_call_operand.vmem [shape: f32[1,32], index: 2, kind: input, shape index: {}]   ;;  %s7112_s3 = inlined_call_operand.vmem [shape: bf16[8,64], index: 3, kind: input, shape index: {}]   ;;  %s7113_s4 = inlined_call_operand.vmem [shape: f32[1,64], index: 4, kind: input, shape index: {}]   ;;  %s7114_s5 = inlined_call_operand.vmem [shape: bf16[64,8], index: 5, kind: input, shape index: {}]   ;;  %s7115_s6 = inlined_call_operand.vmem [shape: f32[1,8], index: 6, kind: input, shape index: {}]   ;;  %s7116_s7 = inlined_call_operand.vmem [shape: f32[1,32], index: 7, kind: input, shape index: {}]   ;;  %s7117_s8 = inlined_call_operand.vmem [shape: f32[1,32], index: 8, kind: input, shape index: {}]   ;;  %s7118_s9 = inlined_call_operand.vmem [shape: bf16[32,64], index: 9, kind: input, shape index: {}]   ;;  %s7119_s10 = inlined_call_operand.vmem [shape: f32[1,64], index: 10, kind: input, shape index: {}]   ;;  %s7120_s11 = inlined_call_operand.vmem [shape: bf16[64,32], index: 11, kind: input, shape index: {}]   ;;  %s7121_s12 = inlined_call_operand.vmem [shape: f32[1,32], index: 12, kind: input, shape index: {}]   ;;  %s7122_s13 = inlined_call_operand.vmem [shape: bf16[256,32], index: 13, kind: input, shape index: {}]   ;;  %s7123_s14 = inlined_call_operand.vmem [shape: f32[1,32], index: 14, kind: input, shape index: {}]   ;;  %s7124_s15 = inlined_call_operand.hbm [shape: f32[16,32], index: 15, kind: output, shape index: {}]  }
   0x1   :  { %7125 = sst [smem:[#allocation6_spill]] %s7109_s0 }
   0x2   :  { %7126 = sst [smem:[#allocation7_spill]] %s7110_s1 }
   0x3   :  { %7127 = sst [smem:[#allocation8_spill]] %s7111_s2 }
   0x4   :  { %7128 = sst [smem:[#allocation9_spill]] %s7112_s3 }
   0x5   :  { %7129 = sst [smem:[#allocation10_spill]] %s7113_s4 }
   0x6   :  { %7130 = sst [smem:[#allocation11_spill]] %s7114_s5 }
   0x7   :  { %20 = vsyncpa [#allocation4], 0 }
   0x8   :  { %22 = vsyncpa [#allocation4 + $0x1], 0  ;;  %s4793_s18 = smov 0   ;;  %s4795_s19 = smov 0  }
   0x9   :  { %s4797_s20 = smov 0   ;;  %s4799_s21 = smov 0  }
   0xa LB: > { %s4163_s22 = sadd.s32 4294967295, %s4707_s21   ;;  %s4164_s23 = sadd.s32 4294967294, %s4707_s21   ;;  %s4707_s21 = sphi %s4799_s21, %s7226_s21   ;;  %s4703_s20 = sphi %s4797_s20, %s7225_s20   ;;  %s4699_s19 = sphi %s4795_s19, %s7224_s19   ;;  %s4695_s18 = sphi %s4793_s18, %s7223_s18  }
   0xb   : > { %s4816_s24 = sadd.s32 1, %s4707_s21   ;;  %s355_s25 = sadd.s32 1, %s4703_s20 }
   0xc   : > { %s352_s26 = ssub.s32 %s4707_s21, %s4816_s24  ;;  %p365_p0 = scmp.ne.s32.totalorder %s4703_s20, %s4699_s19 }
   0xd   : > { %p353_p1 = scmp.eq.s32.totalorder %s352_s26, 0  ;;  %p366_p2 = scmp.eq.s32.totalorder %s4163_s22, 1 }
   0xe   : > { %p371_p3 = scmp.ne.s32.totalorder %s4699_s19, %s4695_s18  ;;  %p372_p4 = scmp.eq.s32.totalorder %s4164_s23, 1 }
   0xf   : > { %s4826_s27 = scalar_select %p353_p1, %s4703_s20, %s355_s25  }
  0x10   : > { %p4828_p5 = por %p366_p2, %p365_p0  ;;  %p4832_p6 = por %p372_p4, %p371_p3 }
  0x11   : > { %p4167_p7 = scmp.ge.s32.totalorder %s4707_s21, 1  ;;  %p441_p8 = scmp.lt.s32.totalorder %s4707_s21, 3 }
  0x13   : > { %p442_p9 = pnand %p4167_p7, %p441_p8 }
  0x14   : > { %s4838_s30 = sshll.u32 (!%p442_p9), %s4163_s22, 3  ;;  %s7133_s0 = sld [smem:[#allocation6_spill]] (!%p442_p9) }
  0x15   : > { %445 = sbr.rel (%p442_p9) target bundleno = 2096 (0x830), region = 80  ;;  %p490_p10 = scmp.lt.s32.totalorder (!%p442_p9), %s4838_s30, 15 }
  0x16   : > { %s7134_s1 = sld [smem:[#allocation7_spill]] (!%p442_p9)  ;;  %s4710_s25 = smov (!%p442_p9), 64  }
  0x17   : > { %s7135_s2 = sld [smem:[#allocation8_spill]] (!%p442_p9)  ;;  %s4712_s22 = smov (!%p442_p9), 96  }
  0x18   : > { %s7136_s3 = sld [smem:[#allocation9_spill]] (!%p442_p9) }
  0x19   : > { %s7137_s4 = sld [smem:[#allocation10_spill]] (!%p442_p9) }
  0x1a   : > { %s491_s16 = scalar_select %p490_p10, %s4838_s30, 15  ;;  %vm512_vm0 = vcmask 261120   ;;  %v4709_v23 = vmov 32.0  }
  0x1b   : > { %4528 = vrcp.f32 %v4709_v23  ;;  %s7138_s5 = sld [smem:[#allocation11_spill]] }
  0x1c   : > { %s4170_s17 = sshll.u32 %s491_s16, 2  ;;  %s4100_s16 = scalar_lea.hbm %s7124_s15, %s4838_s30 }
  0x1d   : > { %s4845_s26 = scalar_lea.vmem %s7133_s0, %s4170_s17  ;;  %s486_s0 = sand.u32 1, %s4699_s19  }
  0x1e   : > { %v4386_v0 = vld [vmem:[%s4845_s26] sm:$0xff]   ;;  %v4401_v1 = vld [vmem:[%s4845_s26 + $0x8] sm:$0xff]   ;;  %v4402_v16 = vld [vmem:[%s4845_s26 + $0x10] sm:$0xff]  }
  0x1f   : > { %v4849_v2 = vunpack.c.h.bf16 %v4386_v0  ;;  %v4851_v3 = vunpack.c.l.bf16 %v4386_v0  ;;  %v4853_v4 = vunpack.c.l.bf16 %v4401_v1  ;;  %v4870_v14 = vunpack.c.h.bf16 %v4401_v1  ;;  %v4403_v26 = vld [vmem:[%s4845_s26 + $0x18] sm:$0xff]   ;;  %s4711_s26 = smov 32  }
  0x20   : > { %v4878_v19 = vunpack.c.h.bf16 %v4402_v16  ;;  %v4886_v27 = vunpack.c.l.bf16 %v4403_v26  ;;  %v4893_v33 = vunpack.c.l.bf16 %v4402_v16 }
  0x21   : > { %v516_v5 = vsel %vm512_vm0, %v4849_v2, 0.0  ;;  %v513_v6 = vsel %vm512_vm0, %v4851_v3, 0.0  ;;  %v519_v7 = vsel %vm512_vm0, %v4853_v4, 0.0  ;;  %v553_v8 = vmul.f32 %v4849_v2, %v4849_v2  ;;  %v4529_v24 = vpop.eup %4528 }
  0x22   : > { %517 = vadd.xlane.f32.xlu1 %v516_v5  ;;  %514 = vadd.xlane.f32.xlu0 %v513_v6  ;;  %v552_v9 = vmul.f32 %v4851_v3, %v4851_v3  ;;  %v554_v10 = vmul.f32 %v4853_v4, %v4853_v4  ;;  %v555_v15 = vmul.f32 %v4870_v14, %v4870_v14  ;;  %v522_v17 = vsel %vm512_vm0, %v4870_v14, 0.0 }
  0x23   : > { %520 = vadd.xlane.f32.xlu2 %v519_v7  ;;  %v563_v11 = vsel %vm512_vm0, %v553_v8, 0.0  ;;  %v557_v20 = vmul.f32 %v4878_v19, %v4878_v19  ;;  %v528_v21 = vsel %vm512_vm0, %v4878_v19, 0.0  ;;  %v538_v25 = vmul.f32 32.0, %v4529_v24 }
  0x24   : > { %v560_v12 = vsel %vm512_vm0, %v552_v9, 0.0  ;;  %v566_v13 = vsel %vm512_vm0, %v554_v10, 0.0  ;;  %v569_v18 = vsel %vm512_vm0, %v555_v15, 0.0  ;;  %v531_v29 = vsel %vm512_vm0, %v4886_v27, 0.0 }
  0x25   : > { %v575_v22 = vsel %vm512_vm0, %v557_v20, 0.0  ;;  %v539_v28 = vsub.f32 1.0, %v538_v25  ;;  %v558_v30 = vmul.f32 %v4886_v27, %v4886_v27  ;;  %v525_v35 = vsel %vm512_vm0, %v4893_v33, 0.0 }
  0x26   : > { %v556_v36 = vmul.f32 %v4893_v33, %v4893_v33  ;;  %vm542_vm1 = vweird.f32 %v4529_v24  ;;  %v4912_v8 = vunpack.c.h.bf16 %v4403_v26 }
  0x27   : > { %v578_v31 = vsel %vm512_vm0, %v558_v30, 0.0  ;;  %v540_v32 = vmul.f32 %v4529_v24, %v539_v28 }
  0x28   : > { %v572_v39 = vsel %vm512_vm0, %v556_v36, 0.0 }
  0x29   : > { %v541_v34 = vadd.f32 %v4529_v24, %v540_v32 }
  0x2a   : > { %564 = vadd.xlane.f32.xlu1 %v563_v11  ;;  %561 = vadd.xlane.f32.xlu0 %v560_v12  ;;  %v534_v12 = vsel %vm512_vm0, %v4912_v8, 0.0 }
  0x2b   : > { %567 = vadd.xlane.f32.xlu2 %v566_v13  ;;  %v4900_v40 = vsel %vm542_vm1, %v4529_v24, %v541_v34 }
  0x32   : > { %523 = vadd.xlane.f32.xlu1 %v522_v17 }
  0x33   : > { %570 = vadd.xlane.f32.xlu2 %v569_v18 }
  0x3a   : > { %529 = vadd.xlane.f32.xlu1 %v528_v21  ;;  %v4923_v21 = vld [vmem:[%s7134_s1] ss:$0 sm:$0xff] }
  0x3b   : > { %576 = vadd.xlane.f32.xlu2 %v575_v22 }
  0x42   : > { %532 = vadd.xlane.f32.xlu1 %v531_v29  ;;  %v4932_v29 = vld [vmem:[%s7135_s2] ss:$0 sm:$0xff] }
  0x43   : > { %579 = vadd.xlane.f32.xlu2 %v578_v31 }
  0x4a   : > { %526 = vadd.xlane.f32.xlu1 %v525_v35 }
  0x4b   : > { %573 = vadd.xlane.f32.xlu2 %v572_v39 }
  0x53   : > { %535 = vadd.xlane.f32.xlu2 %v534_v12  ;;  %v559_v12 = vmul.f32 %v4912_v8, %v4912_v8 }
  0x95   : > { %v518_v37 = vpop.xlane.xlu1 %517  ;;  %v515_v38 = vpop.xlane.xlu0 %514 }
  0x96   : > { %v545_v41 = vmul.f32 %v4900_v40, %v518_v37  ;;  %v544_v42 = vmul.f32 %v4900_v40, %v515_v38  ;;  %v521_v49 = vpop.xlane.xlu2 %520 }
  0x97   : > { %v4907_v54 = vmul.f32 %v4900_v40, %v521_v49 }
  0x98   : > { %v593_v45 = vmul.f32 %v545_v41, %v545_v41  ;;  %v592_v46 = vmul.f32 %v544_v42, %v544_v42  ;;  %v609_v18 = vsub.f32 %v4849_v2, %v545_v41  ;;  %v608_v23 = vsub.f32 %v4851_v3, %v544_v42 }
  0x99   : > { %v594_v55 = vmul.f32 %v4907_v54, %v4907_v54  ;;  %v610_v49 = vsub.f32 %v4853_v4, %v4907_v54 }
  0x9d   : > { %v565_v43 = vpop.xlane.xlu1 %564  ;;  %v562_v44 = vpop.xlane.xlu0 %561 }
  0x9e   : > { %v585_v47 = vmul.f32 %v565_v43, %v4900_v40  ;;  %v584_v48 = vmul.f32 %v562_v44, %v4900_v40  ;;  %v568_v56 = vpop.xlane.xlu2 %567 }
  0x9f   : > { %v586_v58 = vmul.f32 %v568_v56, %v4900_v40 }
  0xa0   : > { %v601_v50 = vsub.f32 %v585_v47, %v593_v45  ;;  %v600_v51 = vsub.f32 %v584_v48, %v592_v46 }
  0xa1   : > { %v602_v60 = vsub.f32 %v586_v58, %v594_v55 }
  0xa2   : > { %v617_v52 = vadd.f32 1e-05, %v601_v50  ;;  %v616_v53 = vadd.f32 1e-05, %v600_v51 }
  0xa3   : > { %v618_v0 = vadd.f32 1e-05, %v602_v60 }
  0xa4   : > { %4530 = vrsqrt.f32 %v617_v52  ;;  %vm640_vm4 = vweird.f32 %v617_v52  ;;  %vm630_vm6 = vweird.f32 %v616_v53 }
  0xa5   : > { %4532 = vrsqrt.f32 %v616_v53  ;;  %v524_v57 = vpop.xlane.xlu1 %523  ;;  %vm650_vm8 = vweird.f32 %v618_v0 }
  0xa6   : > { %4534 = vrsqrt.f32 %v618_v0  ;;  %v571_v7 = vpop.xlane.xlu2 %570  ;;  %v4917_v16 = vmul.f32 %v4900_v40, %v524_v57 }
  0xa7   : > { %v587_v36 = vmul.f32 %v571_v7, %v4900_v40 }
  0xa8   : > { %v595_v32 = vmul.f32 %v4917_v16, %v4917_v16  ;;  %v611_v7 = vsub.f32 %v4870_v14, %v4917_v16 }
  0xaa   : > { %v4531_v59 = vpop.eup %4530  ;;  %v603_v45 = vsub.f32 %v587_v36, %v595_v32 }
  0xab   : > { %v4533_v61 = vpop.eup %4532  ;;  %v635_v62 = vmul.f32 %v4531_v59, %v617_v52  ;;  %vm641_vm2 = vweird.f32 %v4531_v59 }
  0xac   : > { %v625_v63 = vmul.f32 %v4533_v61, %v616_v53  ;;  %vm631_vm3 = vweird.f32 %v4533_v61  ;;  %v4535_v17 = vpop.eup %4534  ;;  %vm642_vm5 = vmor %vm640_vm4, %vm641_vm2  ;;  %v619_v51 = vadd.f32 1e-05, %v603_v45 }
  0xad   : > { %v636_v1 = vmul.f32 %v4531_v59, %v635_v62  ;;  %v530_v11 = vpop.xlane.xlu1 %529  ;;  %vm632_vm7 = vmor %vm630_vm6, %vm631_vm3  ;;  %v645_v25 = vmul.f32 %v4535_v17, %v618_v0  ;;  %vm651_vm9 = vweird.f32 %v4535_v17 }
  0xae   : > { %v626_v5 = vmul.f32 %v4533_v61, %v625_v63  ;;  %v4926_v22 = vmul.f32 %v4900_v40, %v530_v11  ;;  %v577_v34 = vpop.xlane.xlu2 %576  ;;  %vm652_vm10 = vmor %vm650_vm8, %vm651_vm9  ;;  %4536 = vrsqrt.f32 %v619_v51  ;;  %vm660_vm11 = vweird.f32 %v619_v51 }
  0xaf   : > { %v637_v6 = vmul.f32 0.5, %v636_v1  ;;  %v646_v31 = vmul.f32 %v4535_v17, %v645_v25  ;;  %v589_v41 = vmul.f32 %v577_v34, %v4900_v40  ;;  %vm1062_vm8 = vcmask 1043456  }
  0xb0   : > { %v627_v9 = vmul.f32 0.5, %v626_v5  ;;  %v597_v37 = vmul.f32 %v4926_v22, %v4926_v22  ;;  %vm1013_vm9 = vcmask 64512  }
  0xb1   : > { %v638_v10 = vsub.f32 1.5, %v637_v6  ;;  %v647_v39 = vmul.f32 0.5, %v646_v31 }
  0xb2   : > { %v628_v13 = vsub.f32 1.5, %v627_v9  ;;  %v605_v47 = vsub.f32 %v589_v41, %v597_v37  ;;  %v613_v9 = vsub.f32 %v4878_v19, %v4926_v22 }
  0xb3   : > { %v639_v15 = vmul.f32 %v4531_v59, %v638_v10  ;;  %v648_v44 = vsub.f32 1.5, %v647_v39 }
  0xb4   : > { %v629_v20 = vmul.f32 %v4533_v61, %v628_v13  ;;  %v621_v52 = vadd.f32 1e-05, %v605_v47  ;;  %v4537_v56 = vpop.eup %4536 }
  0xb5   : > { %v643_v24 = vsel %vm642_vm5, %v4531_v59, %v639_v15  ;;  %v649_v48 = vmul.f32 %v4535_v17, %v648_v44  ;;  %v655_v59 = vmul.f32 %v4537_v56, %v619_v51  ;;  %vm661_vm12 = vweird.f32 %v4537_v56 }
  0xb6   : > { %v633_v26 = vsel %vm632_vm7, %v4533_v61, %v629_v20  ;;  %v705_v28 = vmul.f32 %v643_v24, %v609_v18  ;;  %4538 = vrsqrt.f32 %v621_v52  ;;  %vm680_vm13 = vweird.f32 %v621_v52  ;;  %vm662_vm15 = vmor %vm660_vm11, %vm661_vm12  ;;  %v533_v24 = vpop.xlane.xlu1 %532 }
  0xb7   : > { %v704_v30 = vmul.f32 %v633_v26, %v608_v23  ;;  %v653_v50 = vsel %vm652_vm10, %v4535_v17, %v649_v48  ;;  %v656_v61 = vmul.f32 %v4537_v56, %v655_v59  ;;  %v581_v17 = vsel %vm512_vm0, %v559_v12, 0.0  ;;  %v580_v26 = vpop.xlane.xlu2 %579 }
  0xb8   : > { %v717_v35 = vmul.f32 %v4923_v21, %v705_v28  ;;  %v706_v53 = vmul.f32 %v653_v50, %v610_v49  ;;  %582 = vadd.xlane.f32.xlu2 %v581_v17  ;;  %v550_v25 = vmul.f32 %v4900_v40, %v533_v24 }
  0xb9   : > { %v716_v38 = vmul.f32 %v4923_v21, %v704_v30  ;;  %v657_v63 = vmul.f32 0.5, %v656_v61  ;;  %v590_v30 = vmul.f32 %v580_v26, %v4900_v40 }
  0xba   : > { %v729_v42 = vadd.f32 %v4932_v29, %v717_v35  ;;  %v718_v55 = vmul.f32 %v4923_v21, %v706_v53  ;;  %v598_v28 = vmul.f32 %v550_v25, %v550_v25  ;;  %v614_v50 = vsub.f32 %v4886_v27, %v550_v25 }
  0xbb   : > { %v728_v43 = vadd.f32 %v4932_v29, %v716_v38  ;;  %v658_v0 = vsub.f32 1.5, %v657_v63 }
  0xbc   : > { %v730_v57 = vadd.f32 %v4932_v29, %v718_v55  ;;  %v4539_v58 = vpop.eup %4538  ;;  %v606_v31 = vsub.f32 %v590_v30, %v598_v28 }
  0xbd   : > { %v4453_v46 = vpack.i.bf16 %v729_v42, %v728_v43  ;;  %v675_v60 = vmul.f32 %v4539_v58, %v621_v52  ;;  %vm681_vm14 = vweird.f32 %v4539_v58  ;;  %v659_v5 = vmul.f32 %v4537_v56, %v658_v0 }
  0xbe   : > { %800 = vxpose.xlu1.b32.start.end [1/1] (short) (narrow) %v730_v57, 32  ;;  %vm682_vm1 = vmor %vm680_vm13, %vm681_vm14  ;;  %v622_v32 = vadd.f32 1e-05, %v606_v31  ;;  %v527_v34 = vpop.xlane.xlu1 %526 }
  0xbf   : > { %4454 = vxpose.xlu0.b32.start.end [1/1] (short) (narrow) %v4453_v46, 32  ;;  %v676_v62 = vmul.f32 %v4539_v58, %v675_v60  ;;  %v663_v10 = vsel %vm662_vm15, %v4537_v56, %v659_v5  ;;  %v548_v35 = vmul.f32 %v4900_v40, %v527_v34  ;;  %v574_v36 = vpop.xlane.xlu2 %573 }
  0xc0   : > { %v707_v13 = vmul.f32 %v663_v10, %v611_v7  ;;  %4540 = vrsqrt.f32 %v622_v32  ;;  %v588_v38 = vmul.f32 %v574_v36, %v4900_v40  ;;  %vm690_vm2 = vweird.f32 %v622_v32 }
  0xc1   : > { %v677_v54 = vmul.f32 0.5, %v676_v62  ;;  %v596_v37 = vmul.f32 %v548_v35, %v548_v35  ;;  %v612_v57 = vsub.f32 %v4893_v33, %v548_v35 }
  0xc2   : > { %v719_v18 = vmul.f32 %v4923_v21, %v707_v13 }
  0xc3   : > { %v678_v1 = vsub.f32 1.5, %v677_v54  ;;  %v604_v39 = vsub.f32 %v588_v38, %v596_v37 }
  0xc4   : > { %v731_v16 = vadd.f32 %v4932_v29, %v719_v18 }
  0xc5   : > { %v679_v6 = vmul.f32 %v4539_v58, %v678_v1  ;;  %v620_v42 = vadd.f32 1e-05, %v604_v39  ;;  %v1008_v1 = vld [vmem:[%s7136_s3] sm:$0xf] }
  0xc6   : > { %v4541_v41 = vpop.eup %4540  ;;  %v1064_v5 = vsel %vm1062_vm8, %v1008_v1, 0 }
  0xc7   : > { %v683_v11 = vsel %vm682_vm1, %v4539_v58, %v679_v6  ;;  %v685_v43 = vmul.f32 %v4541_v41, %v622_v32  ;;  %4542 = vrsqrt.f32 %v620_v42  ;;  %vm691_vm3 = vweird.f32 %v4541_v41  ;;  %1073 = vmatpush.bf16.msra.mxu0 %v1064_v5  ;;  %4404 = vmatpush.bf16.msra.mxu3 %v1064_v5 }
  0xc8   : > { %v709_v15 = vmul.f32 %v683_v11, %v613_v9  ;;  %vm692_vm4 = vmor %vm690_vm2, %vm691_vm3  ;;  %vm670_vm5 = vweird.f32 %v620_v42 }
  0xc9   : > { %v686_v44 = vmul.f32 %v4541_v41, %v685_v43 }
  0xca   : > { %v721_v20 = vmul.f32 %v4923_v21, %v709_v15 }
  0xcb   : > { %v687_v45 = vmul.f32 0.5, %v686_v44 }
  0xcc   : > { %v733_v23 = vadd.f32 %v4932_v29, %v721_v20 }
  0xcd   : > { %v688_v46 = vsub.f32 1.5, %v687_v45  ;;  %v4543_v47 = vpop.eup %4542 }
  0xce   : > { %v4475_v22 = vpack.i.bf16 %v733_v23, %v731_v16  ;;  %v665_v49 = vmul.f32 %v4543_v47, %v620_v42  ;;  %vm671_vm6 = vweird.f32 %v4543_v47 }
  0xcf   : > { %v689_v48 = vmul.f32 %v4541_v41, %v688_v46  ;;  %vm672_vm7 = vmor %vm670_vm5, %vm671_vm6 }
  0xd0   : > { %v666_v51 = vmul.f32 %v4543_v47, %v665_v49 }
  0xd1   : > { %v693_v52 = vsel %vm692_vm4, %v4541_v41, %v689_v48 }
  0xd2   : > { %v667_v53 = vmul.f32 0.5, %v666_v51  ;;  %v710_v55 = vmul.f32 %v693_v52, %v614_v50 }
  0xd4   : > { %v668_v56 = vsub.f32 1.5, %v667_v53  ;;  %v722_v59 = vmul.f32 %v4923_v21, %v710_v55 }
  0xd6   : > { %v669_v58 = vmul.f32 %v4543_v47, %v668_v56  ;;  %v734_v63 = vadd.f32 %v4932_v29, %v722_v59 }
  0xd8   : > { %v673_v60 = vsel %vm672_vm7, %v4543_v47, %v669_v58 }
  0xd9   : > { %v708_v61 = vmul.f32 %v673_v60, %v612_v57 }
  0xdb   : > { %v720_v62 = vmul.f32 %v4923_v21, %v708_v61 }
  0xdd   : > { %v732_v54 = vadd.f32 %v4932_v29, %v720_v62 }
  0xdf   : > { %4476 = vxpose.xlu0.b32.start.end [1/1] (short) (narrow) %v4475_v22, 32  ;;  %v4497_v0 = vpack.i.bf16 %v732_v54, %v734_v63  ;;  %v536_v22 = vpop.xlane.xlu2 %535 }
  0xe0   : > { %v551_v24 = vmul.f32 %v4900_v40, %v536_v22 }
  0xe1   : > { %4498 = vxpose.xlu2.b32.start.end [1/1] (short) (narrow) %v4497_v0, 32 }
  0xe2   : > { %v599_v25 = vmul.f32 %v551_v24, %v551_v24  ;;  %v615_v47 = vsub.f32 %v4912_v8, %v551_v24 }
 0x12b   : > { %v583_v26 = vpop.xlane.xlu2 %582 }
 0x12c   : > { %v591_v28 = vmul.f32 %v583_v26, %v4900_v40 }
 0x12e   : > { %v607_v32 = vsub.f32 %v591_v28, %v599_v25 }
 0x130   : > { %v623_v35 = vadd.f32 1e-05, %v607_v32 }
 0x132   : > { %4544 = vrsqrt.f32 %v623_v35  ;;  %vm700_vm10 = vweird.f32 %v623_v35 }
 0x138   : > { %v4545_v38 = vpop.eup %4544 }
 0x139   : > { %v695_v41 = vmul.f32 %v4545_v38, %v623_v35  ;;  %vm701_vm11 = vweird.f32 %v4545_v38 }
 0x13a   : > { %vm702_vm12 = vmor %vm700_vm10, %vm701_vm11  ;;  %vm2615_vm11 = vcmask 523264  }
 0x13b   : > { %v696_v42 = vmul.f32 %v4545_v38, %v695_v41 }
 0x13d   : > { %v697_v44 = vmul.f32 0.5, %v696_v42 }
 0x13f   : > { %v698_v46 = vsub.f32 1.5, %v697_v44 }
 0x141   : > { %v699_v50 = vmul.f32 %v4545_v38, %v698_v46 }
 0x143   : > { %v703_v51 = vsel %vm702_vm12, %v4545_v38, %v699_v50 }
 0x144   : > { %v711_v52 = vmul.f32 %v703_v51, %v615_v47 }
 0x146   : > { %v723_v53 = vmul.f32 %v4923_v21, %v711_v52 }
 0x148   : > { %v735_v55 = vadd.f32 %v4932_v29, %v723_v53 }
 0x14a   : > { %960 = vxpose.xlu0.b32.start.end [1/1] (short) (narrow) %v735_v55, 32 }
 0x162   : > { %v816_v31 = vpop.trf.xlu1 }
 0x163   : > { %v4455_v6 = vpop.trf.xlu0 }
 0x164   : > { %v4456_v9 = vunpack.i.l.bf16 %v4455_v6  ;;  %v4459_v16 = vunpack.i.h.bf16 %v4455_v6 }
 0x16a   : > { %v817_v39 = vpop.trf.xlu1 }
 0x16b   : > { %v4460_v7 = vpop.trf.xlu0  ;;  %v996_v45 = vpack.c.bf16 %v817_v39, %v816_v31 }
 0x16c   : > { %v4461_v10 = vunpack.i.l.bf16 %v4460_v7  ;;  %v4464_v20 = vunpack.i.h.bf16 %v4460_v7 }
 0x16e   : > { %v992_v11 = vpack.c.bf16 %v4461_v10, %v4456_v9  ;;  %v994_v23 = vpack.c.bf16 %v4464_v20, %v4459_v16 }
 0x170   : > { %4171 = vmatmul.msk.bf16.vlgmr.msra.gmra.mxu0 %vm1013_vm9, %v992_v11  ;;  %v5002_v11 = vld [vmem:[%s7137_s4] ss:$0 sm:$0xff] }
 0x172   : > { %v818_v48 = vpop.trf.xlu1 }
 0x173   : > { %v4465_v12 = vpop.trf.xlu0 }
 0x174   : > { %v4466_v15 = vunpack.i.l.bf16 %v4465_v12  ;;  %v4469_v34 = vunpack.i.h.bf16 %v4465_v12 }
 0x17a   : > { %v819_v57 = vpop.trf.xlu1  ;;  %v4985_v59 = vpop.trf.xlu2 }
 0x17b   : > { %v4470_v13 = vpop.trf.xlu0  ;;  %v997_v58 = vpack.c.bf16 %v819_v57, %v818_v48  ;;  %v4503_v9 = vunpack.i.h.bf16 %v4985_v59 }
 0x17c   : > { %v4471_v17 = vunpack.i.l.bf16 %v4470_v13  ;;  %v4474_v30 = vunpack.i.h.bf16 %v4470_v13 }
 0x17e   : > { %v993_v18 = vpack.c.bf16 %v4471_v17, %v4466_v15  ;;  %v995_v36 = vpack.c.bf16 %v4474_v30, %v4469_v34 }
 0x180   : > { %4172 = vmatmul.msk.bf16.gmra.mxu0 %vm1013_vm9, %v993_v18 }
 0x182   : > { %v4988_v62 = vpop.trf.xlu2 }
 0x183   : > { %v4978_v37 = vpop.trf.xlu0  ;;  %v4508_v10 = vunpack.i.h.bf16 %v4988_v62 }
 0x184   : > { %v4478_v60 = vunpack.i.l.bf16 %v4978_v37  ;;  %v4481_v16 = vunpack.i.h.bf16 %v4978_v37 }
 0x185   : > { %v1000_v12 = vpack.c.bf16 %v4508_v10, %v4503_v9 }
 0x18a   : > { %v4991_v54 = vpop.trf.xlu2 }
 0x18b   : > { %v4482_v43 = vpop.trf.xlu0  ;;  %v4513_v31 = vunpack.i.h.bf16 %v4991_v54 }
 0x18c   : > { %v4483_v61 = vunpack.i.l.bf16 %v4482_v43 }
 0x18e   : > { %v998_v63 = vpack.c.bf16 %v4483_v61, %v4478_v60 }
 0x190   : > { %4173 = vmatmul.msk.bf16.gmra.mxu0 %vm1013_vm9, %v994_v23  ;;  %v4486_v23 = vunpack.i.h.bf16 %v4482_v43 }
 0x192   : > { %v4993_v1 = vpop.trf.xlu2  ;;  %v1002_v35 = vpack.c.bf16 %v4486_v23, %v4481_v16 }
 0x193   : > { %v4487_v49 = vpop.trf.xlu0  ;;  %v4518_v32 = vunpack.i.h.bf16 %v4993_v1 }
 0x194   : > { %v4488_v21 = vunpack.i.l.bf16 %v4487_v49  ;;  %v4491_v5 = vunpack.i.h.bf16 %v4487_v49 }
 0x195   : > { %v1001_v41 = vpack.c.bf16 %v4518_v32, %v4513_v31 }
 0x19b   : > { %v4492_v56 = vpop.trf.xlu0 }
 0x19c   : > { %v4493_v29 = vunpack.i.l.bf16 %v4492_v56  ;;  %v4496_v6 = vunpack.i.h.bf16 %v4492_v56 }
 0x19e   : > { %v999_v0 = vpack.c.bf16 %v4493_v29, %v4488_v21  ;;  %v1003_v7 = vpack.c.bf16 %v4496_v6, %v4491_v5 }
 0x1a0   : > { %4174 = vmatmul.msk.bf16.gmra.mxu0 %vm1013_vm9, %v995_v36  ;;  %4182 = vmatmul.msk.bf16.vlgmr.msra.gmra.mxu3 %vm1013_vm9, %v1003_v7 }
 0x1b0   : > { %4175 = vmatmul.msk.bf16.gmra.mxu0 %vm1013_vm9, %v996_v45 }
 0x1c0   : > { %4176 = vmatmul.msk.bf16.gmra.mxu0 %vm1013_vm9, %v997_v58 }
 0x1d0   : > { %4177 = vmatmul.msk.bf16.gmra.mxu0 %vm1013_vm9, %v998_v63 }
 0x1e0   : > { %4178 = vmatmul.msk.bf16.gmra.mxu0 %vm1013_vm9, %v999_v0 }
 0x1ed   : > { %v1075_v13 = vpop.f32.mrf.mxu0 }
 0x1ee   : > { %v5005_v15 = vadd.f32 %v5002_v11, %v1075_v13 }
 0x1f0   : > { %v5008_v17 = vmul.f32 0.70710677, %v5005_v15  ;;  %4179 = vmatmul.msk.bf16.gmra.mxu0 %vm1013_vm9, %v1000_v12 }
 0x1f2   : > { %v1219_v18 = vmul.f32 %v5008_v17, %v5008_v17 }
 0x1f4   : > { %v5013_v20 = vmin.f32 %v1219_v18, 16.0 }
 0x1f5   : > { %v1077_v22 = vpop.f32.mrf.mxu0 }
 0x1f6   : > { %v1221_v24 = vmul.f32 2.1237322e-06, %v5013_v20  ;;  %v1232_v25 = vmul.f32 3.8918573e-05, %v5013_v20  ;;  %v5019_v26 = vadd.f32 %v5002_v11, %v1077_v22 }
 0x1f8   : > { %v1222_v28 = vadd.f32 0.00028619796, %v1221_v24  ;;  %v1233_v30 = vadd.f32 0.001143296, %v1232_v25  ;;  %v5024_v34 = vmul.f32 0.70710677, %v5019_v26 }
 0x1fa   : > { %v1234_v36 = vmul.f32 %v1233_v30, %v5013_v20  ;;  %v1223_v37 = vmul.f32 %v1222_v28, %v5013_v20  ;;  %v1259_v38 = vmul.f32 %v5024_v34, %v5024_v34 }
 0x1fc   : > { %v1235_v39 = vadd.f32 0.014752088, %v1234_v36  ;;  %v5030_v42 = vmin.f32 %v1259_v38, 16.0  ;;  %v1224_v46 = vadd.f32 0.0036580483, %v1223_v37 }
 0x1fd   : > { %v1080_v43 = vpop.f32.mrf.mxu0 }
 0x1fe   : > { %v1236_v44 = vmul.f32 %v1235_v39, %v5013_v20  ;;  %v5034_v45 = vadd.f32 %v5002_v11, %v1080_v43  ;;  %v1261_v47 = vmul.f32 2.1237322e-06, %v5030_v42  ;;  %v1272_v48 = vmul.f32 3.8918573e-05, %v5030_v42 }
 0x1ff   : > { %v1225_v55 = vmul.f32 %v1224_v46, %v5013_v20 }
 0x200   : > { %v1237_v49 = vadd.f32 0.112945676, %v1236_v44  ;;  %4180 = vmatmul.msk.bf16.gmra.mxu0 %vm1013_vm9, %v1001_v41  ;;  %v1262_v50 = vadd.f32 0.00028619796, %v1261_v47  ;;  %v1273_v51 = vadd.f32 0.001143296, %v1272_v48 }
 0x201   : > { %v5040_v52 = vmul.f32 0.70710677, %v5034_v45  ;;  %v1226_v5 = vadd.f32 0.05243302, %v1225_v55 }
 0x202   : > { %v1238_v53 = vmul.f32 %v1237_v49, %v5013_v20  ;;  %v1263_v56 = vmul.f32 %v1262_v50, %v5030_v42  ;;  %v1274_v57 = vmul.f32 %v1273_v51, %v5030_v42 }
 0x203   : > { %v1299_v58 = vmul.f32 %v5040_v52, %v5040_v52  ;;  %v1227_v23 = vmul.f32 %v1226_v5, %v5013_v20 }
 0x204   : > { %v1239_v60 = vadd.f32 0.4994258, %v1238_v53  ;;  %v1275_v61 = vadd.f32 0.014752088, %v1274_v57  ;;  %v1264_v6 = vadd.f32 0.0036580483, %v1263_v56 }
 0x205   : > { %v5048_v63 = vmin.f32 %v1299_v58, 16.0  ;;  %v1082_v21 = vpop.f32.mrf.mxu0  ;;  %v1228_v39 = vadd.f32 0.18741608, %v1227_v23 }
 0x206   : > { %v1240_v29 = vmul.f32 %v1239_v60, %v5013_v20  ;;  %v5052_v0 = vadd.f32 %v5002_v11, %v1082_v21  ;;  %v1276_v7 = vmul.f32 %v1275_v61, %v5030_v42  ;;  %v1265_v22 = vmul.f32 %v1264_v6, %v5030_v42 }
 0x207   : > { %v1301_v9 = vmul.f32 2.1237322e-06, %v5048_v63  ;;  %v1312_v12 = vmul.f32 3.8918573e-05, %v5048_v63  ;;  %v1229_v61 = vmul.f32 %v1228_v39, %v5013_v20  ;;  %v4361_v20 = vld [vmem:[%s7138_s5 + $0x10] sm:$0xff] }
 0x208   : > { %v5056_v10 = vadd.f32 1.0, %v1240_v29  ;;  %v5060_v13 = vmul.f32 0.70710677, %v5052_v0  ;;  %v1277_v18 = vadd.f32 0.112945676, %v1276_v7 }
 0x209   : > { %v1302_v16 = vadd.f32 0.00028619796, %v1301_v9  ;;  %v1313_v28 = vadd.f32 0.001143296, %v1312_v12  ;;  %v1266_v41 = vadd.f32 0.05243302, %v1265_v22 }
 0x20a   : > { %4546 = vrcp.f32 %v5056_v10  ;;  %v1278_v24 = vmul.f32 %v1277_v18, %v5030_v42  ;;  %v1339_v30 = vmul.f32 %v5060_v13, %v5060_v13  ;;  %vm1247_vm14 = vweird.f32 %v5056_v10 }
 0x20b   : > { %v1303_v25 = vmul.f32 %v1302_v16, %v5048_v63  ;;  %v1314_v37 = vmul.f32 %v1313_v28, %v5048_v63  ;;  %v1267_v58 = vmul.f32 %v1266_v41, %v5030_v42  ;;  %v1251_v12 = vand.u32 2147483647, %v5056_v10 }
 0x20c   : > { %v1279_v31 = vadd.f32 0.4994258, %v1278_v24  ;;  %v5070_v38 = vmin.f32 %v1339_v30, 16.0  ;;  %v1253_v18 = vand.u32 2147483648, %v5056_v10  ;;  %v1230_v28 = vadd.f32 1.1283791, %v1229_v61 }
 0x20d   : > { %v1085_v32 = vpop.f32.mrf.mxu0  ;;  %v1304_v36 = vadd.f32 0.0036580483, %v1303_v25  ;;  %v1315_v47 = vadd.f32 0.014752088, %v1314_v37  ;;  %v1268_v22 = vadd.f32 0.18741608, %v1267_v58 }
 0x20e   : > { %v1280_v43 = vmul.f32 %v1279_v31, %v5030_v42  ;;  %v1341_v48 = vmul.f32 2.1237322e-06, %v5070_v38  ;;  %v1352_v49 = vmul.f32 3.8918573e-05, %v5070_v38  ;;  %v5084_v60 = vadd.f32 %v5002_v11, %v1085_v32 }
 0x20f   : > { %v1305_v46 = vmul.f32 %v1304_v36, %v5048_v63  ;;  %v1316_v53 = vmul.f32 %v1315_v47, %v5048_v63  ;;  %vm1252_vm1 = vcmp.eq.f32.partialorder %v1251_v12, 8.507059e+37  ;;  %v1231_v58 = vmul.f32 %v1230_v28, %v5008_v17 }
 0x210   : > { %v4547_v44 = vpop.eup %4546  ;;  %4181 = vmatmul.msk.bf16.gmra.mxu0 %vm1013_vm9, %v1002_v35  ;;  %v5078_v51 = vadd.f32 1.0, %v1280_v43  ;;  %v1342_v55 = vadd.f32 0.00028619796, %v1341_v48  ;;  %v1353_v56 = vadd.f32 0.001143296, %v1352_v49  ;;  %v4362_v35 = vld [vmem:[%s7138_s5 + $0x18] sm:$0xff] }
 0x211   : > { %v1243_v50 = vmul.f32 %v4547_v44, %v5056_v10  ;;  %v1306_v21 = vadd.f32 0.05243302, %v1305_v46  ;;  %v1317_v29 = vadd.f32 0.112945676, %v1316_v53  ;;  %vm1248_vm13 = vweird.f32 %v4547_v44  ;;  %2668 = vmatpush.bf16.msra.mxu1 %v4362_v35  ;;  %4405 = vmatpush.bf16.msra.mxu2 %v4362_v35  ;;  %v4360_v48 = vld [vmem:[%s7138_s5 + $0x8] sm:$0xff] }
 0x212   : > { %4548 = vrcp.f32 %v5078_v51  ;;  %v1343_v6 = vmul.f32 %v1342_v55, %v5070_v38  ;;  %v1354_v7 = vmul.f32 %v1353_v56, %v5070_v38  ;;  %v5100_v25 = vmul.f32 0.70710677, %v5084_v60  ;;  %vm5103_vm15 = vmor %vm1247_vm14, %vm1248_vm13 }
 0x213   : > { %v1244_v57 = vsub.f32 1.0, %v1243_v50  ;;  %v1318_v16 = vmul.f32 %v1317_v29, %v5048_v63  ;;  %v1307_v10 = vmul.f32 %v1306_v21, %v5048_v63  ;;  %v5116_v43 = vmul.f32 0.5, %v5005_v15 }
 0x214   : > { %v1355_v24 = vadd.f32 0.014752088, %v1354_v7  ;;  %v1344_v37 = vadd.f32 0.0036580483, %v1343_v6  ;;  %v1379_v41 = vmul.f32 %v5100_v25, %v5100_v25  ;;  %v1254_v46 = vor.u32 1.1754944e-38, %v1253_v18 }
 0x215   : > { %v1245_v5 = vmul.f32 %v4547_v44, %v1244_v57  ;;  %v1087_v9 = vpop.f32.mrf.mxu0  ;;  %v1319_v31 = vadd.f32 0.4994258, %v1318_v16  ;;  %2669 = vmatpush.bf16.msra.mxu1 %v4361_v20  ;;  %4406 = vmatpush.bf16.msra.mxu2 %v4361_v20  ;;  %v1308_v56 = vadd.f32 0.18741608, %v1307_v10  ;;  %v5140_v17 = vmul.f32 0.5, %v5034_v45 }
 0x216   : > { %v1356_v39 = vmul.f32 %v1355_v24, %v5070_v38  ;;  %v1088_v53 = vadd.f32 %v5002_v11, %v1087_v9  ;;  %v5126_v57 = vmin.f32 %v1379_v41, 16.0  ;;  %v1345_v61 = vmul.f32 %v1344_v37, %v5070_v38 }
 0x217   : > { %v1246_v23 = vadd.f32 %v4547_v44, %v1245_v5  ;;  %v1320_v49 = vmul.f32 %v1319_v31, %v5048_v63  ;;  %v1309_v16 = vmul.f32 %v1308_v56, %v5048_v63  ;;  %vm1287_vm3 = vweird.f32 %v5078_v51 }
 0x218   : > { %v5108_v32 = vpop.eup %4548  ;;  %v1357_v50 = vadd.f32 0.112945676, %v1356_v39  ;;  %v1381_v5 = vmul.f32 2.1237322e-06, %v5126_v57  ;;  %v1392_v6 = vmul.f32 3.8918573e-05, %v5126_v57 }
 0x219   : > { %v1250_v36 = vsel %vm5103_vm15, %v4547_v44, %v1246_v23  ;;  %v1283_v47 = vmul.f32 %v5108_v32, %v5078_v51  ;;  %v1269_v44 = vmul.f32 %v1268_v22, %v5030_v42  ;;  %v5129_v35 = vadd.f32 1.0, %v1320_v49  ;;  %2670 = vmatpush.bf16.msra.mxu1 %v4360_v48  ;;  %4407 = vmatpush.bf16.msra.mxu2 %v4360_v48 }
 0x21a   : > { %v1255_v55 = vsel %vm1252_vm1, %v1254_v46, %v1250_v36  ;;  %v1358_v21 = vmul.f32 %v1357_v50, %v5070_v38  ;;  %v5134_v42 = vmul.f32 0.5, %v5019_v26  ;;  %v5143_v12 = vmul.f32 0.70710677, %v1088_v53  ;;  %v4359_v26 = vld [vmem:[%s7138_s5] sm:$0xff] }
 0x21b   : > { %v1284_v15 = vsub.f32 1.0, %v1283_v47  ;;  %v1256_v9 = vmul.f32 %v1255_v55, %v1231_v58  ;;  %4550 = vrcp.f32 %v5129_v35  ;;  %v1270_v18 = vadd.f32 1.1283791, %v1269_v44 }
 0x21c   : > { %vm1288_vm2 = vweird.f32 %v5108_v32  ;;  %v1359_v20 = vadd.f32 0.4994258, %v1358_v21  ;;  %v1346_v22 = vadd.f32 0.05243302, %v1345_v61  ;;  %v1382_v24 = vadd.f32 0.00028619796, %v1381_v5 }
 0x21d   : > { %v1285_v29 = vmul.f32 %v5108_v32, %v1284_v15  ;;  %v1090_v7 = vpop.f32.mrf.mxu0  ;;  %v1393_v45 = vadd.f32 0.001143296, %v1392_v6  ;;  %2671 = vmatpush.bf16.msra.mxu1 %v4359_v26  ;;  %v1291_v28 = vand.u32 2147483647, %v5078_v51  ;;  %v1293_v30 = vand.u32 2147483648, %v5078_v51  ;;  %4408 = vmatpush.bf16.msra.mxu2 %v4359_v26  ;;  %vm5162_vm4 = vmor %vm1287_vm3, %vm1288_vm2 }
 0x21e   : > { %v1360_v10 = vmul.f32 %v1359_v20, %v5070_v38  ;;  %v4187_v31 = vclamps-f32 %v1256_v9, 1.0  ;;  %v1383_v36 = vmul.f32 %v1382_v24, %v5126_v57  ;;  %v1419_v37 = vmul.f32 %v5143_v12, %v5143_v12 }
 0x21f   : > { %v1286_v23 = vadd.f32 %v5108_v32, %v1285_v29  ;;  %v1394_v63 = vmul.f32 %v1393_v45, %v5126_v57  ;;  %v1271_v39 = vmul.f32 %v1270_v18, %v5024_v34  ;;  %v1310_v51 = vadd.f32 1.1283791, %v1309_v16 }
 0x220   : > { %v5167_v46 = vmul.f32 0.5, %v5052_v0  ;;  %v5169_v47 = vadd.f32 1.0, %v1360_v10  ;;  %v1347_v34 = vmul.f32 %v1346_v22, %v5070_v38  ;;  %v5177_v50 = vmin.f32 %v1419_v37, 16.0 }
 0x221   : > { %v5171_v48 = vpop.eup %4550  ;;  %v1290_v44 = vsel %vm5162_vm4, %v5108_v32, %v1286_v23  ;;  %v1395_v49 = vadd.f32 0.014752088, %v1394_v63  ;;  %v1294_v55 = vor.u32 1.1754944e-38, %v1293_v30  ;;  %v5182_v0 = vmul.f32 0.5, %v5084_v60 }
 0x222   : > { %v1323_v15 = vmul.f32 %v5171_v48, %v5129_v35  ;;  %v1384_v56 = vadd.f32 0.0036580483, %v1383_v36  ;;  %v5184_v58 = vadd.f32 1.0, %v4187_v31  ;;  %vm1292_vm5 = vcmp.eq.f32.partialorder %v1291_v28, 8.507059e+37 }
 0x223   : > { %4552 = vrcp.f32 %v5169_v47  ;;  %v5187_v61 = vmul.f32 0.5, %v1088_v53  ;;  %v1295_v32 = vsel %vm1292_vm5, %v1294_v55, %v1290_v44  ;;  %v1396_v29 = vmul.f32 %v1395_v49, %v5126_v57 }
 0x224   : > { %v1324_v21 = vsub.f32 1.0, %v1323_v15  ;;  %v5191_v5 = vadd.f32 %v5002_v11, %v1090_v7  ;;  %v5194_v9 = vmul.f32 %v1310_v51, %v5040_v52  ;;  %v1348_v60 = vadd.f32 0.18741608, %v1347_v34 }
 0x225   : > { %v1092_v6 = vpop.f32.mrf.mxu0  ;;  %v1421_v26 = vmul.f32 2.1237322e-06, %v5177_v50  ;;  %v1432_v18 = vmul.f32 3.8918573e-05, %v5177_v50  ;;  %v1331_v16 = vand.u32 2147483647, %v5129_v35  ;;  %v1385_v20 = vmul.f32 %v1384_v56, %v5126_v57 }
 0x226   : > { %v1333_v53 = vand.u32 2147483648, %v5129_v35  ;;  %v1397_v23 = vadd.f32 0.112945676, %v1396_v29  ;;  %v1296_v22 = vmul.f32 %v1295_v32, %v1271_v39  ;;  %v5202_v45 = vadd.f32 %v5002_v11, %v1092_v6 }
 0x227   : > { %v1422_v24 = vadd.f32 0.00028619796, %v1421_v26  ;;  %v1433_v7 = vadd.f32 0.001143296, %v1432_v18  ;;  %v1325_v52 = vmul.f32 %v5171_v48, %v1324_v21  ;;  %vm1327_vm6 = vweird.f32 %v5129_v35 }
 0x228   : > { %v1398_v28 = vmul.f32 %v1397_v23, %v5126_v57  ;;  %v5208_v30 = vmul.f32 0.70710677, %v5191_v5  ;;  %v1349_v31 = vmul.f32 %v1348_v60, %v5070_v38  ;;  %v5216_v37 = vmul.f32 0.70710677, %v5202_v45 }
 0x229   : > { %v5210_v10 = vpop.eup %4552  ;;  %v1423_v36 = vmul.f32 %v1422_v24, %v5177_v50  ;;  %v1434_v63 = vmul.f32 %v1433_v7, %v5177_v50  ;;  %vm5218_vm7 = vcmp.eq.f32.partialorder %v1331_v16, 8.507059e+37  ;;  %v1334_v41 = vor.u32 1.1754944e-38, %v1333_v53 }
 0x22a   : > { %v1363_v51 = vmul.f32 %v5210_v10, %v5169_v47  ;;  %v1386_v44 = vadd.f32 0.05243302, %v1385_v20  ;;  %v4188_v34 = vclamps-f32 %v1296_v22, 1.0  ;;  %vm1328_vm8 = vweird.f32 %v5171_v48 }
 0x22b   : > { %v1399_v38 = vadd.f32 0.4994258, %v1398_v28  ;;  %v1435_v49 = vadd.f32 0.014752088, %v1434_v63  ;;  %v1326_v55 = vadd.f32 %v5171_v48, %v1325_v52  ;;  %v1424_v56 = vadd.f32 0.0036580483, %v1423_v36  ;;  %vm5241_vm10 = vmor %vm1327_vm6, %vm1328_vm8 }
 0x22c   : > { %v1364_v15 = vsub.f32 1.0, %v1363_v51  ;;  %v1459_v32 = vmul.f32 %v5208_v30, %v5208_v30  ;;  %v1350_v21 = vadd.f32 1.1283791, %v1349_v31  ;;  %v1499_v60 = vmul.f32 %v5216_v37, %v5216_v37 }
 0x22d   : > { %v1400_v29 = vmul.f32 %v1399_v38, %v5126_v57  ;;  %v1436_v6 = vmul.f32 %v1435_v49, %v5177_v50  ;;  %v1371_v18 = vand.u32 2147483647, %v5169_v47  ;;  %v1387_v16 = vmul.f32 %v1386_v44, %v5126_v57  ;;  %v1095_v44 = vpop.f32.mrf.mxu0 }
 0x22e   : > { %v1365_v26 = vmul.f32 %v5210_v10, %v1364_v15  ;;  %v5235_v53 = vmin.f32 %v1459_v32, 16.0  ;;  %v2500_v20 = vadd.f32 1.0, %v4188_v34  ;;  %v1373_v22 = vand.u32 2147483648, %v5169_v47 }
 0x22f   : > { %v5246_v24 = vadd.f32 1.0, %v1400_v29  ;;  %v1437_v7 = vadd.f32 0.112945676, %v1436_v6  ;;  %v1330_v52 = vsel %vm5241_vm10, %v5171_v48, %v1326_v55  ;;  %v1425_v28 = vmul.f32 %v1424_v56, %v5177_v50 }
 0x230   : > { %v1461_v31 = vmul.f32 2.1237322e-06, %v5235_v53  ;;  %v1366_v35 = vadd.f32 %v5210_v10, %v1365_v26  ;;  %vm1368_vm12 = vweird.f32 %v5210_v10  ;;  %v5256_v36 = vmin.f32 %v1499_v60, 16.0 }
 0x231   : > { %4554 = vrcp.f32 %v5246_v24  ;;  %vm1367_vm13 = vweird.f32 %v5169_v47  ;;  %vm5259_vm14 = vcmp.eq.f32.partialorder %v1371_v18, 8.507059e+37  ;;  %v1388_v48 = vadd.f32 0.18741608, %v1387_v16 }
 0x232   : > { %v1438_v51 = vmul.f32 %v1437_v7, %v5177_v50  ;;  %v2532_v34 = vmul.f32 %v2500_v20, %v5134_v42  ;;  %v1335_v38 = vsel %vm5218_vm7, %v1334_v41, %v1330_v52  ;;  %v1374_v49 = vor.u32 1.1754944e-38, %v1373_v22  ;;  %vm5269_vm15 = vmor %vm1367_vm13, %vm1368_vm12 }
 0x233   : > { %v1462_v55 = vadd.f32 0.00028619796, %v1461_v31  ;;  %v2531_v15 = vmul.f32 %v5184_v58, %v5116_v43  ;;  %v1426_v56 = vadd.f32 0.05243302, %v1425_v28  ;;  %v1472_v29 = vmul.f32 3.8918573e-05, %v5235_v53 }
 0x234   : > { %v1439_v32 = vadd.f32 0.4994258, %v1438_v51  ;;  %v1370_v42 = vsel %vm5269_vm15, %v5210_v10, %v1366_v35  ;;  %v1501_v41 = vmul.f32 2.1237322e-06, %v5256_v36  ;;  %v1512_v6 = vmul.f32 3.8918573e-05, %v5256_v36 }
 0x235   : > { %v1463_v39 = vmul.f32 %v1462_v55, %v5235_v53  ;;  %v1336_v43 = vmul.f32 %v1335_v38, %v5194_v9  ;;  %v1389_v58 = vmul.f32 %v1388_v48, %v5126_v57  ;;  %v1473_v26 = vadd.f32 0.001143296, %v1472_v29 }
 0x236   : > { %v1440_v60 = vmul.f32 %v1439_v32, %v5177_v50  ;;  %v1502_v20 = vadd.f32 0.00028619796, %v1501_v41  ;;  %v1513_v23 = vadd.f32 0.001143296, %v1512_v6  ;;  %v2563_v22 = vpack.c.bf16 %v2532_v34, %v2531_v15  ;;  %v1097_v15 = vpop.f32.mrf.mxu0 }
 0x237   : > { %v4555_v18 = vpop.eup %4554  ;;  %v1464_v16 = vadd.f32 0.0036580483, %v1463_v39  ;;  %v1351_v10 = vmul.f32 %v1350_v21, %v5060_v13  ;;  %v1375_v7 = vsel %vm5259_vm14, %v1374_v49, %v1370_v42  ;;  %v1427_v28 = vmul.f32 %v1426_v56, %v5177_v50 }
 0x238   : > { %v1403_v52 = vmul.f32 %v4555_v18, %v5246_v24  ;;  %v5288_v9 = vadd.f32 1.0, %v1440_v60  ;;  %v1474_v57 = vmul.f32 %v1473_v26, %v5235_v53  ;;  %v1503_v31 = vmul.f32 %v1502_v20, %v5256_v36  ;;  %4235 = vmatmul.msk.bf16.vlgmr.msra.gmra.mxu1 %vm2615_vm11, %v2563_v22 }
 0x239   : > { %v5293_v35 = vadd.f32 %v5002_v11, %v1095_v44  ;;  %v4189_v48 = vclamps-f32 %v1336_v43, 1.0  ;;  %v1465_v21 = vmul.f32 %v1464_v16, %v5235_v53  ;;  %v1514_v63 = vmul.f32 %v1513_v23, %v5256_v36 }
 0x23a   : > { %v1404_v13 = vsub.f32 1.0, %v1403_v52  ;;  %v1390_v51 = vadd.f32 1.1283791, %v1389_v58  ;;  %vm1407_vm1 = vweird.f32 %v5246_v24  ;;  %v1413_v34 = vand.u32 2147483648, %v5246_v24 }
 0x23b   : > { %4556 = vrcp.f32 %v5288_v9  ;;  %v1376_v38 = vmul.f32 %v1375_v7, %v1351_v10  ;;  %v1475_v55 = vadd.f32 0.014752088, %v1474_v57  ;;  %v1504_v44 = vadd.f32 0.0036580483, %v1503_v31 }
 0x23c   : > { %v1405_v49 = vmul.f32 %v4555_v18, %v1404_v13  ;;  %vm1408_vm2 = vweird.f32 %v4555_v18  ;;  %v1428_v47 = vadd.f32 0.18741608, %v1427_v28  ;;  %v1515_v56 = vadd.f32 0.014752088, %v1514_v63 }
 0x23d   : > { %v5302_v32 = vmul.f32 0.70710677, %v5293_v35  ;;  %v1466_v42 = vadd.f32 0.05243302, %v1465_v21  ;;  %v1476_v39 = vmul.f32 %v1475_v55, %v5235_v53  ;;  %v1505_v41 = vmul.f32 %v1504_v44, %v5256_v36  ;;  %vm5315_vm3 = vmor %vm1407_vm1, %vm1408_vm2 }
 0x23e   : > { %v1406_v29 = vadd.f32 %v4555_v18, %v1405_v49  ;;  %v1411_v6 = vand.u32 2147483647, %v5246_v24  ;;  %v1516_v43 = vmul.f32 %v1515_v56, %v5256_v36  ;;  %v5311_v60 = vadd.f32 %v5002_v11, %v1097_v15 }
 0x23f   : > { %v1539_v58 = vmul.f32 %v5302_v32, %v5302_v32  ;;  %v2501_v26 = vadd.f32 1.0, %v4189_v48  ;;  %v4190_v16 = vclamps-f32 %v1376_v38, 1.0  ;;  %v1414_v23 = vor.u32 1.1754944e-38, %v1413_v34 }
 0x240   : > { %v1477_v22 = vadd.f32 0.112945676, %v1476_v39  ;;  %v1410_v7 = vsel %vm5315_vm3, %v4555_v18, %v1406_v29  ;;  %v1429_v52 = vmul.f32 %v1428_v47, %v5177_v50  ;;  %v1517_v28 = vadd.f32 0.112945676, %v1516_v43  ;;  %v1100_v43 = vpop.f32.mrf.mxu0 }
 0x241   : > { %v4557_v10 = vpop.eup %4556  ;;  %v5323_v57 = vmul.f32 0.70710677, %v5311_v60  ;;  %v1467_v24 = vmul.f32 %v1466_v42, %v5235_v53  ;;  %v1506_v48 = vadd.f32 0.05243302, %v1505_v41  ;;  %v5327_v13 = vmin.f32 %v1539_v58, 16.0 }
 0x242   : > { %v1443_v31 = vmul.f32 %v4557_v10, %v5288_v9  ;;  %v1391_v21 = vmul.f32 %v1390_v51, %v5100_v25  ;;  %vm1412_vm4 = vcmp.eq.f32.partialorder %v1411_v6, 8.507059e+37  ;;  %v1478_v63 = vmul.f32 %v1477_v22, %v5235_v53 }
 0x243   : > { %v1518_v18 = vmul.f32 %v1517_v28, %v5256_v36  ;;  %v2502_v34 = vadd.f32 1.0, %v4190_v16  ;;  %v1415_v50 = vsel %vm1412_vm4, %v1414_v23, %v1410_v7  ;;  %v1541_v49 = vmul.f32 2.1237322e-06, %v5327_v13 }
 0x244   : > { %v1444_v38 = vsub.f32 1.0, %v1443_v31  ;;  %v1430_v55 = vadd.f32 1.1283791, %v1429_v52  ;;  %v1479_v44 = vadd.f32 0.4994258, %v1478_v63  ;;  %v1579_v47 = vmul.f32 %v5323_v57, %v5323_v57 }
 0x245   : > { %v1519_v15 = vadd.f32 0.4994258, %v1518_v18  ;;  %v1468_v29 = vadd.f32 0.18741608, %v1467_v24  ;;  %v1507_v25 = vmul.f32 %v1506_v48, %v5256_v36  ;;  %v1542_v51 = vadd.f32 0.00028619796, %v1541_v49 }
 0x246   : > { %v1445_v56 = vmul.f32 %v4557_v10, %v1444_v38  ;;  %v1416_v42 = vmul.f32 %v1415_v50, %v1391_v21  ;;  %v1480_v39 = vmul.f32 %v1479_v44, %v5235_v53  ;;  %v1552_v6 = vmul.f32 3.8918573e-05, %v5327_v13 }
 0x247   : > { %v1520_v41 = vmul.f32 %v1519_v15, %v5256_v36  ;;  %vm1448_vm5 = vweird.f32 %v4557_v10  ;;  %v1543_v16 = vmul.f32 %v1542_v51, %v5327_v13  ;;  %v5340_v20 = vmin.f32 %v1579_v47, 16.0 }
 0x248   : > { %v1446_v58 = vadd.f32 %v4557_v10, %v1445_v56  ;;  %v1451_v23 = vand.u32 2147483647, %v5288_v9  ;;  %v1453_v22 = vand.u32 2147483648, %v5288_v9  ;;  %v5344_v7 = vadd.f32 1.0, %v1480_v39 }
 0x249   : > { %v5346_v52 = vadd.f32 1.0, %v1520_v41  ;;  %vm1447_vm6 = vweird.f32 %v5288_v9  ;;  %v1508_v28 = vadd.f32 0.18741608, %v1507_v25  ;;  %v1544_v31 = vadd.f32 0.0036580483, %v1543_v16 }
 0x24a   : > { %v1553_v24 = vadd.f32 0.001143296, %v1552_v6  ;;  %vm5349_vm7 = vmor %vm1447_vm6, %vm1448_vm5  ;;  %v1469_v21 = vmul.f32 %v1468_v29, %v5235_v53  ;;  %4558 = vrcp.f32 %v5344_v7  ;;  %v1581_v63 = vmul.f32 2.1237322e-06, %v5340_v20  ;;  %v1102_v6 = vpop.f32.mrf.mxu0 }
 0x24b   : > { %v1592_v18 = vmul.f32 3.8918573e-05, %v5340_v20  ;;  %v2534_v50 = vmul.f32 %v2502_v34, %v5167_v46  ;;  %v4191_v38 = vclamps-f32 %v1416_v42, 1.0  ;;  %v1450_v9 = vsel %vm5349_vm7, %v4557_v10, %v1446_v58 }
 0x24c   : > { %4560 = vrcp.f32 %v5346_v52  ;;  %v2533_v49 = vmul.f32 %v2501_v26, %v5140_v17  ;;  %v1431_v44 = vmul.f32 %v1430_v55, %v5143_v12  ;;  %v1454_v15 = vor.u32 1.1754944e-38, %v1453_v22 }
 0x24d   : > { %v5364_v53 = vadd.f32 %v5002_v11, %v1100_v43  ;;  %vm1452_vm8 = vcmp.eq.f32.partialorder %v1451_v23, 8.507059e+37  ;;  %v1509_v47 = vmul.f32 %v1508_v28, %v5256_v36  ;;  %v1545_v56 = vmul.f32 %v1544_v31, %v5327_v13 }
 0x24e   : > { %v1554_v46 = vmul.f32 %v1553_v24, %v5327_v13  ;;  %v1455_v34 = vsel %vm1452_vm8, %v1454_v15, %v1450_v9  ;;  %v5369_v29 = vadd.f32 1.1283791, %v1469_v21  ;;  %v1582_v10 = vadd.f32 0.00028619796, %v1581_v63 }
 0x24f   : > { %v1593_v25 = vadd.f32 0.001143296, %v1592_v18  ;;  %v5371_v51 = vadd.f32 1.0, %v4191_v38  ;;  %v1491_v17 = vand.u32 2147483647, %v5344_v7  ;;  %v2564_v26 = vpack.c.bf16 %v2534_v50, %v2533_v49 }
 0x250   : > { %v1555_v12 = vadd.f32 0.014752088, %v1554_v46  ;;  %v4559_v55 = vpop.eup %4558  ;;  %v1546_v42 = vadd.f32 0.05243302, %v1545_v56  ;;  %v1583_v39 = vmul.f32 %v1582_v10, %v5340_v20  ;;  %v5377_v41 = vmul.f32 0.70710677, %v5364_v53 }
 0x251   : > { %v1594_v36 = vmul.f32 %v1593_v25, %v5340_v20  ;;  %v1456_v58 = vmul.f32 %v1455_v34, %v1431_v44  ;;  %v1483_v16 = vmul.f32 %v4559_v55, %v5344_v7  ;;  %vm1487_vm10 = vweird.f32 %v5344_v7  ;;  %4236 = vmatmul.msk.bf16.gmra.mxu1 %vm2615_vm11, %v2564_v26 }
 0x252   : > { %v4561_v43 = vpop.eup %4560  ;;  %v1510_v23 = vadd.f32 1.1283791, %v1509_v47  ;;  %v1493_v22 = vand.u32 2147483648, %v5344_v7  ;;  %v1556_v31 = vmul.f32 %v1555_v12, %v5327_v13  ;;  %v1584_v24 = vadd.f32 0.0036580483, %v1583_v39 }
 0x253   : > { %v1523_v28 = vmul.f32 %v4561_v43, %v5346_v52  ;;  %v1484_v48 = vsub.f32 1.0, %v1483_v16  ;;  %v1595_v21 = vadd.f32 0.014752088, %v1594_v36  ;;  %v1619_v63 = vmul.f32 %v5377_v41, %v5377_v41 }
 0x254   : > { %v5388_v18 = vadd.f32 %v5002_v11, %v1102_v6  ;;  %vm5390_vm12 = vcmp.eq.f32.partialorder %v1491_v17, 8.507059e+37  ;;  %vm1527_vm13 = vweird.f32 %v5346_v52  ;;  %v1547_v9 = vmul.f32 %v1546_v42, %v5327_v13 }
 0x255   : > { %v1524_v38 = vsub.f32 1.0, %v1523_v28  ;;  %v1557_v49 = vadd.f32 0.112945676, %v1556_v31  ;;  %v4192_v44 = vclamps-f32 %v1456_v58, 1.0  ;;  %v1485_v15 = vmul.f32 %v4559_v55, %v1484_v48 }
 0x256   : > { %vm1488_vm14 = vweird.f32 %v4559_v55  ;;  %v1596_v47 = vmul.f32 %v1595_v21, %v5340_v20  ;;  %vm1528_vm15 = vweird.f32 %v4561_v43  ;;  %v1585_v34 = vmul.f32 %v1584_v24, %v5340_v20 }
 0x257   : > { %v1525_v56 = vmul.f32 %v4561_v43, %v1524_v38  ;;  %v1558_v46 = vmul.f32 %v1557_v49, %v5327_v13  ;;  %v1486_v10 = vadd.f32 %v4559_v55, %v1485_v15  ;;  %v5399_v17 = vmin.f32 %v1619_v63, 16.0  ;;  %vm5407_vm1 = vmor %vm1487_vm10, %vm1488_vm14 }
 0x258   : > { %v1597_v25 = vadd.f32 0.112945676, %v1596_v47  ;;  %v5402_v12 = vmul.f32 0.70710677, %v5388_v18  ;;  %v1533_v42 = vand.u32 2147483648, %v5346_v52  ;;  %v1494_v58 = vor.u32 1.1754944e-38, %v1493_v22  ;;  %vm5419_vm2 = vmor %vm1527_vm13, %vm1528_vm15 }
 0x259   : > { %v1526_v26 = vadd.f32 %v4561_v43, %v1525_v56  ;;  %v1548_v39 = vadd.f32 0.18741608, %v1547_v9  ;;  %v1559_v36 = vadd.f32 0.4994258, %v1558_v46  ;;  %v1531_v16 = vand.u32 2147483647, %v5346_v52  ;;  %v1105_v46 = vpop.f32.mrf.mxu0 }
 0x25a   : > { %v1598_v28 = vmul.f32 %v1597_v25, %v5340_v20  ;;  %v1621_v31 = vmul.f32 2.1237322e-06, %v5399_v17  ;;  %v2504_v24 = vadd.f32 1.0, %v4192_v44  ;;  %v1490_v48 = vsel %vm5407_vm1, %v4559_v55, %v1486_v10 }
 0x25b   : > { %v1560_v21 = vmul.f32 %v1559_v36, %v5327_v13  ;;  %v1586_v22 = vadd.f32 0.05243302, %v1585_v34  ;;  %v1530_v63 = vsel %vm5419_vm2, %v4561_v43, %v1526_v26  ;;  %v1659_v49 = vmul.f32 %v5402_v12, %v5402_v12 }
 0x25c   : > { %v1599_v38 = vadd.f32 0.4994258, %v1598_v28  ;;  %v1622_v9 = vadd.f32 0.00028619796, %v1621_v31  ;;  %v1534_v44 = vor.u32 1.1754944e-38, %v1533_v42  ;;  %v1549_v55 = vmul.f32 %v1548_v39, %v5327_v13 }
 0x25d   : > { %v5429_v15 = vadd.f32 1.0, %v1560_v21  ;;  %v1632_v52 = vmul.f32 3.8918573e-05, %v5399_v17  ;;  %v1495_v47 = vsel %vm5390_vm12, %v1494_v58, %v1490_v48  ;;  %vm1532_vm3 = vcmp.eq.f32.partialorder %v1531_v16, 8.507059e+37 }
 0x25e   : > { %v1600_v56 = vmul.f32 %v1599_v38, %v5340_v20  ;;  %v1623_v43 = vmul.f32 %v1622_v9, %v5399_v17  ;;  %v1471_v34 = vmul.f32 %v5369_v29, %v5208_v30  ;;  %v1535_v10 = vsel %vm1532_vm3, %v1534_v44, %v1530_v63 }
 0x25f   : > { %4562 = vrcp.f32 %v5429_v15  ;;  %v1587_v13 = vmul.f32 %v1586_v22, %v5340_v20  ;;  %v2536_v25 = vmul.f32 %v2504_v24, %v5187_v61  ;;  %v1511_v26 = vmul.f32 %v1510_v23, %v5216_v37 }
 0x260   : > { %v5442_v50 = vadd.f32 1.0, %v1600_v56  ;;  %v5444_v42 = vmin.f32 %v1659_v49, 16.0  ;;  %v5446_v39 = vmul.f32 %v1495_v47, %v1471_v34  ;;  %v1550_v36 = vadd.f32 1.1283791, %v1549_v55 }
 0x261   : > { %v1624_v6 = vadd.f32 0.0036580483, %v1623_v43  ;;  %v1633_v58 = vadd.f32 0.001143296, %v1632_v52  ;;  %v5448_v16 = vmul.f32 %v1535_v10, %v1511_v26  ;;  %v4500_v30 = vunpack.i.l.bf16 %v4985_v59  ;;  %v1107_v43 = vpop.f32.mrf.mxu0 }
 0x262   : > { %4564 = vrcp.f32 %v5442_v50  ;;  %v2535_v61 = vmul.f32 %v5371_v51, %v5182_v0  ;;  %v1588_v29 = vadd.f32 0.18741608, %v1587_v13  ;;  %v1661_v28 = vmul.f32 2.1237322e-06, %v5444_v42 }
 0x263   : > { %v1625_v37 = vmul.f32 %v1624_v6, %v5399_v17  ;;  %v1634_v23 = vmul.f32 %v1633_v58, %v5399_v17  ;;  %v1672_v31 = vmul.f32 3.8918573e-05, %v5444_v42  ;;  %v4193_v48 = vclamps-f32 %v5446_v39, 1.0 }
 0x264   : > { %v5462_v7 = vmul.f32 %v1550_v36, %v5302_v32  ;;  %v5465_v21 = vadd.f32 %v5002_v11, %v1105_v46  ;;  %v2565_v0 = vpack.c.bf16 %v2536_v25, %v2535_v61  ;;  %v4194_v51 = vclamps-f32 %v5448_v16, 1.0 }
 0x265   : > { %v5458_v24 = vpop.eup %4562  ;;  %v1626_v63 = vadd.f32 0.05243302, %v1625_v37  ;;  %v1635_v38 = vadd.f32 0.014752088, %v1634_v23  ;;  %v1589_v9 = vmul.f32 %v1588_v29, %v5340_v20  ;;  %v1662_v49 = vadd.f32 0.00028619796, %v1661_v28 }
 0x266   : > { %v1563_v22 = vmul.f32 %v5458_v24, %v5429_v15  ;;  %v1673_v44 = vadd.f32 0.001143296, %v1672_v31  ;;  %v5472_v55 = vmul.f32 0.70710677, %v5465_v21  ;;  %4237 = vmatmul.msk.bf16.gmra.mxu1 %vm2615_vm11, %v2565_v0  ;;  %vm1567_vm4 = vweird.f32 %v5429_v15 }
 0x267   : > { %v1571_v47 = vand.u32 2147483647, %v5429_v15  ;;  %v1636_v56 = vmul.f32 %v1635_v38, %v5399_v17  ;;  %v1573_v46 = vand.u32 2147483648, %v5429_v15  ;;  %v1663_v34 = vmul.f32 %v1662_v49, %v5444_v42 }
 0x268   : > { %v5475_v32 = vpop.eup %4564  ;;  %v1564_v52 = vsub.f32 1.0, %v1563_v22  ;;  %v1674_v10 = vmul.f32 %v1673_v44, %v5444_v42  ;;  %v1627_v25 = vmul.f32 %v1626_v63, %v5399_v17  ;;  %v1699_v36 = vmul.f32 %v5472_v55, %v5472_v55 }
 0x269   : > { %v1603_v20 = vmul.f32 %v5475_v32, %v5442_v50  ;;  %v1637_v26 = vadd.f32 0.112945676, %v1636_v56  ;;  %vm1568_vm5 = vweird.f32 %v5458_v24  ;;  %v1664_v58 = vadd.f32 0.0036580483, %v1663_v34 }
 0x26a   : > { %v1565_v13 = vmul.f32 %v5458_v24, %v1564_v52  ;;  %v1675_v61 = vadd.f32 0.014752088, %v1674_v10  ;;  %vm1607_vm6 = vweird.f32 %v5442_v50  ;;  %v1611_v29 = vand.u32 2147483647, %v5442_v50  ;;  %vm5501_vm7 = vmor %vm1567_vm4, %vm1568_vm5 }
 0x26b   : > { %v1604_v6 = vsub.f32 1.0, %v1603_v20  ;;  %v1638_v37 = vmul.f32 %v1637_v26, %v5399_v17  ;;  %v5493_v23 = vmin.f32 %v1699_v36, 16.0  ;;  %v1613_v0 = vand.u32 2147483648, %v5442_v50 }
 0x26c   : > { %v1566_v28 = vadd.f32 %v5458_v24, %v1565_v13  ;;  %v1676_v22 = vmul.f32 %v1675_v61, %v5444_v42  ;;  %vm1608_vm8 = vweird.f32 %v5475_v32  ;;  %v1628_v38 = vadd.f32 0.18741608, %v1627_v25 }
 0x26d   : > { %v1605_v31 = vmul.f32 %v5475_v32, %v1604_v6  ;;  %v1639_v49 = vadd.f32 0.4994258, %v1638_v37  ;;  %v1701_v44 = vmul.f32 2.1237322e-06, %v5493_v23  ;;  %v1590_v52 = vadd.f32 1.1283791, %v1589_v9  ;;  %vm5522_vm12 = vmor %vm1607_vm6, %vm1608_vm8 }
 0x26e   : > { %v1665_v56 = vmul.f32 %v1664_v58, %v5444_v42  ;;  %v1677_v20 = vadd.f32 0.112945676, %v1676_v22  ;;  %v5509_v34 = vadd.f32 %v5002_v11, %v1107_v43  ;;  %vm5511_vm10 = vcmp.eq.f32.partialorder %v1571_v47, 8.507059e+37  ;;  %v1110_v58 = vpop.f32.mrf.mxu0 }
 0x26f   : > { %v1574_v15 = vor.u32 1.1754944e-38, %v1573_v46  ;;  %v1606_v13 = vadd.f32 %v5475_v32, %v1605_v31  ;;  %v1640_v26 = vmul.f32 %v1639_v49, %v5399_v17  ;;  %v1570_v25 = vsel %vm5501_vm7, %v5458_v24, %v1566_v28 }
 0x270   : > { %vm5526_vm13 = vcmp.eq.f32.partialorder %v1611_v29, 8.507059e+37  ;;  %v1678_v47 = vmul.f32 %v1677_v20, %v5444_v42  ;;  %v1702_v43 = vadd.f32 0.00028619796, %v1701_v44  ;;  %v1614_v46 = vor.u32 1.1754944e-38, %v1613_v0  ;;  %v5541_v29 = vld [vmem:[%s7137_s4] ss:$0 sm:$0xff] }
 0x271   : > { %v1629_v36 = vmul.f32 %v1628_v38, %v5399_v17  ;;  %v5532_v6 = vadd.f32 1.0, %v1640_v26  ;;  %v1712_v24 = vmul.f32 3.8918573e-05, %v5493_v23  ;;  %v1666_v50 = vadd.f32 0.05243302, %v1665_v56 }
 0x272   : > { %v1679_v61 = vadd.f32 0.4994258, %v1678_v47  ;;  %v5536_v37 = vmul.f32 0.70710677, %v5509_v34  ;;  %v5544_v28 = vadd.f32 %v5541_v29, %v1110_v58  ;;  %v1575_v17 = vsel %vm5511_vm10, %v1574_v15, %v1570_v25 }
 0x273   : > { %v1610_v31 = vsel %vm5522_vm12, %v5475_v32, %v1606_v13  ;;  %4566 = vrcp.f32 %v5532_v6  ;;  %v1703_v0 = vmul.f32 %v1702_v43, %v5493_v23  ;;  %v1161_v22 = vmul.f32 0.5, %v5191_v5 }
 0x274   : > { %v2505_v63 = vadd.f32 1.0, %v4193_v48  ;;  %v1162_v38 = vmul.f32 0.5, %v5202_v45  ;;  %v1680_v49 = vmul.f32 %v1679_v61, %v5444_v42  ;;  %v2506_v44 = vadd.f32 1.0, %v4194_v51 }
 0x275   : > { %v1591_v56 = vmul.f32 %v1590_v52, %v5323_v57  ;;  %v1630_v20 = vadd.f32 1.1283791, %v1629_v36  ;;  %v1713_v32 = vadd.f32 0.001143296, %v1712_v24  ;;  %v1576_v10 = vmul.f32 %v1575_v17, %v5462_v7 }
 0x276   : > { %v1615_v15 = vsel %vm5526_vm13, %v1614_v46, %v1610_v31  ;;  %v1667_v5 = vmul.f32 %v1666_v50, %v5444_v42  ;;  %v5565_v39 = vadd.f32 1.0, %v1680_v49  ;;  %v1704_v48 = vadd.f32 0.0036580483, %v1703_v0 }
 0x277   : > { %v1714_v45 = vmul.f32 %v1713_v32, %v5493_v23  ;;  %v1739_v16 = vmul.f32 %v5536_v37, %v5536_v37  ;;  %v5571_v51 = vmul.f32 0.70710677, %v5544_v28  ;;  %v4505_v57 = vunpack.i.l.bf16 %v4988_v62 }
 0x278   : > { %v4510_v7 = vunpack.i.l.bf16 %v4991_v54  ;;  %v1163_v52 = vmul.f32 0.5, %v5293_v35  ;;  %4568 = vrcp.f32 %v5565_v39  ;;  %v2537_v26 = vmul.f32 %v2505_v63, %v1161_v22 }
 0x279   : > { %v5577_v13 = vpop.eup %4566  ;;  %v2538_v25 = vmul.f32 %v2506_v44, %v1162_v38  ;;  %v5580_v9 = vmul.f32 0.5, %v5311_v60  ;;  %v5582_v11 = vmin.f32 %v1739_v16, 16.0  ;;  %v1616_v47 = vmul.f32 %v1615_v15, %v1591_v56  ;;  %v1112_v56 = vpop.f32.mrf.mxu0 }
 0x27a   : > { %v1643_v43 = vmul.f32 %v5577_v13, %v5532_v6  ;;  %v1715_v62 = vadd.f32 0.014752088, %v1714_v45  ;;  %v1779_v46 = vmul.f32 %v5571_v51, %v5571_v51  ;;  %v4195_v35 = vclamps-f32 %v1576_v10, 1.0 }
 0x27b   : > { %v5589_v36 = vmul.f32 %v1630_v20, %v5377_v41  ;;  %v1668_v24 = vadd.f32 0.18741608, %v1667_v5  ;;  %v1705_v58 = vmul.f32 %v1704_v48, %v5493_v23  ;;  %v1741_v61 = vmul.f32 2.1237322e-06, %v5582_v11 }
 0x27c   : > { %v1644_v50 = vsub.f32 1.0, %v1643_v43  ;;  %v1716_v60 = vmul.f32 %v1715_v62, %v5493_v23  ;;  %v1752_v17 = vmul.f32 3.8918573e-05, %v5582_v11  ;;  %vm1647_vm14 = vweird.f32 %v5532_v6 }
 0x27d   : > { %v1651_v31 = vand.u32 2147483647, %v5532_v6  ;;  %v5597_v0 = vmin.f32 %v1779_v46, 16.0  ;;  %v2566_v22 = vpack.c.bf16 %v2538_v25, %v2537_v26  ;;  %v4196_v41 = vclamps-f32 %v1616_v47, 1.0 }
 0x27e   : > { %v5599_v63 = vpop.eup %4568  ;;  %v1645_v38 = vmul.f32 %v5577_v13, %v1644_v50  ;;  %v1717_v49 = vadd.f32 0.112945676, %v1716_v60  ;;  %v1753_v44 = vadd.f32 0.001143296, %v1752_v17  ;;  %vm1648_vm15 = vweird.f32 %v5577_v13 }
 0x27f   : > { %v1653_v20 = vand.u32 2147483648, %v5532_v6  ;;  %v1683_v32 = vmul.f32 %v5599_v63, %v5565_v39  ;;  %v1781_v10 = vmul.f32 2.1237322e-06, %v5597_v0  ;;  %4238 = vmatmul.msk.bf16.gmra.mxu1 %vm2615_vm11, %v2566_v22  ;;  %v1706_v15 = vadd.f32 0.05243302, %v1705_v58  ;;  %vm5618_vm1 = vmor %vm1647_vm14, %vm1648_vm15 }
 0x280   : > { %v1718_v5 = vmul.f32 %v1717_v49, %v5493_v23  ;;  %v1742_v48 = vadd.f32 0.00028619796, %v1741_v61  ;;  %v1754_v45 = vmul.f32 %v1753_v44, %v5582_v11  ;;  %v1646_v16 = vadd.f32 %v5577_v13, %v1645_v38 }
 0x281   : > { %v1684_v26 = vsub.f32 1.0, %v1683_v32  ;;  %v5612_v25 = vadd.f32 %v5541_v29, %v1112_v56  ;;  %v1004_v47 = vpack.c.bf16 %v4505_v57, %v4500_v30  ;;  %v2507_v43 = vadd.f32 1.0, %v4195_v35 }
 0x282   : > { %v1669_v46 = vmul.f32 %v1668_v24, %v5444_v42  ;;  %v1719_v58 = vadd.f32 0.4994258, %v1718_v5  ;;  %v1755_v50 = vadd.f32 0.014752088, %v1754_v45  ;;  %v2508_v60 = vadd.f32 1.0, %v4196_v41  ;;  %v1115_v45 = vpop.f32.mrf.mxu0 }
 0x283   : > { %vm5623_vm2 = vcmp.eq.f32.partialorder %v1651_v31, 8.507059e+37  ;;  %v1654_v17 = vor.u32 1.1754944e-38, %v1653_v20  ;;  %v1782_v22 = vadd.f32 0.00028619796, %v1781_v10  ;;  %4183 = vmatmul.msk.bf16.gmra.mxu3 %vm1013_vm9, %v1004_v47  ;;  %v1707_v59 = vmul.f32 %v1706_v15, %v5493_v23 }
 0x284   : > { %v1720_v30 = vmul.f32 %v1719_v58, %v5493_v23  ;;  %v1743_v6 = vmul.f32 %v1742_v48, %v5582_v11  ;;  %v1756_v57 = vmul.f32 %v1755_v50, %v5582_v11  ;;  %v1650_v42 = vsel %vm5618_vm1, %v5577_v13, %v1646_v16 }
 0x285   : > { %v1685_v35 = vmul.f32 %v5599_v63, %v1684_v26  ;;  %v1792_v24 = vmul.f32 3.8918573e-05, %v5597_v0  ;;  %v5638_v31 = vmul.f32 0.70710677, %v5612_v25  ;;  %v2539_v41 = vmul.f32 %v2507_v43, %v1163_v52 }
 0x286   : > { %vm1687_vm3 = vweird.f32 %v5565_v39  ;;  %v5641_v38 = vadd.f32 1.0, %v1720_v30  ;;  %v1757_v49 = vadd.f32 0.112945676, %v1756_v57  ;;  %vm1688_vm4 = vweird.f32 %v5599_v63 }
 0x287   : > { %v1691_v44 = vand.u32 2147483647, %v5565_v39  ;;  %v1693_v56 = vand.u32 2147483648, %v5565_v39  ;;  %v1783_v13 = vmul.f32 %v1782_v22, %v5597_v0  ;;  %v1655_v20 = vsel %vm5623_vm2, %v1654_v17, %v1650_v42  ;;  %vm5665_vm5 = vmor %vm1687_vm3, %vm1688_vm4 }
 0x288   : > { %4570 = vrcp.f32 %v5641_v38  ;;  %v1793_v32 = vadd.f32 0.001143296, %v1792_v24  ;;  %v1819_v52 = vmul.f32 %v5638_v31, %v5638_v31  ;;  %v2540_v10 = vmul.f32 %v2508_v60, %v5580_v9 }
 0x289   : > { %v1686_v15 = vadd.f32 %v5599_v63, %v1685_v35  ;;  %v1708_v5 = vadd.f32 0.18741608, %v1707_v59  ;;  %v1744_v48 = vadd.f32 0.0036580483, %v1743_v6  ;;  %v4515_v16 = vunpack.i.l.bf16 %v4993_v1 }
 0x28a   : > { %v5656_v26 = vmul.f32 0.5, %v5364_v53  ;;  %v5659_v47 = vmul.f32 0.5, %v5388_v18  ;;  %v1758_v9 = vmul.f32 %v1757_v49, %v5582_v11  ;;  %v1656_v62 = vmul.f32 %v1655_v20, %v5589_v36 }
 0x28b   : > { %v1670_v58 = vadd.f32 1.1283791, %v1669_v46  ;;  %vm5671_vm6 = vcmp.eq.f32.partialorder %v1691_v44, 8.507059e+37  ;;  %v1784_v53 = vadd.f32 0.0036580483, %v1783_v13  ;;  %v1694_v18 = vor.u32 1.1754944e-38, %v1693_v56 }
 0x28c   : > { %v1759_v50 = vadd.f32 0.4994258, %v1758_v9  ;;  %v1794_v60 = vmul.f32 %v1793_v32, %v5597_v0  ;;  %v5676_v61 = vmin.f32 %v1819_v52, 16.0  ;;  %v1690_v39 = vsel %vm5665_vm5, %v5599_v63, %v1686_v15 }
 0x28d   : > { %v1709_v17 = vmul.f32 %v1708_v5, %v5493_v23  ;;  %v1745_v36 = vmul.f32 %v1744_v48, %v5582_v11  ;;  %v2567_v46 = vpack.c.bf16 %v2540_v10, %v2539_v41  ;;  %v5688_v57 = vadd.f32 %v5541_v29, %v1115_v45 }
 0x28e   : > { %v5683_v22 = vpop.eup %4570  ;;  %v1760_v59 = vmul.f32 %v1759_v50, %v5582_v11  ;;  %v1795_v30 = vadd.f32 0.014752088, %v1794_v60  ;;  %v1821_v6 = vmul.f32 2.1237322e-06, %v5676_v61  ;;  %v4197_v42 = vclamps-f32 %v1656_v62, 1.0 }
 0x28f   : > { %v1671_v35 = vmul.f32 %v1670_v58, %v5402_v12  ;;  %v1723_v63 = vmul.f32 %v5683_v22, %v5641_v38  ;;  %v1785_v23 = vmul.f32 %v1784_v53, %v5597_v0  ;;  %4239 = vmatmul.msk.bf16.gmra.mxu1 %vm2615_vm11, %v2567_v46  ;;  %v1695_v24 = vsel %vm5671_vm6, %v1694_v18, %v1690_v39 }
 0x290   : > { %v5697_v41 = vadd.f32 1.0, %v1760_v59  ;;  %v1796_v49 = vmul.f32 %v1795_v30, %v5597_v0  ;;  %v1822_v44 = vadd.f32 0.00028619796, %v1821_v6  ;;  %v5701_v56 = vmul.f32 0.5, %v5465_v21  ;;  %v1117_v21 = vpop.f32.mrf.mxu0 }
 0x291   : > { %v1724_v13 = vsub.f32 1.0, %v1723_v63  ;;  %v5704_v12 = vmul.f32 0.5, %v5509_v34  ;;  %v1832_v20 = vmul.f32 3.8918573e-05, %v5676_v61  ;;  %v1710_v32 = vadd.f32 1.1283791, %v1709_v17 }
 0x292   : > { %v1746_v52 = vadd.f32 0.05243302, %v1745_v36  ;;  %4572 = vrcp.f32 %v5697_v41  ;;  %v5709_v10 = vmul.f32 0.70710677, %v5688_v57  ;;  %v2509_v15 = vadd.f32 1.0, %v4197_v42 }
 0x293   : > { %v1696_v5 = vmul.f32 %v1695_v24, %v1671_v35  ;;  %v1725_v48 = vmul.f32 %v5683_v22, %v1724_v13  ;;  %v1797_v45 = vadd.f32 0.112945676, %v1796_v49  ;;  %vm1727_vm7 = vweird.f32 %v5641_v38 }
 0x294   : > { %v1786_v43 = vadd.f32 0.05243302, %v1785_v23  ;;  %v1823_v34 = vmul.f32 %v1822_v44, %v5676_v61  ;;  %v1833_v9 = vadd.f32 0.001143296, %v1832_v20  ;;  %vm1728_vm8 = vweird.f32 %v5683_v22 }
 0x295   : > { %v1731_v62 = vand.u32 2147483647, %v5641_v38  ;;  %v1733_v58 = vand.u32 2147483648, %v5641_v38  ;;  %v1798_v1 = vmul.f32 %v1797_v45, %v5597_v0  ;;  %v1859_v18 = vmul.f32 %v5709_v10, %v5709_v10  ;;  %vm5732_vm10 = vmor %vm1727_vm7, %vm1728_vm8 }
 0x296   : > { %v1834_v53 = vmul.f32 %v1833_v9, %v5676_v61  ;;  %v5722_v50 = vadd.f32 %v5541_v29, %v1117_v21  ;;  %v1005_v60 = vpack.c.bf16 %v4515_v16, %v4510_v7  ;;  %v4198_v39 = vclamps-f32 %v1696_v5, 1.0 }
 0x297   : > { %v1726_v17 = vadd.f32 %v5683_v22, %v1725_v48  ;;  %v1747_v36 = vmul.f32 %v1746_v52, %v5582_v11  ;;  %v1799_v46 = vadd.f32 0.4994258, %v1798_v1  ;;  %v1787_v6 = vmul.f32 %v1786_v43, %v5597_v0 }
 0x298   : > { %v5728_v59 = vpop.eup %4572  ;;  %v1824_v42 = vadd.f32 0.0036580483, %v1823_v34  ;;  %v1835_v35 = vadd.f32 0.014752088, %v1834_v53  ;;  %v5737_v54 = vmin.f32 %v1859_v18, 16.0  ;;  %4184 = vmatmul.msk.bf16.gmra.mxu3 %vm1013_vm9, %v1005_v60  ;;  %vm5740_vm12 = vcmp.eq.f32.partialorder %v1731_v62, 8.507059e+37 }
 0x299   : > { %v1763_v16 = vmul.f32 %v5728_v59, %v5697_v41  ;;  %v1800_v38 = vmul.f32 %v1799_v46, %v5597_v0  ;;  %v5748_v63 = vmul.f32 0.70710677, %v5722_v50  ;;  %v1734_v23 = vor.u32 1.1754944e-38, %v1733_v58 }
 0x29a   : > { %v1836_v24 = vmul.f32 %v1835_v35, %v5676_v61  ;;  %v1861_v49 = vmul.f32 2.1237322e-06, %v5737_v54  ;;  %v1872_v44 = vmul.f32 3.8918573e-05, %v5737_v54  ;;  %v1730_v13 = vsel %vm5732_vm10, %v5683_v22, %v1726_v17 }
 0x29b   : > { %v1748_v20 = vadd.f32 0.18741608, %v1747_v36  ;;  %v1764_v52 = vsub.f32 1.0, %v1763_v16  ;;  %v5756_v5 = vadd.f32 1.0, %v1800_v38  ;;  %v1788_v48 = vadd.f32 0.18741608, %v1787_v6 }
 0x29c   : > { %v1825_v45 = vmul.f32 %v1824_v42, %v5676_v61  ;;  %v1837_v21 = vadd.f32 0.112945676, %v1836_v24  ;;  %v1862_v43 = vadd.f32 0.00028619796, %v1861_v49  ;;  %v1711_v34 = vmul.f32 %v1710_v32, %v5472_v55 }
 0x29d   : > { %4574 = vrcp.f32 %v5756_v5  ;;  %v1873_v9 = vadd.f32 0.001143296, %v1872_v44  ;;  %v1899_v62 = vmul.f32 %v5748_v63, %v5748_v63  ;;  %v5764_v58 = vmul.f32 %v2509_v15, %v5656_v26 }
 0x29e   : > { %v1735_v22 = vsel %vm5740_vm12, %v1734_v23, %v1730_v13  ;;  %v5769_v1 = vmul.f32 0.5, %v5544_v28  ;;  %v1838_v53 = vmul.f32 %v1837_v21, %v5676_v61  ;;  %v2510_v18 = vadd.f32 1.0, %v4198_v39  ;;  %v1120_v39 = vpop.f32.mrf.mxu0 }
 0x29f   : > { %v1749_v55 = vmul.f32 %v1748_v20, %v5582_v11  ;;  %v1765_v32 = vmul.f32 %v5728_v59, %v1764_v52  ;;  %v1863_v60 = vmul.f32 %v1862_v43, %v5737_v54  ;;  %vm1767_vm13 = vweird.f32 %v5697_v41 }
 0x2a0   : > { %v1789_v26 = vmul.f32 %v1788_v48, %v5597_v0  ;;  %v1826_v15 = vadd.f32 0.05243302, %v1825_v45  ;;  %v1839_v17 = vadd.f32 0.4994258, %v1838_v53  ;;  %v1736_v36 = vmul.f32 %v1735_v22, %v1711_v34 }
 0x2a1   : > { %vm1768_vm14 = vweird.f32 %v5728_v59  ;;  %v1874_v28 = vmul.f32 %v1873_v9, %v5737_v54  ;;  %v5779_v46 = vmin.f32 %v1899_v62, 16.0  ;;  %v1771_v11 = vand.u32 2147483647, %v5697_v41 }
 0x2a2   : > { %v1773_v30 = vand.u32 2147483648, %v5697_v41  ;;  %v1840_v6 = vmul.f32 %v1839_v17, %v5676_v61  ;;  %v5785_v42 = vadd.f32 %v5541_v29, %v1120_v39  ;;  %v1766_v35 = vadd.f32 %v5728_v59, %v1765_v32  ;;  %vm5796_vm15 = vmor %vm1767_vm13, %vm1768_vm14 }
 0x2a3   : > { %v5787_v0 = vpop.eup %4574  ;;  %v1864_v7 = vadd.f32 0.0036580483, %v1863_v60  ;;  %v1875_v16 = vadd.f32 0.014752088, %v1874_v28  ;;  %v1901_v38 = vmul.f32 2.1237322e-06, %v5779_v46  ;;  %v2542_v23 = vmul.f32 %v2510_v18, %v5659_v47  ;;  %v5831_v28 = vpop.trf.xlu0 }
 0x2a4   : > { %v1750_v24 = vadd.f32 1.1283791, %v1749_v55  ;;  %v1827_v44 = vmul.f32 %v1826_v15, %v5676_v61  ;;  %v5801_v13 = vadd.f32 1.0, %v1840_v6  ;;  %v4199_v20 = vclamps-f32 %v1736_v36, 1.0 }
 0x2a5   : > { %v1803_v52 = vmul.f32 %v5787_v0, %v5756_v5  ;;  %v1876_v48 = vmul.f32 %v1875_v16, %v5737_v54  ;;  %v1902_v47 = vadd.f32 0.00028619796, %v1901_v38  ;;  %vm5806_vm1 = vcmp.eq.f32.partialorder %v1771_v11, 8.507059e+37 }
 0x2a6   : > { %v1774_v41 = vor.u32 1.1754944e-38, %v1773_v30  ;;  %v1790_v21 = vadd.f32 1.1283791, %v1789_v26  ;;  %4576 = vrcp.f32 %v5801_v13  ;;  %v1770_v43 = vsel %vm5796_vm15, %v5728_v59, %v1766_v35  ;;  %v1130_v30 = vpop.f32.mrf.mxu3 }
 0x2a7   : > { %v1865_v34 = vmul.f32 %v1864_v7, %v5737_v54  ;;  %v1877_v9 = vadd.f32 0.112945676, %v1876_v48  ;;  %v5816_v62 = vmul.f32 0.70710677, %v5785_v42  ;;  %v1751_v22 = vmul.f32 %v1750_v24, %v5536_v37 }
 0x2a8   : > { %v5820_v53 = vmul.f32 0.5, %v5612_v25  ;;  %v1828_v18 = vadd.f32 0.18741608, %v1827_v44  ;;  %v1912_v55 = vmul.f32 3.8918573e-05, %v5779_v46  ;;  %v2511_v32 = vadd.f32 1.0, %v4199_v20 }
 0x2a9   : > { %v1804_v60 = vsub.f32 1.0, %v1803_v52  ;;  %v1878_v26 = vmul.f32 %v1877_v9, %v5737_v54  ;;  %v1903_v59 = vmul.f32 %v1902_v47, %v5779_v46  ;;  %v1775_v15 = vsel %vm5806_vm1, %v1774_v41, %v1770_v43 }
 0x2aa   : > { %v5828_v17 = vmul.f32 %v1790_v21, %v5571_v51  ;;  %vm1807_vm2 = vweird.f32 %v5756_v5  ;;  %v1913_v37 = vadd.f32 0.001143296, %v1912_v55  ;;  %v1866_v25 = vadd.f32 0.05243302, %v1865_v34 }
 0x2ab   : > { %v1879_v36 = vadd.f32 0.4994258, %v1878_v26  ;;  %v1939_v39 = vmul.f32 %v5816_v62, %v5816_v62  ;;  %v2568_v11 = vpack.c.bf16 %v2542_v23, %v5764_v58  ;;  %v1811_v35 = vand.u32 2147483647, %v5756_v5 }
 0x2ac   : > { %v5836_v6 = vpop.eup %4576  ;;  %v1829_v51 = vmul.f32 %v1828_v18, %v5676_v61  ;;  %v1914_v7 = vmul.f32 %v1913_v37, %v5779_v46  ;;  %v5842_v16 = vadd.f32 %v5541_v29, %v1130_v30  ;;  %v5845_v38 = vmul.f32 %v2511_v32, %v5701_v56 }
 0x2ad   : > { %v1805_v24 = vmul.f32 %v5787_v0, %v1804_v60  ;;  %v1813_v49 = vand.u32 2147483648, %v5756_v5  ;;  %v1904_v58 = vadd.f32 0.0036580483, %v1903_v59  ;;  %4240 = vmatmul.msk.bf16.gmra.mxu1 %vm2615_vm11, %v2568_v11  ;;  %v1776_v23 = vmul.f32 %v1775_v15, %v1751_v22 }
 0x2ae   : > { %v1843_v44 = vmul.f32 %v5836_v6, %v5801_v13  ;;  %v1880_v61 = vmul.f32 %v1879_v36, %v5737_v54  ;;  %v1915_v20 = vadd.f32 0.014752088, %v1914_v7  ;;  %vm1808_vm3 = vweird.f32 %v5787_v0 }
 0x2af   : > { %v1867_v52 = vmul.f32 %v1866_v25, %v5737_v54  ;;  %v5855_v56 = vmin.f32 %v1939_v39, 16.0  ;;  %v5858_v48 = vmul.f32 0.70710677, %v5842_v16  ;;  %v1830_v47 = vadd.f32 1.1283791, %v1829_v51  ;;  %vm5872_vm4 = vmor %vm1807_vm2, %vm1808_vm3 }
 0x2b0   : > { %v5861_v45 = vmul.f32 0.5, %v5688_v57  ;;  %v5863_v41 = vadd.f32 1.0, %v1880_v61  ;;  %v1916_v21 = vmul.f32 %v1915_v20, %v5779_v46  ;;  %v1806_v43 = vadd.f32 %v5787_v0, %v1805_v24 }
 0x2b1   : > { %v1905_v34 = vmul.f32 %v1904_v58, %v5779_v46  ;;  %v1941_v9 = vmul.f32 2.1237322e-06, %v5855_v56  ;;  %v1952_v22 = vmul.f32 3.8918573e-05, %v5855_v56  ;;  %v4200_v18 = vclamps-f32 %v1776_v23, 1.0 }
 0x2b2   : > { %vm5876_vm5 = vcmp.eq.f32.partialorder %v1811_v35, 8.507059e+37  ;;  %v1844_v32 = vsub.f32 1.0, %v1843_v44  ;;  %4578 = vrcp.f32 %v5863_v41  ;;  %v1814_v60 = vor.u32 1.1754944e-38, %v1813_v49  ;;  %v977_v35 = vpop.trf.xlu0  ;;  %v1122_v49 = vpop.f32.mrf.mxu0 }
 0x2b3   : > { %v1868_v26 = vadd.f32 0.18741608, %v1867_v52  ;;  %v1917_v59 = vadd.f32 0.112945676, %v1916_v21  ;;  %v2099_v15 = vmul.f32 %v5858_v48, %v5858_v48  ;;  %v5884_v37 = vmul.f32 %v1830_v47, %v5638_v31 }
 0x2b4   : > { %vm1847_vm6 = vweird.f32 %v5801_v13  ;;  %v1942_v5 = vadd.f32 0.00028619796, %v1941_v9  ;;  %v1953_v25 = vadd.f32 0.001143296, %v1952_v22  ;;  %v1810_v36 = vsel %vm5872_vm4, %v5787_v0, %v1806_v43 }
 0x2b5   : > { %v1851_v39 = vand.u32 2147483647, %v5801_v13  ;;  %v1906_v11 = vadd.f32 0.05243302, %v1905_v34  ;;  %v1918_v30 = vmul.f32 %v1917_v59, %v5779_v46  ;;  %v2512_v51 = vadd.f32 1.0, %v4200_v18  ;;  %v1132_v59 = vpop.f32.mrf.mxu3 }
 0x2b6   : > { %v1845_v7 = vmul.f32 %v5836_v6, %v1844_v32  ;;  %v1853_v31 = vand.u32 2147483648, %v5801_v13  ;;  %v1954_v24 = vmul.f32 %v1953_v25, %v5855_v56  ;;  %v1869_v58 = vmul.f32 %v1868_v26, %v5737_v54 }
 0x2b7   : > { %v1919_v23 = vadd.f32 0.4994258, %v1918_v30  ;;  %v1943_v44 = vmul.f32 %v1942_v5, %v5855_v56  ;;  %v5897_v0 = vmin.f32 %v2099_v15, 16.0  ;;  %v1815_v20 = vsel %vm5876_vm5, %v1814_v60, %v1810_v36 }
 0x2b8   : > { %v5899_v61 = vpop.eup %4578  ;;  %vm1848_vm7 = vweird.f32 %v5836_v6  ;;  %v1955_v52 = vadd.f32 0.014752088, %v1954_v24  ;;  %v1006_v47 = vpack.c.bf16 %v977_v35, %v5831_v28  ;;  %vm5905_vm8 = vcmp.eq.f32.partialorder %v1851_v39, 8.507059e+37 }
 0x2b9   : > { %v1883_v54 = vmul.f32 %v5899_v61, %v5863_v41  ;;  %v1907_v43 = vmul.f32 %v1906_v11, %v5779_v46  ;;  %v5913_v34 = vadd.f32 %v5541_v29, %v1122_v49  ;;  %v1846_v9 = vadd.f32 %v5836_v6, %v1845_v7  ;;  %vm5923_vm10 = vmor %vm1847_vm6, %vm1848_vm7 }
 0x2ba   : > { %v1920_v22 = vmul.f32 %v1919_v23, %v5779_v46  ;;  %v1956_v18 = vmul.f32 %v1955_v52, %v5855_v56  ;;  %v2101_v28 = vmul.f32 2.1237322e-06, %v5897_v0  ;;  %4185 = vmatmul.msk.bf16.gmra.mxu3 %vm1013_vm9, %v1006_v47  ;;  %v1816_v55 = vmul.f32 %v1815_v20, %v5828_v17 }
 0x2bb   : > { %v1884_v32 = vsub.f32 1.0, %v1883_v54  ;;  %v1944_v60 = vadd.f32 0.0036580483, %v1943_v44  ;;  %v2112_v26 = vmul.f32 3.8918573e-05, %v5897_v0  ;;  %v1854_v15 = vor.u32 1.1754944e-38, %v1853_v31 }
 0x2bc   : > { %v1870_v5 = vadd.f32 1.1283791, %v1869_v58  ;;  %v5928_v25 = vadd.f32 1.0, %v1920_v22  ;;  %v1957_v36 = vadd.f32 0.112945676, %v1956_v18  ;;  %v5931_v39 = vmul.f32 %v2512_v51, %v5704_v12 }
 0x2bd   : > { %v2102_v17 = vadd.f32 0.00028619796, %v2101_v28  ;;  %v2113_v11 = vadd.f32 0.001143296, %v2112_v26  ;;  %v5934_v13 = vmul.f32 0.70710677, %v5913_v34  ;;  %v1850_v30 = vsel %vm5923_vm10, %v5836_v6, %v1846_v9 }
 0x2be   : > { %v1908_v35 = vadd.f32 0.18741608, %v1907_v43  ;;  %4580 = vrcp.f32 %v5928_v25  ;;  %v5941_v7 = vadd.f32 %v5541_v29, %v1132_v59  ;;  %v4201_v31 = vclamps-f32 %v1816_v55, 1.0 }
 0x2bf   : > { %v1885_v24 = vmul.f32 %v5899_v61, %v1884_v32  ;;  %v1945_v12 = vmul.f32 %v1944_v60, %v5855_v56  ;;  %v1958_v51 = vmul.f32 %v1957_v36, %v5855_v56  ;;  %vm1887_vm12 = vweird.f32 %v5863_v41 }
 0x2c0   : > { %v1891_v49 = vand.u32 2147483647, %v5863_v41  ;;  %v2103_v58 = vmul.f32 %v2102_v17, %v5897_v0  ;;  %v2114_v6 = vmul.f32 %v2113_v11, %v5897_v0  ;;  %v1855_v23 = vsel %vm5905_vm8, %v1854_v15, %v1850_v30 }
 0x2c1   : > { %vm1888_vm13 = vweird.f32 %v5899_v61  ;;  %v1959_v44 = vadd.f32 0.4994258, %v1958_v51  ;;  %v1979_v20 = vmul.f32 %v5934_v13, %v5934_v13  ;;  %v1893_v52 = vand.u32 2147483648, %v5863_v41 }
 0x2c2   : > { %v1909_v47 = vmul.f32 %v1908_v35, %v5779_v46  ;;  %v2115_v54 = vadd.f32 0.014752088, %v2114_v6  ;;  %v5958_v43 = vmul.f32 0.70710677, %v5941_v7  ;;  %v1871_v9 = vmul.f32 %v1870_v5, %v5709_v10  ;;  %vm5968_vm14 = vmor %vm1887_vm12, %vm1888_vm13 }
 0x2c3   : > { %v1886_v22 = vadd.f32 %v5899_v61, %v1885_v24  ;;  %v1946_v21 = vadd.f32 0.05243302, %v1945_v12  ;;  %v1960_v18 = vmul.f32 %v1959_v44, %v5855_v56  ;;  %v1856_v55 = vmul.f32 %v1855_v23, %v5884_v37 }
 0x2c4   : > { %v5963_v28 = vpop.eup %4580  ;;  %v2104_v46 = vadd.f32 0.0036580483, %v2103_v58  ;;  %v2116_v32 = vmul.f32 %v2115_v54, %v5897_v0  ;;  %v2139_v10 = vmul.f32 %v5958_v43, %v5958_v43  ;;  %v2513_v60 = vadd.f32 1.0, %v4201_v31  ;;  %v1125_v54 = vpop.f32.mrf.mxu0 }
 0x2c5   : > { %vm5975_vm15 = vcmp.eq.f32.partialorder %v1891_v49, 8.507059e+37  ;;  %v1923_v37 = vmul.f32 %v5963_v28, %v5928_v25  ;;  %v5981_v59 = vmin.f32 %v1979_v20, 16.0  ;;  %v1894_v41 = vor.u32 1.1754944e-38, %v1893_v52 }
 0x2c6   : > { %v1910_v15 = vadd.f32 1.1283791, %v1909_v47  ;;  %v5983_v5 = vadd.f32 1.0, %v1960_v18  ;;  %v2117_v36 = vadd.f32 0.112945676, %v2116_v32  ;;  %v1890_v17 = vsel %vm5968_vm14, %v5899_v61, %v1886_v22 }
 0x2c7   : > { %v1924_v11 = vsub.f32 1.0, %v1923_v37  ;;  %v1947_v30 = vmul.f32 %v1946_v21, %v5855_v56  ;;  %v1981_v35 = vmul.f32 2.1237322e-06, %v5981_v59  ;;  %v4202_v31 = vclamps-f32 %v1856_v55, 1.0 }
 0x2c8   : > { %vm1927_vm1 = vweird.f32 %v5928_v25  ;;  %v2105_v24 = vmul.f32 %v2104_v46, %v5897_v0  ;;  %v5992_v12 = vmin.f32 %v2139_v10, 16.0  ;;  %vm1928_vm2 = vweird.f32 %v5963_v28 }
 0x2c9   : > { %v1925_v51 = vmul.f32 %v5963_v28, %v1924_v11  ;;  %4582 = vrcp.f32 %v5983_v5  ;;  %v2118_v61 = vmul.f32 %v2117_v36, %v5897_v0  ;;  %v1895_v49 = vsel %vm5975_vm15, %v1894_v41, %v1890_v17  ;;  %vm6006_vm3 = vmor %vm1927_vm1, %vm1928_vm2 }
 0x2ca   : > { %v1931_v58 = vand.u32 2147483647, %v5928_v25  ;;  %v1933_v6 = vand.u32 2147483648, %v5928_v25  ;;  %v1982_v23 = vadd.f32 0.00028619796, %v1981_v35  ;;  %v2514_v46 = vadd.f32 1.0, %v4202_v31 }
 0x2cb   : > { %v1926_v44 = vadd.f32 %v5963_v28, %v1925_v51  ;;  %v1948_v20 = vadd.f32 0.18741608, %v1947_v30  ;;  %v2119_v52 = vadd.f32 0.4994258, %v2118_v61  ;;  %v1992_v47 = vmul.f32 3.8918573e-05, %v5981_v59 }
 0x2cc   : > { %v2106_v21 = vadd.f32 0.05243302, %v2105_v24  ;;  %v1983_v18 = vmul.f32 %v1982_v23, %v5981_v59  ;;  %v2141_v55 = vmul.f32 2.1237322e-06, %v5992_v12  ;;  %v2152_v57 = vmul.f32 3.8918573e-05, %v5992_v12 }
 0x2cd   : > { %v1896_v32 = vmul.f32 %v1895_v49, %v1871_v9  ;;  %v2120_v10 = vmul.f32 %v2119_v52, %v5897_v0  ;;  %v1993_v26 = vadd.f32 0.001143296, %v1992_v47  ;;  %v1934_v37 = vor.u32 1.1754944e-38, %v1933_v6  ;;  %v6023_v9 = vpop.trf.xlu0 }
 0x2ce   : > { %v2142_v41 = vadd.f32 0.00028619796, %v2141_v55  ;;  %v2153_v36 = vadd.f32 0.001143296, %v2152_v57  ;;  %v6015_v25 = vadd.f32 %v5541_v29, %v1125_v54  ;;  %v1930_v11 = vsel %vm6006_vm3, %v5963_v28, %v1926_v44 }
 0x2cf   : > { %v6017_v17 = vpop.eup %4582  ;;  %vm1932_vm4 = vcmp.eq.f32.partialorder %v1931_v58, 8.507059e+37  ;;  %v1949_v30 = vmul.f32 %v1948_v20, %v5855_v56  ;;  %v1984_v35 = vadd.f32 0.0036580483, %v1983_v18  ;;  %v2107_v31 = vmul.f32 %v2106_v21, %v5897_v0 }
 0x2d0   : > { %v6026_v24 = vadd.f32 1.0, %v2120_v10  ;;  %v1994_v51 = vmul.f32 %v1993_v26, %v5981_v59  ;;  %v2143_v61 = vmul.f32 %v2142_v41, %v5992_v12  ;;  %v4203_v49 = vclamps-f32 %v1896_v32, 1.0 }
 0x2d1   : > { %v6031_v6 = vmul.f32 0.5, %v5722_v50  ;;  %v1911_v28 = vmul.f32 %v1910_v15, %v5748_v63  ;;  %v2154_v58 = vmul.f32 %v2153_v36, %v5992_v12  ;;  %v1935_v56 = vsel %vm1932_vm4, %v1934_v37, %v1930_v11  ;;  %v6061_v37 = vpop.f32.mrf.mxu1 }
 0x2d2   : > { %v1963_v23 = vmul.f32 %v6017_v17, %v5983_v5  ;;  %4584 = vrcp.f32 %v6026_v24  ;;  %v6039_v44 = vmul.f32 0.70710677, %v6015_v25  ;;  %v6042_v20 = vmul.f32 %v2513_v60, %v5769_v1 }
 0x2d3   : > { %v6044_v52 = vadd.f32 1.1283791, %v1949_v30  ;;  %v1985_v50 = vmul.f32 %v1984_v35, %v5981_v59  ;;  %v1995_v47 = vadd.f32 0.014752088, %v1994_v51  ;;  %v6048_v63 = vmul.f32 %v2514_v46, %v5820_v53 }
 0x2d4   : > { %v2108_v15 = vadd.f32 0.18741608, %v2107_v31  ;;  %v2144_v54 = vadd.f32 0.0036580483, %v2143_v61  ;;  %v2155_v22 = vadd.f32 0.014752088, %v2154_v58  ;;  %v1936_v18 = vmul.f32 %v1935_v56, %v1911_v28 }
 0x2d5   : > { %v6050_v21 = vadd.f32 1.0, %v4203_v49  ;;  %vm1967_vm5 = vweird.f32 %v5983_v5  ;;  %v1996_v55 = vmul.f32 %v1995_v47, %v5981_v59  ;;  %v1964_v1 = vsub.f32 1.0, %v1963_v23 }
 0x2d6   : > { %v2145_v60 = vmul.f32 %v2144_v54, %v5992_v12  ;;  %v2156_v57 = vmul.f32 %v2155_v22, %v5992_v12  ;;  %v2019_v32 = vmul.f32 %v6039_v44, %v6039_v44  ;;  %v1971_v53 = vand.u32 2147483647, %v5983_v5  ;;  %v1127_v22 = vpop.f32.mrf.mxu0 }
 0x2d7   : > { %v1986_v46 = vadd.f32 0.05243302, %v1985_v50  ;;  %v1997_v10 = vadd.f32 0.112945676, %v1996_v55  ;;  %v2569_v26 = vpack.c.bf16 %v5931_v39, %v5845_v38  ;;  %v1973_v36 = vand.u32 2147483648, %v5983_v5  ;;  %v979_v38 = vpop.trf.xlu0 }
 0x2d8   : > { %v6063_v41 = vpop.eup %4584  ;;  %v2109_v11 = vmul.f32 %v2108_v15, %v5897_v0  ;;  %v2146_v30 = vadd.f32 0.05243302, %v2145_v60  ;;  %v2157_v35 = vadd.f32 0.112945676, %v2156_v57  ;;  %v4204_v31 = vclamps-f32 %v1936_v18, 1.0 }
 0x2d9   : > { %vm1968_vm6 = vweird.f32 %v6017_v17  ;;  %v2123_v51 = vmul.f32 %v6063_v41, %v6026_v24  ;;  %v6070_v61 = vmin.f32 %v2019_v32, 16.0  ;;  %4241 = vmatmul.msk.bf16.gmra.mxu1 %vm2615_vm11, %v2569_v26  ;;  %v1965_v39 = vmul.f32 %v6017_v17, %v1964_v1 }
 0x2da   : > { %v1998_v49 = vmul.f32 %v1997_v10, %v5981_v59  ;;  %v2147_v28 = vmul.f32 %v2146_v30, %v5992_v12  ;;  %v2158_v0 = vmul.f32 %v2157_v35, %v5992_v12  ;;  %vm6077_vm7 = vcmp.eq.f32.partialorder %v1971_v53, 8.507059e+37 }
 0x2db   : > { %v2124_v56 = vsub.f32 1.0, %v2123_v51  ;;  %vm2127_vm8 = vweird.f32 %v6026_v24  ;;  %v1987_v23 = vmul.f32 %v1986_v46, %v5981_v59  ;;  %v2021_v50 = vmul.f32 2.1237322e-06, %v6070_v61  ;;  %v2675_v51 = vpop.f32.mrf.mxu1 }
 0x2dc   : > { %vm2128_vm10 = vweird.f32 %v6063_v41  ;;  %v1999_v47 = vadd.f32 0.4994258, %v1998_v49  ;;  %v2159_v15 = vadd.f32 0.4994258, %v2158_v0  ;;  %v1007_v54 = vpack.c.bf16 %v979_v38, %v6023_v9 }
 0x2dd   : > { %v2125_v18 = vmul.f32 %v6063_v41, %v2124_v56  ;;  %v2131_v55 = vand.u32 2147483647, %v6026_v24  ;;  %v2133_v1 = vand.u32 2147483648, %v6026_v24  ;;  %v2148_v60 = vadd.f32 0.18741608, %v2147_v28  ;;  %vm6099_vm12 = vmor %vm2127_vm8, %vm2128_vm10 }
 0x2de   : > { %v1966_v57 = vadd.f32 %v6017_v17, %v1965_v39  ;;  %v2000_v32 = vmul.f32 %v1999_v47, %v5981_v59  ;;  %v2160_v53 = vmul.f32 %v2159_v15, %v5992_v12  ;;  %v2032_v46 = vmul.f32 3.8918573e-05, %v6070_v61  ;;  %4186 = vmatmul.msk.bf16.gmra.mxu3 %vm1013_vm9, %v1007_v54  ;;  %vm6110_vm9 = vmor %vm1967_vm5, %vm1968_vm6 }
 0x2df   : > { %v2126_v9 = vadd.f32 %v6063_v41, %v2125_v18  ;;  %v1988_v26 = vadd.f32 0.18741608, %v1987_v23  ;;  %v2022_v30 = vadd.f32 0.00028619796, %v2021_v50  ;;  %v6104_v35 = vadd.f32 %v5541_v29, %v1127_v22 }
 0x2e0   : > { %v1974_v39 = vor.u32 1.1754944e-38, %v1973_v36  ;;  %v2110_v24 = vadd.f32 1.1283791, %v2109_v11  ;;  %v2001_v49 = vadd.f32 1.0, %v2000_v32  ;;  %v6114_v28 = vadd.f32 1.0, %v2160_v53 }
 0x2e1   : > { %v2516_v0 = vadd.f32 1.0, %v4204_v31  ;;  %v2134_v56 = vor.u32 1.1754944e-38, %v2133_v1  ;;  %v2149_v23 = vmul.f32 %v2148_v60, %v5992_v12  ;;  %v2033_v29 = vadd.f32 0.001143296, %v2032_v46  ;;  %v6132_v31 = vld [vmem:[%s7115_s6] ss:$0 sm:$0xff] }
 0x2e2   : > { %v2130_v50 = vsel %vm6099_vm12, %v6063_v41, %v2126_v9  ;;  %vm2132_vm13 = vcmp.eq.f32.partialorder %v2131_v55, 8.507059e+37  ;;  %4586 = vrcp.f32 %v2001_v49  ;;  %v6121_v5 = vmul.f32 0.70710677, %v6104_v35 }
 0x2e3   : > { %v1970_v36 = vsel %vm6110_vm9, %v6017_v17, %v1966_v57  ;;  %v1989_v11 = vmul.f32 %v1988_v26, %v5981_v59  ;;  %4588 = vrcp.f32 %v6114_v28  ;;  %v2023_v12 = vmul.f32 %v2022_v30, %v6070_v61  ;;  %v6155_v1 = vpop.f32.mrf.mxu1 }
 0x2e4   : > { %v6136_v41 = vmul.f32 %v6044_v52, %v5816_v62  ;;  %v2111_v47 = vmul.f32 %v2110_v24, %v5858_v48  ;;  %v6141_v17 = vmul.f32 %v6050_v21, %v5861_v45  ;;  %v2135_v59 = vsel %vm2132_vm13, %v2134_v56, %v2130_v50 }
 0x2e5   : > { %v2150_v15 = vadd.f32 1.1283791, %v2149_v23  ;;  %v2034_v54 = vmul.f32 %v2033_v29, %v6070_v61  ;;  %v6145_v22 = vmul.f32 %v2516_v0, %v6031_v6  ;;  %v1975_v18 = vsel %vm6077_vm7, %v1974_v39, %v1970_v36 }
 0x2e6   : > { %v2059_v62 = vmul.f32 %v6121_v5, %v6121_v5  ;;  %v2570_v48 = vpack.c.bf16 %v6048_v63, %v6042_v20  ;;  %v1990_v52 = vadd.f32 1.1283791, %v1989_v11  ;;  %v2024_v55 = vadd.f32 0.0036580483, %v2023_v12 }
 0x2e7   : > { %v2035_v45 = vadd.f32 0.014752088, %v2034_v54  ;;  %v2674_v21 = vadd.f32 %v6132_v31, %v6061_v37  ;;  %v2136_v6 = vmul.f32 %v2135_v59, %v2111_v47  ;;  %vm2007_vm14 = vweird.f32 %v2001_v49 }
 0x2e8   : > { %v4587_v60 = vpop.eup %4586  ;;  %v2011_v57 = vand.u32 2147483647, %v2001_v49  ;;  %v6157_v58 = vmin.f32 %v2059_v62, 16.0  ;;  %v2013_v46 = vand.u32 2147483648, %v2001_v49  ;;  %v2151_v9 = vmul.f32 %v2150_v15, %v5958_v43 }
 0x2e9   : > { %v4589_v32 = vpop.eup %4588  ;;  %v2003_v53 = vmul.f32 %v4587_v60, %v2001_v49  ;;  %vm2167_vm15 = vweird.f32 %v6114_v28  ;;  %4242 = vmatmul.msk.bf16.gmra.mxu1 %vm2615_vm11, %v2570_v48  ;;  %2753 = vxpose.xlu2.b32.start [1/4] (short) (narrow) %v2674_v21, 8  ;;  %v2171_v63 = vand.u32 2147483647, %v6114_v28  ;;  %v2036_v37 = vmul.f32 %v2035_v45, %v6070_v61 }
 0x2ea   : > { %v2163_v20 = vmul.f32 %v4589_v32, %v6114_v28  ;;  %v2061_v10 = vmul.f32 2.1237322e-06, %v6157_v58  ;;  %vm2008_vm1 = vweird.f32 %v4587_v60  ;;  %v2173_v30 = vand.u32 2147483648, %v6114_v28 }
 0x2eb   : > { %v2004_v26 = vsub.f32 1.0, %v2003_v53  ;;  %v2072_v38 = vmul.f32 3.8918573e-05, %v6157_v58  ;;  %vm2168_vm2 = vweird.f32 %v4589_v32  ;;  %v2037_v39 = vadd.f32 0.112945676, %v2036_v37  ;;  %vm6174_vm4 = vmor %vm2007_vm14, %vm2008_vm1  ;;  %v2680_v62 = vpop.f32.mrf.mxu1 }
 0x2ec   : > { %v2164_v43 = vsub.f32 1.0, %v2163_v20  ;;  %v2062_v24 = vadd.f32 0.00028619796, %v2061_v10  ;;  %vm6168_vm3 = vcmp.eq.f32.partialorder %v2011_v57, 8.507059e+37  ;;  %v2676_v29 = vadd.f32 %v6132_v31, %v2675_v51  ;;  %vm6182_vm5 = vmor %vm2167_vm15, %vm2168_vm2 }
 0x2ed   : > { %v2005_v0 = vmul.f32 %v4587_v60, %v2004_v26  ;;  %v2073_v23 = vadd.f32 0.001143296, %v2072_v38  ;;  %v2014_v36 = vor.u32 1.1754944e-38, %v2013_v46  ;;  %v2038_v12 = vmul.f32 %v2037_v39, %v6070_v61 }
 0x2ee   : > { %v2165_v11 = vmul.f32 %v4589_v32, %v2164_v43  ;;  %v2063_v47 = vmul.f32 %v2062_v24, %v6157_v58  ;;  %v4209_v59 = vclamps-f32 %v2136_v6, 1.0  ;;  %v2174_v51 = vor.u32 1.1754944e-38, %v2173_v30 }
 0x2ef   : > { %v2006_v15 = vadd.f32 %v4587_v60, %v2005_v0  ;;  %v2074_v49 = vmul.f32 %v2073_v23, %v6157_v58  ;;  %vm2172_vm6 = vcmp.eq.f32.partialorder %v2171_v63, 8.507059e+37  ;;  %v2025_v45 = vmul.f32 %v2024_v55, %v6070_v61 }
 0x2f0   : > { %v2166_v48 = vadd.f32 %v4589_v32, %v2165_v11  ;;  %v2039_v21 = vadd.f32 0.4994258, %v2038_v12  ;;  %v1991_v57 = vmul.f32 %v1990_v52, %v5934_v13  ;;  %v2064_v53 = vadd.f32 0.0036580483, %v2063_v47 }
 0x2f1   : > { %v2010_v6 = vsel %vm6174_vm4, %v4587_v60, %v2006_v15  ;;  %v2075_v28 = vadd.f32 0.014752088, %v2074_v49  ;;  %2754 = vxpose.xlu2.b32.cont [2/4] (short) (narrow) %v2676_v29, 8  ;;  %v1177_v46 = vmul.f32 0.5, %v5842_v16  ;;  %v1976_v55 = vmul.f32 %v1975_v18, %v6136_v41 }
 0x2f2   : > { %v2015_v20 = vsel %vm6168_vm3, %v2014_v36, %v2010_v6  ;;  %v2170_v37 = vsel %vm6182_vm5, %v4589_v32, %v2166_v48  ;;  %v2040_v63 = vmul.f32 %v2039_v21, %v6070_v61  ;;  %v2521_v10 = vadd.f32 1.0, %v4209_v59 }
 0x2f3   : > { %v2175_v13 = vsel %vm2172_vm6, %v2174_v51, %v2170_v37  ;;  %v2076_v52 = vmul.f32 %v2075_v28, %v6157_v58  ;;  %v2026_v26 = vadd.f32 0.05243302, %v2025_v45  ;;  %v2571_v16 = vpack.c.bf16 %v6145_v22, %v6141_v17 }
 0x2f4   : > { %v2176_v60 = vmul.f32 %v2175_v13, %v2151_v9  ;;  %v2041_v30 = vadd.f32 1.0, %v2040_v63  ;;  %v2016_v38 = vmul.f32 %v2015_v20, %v1991_v57  ;;  %v2065_v43 = vmul.f32 %v2064_v53, %v6157_v58  ;;  %v2683_v9 = vpop.f32.mrf.mxu1 }
 0x2f5   : > { %v2077_v39 = vadd.f32 0.112945676, %v2076_v52  ;;  %v2679_v32 = vadd.f32 %v6132_v31, %v6155_v1  ;;  %v1178_v24 = vmul.f32 0.5, %v5941_v7  ;;  %v4205_v18 = vclamps-f32 %v1976_v55, 1.0 }
 0x2f6   : > { %v4210_v41 = vclamps-f32 %v2176_v60, 1.0  ;;  %4590 = vrcp.f32 %v2041_v30  ;;  %v2553_v56 = vmul.f32 %v2521_v10, %v1177_v46  ;;  %v2027_v29 = vmul.f32 %v2026_v26, %v6070_v61 }
 0x2f7   : > { %v2078_v0 = vmul.f32 %v2077_v39, %v6157_v58  ;;  %v2684_v17 = vadd.f32 %v6132_v31, %v2683_v9  ;;  %v4206_v22 = vclamps-f32 %v2016_v38, 1.0  ;;  %v2066_v50 = vadd.f32 0.05243302, %v2065_v43  ;;  %v6222_v39 = vld [vmem:[%s7137_s4] ss:$0 sm:$0xff]  ;;  %s4090_s4 = scalar_lea.sflag [#allocation4], %s486_s0 }
 0x2f8   : > { %v2522_v23 = vadd.f32 1.0, %v4210_v41  ;;  %v1173_v7 = vmul.f32 0.5, %v5785_v42  ;;  %v1174_v11 = vmul.f32 0.5, %v5913_v34  ;;  %v2517_v59 = vadd.f32 1.0, %v4205_v18 }
 0x2f9   : > { %v2079_v36 = vadd.f32 0.4994258, %v2078_v0  ;;  %4243 = vmatmul.msk.bf16.gmra.mxu1 %vm2615_vm11, %v2571_v16  ;;  %2755 = vxpose.xlu2.b32.cont [3/4] (short) (narrow) %v2679_v32, 8  ;;  %v2028_v15 = vadd.f32 0.18741608, %v2027_v29  ;;  %v2681_v54 = vadd.f32 %v6132_v31, %v2680_v62  ;;  %v2518_v49 = vadd.f32 1.0, %v4206_v22 }
 0x2fa   : > { %v2554_v1 = vmul.f32 %v2522_v23, %v1178_v24  ;;  %2785 = vxpose.xlu1.b32.start [1/4] (short) (narrow) %v2684_v17, 8  ;;  %v2067_v45 = vmul.f32 %v2066_v50, %v6157_v58  ;;  %vm2047_vm7 = vweird.f32 %v2041_v30  ;;  %v2053_v42 = vand.u32 2147483648, %v2041_v30 }
 0x2fb   : > { %v2080_v12 = vmul.f32 %v2079_v36, %v6157_v58  ;;  %v2029_v6 = vmul.f32 %v2028_v15, %v6070_v61  ;;  %v2051_v53 = vand.u32 2147483647, %v2041_v30  ;;  %v2549_v62 = vmul.f32 %v2517_v59, %v1173_v7 }
 0x2fc   : > { %v4591_v47 = vpop.eup %4590  ;;  %v2574_v51 = vpack.c.bf16 %v2554_v1, %v2553_v56  ;;  %v2685_v34 = vpop.f32.mrf.mxu1  ;;  %v2550_v46 = vmul.f32 %v2518_v49, %v1174_v11  ;;  %v2068_v37 = vadd.f32 0.18741608, %v2067_v45  ;;  %v2054_v55 = vor.u32 1.1754944e-38, %v2053_v42 }
 0x2fd   : > { %v2043_v48 = vmul.f32 %v4591_v47, %v2041_v30  ;;  %v2081_v21 = vadd.f32 1.0, %v2080_v12  ;;  %vm2048_vm8 = vweird.f32 %v4591_v47  ;;  %v2686_v28 = vadd.f32 %v6132_v31, %v2685_v34 }
 0x2fe   : > { %4246 = vmatmul.msk.bf16.vlgmr.msra.gmra.mxu2 %vm2615_vm11, %v2574_v51  ;;  %vm2049_vm10 = vmor %vm2047_vm7, %vm2048_vm8  ;;  %v2030_v10 = vadd.f32 1.1283791, %v2029_v6  ;;  %vm2052_vm12 = vcmp.eq.f32.partialorder %v2051_v53, 8.507059e+37  ;;  %v2069_v60 = vmul.f32 %v2068_v37, %v6157_v58  ;;  %v2572_v61 = vpack.c.bf16 %v2550_v46, %v2549_v62 }
 0x2ff   : > { %v2044_v57 = vsub.f32 1.0, %v2043_v48  ;;  %4592 = vrcp.f32 %v2081_v21  ;;  %vm2087_vm9 = vweird.f32 %v2081_v21  ;;  %v2093_v58 = vand.u32 2147483648, %v2081_v21 }
 0x300   : > { %v2031_v32 = vmul.f32 %v2030_v10, %v6039_v44  ;;  %v2070_v18 = vadd.f32 1.1283791, %v2069_v60  ;;  %v2091_v23 = vand.u32 2147483647, %v2081_v21  ;;  %v1175_v48 = vmul.f32 0.5, %v6015_v25 }
 0x301   : > { %v2045_v20 = vmul.f32 %v4591_v47, %v2044_v57  ;;  %2756 = vxpose.xlu2.b32.end [4/4] (short) (narrow) %v2681_v54, 8  ;;  %v2094_v17 = vor.u32 1.1754944e-38, %v2093_v58  ;;  %v1176_v45 = vmul.f32 0.5, %v6104_v35 }
 0x302   : > { %2786 = vxpose.xlu1.b32.cont [2/4] (short) (narrow) %v2686_v28, 8  ;;  %v2071_v36 = vmul.f32 %v2070_v18, %v6121_v5  ;;  %vm2092_vm15 = vcmp.eq.f32.partialorder %v2091_v23, 8.507059e+37 }
 0x303   : > { %v2046_v63 = vadd.f32 %v4591_v47, %v2045_v20 }
 0x304   : > { %v2688_v43 = vpop.f32.mrf.mxu1 }
 0x305   : > { %v4593_v13 = vpop.eup %4592  ;;  %v2050_v52 = vsel %vm2049_vm10, %v4591_v47, %v2046_v63  ;;  %v2689_v41 = vadd.f32 %v6132_v31, %v2688_v43 }
 0x306   : > { %v2083_v26 = vmul.f32 %v4593_v13, %v2081_v21  ;;  %v1135_v16 = vpop.f32.mrf.mxu3  ;;  %v2055_v38 = vsel %vm2052_vm12, %v2054_v55, %v2050_v52  ;;  %vm2088_vm13 = vweird.f32 %v4593_v13 }
 0x307   : > { %v6225_v30 = vadd.f32 %v6222_v39, %v1135_v16  ;;  %v2056_v9 = vmul.f32 %v2055_v38, %v2031_v32  ;;  %vm2089_vm14 = vmor %vm2087_vm9, %vm2088_vm13 }
 0x308   : > { %v2084_v24 = vsub.f32 1.0, %v2083_v26 }
 0x309   : > { %4244 = vmatmul.msk.bf16.gmra.mxu1 %vm2615_vm11, %v2572_v61  ;;  %v6231_v0 = vmul.f32 0.70710677, %v6225_v30  ;;  %v4207_v50 = vclamps-f32 %v2056_v9, 1.0 }
 0x30a   : > { %v2085_v56 = vmul.f32 %v4593_v13, %v2084_v24  ;;  %2787 = vxpose.xlu1.b32.cont [3/4] (short) (narrow) %v2689_v41, 8 }
 0x30b   : > { %v2179_v29 = vmul.f32 %v6231_v0, %v6231_v0  ;;  %v2519_v54 = vadd.f32 1.0, %v4207_v50 }
 0x30c   : > { %v2086_v44 = vadd.f32 %v4593_v13, %v2085_v56  ;;  %v2690_v11 = vpop.f32.mrf.mxu1 }
 0x30d   : > { %v6235_v22 = vmin.f32 %v2179_v29, 16.0  ;;  %v2691_v59 = vadd.f32 %v6132_v31, %v2690_v11  ;;  %v2551_v42 = vmul.f32 %v2519_v54, %v1175_v48 }
 0x30e   : > { %v2090_v1 = vsel %vm2089_vm14, %v4593_v13, %v2086_v44  ;;  %v1137_v25 = vpop.f32.mrf.mxu3 }
 0x30f   : > { %v2095_v7 = vsel %vm2092_vm15, %v2094_v17, %v2090_v1  ;;  %v2192_v12 = vmul.f32 3.8918573e-05, %v6235_v22  ;;  %v2181_v21 = vmul.f32 2.1237322e-06, %v6235_v22  ;;  %v6249_v37 = vadd.f32 %v6222_v39, %v1137_v25 }
 0x310   : > { %v2096_v47 = vmul.f32 %v2095_v7, %v2071_v36 }
 0x311   : > { %v2193_v15 = vadd.f32 0.001143296, %v2192_v12  ;;  %v2182_v46 = vadd.f32 0.00028619796, %v2181_v21  ;;  %v6253_v10 = vmul.f32 0.70710677, %v6249_v37 }
 0x312   : > { %v4208_v51 = vclamps-f32 %v2096_v47, 1.0  ;;  %2788 = vxpose.xlu1.b32.end [4/4] (short) (narrow) %v2691_v59, 8 }
 0x313   : > { %v2194_v49 = vmul.f32 %v2193_v15, %v6235_v22  ;;  %v2183_v63 = vmul.f32 %v2182_v46, %v6235_v22  ;;  %v2219_v26 = vmul.f32 %v6253_v10, %v6253_v10 }
 0x314   : > { %v2520_v5 = vadd.f32 1.0, %v4208_v51  ;;  %v2693_v6 = vpop.f32.mrf.mxu1 }
 0x315   : > { %v2195_v57 = vadd.f32 0.014752088, %v2194_v49  ;;  %v2694_v62 = vadd.f32 %v6132_v31, %v2693_v6  ;;  %v2184_v60 = vadd.f32 0.0036580483, %v2183_v63  ;;  %v2220_v38 = vmin.f32 %v2219_v26, 16.0 }
 0x316   : > { %v2552_v34 = vmul.f32 %v2520_v5, %v1176_v45 }
 0x317   : > { %v2196_v53 = vmul.f32 %v2195_v57, %v6235_v22  ;;  %2817 = vxpose.xlu0.b32.start [1/4] (short) (narrow) %v2694_v62, 8  ;;  %v2185_v43 = vmul.f32 %v2184_v60, %v6235_v22  ;;  %v2221_v32 = vmul.f32 2.1237322e-06, %v2220_v38  ;;  %v2232_v24 = vmul.f32 3.8918573e-05, %v2220_v38 }
 0x318   : > { %v2573_v28 = vpack.c.bf16 %v2552_v34, %v2551_v42 }
 0x319   : > { %v2197_v20 = vadd.f32 0.112945676, %v2196_v53  ;;  %v2222_v41 = vadd.f32 0.00028619796, %v2221_v32  ;;  %v2233_v18 = vadd.f32 0.001143296, %v2232_v24 }
 0x31a   : > { %4245 = vmatmul.msk.bf16.gmra.mxu1 %vm2615_vm11, %v2573_v28  ;;  %v2186_v58 = vadd.f32 0.05243302, %v2185_v43 }
 0x31b   : > { %v2198_v35 = vmul.f32 %v2197_v20, %v6235_v22  ;;  %v2223_v9 = vmul.f32 %v2222_v41, %v2220_v38  ;;  %v2234_v56 = vmul.f32 %v2233_v18, %v2220_v38  ;;  %v1140_v23 = vpop.f32.mrf.mxu3 }
 0x31c   : > { %v2695_v52 = vpop.f32.mrf.mxu1  ;;  %v2187_v7 = vmul.f32 %v2186_v58, %v6235_v22  ;;  %v6267_v54 = vadd.f32 %v6222_v39, %v1140_v23 }
 0x31d   : > { %v2199_v55 = vadd.f32 0.4994258, %v2198_v35  ;;  %v2696_v61 = vadd.f32 %v6132_v31, %v2695_v52  ;;  %v2224_v44 = vadd.f32 0.0036580483, %v2223_v9  ;;  %v2235_v17 = vadd.f32 0.014752088, %v2234_v56 }
 0x31e   : > { %v2188_v51 = vadd.f32 0.18741608, %v2187_v7  ;;  %v6270_v45 = vmul.f32 0.70710677, %v6267_v54 }
 0x31f   : > { %v2200_v13 = vmul.f32 %v2199_v55, %v6235_v22  ;;  %2818 = vxpose.xlu0.b32.cont [2/4] (short) (narrow) %v2696_v61, 8  ;;  %v2225_v11 = vmul.f32 %v2224_v44, %v2220_v38  ;;  %v2236_v12 = vmul.f32 %v2235_v17, %v2220_v38 }
 0x320   : > { %v2259_v6 = vmul.f32 %v6270_v45, %v6270_v45  ;;  %v2189_v62 = vmul.f32 %v2188_v51, %v6235_v22 }
 0x321   : > { %v6259_v16 = vadd.f32 1.0, %v2200_v13  ;;  %v2226_v47 = vadd.f32 0.05243302, %v2225_v11  ;;  %v2237_v59 = vadd.f32 0.112945676, %v2236_v12 }
 0x322   : > { %v6283_v20 = vmin.f32 %v2259_v6, 16.0  ;;  %v2190_v26 = vadd.f32 1.1283791, %v2189_v62 }
 0x323   : > { %4594 = vrcp.f32 %v6259_v16  ;;  %v2238_v49 = vmul.f32 %v2237_v59, %v2220_v38  ;;  %v1142_v48 = vpop.f32.mrf.mxu3  ;;  %v2227_v21 = vmul.f32 %v2226_v47, %v2220_v38  ;;  %vm2207_vm1 = vweird.f32 %v6259_v16 }
 0x324   : > { %v6273_v5 = vadd.f32 %v6222_v39, %v1142_v48  ;;  %v2211_v35 = vand.u32 2147483647, %v6259_v16  ;;  %v2213_v63 = vand.u32 2147483648, %v6259_v16  ;;  %v2261_v52 = vmul.f32 2.1237322e-06, %v6283_v20 }
 0x325   : > { %v2239_v57 = vadd.f32 0.4994258, %v2238_v49  ;;  %v2272_v22 = vmul.f32 3.8918573e-05, %v6283_v20 }
 0x326   : > { %v6279_v28 = vmul.f32 0.70710677, %v6273_v5  ;;  %v2262_v43 = vadd.f32 0.00028619796, %v2261_v52  ;;  %v2214_v32 = vor.u32 1.1754944e-38, %v2213_v63  ;;  %vm2212_vm4 = vcmp.eq.f32.partialorder %v2211_v35, 8.507059e+37 }
 0x327   : > { %v2240_v46 = vmul.f32 %v2239_v57, %v2220_v38  ;;  %v2273_v24 = vadd.f32 0.001143296, %v2272_v22 }
 0x328   : > { %v2299_v25 = vmul.f32 %v6279_v28, %v6279_v28  ;;  %v2263_v58 = vmul.f32 %v2262_v43, %v6283_v20 }
 0x329   : > { %v4595_v29 = vpop.eup %4594  ;;  %v2241_v55 = vadd.f32 1.0, %v2240_v46  ;;  %v2274_v9 = vmul.f32 %v2273_v24, %v6283_v20 }
 0x32a   : > { %v2698_v50 = vpop.f32.mrf.mxu1  ;;  %v2203_v36 = vmul.f32 %v4595_v29, %v6259_v16  ;;  %vm2208_vm2 = vweird.f32 %v4595_v29  ;;  %v6291_v60 = vmin.f32 %v2299_v25, 16.0  ;;  %v2264_v23 = vadd.f32 0.0036580483, %v2263_v58 }
 0x32b   : > { %v2699_v1 = vadd.f32 %v6132_v31, %v2698_v50  ;;  %vm6293_vm3 = vmor %vm2207_vm1, %vm2208_vm2  ;;  %4596 = vrcp.f32 %v2241_v55  ;;  %v2191_v50 = vmul.f32 %v2190_v26, %v6231_v0  ;;  %vm2247_vm5 = vweird.f32 %v2241_v55 }
 0x32c   : > { %v2204_v15 = vsub.f32 1.0, %v2203_v36  ;;  %v2312_v16 = vmul.f32 3.8918573e-05, %v6291_v60  ;;  %v2253_v47 = vand.u32 2147483648, %v2241_v55  ;;  %v2301_v6 = vmul.f32 2.1237322e-06, %v6291_v60 }
 0x32d   : > { %2819 = vxpose.xlu0.b32.cont [3/4] (short) (narrow) %v2699_v1, 8  ;;  %v2275_v1 = vadd.f32 0.014752088, %v2274_v9 }
 0x32e   : > { %v2205_v34 = vmul.f32 %v4595_v29, %v2204_v15  ;;  %v2313_v56 = vadd.f32 0.001143296, %v2312_v16  ;;  %v2254_v62 = vor.u32 1.1754944e-38, %v2253_v47 }
 0x32f   : > { %v2276_v59 = vmul.f32 %v2275_v1, %v6283_v20 }
 0x330   : > { %v2206_v13 = vadd.f32 %v4595_v29, %v2205_v34  ;;  %v2314_v7 = vmul.f32 %v2313_v56, %v6291_v60 }
 0x331   : > { %v4597_v17 = vpop.eup %4596  ;;  %v2277_v0 = vadd.f32 0.112945676, %v2276_v59  ;;  %v1179_v59 = vmul.f32 0.5, %v6225_v30 }
 0x332   : > { %v2700_v42 = vpop.f32.mrf.mxu1  ;;  %v2210_v41 = vsel %vm6293_vm3, %v4595_v29, %v2206_v13  ;;  %v2243_v12 = vmul.f32 %v4597_v17, %v2241_v55  ;;  %v2265_v29 = vmul.f32 %v2264_v23, %v6283_v20  ;;  %v2315_v15 = vadd.f32 0.014752088, %v2314_v7 }
 0x333   : > { %v2701_v53 = vadd.f32 %v6132_v31, %v2700_v42  ;;  %v2228_v31 = vadd.f32 0.18741608, %v2227_v21  ;;  %v2215_v36 = vsel %vm2212_vm4, %v2214_v32, %v2210_v41  ;;  %vm2248_vm6 = vweird.f32 %v4597_v17 }
 0x334   : > { %v2244_v51 = vsub.f32 1.0, %v2243_v12  ;;  %v2266_v49 = vadd.f32 0.05243302, %v2265_v29  ;;  %v2316_v21 = vmul.f32 %v2315_v15, %v6291_v60  ;;  %v2216_v57 = vmul.f32 %v2215_v36, %v2191_v50  ;;  %vm6313_vm7 = vmor %vm2247_vm5, %vm2248_vm6 }
 0x335   : > { %2820 = vxpose.xlu0.b32.end [4/4] (short) (narrow) %v2701_v53, 8  ;;  %v2229_v18 = vmul.f32 %v2228_v31, %v2220_v38  ;;  %v2251_v38 = vand.u32 2147483647, %v2241_v55  ;;  %v2278_v46 = vmul.f32 %v2277_v0, %v6283_v20  ;;  %v2302_v13 = vadd.f32 0.00028619796, %v2301_v6 }
 0x336   : > { %v2245_v42 = vmul.f32 %v4597_v17, %v2244_v51  ;;  %v2267_v34 = vmul.f32 %v2266_v49, %v6283_v20  ;;  %v2317_v25 = vadd.f32 0.112945676, %v2316_v21  ;;  %v4211_v58 = vclamps-f32 %v2216_v57, 1.0 }
 0x337   : > { %v2230_v11 = vadd.f32 1.1283791, %v2229_v18  ;;  %vm2252_vm8 = vcmp.eq.f32.partialorder %v2251_v38, 8.507059e+37  ;;  %v2279_v22 = vadd.f32 0.4994258, %v2278_v46  ;;  %v2303_v32 = vmul.f32 %v2302_v13, %v6291_v60 }
 0x338   : > { %v2246_v31 = vadd.f32 %v4597_v17, %v2245_v42  ;;  %v2318_v55 = vmul.f32 %v2317_v25, %v6291_v60  ;;  %v2268_v43 = vadd.f32 0.18741608, %v2267_v34  ;;  %v2523_v15 = vadd.f32 1.0, %v4211_v58 }
 0x339   : > { %v2231_v63 = vmul.f32 %v2230_v11, %v6253_v10  ;;  %v2280_v16 = vmul.f32 %v2279_v22, %v6283_v20  ;;  %v2304_v56 = vadd.f32 0.0036580483, %v2303_v32  ;;  %v1180_v34 = vmul.f32 0.5, %v6249_v37 }
 0x33a   : > { %v2250_v26 = vsel %vm6313_vm7, %v4597_v17, %v2246_v31  ;;  %v2319_v41 = vadd.f32 0.4994258, %v2318_v55  ;;  %v2269_v1 = vmul.f32 %v2268_v43, %v6283_v20  ;;  %v2555_v46 = vmul.f32 %v2523_v15, %v1179_v59 }
 0x33b   : > { %v2255_v10 = vsel %vm2252_vm8, %v2254_v62, %v2250_v26  ;;  %v2305_v7 = vmul.f32 %v2304_v56, %v6291_v60 }
 0x33c   : > { %v2256_v9 = vmul.f32 %v2255_v10, %v2231_v63  ;;  %v2320_v17 = vmul.f32 %v2319_v41, %v6291_v60  ;;  %v2270_v0 = vadd.f32 1.1283791, %v2269_v1 }
 0x33d   : > { %v1145_v44 = vpop.f32.mrf.mxu3  ;;  %v2306_v29 = vadd.f32 0.05243302, %v2305_v7 }
 0x33e   : > { %v6307_v48 = vadd.f32 %v6222_v39, %v1145_v44  ;;  %v2281_v44 = vadd.f32 1.0, %v2280_v16  ;;  %v4212_v12 = vclamps-f32 %v2256_v9, 1.0  ;;  %v2321_v38 = vadd.f32 1.0, %v2320_v17 }
 0x33f   : > { %v2307_v21 = vmul.f32 %v2306_v29, %v6291_v60  ;;  %v2271_v31 = vmul.f32 %v2270_v0, %v6270_v45 }
 0x340   : > { %v6319_v35 = vmul.f32 0.70710677, %v6307_v48  ;;  %4598 = vrcp.f32 %v2281_v44  ;;  %v2293_v20 = vand.u32 2147483648, %v2281_v44  ;;  %v2524_v6 = vadd.f32 1.0, %v4212_v12 }
 0x341   : > { %4600 = vrcp.f32 %v2321_v38  ;;  %v2308_v53 = vadd.f32 0.18741608, %v2307_v21  ;;  %vm2287_vm10 = vweird.f32 %v2281_v44  ;;  %v2291_v55 = vand.u32 2147483647, %v2281_v44 }
 0x342   : > { %v2339_v61 = vmul.f32 %v6319_v35, %v6319_v35  ;;  %v2556_v43 = vmul.f32 %v2524_v6, %v1180_v34  ;;  %vm2327_vm9 = vweird.f32 %v2321_v38  ;;  %v2333_v56 = vand.u32 2147483648, %v2321_v38 }
 0x343   : > { %vm2292_vm15 = vcmp.eq.f32.partialorder %v2291_v55, 8.507059e+37  ;;  %v1182_v55 = vmul.f32 0.5, %v6273_v5 }
 0x344   : > { %v6332_v18 = vmin.f32 %v2339_v61, 16.0  ;;  %v2294_v61 = vor.u32 1.1754944e-38, %v2293_v20  ;;  %v2575_v12 = vpack.c.bf16 %v2556_v43, %v2555_v46  ;;  %v2334_v0 = vor.u32 1.1754944e-38, %v2333_v56 }
 0x345   : > { %v1147_v52 = vpop.f32.mrf.mxu3 }
 0x346   : > { %v6329_v24 = vadd.f32 %v6222_v39, %v1147_v52  ;;  %v2341_v50 = vmul.f32 2.1237322e-06, %v6332_v18  ;;  %v2352_v36 = vmul.f32 3.8918573e-05, %v6332_v18  ;;  %v4599_v30 = vpop.eup %4598  ;;  %v2309_v52 = vmul.f32 %v2308_v53, %v6291_v60  ;;  %4247 = vmatmul.msk.bf16.gmra.mxu2 %vm2615_vm11, %v2575_v12 }
 0x347   : > { %v2283_v13 = vmul.f32 %v4599_v30, %v2281_v44  ;;  %v4601_v37 = vpop.eup %4600  ;;  %vm2288_vm12 = vweird.f32 %v4599_v30  ;;  %v2331_v60 = vand.u32 2147483647, %v2321_v38 }
 0x348   : > { %v6335_v23 = vmul.f32 0.70710677, %v6329_v24  ;;  %v2342_v47 = vadd.f32 0.00028619796, %v2341_v50  ;;  %v2353_v51 = vadd.f32 0.001143296, %v2352_v36  ;;  %v2323_v16 = vmul.f32 %v4601_v37, %v2321_v38  ;;  %vm6358_vm13 = vmor %vm2287_vm10, %vm2288_vm12 }
 0x349   : > { %v2284_v32 = vsub.f32 1.0, %v2283_v13  ;;  %v2310_v9 = vadd.f32 1.1283791, %v2309_v52  ;;  %vm2328_vm14 = vweird.f32 %v4601_v37  ;;  %vm2332_vm2 = vcmp.eq.f32.partialorder %v2331_v60, 8.507059e+37 }
 0x34a   : > { %v2379_v11 = vmul.f32 %v6335_v23, %v6335_v23  ;;  %v2343_v57 = vmul.f32 %v2342_v47, %v6332_v18  ;;  %v2354_v42 = vmul.f32 %v2353_v51, %v6332_v18  ;;  %v2324_v50 = vsub.f32 1.0, %v2323_v16  ;;  %vm6367_vm1 = vmor %vm2327_vm9, %vm2328_vm14 }
 0x34b   : > { %v2285_v58 = vmul.f32 %v4599_v30, %v2284_v32  ;;  %v1181_v52 = vmul.f32 0.5, %v6267_v54 }
 0x34c   : > { %v6345_v49 = vmin.f32 %v2379_v11, 16.0  ;;  %v2344_v25 = vadd.f32 0.0036580483, %v2343_v57  ;;  %v2355_v63 = vadd.f32 0.014752088, %v2354_v42  ;;  %v2325_v29 = vmul.f32 %v4601_v37, %v2324_v50 }
 0x34d   : > { %v2286_v7 = vadd.f32 %v4599_v30, %v2285_v58  ;;  %v2311_v57 = vmul.f32 %v2310_v9, %v6279_v28 }
 0x34e   : > { %v2392_v62 = vmul.f32 3.8918573e-05, %v6345_v49  ;;  %v2356_v26 = vmul.f32 %v2355_v63, %v6332_v18  ;;  %v2345_v41 = vmul.f32 %v2344_v25, %v6332_v18  ;;  %v2381_v1 = vmul.f32 2.1237322e-06, %v6345_v49 }
 0x34f   : > { %v2290_v44 = vsel %vm6358_vm13, %v4599_v30, %v2286_v7  ;;  %v2326_v42 = vadd.f32 %v4601_v37, %v2325_v29 }
 0x350   : > { %v2393_v22 = vadd.f32 0.001143296, %v2392_v62  ;;  %v2357_v45 = vadd.f32 0.112945676, %v2356_v26  ;;  %v2346_v47 = vadd.f32 0.05243302, %v2345_v41  ;;  %v2295_v20 = vsel %vm2292_vm15, %v2294_v61, %v2290_v44 }
 0x351   : > { %v2382_v15 = vadd.f32 0.00028619796, %v2381_v1  ;;  %v2296_v6 = vmul.f32 %v2295_v20, %v2271_v31  ;;  %v2330_v38 = vsel %vm6367_vm1, %v4601_v37, %v2326_v42 }
 0x352   : > { %v2394_v10 = vmul.f32 %v2393_v22, %v6345_v49  ;;  %v2358_v36 = vmul.f32 %v2357_v45, %v6332_v18  ;;  %v2347_v62 = vmul.f32 %v2346_v47, %v6332_v18  ;;  %v2335_v63 = vsel %vm2332_vm2, %v2334_v0, %v2330_v38 }
 0x353   : > { %v2383_v53 = vmul.f32 %v2382_v15, %v6345_v49  ;;  %v4213_v25 = vclamps-f32 %v2296_v6, 1.0  ;;  %v2336_v22 = vmul.f32 %v2335_v63, %v2311_v57 }
 0x354   : > { %v2395_v11 = vadd.f32 0.014752088, %v2394_v10  ;;  %v2359_v59 = vadd.f32 0.4994258, %v2358_v36  ;;  %v2348_v43 = vadd.f32 0.18741608, %v2347_v62 }
 0x355   : > { %v2384_v13 = vadd.f32 0.0036580483, %v2383_v53  ;;  %v2525_v28 = vadd.f32 1.0, %v4213_v25  ;;  %v4214_v26 = vclamps-f32 %v2336_v22, 1.0 }
 0x356   : > { %v2396_v21 = vmul.f32 %v2395_v11, %v6345_v49  ;;  %v2360_v34 = vmul.f32 %v2359_v59, %v6332_v18  ;;  %v2349_v5 = vmul.f32 %v2348_v43, %v6332_v18 }
 0x357   : > { %v2385_v31 = vmul.f32 %v2384_v13, %v6345_v49  ;;  %v2557_v16 = vmul.f32 %v2525_v28, %v1181_v52  ;;  %v2526_v41 = vadd.f32 1.0, %v4214_v26 }
 0x358   : > { %v2361_v30 = vadd.f32 1.0, %v2360_v34  ;;  %v2397_v46 = vadd.f32 0.112945676, %v2396_v21  ;;  %v2350_v59 = vadd.f32 1.1283791, %v2349_v5 }
 0x359   : > { %v2386_v10 = vadd.f32 0.05243302, %v2385_v31  ;;  %v2558_v9 = vmul.f32 %v2526_v41, %v1182_v55 }
 0x35a   : > { %4602 = vrcp.f32 %v2361_v30  ;;  %v2398_v37 = vmul.f32 %v2397_v46, %v6345_v49  ;;  %v2373_v36 = vand.u32 2147483648, %v2361_v30  ;;  %vm2367_vm3 = vweird.f32 %v2361_v30 }
 0x35b   : > { %v2387_v50 = vmul.f32 %v2386_v10, %v6345_v49  ;;  %v2576_v11 = vpack.c.bf16 %v2558_v9, %v2557_v16  ;;  %v2371_v29 = vand.u32 2147483647, %v2361_v30  ;;  %v2351_v34 = vmul.f32 %v2350_v59, %v6319_v35 }
 0x35c   : > { %v2399_v45 = vadd.f32 0.4994258, %v2398_v37  ;;  %v2374_v0 = vor.u32 1.1754944e-38, %v2373_v36 }
 0x35d   : > { %v2388_v15 = vadd.f32 0.18741608, %v2387_v50  ;;  %4248 = vmatmul.msk.bf16.gmra.mxu2 %vm2615_vm11, %v2576_v11  ;;  %vm2372_vm6 = vcmp.eq.f32.partialorder %v2371_v29, 8.507059e+37 }
 0x35e   : > { %v2400_v60 = vmul.f32 %v2399_v45, %v6345_v49 }
 0x35f   : > { %v2389_v38 = vmul.f32 %v2388_v15, %v6345_v49 }
 0x360   : > { %v4603_v58 = vpop.eup %4602  ;;  %v2401_v1 = vadd.f32 1.0, %v2400_v60 }
 0x361   : > { %v1150_v61 = vpop.f32.mrf.mxu3  ;;  %v2363_v17 = vmul.f32 %v4603_v58, %v2361_v30  ;;  %vm2368_vm4 = vweird.f32 %v4603_v58  ;;  %v2390_v31 = vadd.f32 1.1283791, %v2389_v38 }
 0x362   : > { %v6384_v32 = vadd.f32 %v6222_v39, %v1150_v61  ;;  %4604 = vrcp.f32 %v2401_v1  ;;  %vm2369_vm5 = vmor %vm2367_vm3, %vm2368_vm4  ;;  %v2413_v13 = vand.u32 2147483648, %v2401_v1  ;;  %vm2407_vm7 = vweird.f32 %v2401_v1 }
 0x363   : > { %v2364_v12 = vsub.f32 1.0, %v2363_v17  ;;  %v2411_v35 = vand.u32 2147483647, %v2401_v1  ;;  %v2391_v5 = vmul.f32 %v2390_v31, %v6335_v23 }
 0x364   : > { %v6387_v54 = vmul.f32 0.70710677, %v6384_v32  ;;  %v2414_v10 = vor.u32 1.1754944e-38, %v2413_v13 }
 0x365   : > { %v2365_v18 = vmul.f32 %v4603_v58, %v2364_v12  ;;  %vm2412_vm12 = vcmp.eq.f32.partialorder %v2411_v35, 8.507059e+37 }
 0x366   : > { %v2419_v56 = vmul.f32 %v6387_v54, %v6387_v54 }
 0x367   : > { %v2366_v20 = vadd.f32 %v4603_v58, %v2365_v18  ;;  %v1183_v18 = vmul.f32 0.5, %v6307_v48 }
 0x368   : > { %v6394_v7 = vmin.f32 %v2419_v56, 16.0  ;;  %v4605_v46 = vpop.eup %4604  ;;  %v6418_v56 = vpop.f32.mrf.mxu1 }
 0x369   : > { %v1152_v47 = vpop.f32.mrf.mxu3  ;;  %v2370_v53 = vsel %vm2369_vm5, %v4603_v58, %v2366_v20  ;;  %v2403_v63 = vmul.f32 %v4605_v46, %v2401_v1  ;;  %vm2408_vm8 = vweird.f32 %v4605_v46 }
 0x36a   : > { %v2421_v44 = vmul.f32 2.1237322e-06, %v6394_v7  ;;  %v2432_v51 = vmul.f32 3.8918573e-05, %v6394_v7  ;;  %v6400_v21 = vadd.f32 %v6222_v39, %v1152_v47  ;;  %v2375_v25 = vsel %vm2372_vm6, %v2374_v0, %v2370_v53  ;;  %vm2409_vm10 = vmor %vm2407_vm7, %vm2408_vm8 }
 0x36b   : > { %v2376_v55 = vmul.f32 %v2375_v25, %v2351_v34  ;;  %v2404_v49 = vsub.f32 1.0, %v2403_v63  ;;  %v1184_v0 = vmul.f32 0.5, %v6329_v24 }
 0x36c   : > { %v2422_v57 = vadd.f32 0.00028619796, %v2421_v44  ;;  %v2433_v42 = vadd.f32 0.001143296, %v2432_v51  ;;  %v6404_v6 = vmul.f32 0.70710677, %v6400_v21 }
 0x36d   : > { %v2405_v37 = vmul.f32 %v4605_v46, %v2404_v49  ;;  %v4215_v9 = vclamps-f32 %v2376_v55, 1.0 }
 0x36e   : > { %v2423_v62 = vmul.f32 %v2422_v57, %v6394_v7  ;;  %v2434_v30 = vmul.f32 %v2433_v42, %v6394_v7  ;;  %v2459_v39 = vmul.f32 %v6404_v6, %v6404_v6 }
 0x36f   : > { %v2406_v60 = vadd.f32 %v4605_v46, %v2405_v37  ;;  %v2527_v15 = vadd.f32 1.0, %v4215_v9 }
 0x370   : > { %v2424_v52 = vadd.f32 0.0036580483, %v2423_v62  ;;  %v2435_v22 = vadd.f32 0.014752088, %v2434_v30  ;;  %v6411_v28 = vmin.f32 %v2459_v39, 16.0  ;;  %v6430_v25 = vpop.f32.mrf.mxu1 }
 0x371   : > { %v2410_v1 = vsel %vm2409_vm10, %v4605_v46, %v2406_v60  ;;  %v2559_v38 = vmul.f32 %v2527_v15, %v1183_v18 }
 0x372   : > { %v2436_v61 = vmul.f32 %v2435_v22, %v6394_v7  ;;  %v2461_v26 = vmul.f32 2.1237322e-06, %v6411_v28  ;;  %v2472_v43 = vmul.f32 3.8918573e-05, %v6411_v28  ;;  %v2425_v16 = vmul.f32 %v2424_v52, %v6394_v7 }
 0x373   : > { %v2415_v12 = vsel %vm2412_vm12, %v2414_v10, %v2410_v1 }
 0x374   : > { %v2437_v41 = vadd.f32 0.112945676, %v2436_v61  ;;  %v2462_v45 = vadd.f32 0.00028619796, %v2461_v26  ;;  %v2473_v58 = vadd.f32 0.001143296, %v2472_v43  ;;  %v2416_v23 = vmul.f32 %v2415_v12, %v2391_v5 }
 0x375   : > { %v2426_v11 = vadd.f32 0.05243302, %v2425_v16 }
 0x376   : > { %v2438_v17 = vmul.f32 %v2437_v41, %v6394_v7  ;;  %v2463_v50 = vmul.f32 %v2462_v45, %v6411_v28  ;;  %v2474_v36 = vmul.f32 %v2473_v58, %v6411_v28  ;;  %v4216_v20 = vclamps-f32 %v2416_v23, 1.0 }
 0x377   : > { %v2427_v42 = vmul.f32 %v2426_v11, %v6394_v7 }
 0x378   : > { %v2439_v29 = vadd.f32 0.4994258, %v2438_v17  ;;  %v2464_v47 = vadd.f32 0.0036580483, %v2463_v50  ;;  %v2475_v59 = vadd.f32 0.014752088, %v2474_v36  ;;  %v2708_v9 = vpop.f32.mrf.mxu1 }
 0x379   : > { %v2528_v62 = vadd.f32 1.0, %v4216_v20  ;;  %v2428_v39 = vadd.f32 0.18741608, %v2427_v42 }
 0x37a   : > { %v2440_v44 = vmul.f32 %v2439_v29, %v6394_v7  ;;  %v2476_v51 = vmul.f32 %v2475_v59, %v6411_v28  ;;  %v2465_v57 = vmul.f32 %v2464_v47, %v6411_v28 }
 0x37b   : > { %v2560_v30 = vmul.f32 %v2528_v62, %v1184_v0  ;;  %v2429_v61 = vmul.f32 %v2428_v39, %v6394_v7 }
 0x37c   : > { %v2441_v34 = vadd.f32 1.0, %v2440_v44  ;;  %v2477_v53 = vadd.f32 0.112945676, %v2476_v51  ;;  %v2466_v48 = vadd.f32 0.05243302, %v2465_v57  ;;  %v1185_v57 = vmul.f32 0.5, %v6384_v32 }
 0x37d   : > { %v2577_v52 = vpack.c.bf16 %v2560_v30, %v2559_v38  ;;  %v2430_v45 = vadd.f32 1.1283791, %v2429_v61 }
 0x37e   : > { %4606 = vrcp.f32 %v2441_v34  ;;  %v2478_v46 = vmul.f32 %v2477_v53, %v6411_v28  ;;  %v2467_v35 = vmul.f32 %v2466_v48, %v6411_v28  ;;  %vm2447_vm9 = vweird.f32 %v2441_v34 }
 0x37f   : > { %4249 = vmatmul.msk.bf16.gmra.mxu2 %vm2615_vm11, %v2577_v52  ;;  %v2451_v43 = vand.u32 2147483647, %v2441_v34  ;;  %v2453_v37 = vand.u32 2147483648, %v2441_v34  ;;  %v2431_v17 = vmul.f32 %v2430_v45, %v6387_v54  ;;  %v1186_v53 = vmul.f32 0.5, %v6400_v21 }
 0x380   : > { %v2479_v13 = vadd.f32 0.4994258, %v2478_v46  ;;  %v2468_v41 = vadd.f32 0.18741608, %v2467_v35  ;;  %v2710_v51 = vpop.f32.mrf.mxu1 }
 0x381   : > { %v2454_v5 = vor.u32 1.1754944e-38, %v2453_v37  ;;  %vm2452_vm15 = vcmp.eq.f32.partialorder %v2451_v43, 8.507059e+37  ;;  %v2728_v43 = vpop.f32.mrf.mxu2 }
 0x382   : > { %v2769_v63 = vpop.trf.xlu2  ;;  %v2480_v22 = vmul.f32 %v2479_v13, %v6411_v28  ;;  %v2469_v7 = vmul.f32 %v2468_v41, %v6411_v28 }
 0x383   : > { %v6433_v24 = vadd.f32 %v4851_v3, %v2769_v63 }
 0x384   : > { %v4607_v49 = vpop.eup %4606  ;;  %v2481_v3 = vadd.f32 1.0, %v2480_v22  ;;  %v2470_v12 = vadd.f32 1.1283791, %v2469_v7 }
 0x385   : > { %v3017_v55 = vsel %vm512_vm0, %v6433_v24, 0.0  ;;  %v3049_v31 = vmul.f32 %v6433_v24, %v6433_v24  ;;  %v2443_v26 = vmul.f32 %v4607_v49, %v2441_v34  ;;  %vm2448_vm13 = vweird.f32 %v4607_v49 }
 0x386   : > { %3018 = vadd.xlane.f32.xlu1 %v3017_v55  ;;  %4608 = vrcp.f32 %v2481_v3  ;;  %vm2449_vm14 = vmor %vm2447_vm9, %vm2448_vm13  ;;  %vm2487_vm1 = vweird.f32 %v2481_v3  ;;  %v2493_v29 = vand.u32 2147483648, %v2481_v3  ;;  %v2491_v18 = vand.u32 2147483647, %v2481_v3 }
 0x387   : > { %v3057_v10 = vsel %vm512_vm0, %v3049_v31, 0.0  ;;  %v2444_v16 = vsub.f32 1.0, %v2443_v26  ;;  %v2471_v28 = vmul.f32 %v2470_v12, %v6404_v6 }
 0x388   : > { %3058 = vadd.xlane.f32.xlu2 %v3057_v10  ;;  %v2494_v23 = vor.u32 1.1754944e-38, %v2493_v29  ;;  %vm2492_vm4 = vcmp.eq.f32.partialorder %v2491_v18, 8.507059e+37  ;;  %v2713_v63 = vpop.f32.mrf.mxu1 }
 0x389   : > { %v2445_v58 = vmul.f32 %v4607_v49, %v2444_v16  ;;  %v2730_v10 = vpop.f32.mrf.mxu2 }
 0x38b   : > { %v2446_v60 = vadd.f32 %v4607_v49, %v2445_v58 }
 0x38c   : > { %v4609_v50 = vpop.eup %4608 }
 0x38d   : > { %v2450_v36 = vsel %vm2449_vm14, %v4607_v49, %v2446_v60  ;;  %v2483_v11 = vmul.f32 %v4609_v50, %v2481_v3  ;;  %vm2488_vm2 = vweird.f32 %v4609_v50 }
 0x38e   : > { %v2455_v1 = vsel %vm2452_vm15, %v2454_v5, %v2450_v36  ;;  %vm2489_vm3 = vmor %vm2487_vm1, %vm2488_vm2 }
 0x38f   : > { %v2456_v47 = vmul.f32 %v2455_v1, %v2431_v17  ;;  %v2484_v59 = vsub.f32 1.0, %v2483_v11 }
 0x390   : > { %v2715_v21 = vpop.f32.mrf.mxu1 }
 0x391   : > { %v2485_v15 = vmul.f32 %v4609_v50, %v2484_v59  ;;  %v4217_v44 = vclamps-f32 %v2456_v47, 1.0 }
 0x393   : > { %v2486_v0 = vadd.f32 %v4609_v50, %v2485_v15  ;;  %v2529_v42 = vadd.f32 1.0, %v4217_v44 }
 0x395   : > { %v2490_v54 = vsel %vm2489_vm3, %v4609_v50, %v2486_v0  ;;  %v2561_v62 = vmul.f32 %v2529_v42, %v1185_v57  ;;  %v4364_v42 = vld [vmem:[%s7118_s9 + $0x8] sm:$0xff] }
 0x396   : > { %v2495_v20 = vsel %vm2492_vm4, %v2494_v23, %v2490_v54  ;;  %3275 = vmatpush.bf16.msrb.mxu2 %v4364_v42 }
 0x397   : > { %v2496_v34 = vmul.f32 %v2495_v20, %v2471_v28 }
 0x398   : > { %v2718_v22 = vpop.f32.mrf.mxu1 }
 0x399   : > { %v4218_v38 = vclamps-f32 %v2496_v34, 1.0 }
 0x39b   : > { %v2530_v30 = vadd.f32 1.0, %v4218_v38 }
 0x39d   : > { %v2562_v39 = vmul.f32 %v2530_v30, %v1186_v53 }
 0x39e   : > { %v2801_v48 = vpop.trf.xlu1 }
 0x39f   : > { %v6450_v46 = vadd.f32 %v4849_v2, %v2801_v48  ;;  %v2578_v13 = vpack.c.bf16 %v2562_v39, %v2561_v62  ;;  %v6461_v2 = vld [vmem:[%s7115_s6] ss:$0 sm:$0xff] }
 0x3a0   : > { %v2704_v35 = vadd.f32 %v6461_v2, %v6418_v56  ;;  %v2706_v55 = vadd.f32 %v6461_v2, %v6430_v25  ;;  %v2720_v31 = vpop.f32.mrf.mxu1  ;;  %v2709_v49 = vadd.f32 %v6461_v2, %v2708_v9  ;;  %v2711_v61 = vadd.f32 %v6461_v2, %v2710_v51  ;;  %v4363_v48 = vld [vmem:[%s7118_s9] sm:$0xff] }
 0x3a1   : > { %v3050_v6 = vmul.f32 %v6450_v46, %v6450_v46  ;;  %v3020_v32 = vsel %vm512_vm0, %v6450_v46, 0.0  ;;  %4250 = vmatmul.msk.bf16.gmra.mxu2 %vm2615_vm11, %v2578_v13  ;;  %v2714_v25 = vadd.f32 %v6461_v2, %v2713_v63  ;;  %v2729_v16 = vadd.f32 %v6461_v2, %v2728_v43 }
 0x3a2   : > { %v2716_v45 = vadd.f32 %v6461_v2, %v2715_v21  ;;  %v2731_v58 = vadd.f32 %v6461_v2, %v2730_v10  ;;  %v2719_v9 = vadd.f32 %v6461_v2, %v2718_v22  ;;  %v2721_v60 = vadd.f32 %v6461_v2, %v2720_v31  ;;  %3276 = vmatpush.bf16.msrb.mxu2 %v4363_v48 }
 0x3a3   : > { %v3060_v52 = vsel %vm512_vm0, %v3050_v6, 0.0 }
 0x3a4   : > { %3061 = vadd.xlane.f32.xlu1 %v3060_v52 }
 0x3a6   : > { %3021 = vadd.xlane.f32.xlu0 %v3020_v32 }
 0x3a8   : > { %v2723_v26 = vpop.f32.mrf.mxu1 }
 0x3a9   : > { %v2724_v3 = vadd.f32 %v6461_v2, %v2723_v26 }
 0x3b0   : > { %v2725_v37 = vpop.f32.mrf.mxu1 }
 0x3b1   : > { %2849 = vxpose.xlu2.b32.start [1/4] (short) (narrow) %v2704_v35, 8  ;;  %v2726_v56 = vadd.f32 %v6461_v2, %v2725_v37 }
 0x3b9   : > { %2850 = vxpose.xlu2.b32.cont [2/4] (short) (narrow) %v2706_v55, 8 }
 0x3c1   : > { %2851 = vxpose.xlu2.b32.cont [3/4] (short) (narrow) %v2709_v49, 8  ;;  %v2833_v15 = vpop.trf.xlu0 }
 0x3c2   : > { %v6507_v10 = vadd.f32 %v4853_v4, %v2833_v15 }
 0x3c4   : > { %v3051_v4 = vmul.f32 %v6507_v10, %v6507_v10 }
 0x3c9   : > { %2852 = vxpose.xlu2.b32.end [4/4] (short) (narrow) %v2711_v61, 8  ;;  %v6473_v41 = vpop.f32.mrf.mxu2 }
 0x3cf   : > { %2913 = vxpose.xlu0.b32.start [1/4] (short) (narrow) %v2724_v3, 8  ;;  %v6503_v3 = vld [vmem:[%s7116_s7] ss:$0 sm:$0xff] }
 0x3d1   : > { %v6478_v5 = vpop.f32.mrf.mxu2 }
 0x3d7   : > { %2914 = vxpose.xlu0.b32.cont [2/4] (short) (narrow) %v2726_v56, 8 }
 0x3de   : > { %2881 = vxpose.xlu1.b32.start [1/4] (short) (narrow) %v2714_v25, 8 }
 0x3df   : > { %2915 = vxpose.xlu0.b32.cont [3/4] (short) (narrow) %v2729_v16, 8 }
 0x3e0   : > { %v6481_v7 = vpop.f32.mrf.mxu2 }
 0x3e6   : > { %2882 = vxpose.xlu1.b32.cont [2/4] (short) (narrow) %v2716_v45, 8  ;;  %v6513_v45 = vld [vmem:[%s7117_s8] ss:$0 sm:$0xff] }
 0x3e7   : > { %2916 = vxpose.xlu0.b32.end [4/4] (short) (narrow) %v2731_v58, 8 }
 0x3e8   : > { %v6483_v50 = vpop.f32.mrf.mxu2 }
 0x3ee   : > { %2883 = vxpose.xlu1.b32.cont [3/4] (short) (narrow) %v2719_v9, 8  ;;  %v3023_v9 = vsel %vm512_vm0, %v6507_v10, 0.0 }
 0x3f6   : > { %2884 = vxpose.xlu1.b32.end [4/4] (short) (narrow) %v2721_v60, 8 }
 0x3f9   : > { %v3019_v17 = vpop.xlane.xlu1 %3018 }
 0x3fa   : > { %v3041_v36 = vmul.f32 %v3019_v17, %v4900_v40 }
 0x3fb   : > { %v3059_v1 = vpop.xlane.xlu2 %3058 }
 0x3fc   : > { %v3089_v11 = vmul.f32 %v3041_v36, %v3041_v36  ;;  %v3081_v12 = vmul.f32 %v3059_v1, %v4900_v40  ;;  %v3105_v55 = vsub.f32 %v6433_v24, %v3041_v36  ;;  %v3063_v1 = vsel %vm512_vm0, %v3051_v4, 0.0 }
 0x3fe   : > { %v3097_v29 = vsub.f32 %v3081_v12, %v3089_v11 }
 0x400   : > { %v3113_v18 = vadd.f32 1e-05, %v3097_v29 }
 0x402   : > { %v2743_v47 = vpop.f32.mrf.mxu2  ;;  %4610 = vrsqrt.f32 %v3113_v18  ;;  %vm3127_vm6 = vweird.f32 %v3113_v18 }
 0x403   : > { %v2744_v59 = vadd.f32 %v6461_v2, %v2743_v47 }
 0x405   : > { %2977 = vxpose.xlu1.b32.start [1/4] (short) (narrow) %v2744_v59, 8 }
 0x408   : > { %v4611_v51 = vpop.eup %4610 }
 0x409   : > { %v3122_v0 = vmul.f32 %v4611_v51, %v3113_v18  ;;  %vm3128_vm5 = vweird.f32 %v4611_v51  ;;  %v2734_v18 = vadd.f32 %v6461_v2, %v6473_v41 }
 0x40a   : > { %v2745_v23 = vpop.f32.mrf.mxu2  ;;  %vm3129_vm7 = vmor %vm3127_vm6, %vm3128_vm5 }
 0x40b   : > { %v2746_v44 = vadd.f32 %v6461_v2, %v2745_v23  ;;  %v3123_v53 = vmul.f32 %v4611_v51, %v3122_v0 }
 0x40d   : > { %2978 = vxpose.xlu1.b32.cont [2/4] (short) (narrow) %v2746_v44, 8  ;;  %v3124_v30 = vmul.f32 0.5, %v3123_v53 }
 0x40f   : > { %v3125_v39 = vsub.f32 1.5, %v3124_v30 }
 0x411   : > { %v3126_v32 = vmul.f32 %v4611_v51, %v3125_v39 }
 0x413   : > { %v3130_v35 = vsel %vm3129_vm7, %v4611_v51, %v3126_v32 }
 0x414   : > { %v3201_v61 = vmul.f32 %v3130_v35, %v3105_v55 }
 0x416   : > { %v3213_v16 = vmul.f32 %v6503_v3, %v3201_v61 }
 0x417   : > { %v3062_v28 = vpop.xlane.xlu1 %3061 }
 0x418   : > { %v3082_v57 = vmul.f32 %v3062_v28, %v4900_v40  ;;  %v3225_v60 = vadd.f32 %v6513_v45, %v3213_v16  ;;  %v2736_v28 = vadd.f32 %v6461_v2, %v6478_v5 }
 0x419   : > { %v3022_v54 = vpop.xlane.xlu0 %3021 }
 0x41a   : > { %v3042_v20 = vmul.f32 %v3022_v54, %v4900_v40  ;;  %v2741_v54 = vadd.f32 %v6461_v2, %v6483_v50 }
 0x41c   : > { %v3090_v34 = vmul.f32 %v3042_v20, %v3042_v20  ;;  %v3106_v37 = vsub.f32 %v6450_v46, %v3042_v20 }
 0x41e   : > { %v3098_v38 = vsub.f32 %v3082_v57, %v3090_v34 }
 0x420   : > { %v3114_v62 = vadd.f32 1e-05, %v3098_v38  ;;  %v6564_v38 = vld [vmem:[%s7119_s10] ss:$0 sm:$0xff] }
 0x422   : > { %4612 = vrsqrt.f32 %v3114_v62  ;;  %vm3137_vm8 = vweird.f32 %v3114_v62 }
 0x424   : > { %v2748_v63 = vpop.f32.mrf.mxu2 }
 0x425   : > { %v2749_v13 = vadd.f32 %v6461_v2, %v2748_v63 }
 0x427   : > { %2979 = vxpose.xlu1.b32.cont [3/4] (short) (narrow) %v2749_v13, 8 }
 0x428   : > { %v4613_v6 = vpop.eup %4612 }
 0x429   : > { %v3132_v52 = vmul.f32 %v4613_v6, %v3114_v62  ;;  %vm3138_vm10 = vweird.f32 %v4613_v6 }
 0x42a   : > { %vm3139_vm12 = vmor %vm3137_vm8, %vm3138_vm10 }
 0x42b   : > { %v3133_v21 = vmul.f32 %v4613_v6, %v3132_v52 }
 0x42c   : > { %v2750_v31 = vpop.f32.mrf.mxu2 }
 0x42d   : > { %v3134_v22 = vmul.f32 0.5, %v3133_v21  ;;  %v2751_v26 = vadd.f32 %v6461_v2, %v2750_v31 }
 0x42f   : > { %v3135_v49 = vsub.f32 1.5, %v3134_v22  ;;  %2980 = vxpose.xlu1.b32.end [4/4] (short) (narrow) %v2751_v26, 8 }
 0x431   : > { %v3136_v43 = vmul.f32 %v4613_v6, %v3135_v49 }
 0x433   : > { %v3140_v56 = vsel %vm3139_vm12, %v4613_v6, %v3136_v43 }
 0x434   : > { %v3202_v25 = vmul.f32 %v3140_v56, %v3106_v37 }
 0x436   : > { %v3214_v58 = vmul.f32 %v6503_v3, %v3202_v25 }
 0x438   : > { %v3226_v17 = vadd.f32 %v6513_v45, %v3214_v58 }
 0x43a   : > { %v3233_v36 = vpack.c.bf16 %v3226_v17, %v3225_v60  ;;  %3024 = vadd.xlane.f32.xlu2 %v3023_v9 }
 0x43c   : > { %4259 = vmatmul.msk.bf16.vlgmr.msrb.gmra.mxu2 %vm512_vm0, %v3233_v36 }
 0x442   : > { %3064 = vadd.xlane.f32.xlu2 %v3063_v1 }
 0x44a   : > { %v2865_v11 = vpop.trf.xlu2 }
 0x44b   : > { %v6525_v12 = vadd.f32 %v4870_v14, %v2865_v11 }
 0x44d   : > { %v3026_v29 = vsel %vm512_vm0, %v6525_v12, 0.0  ;;  %v3052_v47 = vmul.f32 %v6525_v12, %v6525_v12 }
 0x44e   : > { %3027 = vadd.xlane.f32.xlu2 %v3026_v29 }
 0x44f   : > { %v3066_v59 = vsel %vm512_vm0, %v3052_v47, 0.0 }
 0x456   : > { %3067 = vadd.xlane.f32.xlu2 %v3066_v59 }
 0x473   : > { %v2929_v15 = vpop.trf.xlu0 }
 0x474   : > { %v6538_v14 = vadd.f32 %v4878_v19, %v2929_v15 }
 0x476   : > { %v3054_v0 = vmul.f32 %v6538_v14, %v6538_v14  ;;  %v3032_v19 = vsel %vm512_vm0, %v6538_v14, 0.0 }
 0x478   : > { %v3072_v41 = vsel %vm512_vm0, %v3054_v0, 0.0 }
 0x47f   : > { %2945 = vxpose.xlu2.b32.start [1/4] (short) (narrow) %v2734_v18, 8 }
 0x482   : > { %v2897_v23 = vpop.trf.xlu1 }
 0x483   : > { %v6535_v44 = vadd.f32 %v4893_v33, %v2897_v23  ;;  %v2739_v33 = vadd.f32 %v6461_v2, %v6481_v7 }
 0x485   : > { %v3029_v51 = vsel %vm512_vm0, %v6535_v44, 0.0 }
 0x486   : > { %3030 = vadd.xlane.f32.xlu0 %v3029_v51 }
 0x487   : > { %2946 = vxpose.xlu2.b32.cont [2/4] (short) (narrow) %v2736_v28, 8 }
 0x48e   : > { %3073 = vadd.xlane.f32.xlu0 %v3072_v41 }
 0x48f   : > { %2947 = vxpose.xlu2.b32.cont [3/4] (short) (narrow) %v2739_v33, 8  ;;  %3033 = vadd.xlane.f32.xlu1 %v3032_v19 }
 0x497   : > { %2948 = vxpose.xlu2.b32.end [4/4] (short) (narrow) %v2741_v54, 8 }
 0x4ad   : > { %v3025_v5 = vpop.xlane.xlu2 %3024 }
 0x4ae   : > { %v6554_v20 = vmul.f32 %v3025_v5, %v4900_v40 }
 0x4b0   : > { %v3091_v42 = vmul.f32 %v6554_v20, %v6554_v20 }
 0x4b5   : > { %v3065_v57 = vpop.xlane.xlu2 %3064 }
 0x4b6   : > { %v3083_v7 = vmul.f32 %v3065_v57, %v4900_v40 }
 0x4b8   : > { %v3099_v34 = vsub.f32 %v3083_v7, %v3091_v42 }
 0x4ba   : > { %v6559_v53 = vadd.f32 1e-05, %v3099_v34 }
 0x4bb   : > { %v2993_v2 = vpop.trf.xlu1 }
 0x4bc   : > { %v6567_v50 = vadd.f32 %v4912_v8, %v2993_v2  ;;  %4614 = vrsqrt.f32 %v6559_v53  ;;  %vm3147_vm13 = vweird.f32 %v6559_v53 }
 0x4be   : > { %v3038_v48 = vsel %vm512_vm0, %v6567_v50, 0.0  ;;  %v3056_v6 = vmul.f32 %v6567_v50, %v6567_v50 }
 0x4bf   : > { %v3278_v62 = vpop.f32.mrf.mxu2  ;;  %3039 = vadd.xlane.f32.xlu1 %v3038_v48 }
 0x4c0   : > { %v6571_v30 = vadd.f32 %v6564_v38, %v3278_v62  ;;  %v3078_v52 = vsel %vm512_vm0, %v3056_v6, 0.0 }
 0x4c1   : > { %v3028_v39 = vpop.xlane.xlu2 %3027 }
 0x4c2   : > { %v6576_v63 = vmul.f32 0.70710677, %v6571_v30  ;;  %v6582_v13 = vpop.eup %4614  ;;  %v6588_v21 = vmul.f32 %v3028_v39, %v4900_v40 }
 0x4c3   : > { %v3142_v49 = vmul.f32 %v6582_v13, %v6559_v53  ;;  %vm3148_vm9 = vweird.f32 %v6582_v13  ;;  %v4368_v53 = vld [vmem:[%s7120_s11 + $0x18] sm:$0xff] }
 0x4c4   : > { %v3314_v8 = vmul.f32 %v6576_v63, %v6576_v63  ;;  %v3092_v37 = vmul.f32 %v6588_v21, %v6588_v21  ;;  %vm3149_vm14 = vmor %vm3147_vm13, %vm3148_vm9  ;;  %3706 = vmatpush.bf16.msrb.mxu3 %v4368_v53 }
 0x4c5   : > { %v3143_v58 = vmul.f32 %v6582_v13, %v3142_v49  ;;  %v3107_v49 = vsub.f32 %v6507_v10, %v6554_v20 }
 0x4c6   : > { %v6584_v32 = vmin.f32 %v3314_v8, 16.0 }
 0x4c7   : > { %v3280_v35 = vpop.f32.mrf.mxu2  ;;  %3079 = vadd.xlane.f32.xlu1 %v3078_v52  ;;  %v3144_v29 = vmul.f32 0.5, %v3143_v58 }
 0x4c8   : > { %v3316_v22 = vmul.f32 2.1237322e-06, %v6584_v32  ;;  %v3327_v55 = vmul.f32 3.8918573e-05, %v6584_v32  ;;  %v6593_v31 = vadd.f32 %v6564_v38, %v3280_v35 }
 0x4c9   : > { %v3068_v61 = vpop.xlane.xlu2 %3067  ;;  %v3145_v0 = vsub.f32 1.5, %v3144_v29 }
 0x4ca   : > { %v3317_v26 = vadd.f32 0.00028619796, %v3316_v22  ;;  %v3328_v43 = vadd.f32 0.001143296, %v3327_v55  ;;  %v3084_v56 = vmul.f32 %v3068_v61, %v4900_v40  ;;  %v6601_v25 = vmul.f32 0.70710677, %v6593_v31 }
 0x4cb   : > { %v3146_v2 = vmul.f32 %v6582_v13, %v3145_v0 }
 0x4cc   : > { %v3329_v16 = vmul.f32 %v3328_v43, %v6584_v32  ;;  %v3100_v9 = vsub.f32 %v3084_v56, %v3092_v37  ;;  %v3354_v60 = vmul.f32 %v6601_v25, %v6601_v25  ;;  %v3318_v17 = vmul.f32 %v3317_v26, %v6584_v32 }
 0x4cd   : > { %v3150_v22 = vsel %vm3149_vm14, %v6582_v13, %v3146_v2  ;;  %v4367_v13 = vld [vmem:[%s7120_s11 + $0x10] sm:$0xff] }
 0x4ce   : > { %v3330_v36 = vadd.f32 0.014752088, %v3329_v16  ;;  %v3116_v4 = vadd.f32 1e-05, %v3100_v9  ;;  %v6608_v1 = vmin.f32 %v3354_v60, 16.0  ;;  %v3203_v16 = vmul.f32 %v3150_v22, %v3107_v49  ;;  %3707 = vmatpush.bf16.msrb.mxu3 %v4367_v13 }
 0x4cf   : > { %v3319_v18 = vadd.f32 0.0036580483, %v3318_v17  ;;  %v3108_v9 = vsub.f32 %v6525_v12, %v6588_v21 }
 0x4d0   : > { %v3331_v11 = vmul.f32 %v3330_v36, %v6584_v32  ;;  %4616 = vrsqrt.f32 %v3116_v4  ;;  %v3356_v47 = vmul.f32 2.1237322e-06, %v6608_v1  ;;  %v3367_v59 = vmul.f32 3.8918573e-05, %v6608_v1 }
 0x4d1   : > { %v3320_v19 = vmul.f32 %v3319_v18, %v6584_v32  ;;  %vm3157_vm1 = vweird.f32 %v3116_v4 }
 0x4d2   : > { %v3332_v15 = vadd.f32 0.112945676, %v3331_v11  ;;  %v3357_v23 = vadd.f32 0.00028619796, %v3356_v47  ;;  %v3368_v51 = vadd.f32 0.001143296, %v3367_v59  ;;  %v3215_v47 = vmul.f32 %v6503_v3, %v3203_v16 }
 0x4d3   : > { %v3321_v39 = vadd.f32 0.05243302, %v3320_v19  ;;  %v4366_v59 = vld [vmem:[%s7120_s11 + $0x8] sm:$0xff]  ;;  %v4365_v19 = vld [vmem:[%s7120_s11] sm:$0xff]  ;;  %v3299_v16 = vmul.f32 0.5, %v6593_v31 }
 0x4d4   : > { %v3333_v28 = vmul.f32 %v3332_v15, %v6584_v32  ;;  %v3358_v41 = vmul.f32 %v3357_v23, %v6608_v1  ;;  %v3369_v33 = vmul.f32 %v3368_v51, %v6608_v1  ;;  %3708 = vmatpush.bf16.msrb.mxu3 %v4366_v59 }
 0x4d5   : > { %v3322_v26 = vmul.f32 %v3321_v39, %v6584_v32 }
 0x4d6   : > { %v3334_v54 = vadd.f32 0.4994258, %v3333_v28  ;;  %v4617_v5 = vpop.eup %4616  ;;  %v3359_v57 = vadd.f32 0.0036580483, %v3358_v41  ;;  %v3370_v42 = vadd.f32 0.014752088, %v3369_v33  ;;  %v3227_v41 = vadd.f32 %v6513_v45, %v3215_v47 }
 0x4d7   : > { %v3152_v7 = vmul.f32 %v4617_v5, %v3116_v4  ;;  %vm3158_vm15 = vweird.f32 %v4617_v5  ;;  %v3323_v17 = vadd.f32 0.18741608, %v3322_v26 }
 0x4d8   : > { %v3335_v34 = vmul.f32 %v3334_v54, %v6584_v32  ;;  %v3371_v62 = vmul.f32 %v3370_v42, %v6608_v1  ;;  %v3360_v8 = vmul.f32 %v3359_v57, %v6608_v1  ;;  %vm3159_vm2 = vmor %vm3157_vm1, %vm3158_vm15  ;;  %3709 = vmatpush.bf16.msrb.mxu3 %v4365_v19 }
 0x4d9   : > { %v3153_v48 = vmul.f32 %v4617_v5, %v3152_v7  ;;  %v3324_v15 = vmul.f32 %v3323_v17, %v6584_v32 }
 0x4da   : > { %v3336_v6 = vadd.f32 1.0, %v3335_v34  ;;  %v3372_v52 = vadd.f32 0.112945676, %v3371_v62  ;;  %v3361_v43 = vadd.f32 0.05243302, %v3360_v8 }
 0x4db   : > { %v3154_v35 = vmul.f32 0.5, %v3153_v48 }
 0x4dc   : > { %4618 = vrcp.f32 %v3336_v6  ;;  %v3373_v55 = vmul.f32 %v3372_v52, %v6608_v1  ;;  %v3362_v11 = vmul.f32 %v3361_v43, %v6608_v1  ;;  %v3348_v51 = vand.u32 2147483648, %v3336_v6 }
 0x4dd   : > { %v3155_v61 = vsub.f32 1.5, %v3154_v35  ;;  %v3346_v0 = vand.u32 2147483647, %v3336_v6  ;;  %vm3342_vm4 = vweird.f32 %v3336_v6 }
 0x4de   : > { %v3374_v37 = vadd.f32 0.4994258, %v3373_v55  ;;  %v3363_v28 = vadd.f32 0.18741608, %v3362_v11  ;;  %v3349_v7 = vor.u32 1.1754944e-38, %v3348_v51 }
 0x4df   : > { %v3156_v56 = vmul.f32 %v4617_v5, %v3155_v61  ;;  %vm3347_vm6 = vcmp.eq.f32.partialorder %v3346_v0, 8.507059e+37 }
 0x4e0   : > { %v3375_v20 = vmul.f32 %v3374_v37, %v6608_v1  ;;  %v3364_v34 = vmul.f32 %v3363_v28, %v6608_v1 }
 0x4e1   : > { %v3160_v60 = vsel %vm3159_vm2, %v4617_v5, %v3156_v56  ;;  %v3325_v5 = vadd.f32 1.1283791, %v3324_v15  ;;  %v3298_v56 = vmul.f32 0.5, %v6571_v30 }
 0x4e2   : > { %v4619_v58 = vpop.eup %4618  ;;  %v3376_v29 = vadd.f32 1.0, %v3375_v20  ;;  %v3204_v4 = vmul.f32 %v3160_v60, %v3108_v9  ;;  %v3365_v8 = vadd.f32 1.1283791, %v3364_v34  ;;  %v3053_v60 = vmul.f32 %v6535_v44, %v6535_v44 }
 0x4e3   : > { %v3338_v36 = vmul.f32 %v4619_v58, %v3336_v6  ;;  %vm3343_vm3 = vweird.f32 %v4619_v58  ;;  %v3326_v48 = vmul.f32 %v3325_v5, %v6576_v63 }
 0x4e4   : > { %4620 = vrcp.f32 %v3376_v29  ;;  %v3216_v21 = vmul.f32 %v6503_v3, %v3204_v4  ;;  %vm3344_vm5 = vmor %vm3342_vm4, %vm3343_vm3  ;;  %v3388_v52 = vand.u32 2147483648, %v3376_v29  ;;  %v3386_v22 = vand.u32 2147483647, %v3376_v29 }
 0x4e5   : > { %v3339_v18 = vsub.f32 1.0, %v3338_v36  ;;  %vm3382_vm8 = vweird.f32 %v3376_v29  ;;  %v3366_v61 = vmul.f32 %v3365_v8, %v6601_v25  ;;  %v3069_v25 = vsel %vm512_vm0, %v3053_v60, 0.0 }
 0x4e6   : > { %v3228_v33 = vadd.f32 %v6513_v45, %v3216_v21  ;;  %v3389_v49 = vor.u32 1.1754944e-38, %v3388_v52  ;;  %vm3387_vm12 = vcmp.eq.f32.partialorder %v3386_v22, 8.507059e+37 }
 0x4e7   : > { %v3340_v23 = vmul.f32 %v4619_v58, %v3339_v18 }
 0x4e8   : > { %v3234_v32 = vpack.c.bf16 %v3228_v33, %v3227_v41 }
 0x4e9   : > { %v3341_v54 = vadd.f32 %v4619_v58, %v3340_v23 }
 0x4ea   : > { %v4621_v57 = vpop.eup %4620  ;;  %4260 = vmatmul.msk.bf16.gmra.mxu2 %vm512_vm0, %v3234_v32 }
 0x4eb   : > { %v3345_v42 = vsel %vm3344_vm5, %v4619_v58, %v3341_v54  ;;  %v3378_v2 = vmul.f32 %v4621_v57, %v3376_v29  ;;  %vm3383_vm7 = vweird.f32 %v4621_v57 }
 0x4ec   : > { %v3350_v62 = vsel %vm3347_vm6, %v3349_v7, %v3345_v42  ;;  %vm3384_vm10 = vmor %vm3382_vm8, %vm3383_vm7 }
 0x4ed   : > { %v3379_v39 = vsub.f32 1.0, %v3378_v2  ;;  %v3351_v6 = vmul.f32 %v3350_v62, %v3326_v48 }
 0x4ef   : > { %v3380_v35 = vmul.f32 %v4621_v57, %v3379_v39  ;;  %v4263_v1 = vclamps-f32 %v3351_v6, 1.0 }
 0x4f1   : > { %v3381_v55 = vadd.f32 %v4621_v57, %v3380_v35  ;;  %v3634_v37 = vadd.f32 1.0, %v4263_v1 }
 0x4f3   : > { %v3385_v26 = vsel %vm3384_vm10, %v4621_v57, %v3381_v55  ;;  %v3642_v20 = vmul.f32 %v3634_v37, %v3298_v56 }
 0x4f4   : > { %v3390_v53 = vsel %vm3387_vm12, %v3389_v49, %v3385_v26 }
 0x4f5   : > { %v3391_v43 = vmul.f32 %v3390_v53, %v3366_v61 }
 0x4f7   : > { %v4264_v63 = vclamps-f32 %v3391_v43, 1.0 }
 0x4f9   : > { %v3635_v13 = vadd.f32 1.0, %v4264_v63  ;;  %v3031_v29 = vpop.xlane.xlu0 %3030 }
 0x4fa   : > { %v6694_v42 = vmul.f32 %v3031_v29, %v4900_v40 }
 0x4fb   : > { %v3643_v58 = vmul.f32 %v3635_v13, %v3299_v16 }
 0x4fc   : > { %v3093_v62 = vmul.f32 %v6694_v42, %v6694_v42 }
 0x4fd   : > { %v3650_v9 = vpack.c.bf16 %v3643_v58, %v3642_v20 }
 0x4ff   : > { %4287 = vmatmul.msk.bf16.vlgmr.msrb.gmra.mxu3 %vm2615_vm11, %v3650_v9 }
 0x501   : > { %v3074_v59 = vpop.xlane.xlu0 %3073 }
 0x502   : > { %v3034_v4 = vpop.xlane.xlu1 %3033  ;;  %v3086_v18 = vmul.f32 %v3074_v59, %v4900_v40 }
 0x503   : > { %v6668_v47 = vmul.f32 %v3034_v4, %v4900_v40 }
 0x508   : > { %3070 = vadd.xlane.f32.xlu2 %v3069_v25 }
 0x518   : > { %v2961_v17 = vpop.trf.xlu2 }
 0x519   : > { %v6660_v36 = vadd.f32 %v4886_v27, %v2961_v17  ;;  %v3094_v27 = vmul.f32 %v6668_v47, %v6668_v47 }
 0x51b   : > { %v3035_v30 = vsel %vm512_vm0, %v6660_v36, 0.0  ;;  %v3055_v31 = vmul.f32 %v6660_v36, %v6660_v36  ;;  %v3102_v15 = vsub.f32 %v3086_v18, %v3094_v27 }
 0x51c   : > { %3036 = vadd.xlane.f32.xlu0 %v3035_v30 }
 0x51d   : > { %v3075_v11 = vsel %vm512_vm0, %v3055_v31, 0.0  ;;  %v6673_v21 = vadd.f32 1e-05, %v3102_v15 }
 0x51f   : > { %4622 = vrsqrt.f32 %v6673_v21  ;;  %vm3177_vm9 = vweird.f32 %v6673_v21 }
 0x524   : > { %3076 = vadd.xlane.f32.xlu0 %v3075_v11 }
 0x525   : > { %v6686_v19 = vpop.eup %4622 }
 0x526   : > { %v3172_v7 = vmul.f32 %v6686_v19, %v6673_v21  ;;  %vm3178_vm13 = vweird.f32 %v6686_v19 }
 0x527   : > { %vm6733_vm14 = vmor %vm3177_vm9, %vm3178_vm13 }
 0x528   : > { %v3173_v55 = vmul.f32 %v6686_v19, %v3172_v7 }
 0x52a   : > { %v3174_v13 = vmul.f32 0.5, %v3173_v55  ;;  %v3110_v55 = vsub.f32 %v6538_v14, %v6668_v47  ;;  %v3109_v47 = vsub.f32 %v6535_v44, %v6694_v42 }
 0x52c   : > { %v3175_v11 = vsub.f32 1.5, %v3174_v13 }
 0x532   : > { %v3040_v28 = vpop.xlane.xlu1 %3039 }
 0x533   : > { %v6705_v6 = vmul.f32 %v3040_v28, %v4900_v40 }
 0x535   : > { %v3096_v61 = vmul.f32 %v6705_v6, %v6705_v6 }
 0x53a   : > { %v3080_v39 = vpop.xlane.xlu1 %3079 }
 0x53b   : > { %v3088_v26 = vmul.f32 %v3080_v39, %v4900_v40 }
 0x53d   : > { %v3104_v9 = vsub.f32 %v3088_v26, %v3096_v61 }
 0x53f   : > { %v6724_v59 = vadd.f32 1e-05, %v3104_v9 }
 0x541   : > { %vm3197_vm10 = vweird.f32 %v6724_v59 }
 0x56d   : > { %v3283_v23 = vpop.f32.mrf.mxu2 }
 0x56e   : > { %v6676_v51 = vadd.f32 %v6564_v38, %v3283_v23 }
 0x570   : > { %v6680_v0 = vmul.f32 0.70710677, %v6676_v51 }
 0x572   : > { %v3394_v41 = vmul.f32 %v6680_v0, %v6680_v0 }
 0x574   : > { %v6684_v33 = vmin.f32 %v3394_v41, 16.0 }
 0x575   : > { %v3285_v54 = vpop.f32.mrf.mxu2 }
 0x576   : > { %v3396_v5 = vmul.f32 2.1237322e-06, %v6684_v33  ;;  %v3407_v32 = vmul.f32 3.8918573e-05, %v6684_v33  ;;  %v6691_v57 = vadd.f32 %v6564_v38, %v3285_v54 }
 0x578   : > { %v3397_v34 = vadd.f32 0.00028619796, %v3396_v5  ;;  %v3408_v2 = vadd.f32 0.001143296, %v3407_v32  ;;  %v6701_v48 = vmul.f32 0.70710677, %v6691_v57  ;;  %v3176_v32 = vmul.f32 %v6686_v19, %v3175_v11 }
 0x57a   : > { %v3409_v8 = vmul.f32 %v3408_v2, %v6684_v33  ;;  %v3434_v35 = vmul.f32 %v6701_v48, %v6701_v48  ;;  %v3398_v49 = vmul.f32 %v3397_v34, %v6684_v33 }
 0x57b   : > { %v3071_v52 = vpop.xlane.xlu2 %3070 }
 0x57c   : > { %v3085_v22 = vmul.f32 %v3071_v52, %v4900_v40  ;;  %v3410_v1 = vadd.f32 0.014752088, %v3409_v8  ;;  %v6715_v53 = vmin.f32 %v3434_v35, 16.0  ;;  %v3399_v20 = vadd.f32 0.0036580483, %v3398_v49 }
 0x57d   : > { %v3180_v8 = vsel %vm6733_vm14, %v6686_v19, %v3176_v32 }
 0x57e   : > { %v3101_v43 = vsub.f32 %v3085_v22, %v3093_v62  ;;  %v3411_v37 = vmul.f32 %v3410_v1, %v6684_v33  ;;  %v3436_v63 = vmul.f32 2.1237322e-06, %v6715_v53  ;;  %v3447_v56 = vmul.f32 3.8918573e-05, %v6715_v53 }
 0x57f   : > { %v3400_v29 = vmul.f32 %v3399_v20, %v6684_v33 }
 0x580   : > { %v3117_v16 = vadd.f32 1e-05, %v3101_v43  ;;  %v3412_v58 = vadd.f32 0.112945676, %v3411_v37  ;;  %v3437_v60 = vadd.f32 0.00028619796, %v3436_v63  ;;  %v3206_v63 = vmul.f32 %v3180_v8, %v3110_v55 }
 0x581   : > { %v3448_v25 = vadd.f32 0.001143296, %v3447_v56  ;;  %v3401_v41 = vadd.f32 0.05243302, %v3400_v29 }
 0x582   : > { %4624 = vrsqrt.f32 %v3117_v16  ;;  %v3413_v17 = vmul.f32 %v3412_v58, %v6684_v33  ;;  %v3438_v30 = vmul.f32 %v3437_v60, %v6715_v53  ;;  %vm3167_vm15 = vweird.f32 %v3117_v16 }
 0x583   : > { %v3449_v31 = vmul.f32 %v3448_v25, %v6715_v53  ;;  %4626 = vrsqrt.f32 %v6724_v59  ;;  %v3402_v39 = vmul.f32 %v3401_v41, %v6684_v33 }
 0x584   : > { %v3414_v4 = vadd.f32 0.4994258, %v3413_v17  ;;  %v3439_v27 = vadd.f32 0.0036580483, %v3438_v30  ;;  %v3218_v30 = vmul.f32 %v6503_v3, %v3206_v63 }
 0x585   : > { %v3450_v18 = vadd.f32 0.014752088, %v3449_v31  ;;  %v3403_v37 = vadd.f32 0.18741608, %v3402_v39 }
 0x586   : > { %v3415_v15 = vmul.f32 %v3414_v4, %v6684_v33  ;;  %v3440_v7 = vmul.f32 %v3439_v27, %v6715_v53 }
 0x587   : > { %v3451_v28 = vmul.f32 %v3450_v18, %v6715_v53 }
 0x588   : > { %v4625_v23 = vpop.eup %4624  ;;  %v3416_v54 = vadd.f32 1.0, %v3415_v15  ;;  %v3441_v52 = vadd.f32 0.05243302, %v3440_v7 }
 0x589   : > { %v3162_v5 = vmul.f32 %v4625_v23, %v3117_v16  ;;  %v3452_v34 = vadd.f32 0.112945676, %v3451_v28  ;;  %v6744_v1 = vpop.eup %4626  ;;  %vm3168_vm1 = vweird.f32 %v4625_v23  ;;  %v3404_v16 = vmul.f32 %v3403_v37, %v6684_v33 }
 0x58a   : > { %4628 = vrcp.f32 %v3416_v54  ;;  %v3442_v19 = vmul.f32 %v3441_v52, %v6715_v53  ;;  %v3192_v20 = vmul.f32 %v6744_v1, %v6724_v59  ;;  %vm3169_vm2 = vmor %vm3167_vm15, %vm3168_vm1  ;;  %v3428_v25 = vand.u32 2147483648, %v3416_v54 }
 0x58b   : > { %v3453_v21 = vmul.f32 %v3452_v34, %v6715_v53  ;;  %v3163_v62 = vmul.f32 %v4625_v23, %v3162_v5  ;;  %vm3422_vm4 = vweird.f32 %v3416_v54  ;;  %v3426_v42 = vand.u32 2147483647, %v3416_v54 }
 0x58c   : > { %v3443_v11 = vadd.f32 0.18741608, %v3442_v19  ;;  %v3193_v4 = vmul.f32 %v6744_v1, %v3192_v20  ;;  %v3429_v41 = vor.u32 1.1754944e-38, %v3428_v25  ;;  %v3230_v5 = vadd.f32 %v6513_v45, %v3218_v30 }
 0x58d   : > { %v3454_v35 = vadd.f32 0.4994258, %v3453_v21  ;;  %v3164_v22 = vmul.f32 0.5, %v3163_v62  ;;  %vm3427_vm6 = vcmp.eq.f32.partialorder %v3426_v42, 8.507059e+37  ;;  %vm3198_vm12 = vweird.f32 %v6744_v1 }
 0x58e   : > { %v3444_v34 = vmul.f32 %v3443_v11, %v6715_v53  ;;  %v3194_v62 = vmul.f32 0.5, %v3193_v4  ;;  %vm6771_vm14 = vmor %vm3197_vm10, %vm3198_vm12  ;;  %v3301_v30 = vmul.f32 0.5, %v6691_v57 }
 0x58f   : > { %v3037_v49 = vpop.xlane.xlu0 %3036  ;;  %v3455_v61 = vmul.f32 %v3454_v35, %v6715_v53  ;;  %v3165_v26 = vsub.f32 1.5, %v3164_v22 }
 0x590   : > { %v4629_v43 = vpop.eup %4628  ;;  %v6753_v60 = vmul.f32 %v3037_v49, %v4900_v40  ;;  %v3445_v22 = vadd.f32 1.1283791, %v3444_v34 }
 0x591   : > { %v3418_v56 = vmul.f32 %v4629_v43, %v3416_v54  ;;  %v3456_v13 = vadd.f32 1.0, %v3455_v61  ;;  %v3166_v58 = vmul.f32 %v4625_v23, %v3165_v26  ;;  %vm3423_vm3 = vweird.f32 %v4629_v43 }
 0x592   : > { %v3095_v15 = vmul.f32 %v6753_v60, %v6753_v60  ;;  %vm3424_vm5 = vmor %vm3422_vm4, %vm3423_vm3  ;;  %v3195_v26 = vsub.f32 1.5, %v3194_v62  ;;  %v3446_v63 = vmul.f32 %v3445_v22, %v6701_v48  ;;  %v3300_v48 = vmul.f32 0.5, %v6676_v51 }
 0x593   : > { %v3419_v9 = vsub.f32 1.0, %v3418_v56  ;;  %4630 = vrcp.f32 %v3456_v13  ;;  %v3170_v17 = vsel %vm3169_vm2, %v4625_v23, %v3166_v58  ;;  %v3405_v23 = vadd.f32 1.1283791, %v3404_v16 }
 0x594   : > { %v3205_v29 = vmul.f32 %v3170_v17, %v3109_v47  ;;  %v3468_v55 = vand.u32 2147483648, %v3456_v13  ;;  %v3466_v53 = vand.u32 2147483647, %v3456_v13  ;;  %vm3462_vm8 = vweird.f32 %v3456_v13 }
 0x595   : > { %v3420_v31 = vmul.f32 %v4629_v43, %v3419_v9  ;;  %v3406_v52 = vmul.f32 %v3405_v23, %v6680_v0  ;;  %v3196_v20 = vmul.f32 %v6744_v1, %v3195_v26 }
 0x596   : > { %v3217_v33 = vmul.f32 %v6503_v3, %v3205_v29  ;;  %v3469_v37 = vor.u32 1.1754944e-38, %v3468_v55  ;;  %vm3467_vm13 = vcmp.eq.f32.partialorder %v3466_v53, 8.507059e+37  ;;  %v3112_v29 = vsub.f32 %v6567_v50, %v6705_v6 }
 0x597   : > { %v3077_v27 = vpop.xlane.xlu0 %3076  ;;  %v3421_v18 = vadd.f32 %v4629_v43, %v3420_v31  ;;  %v3200_v17 = vsel %vm6771_vm14, %v6744_v1, %v3196_v20  ;;  %v3111_v1 = vsub.f32 %v6660_v36, %v6753_v60 }
 0x598   : > { %v3087_v28 = vmul.f32 %v3077_v27, %v4900_v40  ;;  %v3229_v54 = vadd.f32 %v6513_v45, %v3217_v33 }
 0x599   : > { %v4631_v32 = vpop.eup %4630  ;;  %v3425_v7 = vsel %vm3424_vm5, %v4629_v43, %v3421_v18  ;;  %v3208_v18 = vmul.f32 %v3200_v17, %v3112_v29 }
 0x59a   : > { %v3103_v2 = vsub.f32 %v3087_v28, %v3095_v15  ;;  %v3458_v21 = vmul.f32 %v4631_v32, %v3456_v13  ;;  %v3430_v39 = vsel %vm3427_vm6, %v3429_v41, %v3425_v7  ;;  %v3235_v40 = vpack.c.bf16 %v3230_v5, %v3229_v54 }
 0x59b   : > { %v3431_v49 = vmul.f32 %v3430_v39, %v3406_v52  ;;  %vm3463_vm7 = vweird.f32 %v4631_v32  ;;  %v3220_v33 = vmul.f32 %v6503_v3, %v3208_v18 }
 0x59c   : > { %v3119_v8 = vadd.f32 1e-05, %v3103_v2  ;;  %v3459_v35 = vsub.f32 1.0, %v3458_v21  ;;  %4261 = vmatmul.msk.bf16.gmra.mxu2 %vm512_vm0, %v3235_v40  ;;  %vm3464_vm9 = vmor %vm3462_vm8, %vm3463_vm7 }
 0x59d   : > { %v4265_v0 = vclamps-f32 %v3431_v49, 1.0  ;;  %v3232_v41 = vadd.f32 %v6513_v45, %v3220_v33 }
 0x59e   : > { %4632 = vrsqrt.f32 %v3119_v8  ;;  %v3460_v61 = vmul.f32 %v4631_v32, %v3459_v35  ;;  %vm3187_vm1 = vweird.f32 %v3119_v8 }
 0x59f   : > { %v3636_v59 = vadd.f32 1.0, %v4265_v0 }
 0x5a0   : > { %v3461_v43 = vadd.f32 %v4631_v32, %v3460_v61 }
 0x5a1   : > { %v3644_v4 = vmul.f32 %v3636_v59, %v3300_v48 }
 0x5a2   : > { %v3465_v56 = vsel %vm3464_vm9, %v4631_v32, %v3461_v43 }
 0x5a3   : > { %v3470_v58 = vsel %vm3467_vm13, %v3469_v37, %v3465_v56 }
 0x5a4   : > { %v4633_v19 = vpop.eup %4632  ;;  %v3471_v13 = vmul.f32 %v3470_v58, %v3446_v63 }
 0x5a5   : > { %v3182_v9 = vmul.f32 %v4633_v19, %v3119_v8  ;;  %vm3188_vm15 = vweird.f32 %v4633_v19 }
 0x5a6   : > { %v4266_v16 = vclamps-f32 %v3471_v13, 1.0  ;;  %vm3189_vm2 = vmor %vm3187_vm1, %vm3188_vm15 }
 0x5a7   : > { %v3183_v25 = vmul.f32 %v4633_v19, %v3182_v9 }
 0x5a8   : > { %v3637_v31 = vadd.f32 1.0, %v4266_v16 }
 0x5a9   : > { %v3184_v11 = vmul.f32 0.5, %v3183_v25 }
 0x5aa   : > { %v3645_v42 = vmul.f32 %v3637_v31, %v3301_v30 }
 0x5ab   : > { %v3185_v27 = vsub.f32 1.5, %v3184_v11 }
 0x5ac   : > { %v3651_v28 = vpack.c.bf16 %v3645_v42, %v3644_v4 }
 0x5ad   : > { %v3186_v15 = vmul.f32 %v4633_v19, %v3185_v27 }
 0x5ae   : > { %4288 = vmatmul.msk.bf16.gmra.mxu3 %vm2615_vm11, %v3651_v28 }
 0x5af   : > { %v3190_v51 = vsel %vm3189_vm2, %v4633_v19, %v3186_v15 }
 0x5b0   : > { %v3207_v57 = vmul.f32 %v3190_v51, %v3111_v1 }
 0x5b2   : > { %v3219_v6 = vmul.f32 %v6503_v3, %v3207_v57 }
 0x5b4   : > { %v3231_v23 = vadd.f32 %v6513_v45, %v3219_v6 }
 0x5b6   : > { %v3236_v5 = vpack.c.bf16 %v3232_v41, %v3231_v23 }
 0x5b8   : > { %4262 = vmatmul.msk.bf16.gmra.mxu2 %vm512_vm0, %v3236_v5 }
 0x61f   : > { %v3288_v32 = vpop.f32.mrf.mxu2 }
 0x620   : > { %v6791_v7 = vadd.f32 %v6564_v38, %v3288_v32 }
 0x622   : > { %v6794_v60 = vmul.f32 0.70710677, %v6791_v7 }
 0x624   : > { %v3474_v34 = vmul.f32 %v6794_v60, %v6794_v60 }
 0x626   : > { %v3475_v2 = vmin.f32 %v3474_v34, 16.0 }
 0x627   : > { %v3290_v54 = vpop.f32.mrf.mxu2 }
 0x628   : > { %v3476_v3 = vmul.f32 2.1237322e-06, %v3475_v2  ;;  %v3487_v21 = vmul.f32 3.8918573e-05, %v3475_v2  ;;  %v6799_v62 = vadd.f32 %v6564_v38, %v3290_v54 }
 0x62a   : > { %v3477_v45 = vadd.f32 0.00028619796, %v3476_v3  ;;  %v3488_v39 = vadd.f32 0.001143296, %v3487_v21  ;;  %v6802_v8 = vmul.f32 0.70710677, %v6799_v62 }
 0x62c   : > { %v3478_v40 = vmul.f32 %v3477_v45, %v3475_v2  ;;  %v3489_v52 = vmul.f32 %v3488_v39, %v3475_v2  ;;  %v3514_v35 = vmul.f32 %v6802_v8, %v6802_v8 }
 0x62e   : > { %v3490_v22 = vadd.f32 0.014752088, %v3489_v52  ;;  %v3515_v55 = vmin.f32 %v3514_v35, 16.0  ;;  %v3479_v49 = vadd.f32 0.0036580483, %v3478_v40 }
 0x630   : > { %v3491_v61 = vmul.f32 %v3490_v22, %v3475_v2  ;;  %v3516_v53 = vmul.f32 2.1237322e-06, %v3515_v55  ;;  %v3527_v26 = vmul.f32 3.8918573e-05, %v3515_v55  ;;  %v3480_v63 = vmul.f32 %v3479_v49, %v3475_v2 }
 0x632   : > { %v3492_v43 = vadd.f32 0.112945676, %v3491_v61  ;;  %v3517_v37 = vadd.f32 0.00028619796, %v3516_v53  ;;  %v3528_v0 = vadd.f32 0.001143296, %v3527_v26 }
 0x633   : > { %v3481_v9 = vadd.f32 0.05243302, %v3480_v63 }
 0x634   : > { %v3493_v56 = vmul.f32 %v3492_v43, %v3475_v2  ;;  %v3518_v19 = vmul.f32 %v3517_v37, %v3515_v55  ;;  %v3529_v20 = vmul.f32 %v3528_v0, %v3515_v55 }
 0x635   : > { %v3482_v11 = vmul.f32 %v3481_v9, %v3475_v2 }
 0x636   : > { %v3494_v58 = vadd.f32 0.4994258, %v3493_v56  ;;  %v3519_v47 = vadd.f32 0.0036580483, %v3518_v19  ;;  %v3530_v13 = vadd.f32 0.014752088, %v3529_v20 }
 0x637   : > { %v3483_v18 = vadd.f32 0.18741608, %v3482_v11 }
 0x638   : > { %v3495_v59 = vmul.f32 %v3494_v58, %v3475_v2  ;;  %v3531_v16 = vmul.f32 %v3530_v13, %v3515_v55  ;;  %v3520_v48 = vmul.f32 %v3519_v47, %v3515_v55 }
 0x639   : > { %v3484_v5 = vmul.f32 %v3483_v18, %v3475_v2 }
 0x63a   : > { %v3496_v17 = vadd.f32 1.0, %v3495_v59  ;;  %v3532_v31 = vadd.f32 0.112945676, %v3531_v16  ;;  %v3521_v4 = vadd.f32 0.05243302, %v3520_v48 }
 0x63b   : > { %v3293_v25 = vpop.f32.mrf.mxu2  ;;  %v3485_v35 = vadd.f32 1.1283791, %v3484_v5 }
 0x63c   : > { %v6807_v30 = vadd.f32 %v6564_v38, %v3293_v25  ;;  %4634 = vrcp.f32 %v3496_v17  ;;  %v3533_v29 = vmul.f32 %v3532_v31, %v3515_v55  ;;  %v3522_v57 = vmul.f32 %v3521_v4, %v3515_v55 }
 0x63d   : > { %v3508_v3 = vand.u32 2147483648, %v3496_v17  ;;  %v3506_v22 = vand.u32 2147483647, %v3496_v17  ;;  %vm3502_vm4 = vweird.f32 %v3496_v17  ;;  %v3486_v56 = vmul.f32 %v3485_v35, %v6794_v60 }
 0x63e   : > { %v6810_v42 = vmul.f32 0.70710677, %v6807_v30  ;;  %v3534_v27 = vadd.f32 0.4994258, %v3533_v29  ;;  %v3523_v21 = vadd.f32 0.18741608, %v3522_v57 }
 0x63f   : > { %v3509_v61 = vor.u32 1.1754944e-38, %v3508_v3  ;;  %vm3507_vm6 = vcmp.eq.f32.partialorder %v3506_v22, 8.507059e+37  ;;  %v3302_v22 = vmul.f32 0.5, %v6791_v7 }
 0x640   : > { %v3554_v15 = vmul.f32 %v6810_v42, %v6810_v42  ;;  %v3535_v28 = vmul.f32 %v3534_v27, %v3515_v55  ;;  %v3524_v53 = vmul.f32 %v3523_v21, %v3515_v55 }
 0x642   : > { %v4635_v51 = vpop.eup %4634  ;;  %v6814_v33 = vmin.f32 %v3554_v15, 16.0  ;;  %v3536_v23 = vadd.f32 1.0, %v3535_v28  ;;  %v3525_v9 = vadd.f32 1.1283791, %v3524_v53 }
 0x643   : > { %v3295_v1 = vpop.f32.mrf.mxu2  ;;  %v3498_v6 = vmul.f32 %v4635_v51, %v3496_v17  ;;  %vm3503_vm3 = vweird.f32 %v4635_v51 }
 0x644   : > { %v6817_v41 = vadd.f32 %v6564_v38, %v3295_v1  ;;  %v3556_v32 = vmul.f32 2.1237322e-06, %v6814_v33  ;;  %v3567_v34 = vmul.f32 3.8918573e-05, %v6814_v33  ;;  %4636 = vrcp.f32 %v3536_v23  ;;  %vm3504_vm5 = vmor %vm3502_vm4, %vm3503_vm3 }
 0x645   : > { %v3499_v54 = vsub.f32 1.0, %v3498_v6  ;;  %v3546_v59 = vand.u32 2147483647, %v3536_v23  ;;  %v3548_v16 = vand.u32 2147483648, %v3536_v23  ;;  %v3526_v27 = vmul.f32 %v3525_v9, %v6802_v8 }
 0x646   : > { %v3557_v39 = vadd.f32 0.00028619796, %v3556_v32  ;;  %v3568_v40 = vadd.f32 0.001143296, %v3567_v34  ;;  %v6822_v52 = vmul.f32 0.70710677, %v6817_v41  ;;  %vm3542_vm8 = vweird.f32 %v3536_v23 }
 0x647   : > { %v3500_v45 = vmul.f32 %v4635_v51, %v3499_v54  ;;  %vm3547_vm12 = vcmp.eq.f32.partialorder %v3546_v59, 8.507059e+37  ;;  %v3549_v28 = vor.u32 1.1754944e-38, %v3548_v16 }
 0x648   : > { %v3569_v2 = vmul.f32 %v3568_v40, %v6814_v33  ;;  %v3594_v49 = vmul.f32 %v6822_v52, %v6822_v52  ;;  %v3558_v37 = vmul.f32 %v3557_v39, %v6814_v33 }
 0x649   : > { %v3501_v38 = vadd.f32 %v4635_v51, %v3500_v45 }
 0x64a   : > { %v4637_v26 = vpop.eup %4636  ;;  %v3570_v0 = vadd.f32 0.014752088, %v3569_v2  ;;  %v6828_v63 = vmin.f32 %v3594_v49, 16.0  ;;  %v3559_v25 = vadd.f32 0.0036580483, %v3558_v37 }
 0x64b   : > { %v3505_v43 = vsel %vm3504_vm5, %v4635_v51, %v3501_v38  ;;  %v3538_v19 = vmul.f32 %v4637_v26, %v3536_v23  ;;  %vm3543_vm7 = vweird.f32 %v4637_v26  ;;  %v3303_v38 = vmul.f32 0.5, %v6799_v62 }
 0x64c   : > { %v3510_v20 = vsel %vm3507_vm6, %v3509_v61, %v3505_v43  ;;  %v3571_v58 = vmul.f32 %v3570_v0, %v6814_v33  ;;  %v3596_v47 = vmul.f32 2.1237322e-06, %v6828_v63  ;;  %v3607_v13 = vmul.f32 3.8918573e-05, %v6828_v63  ;;  %vm3544_vm10 = vmor %vm3542_vm8, %vm3543_vm7 }
 0x64d   : > { %v3539_v55 = vsub.f32 1.0, %v3538_v19  ;;  %v3511_v31 = vmul.f32 %v3510_v20, %v3486_v56  ;;  %v3560_v1 = vmul.f32 %v3559_v25, %v6814_v33  ;;  %vm3767_vm5 = vcmask 1042434  }
 0x64e   : > { %v3572_v17 = vadd.f32 0.112945676, %v3571_v58  ;;  %v3597_v48 = vadd.f32 0.00028619796, %v3596_v47  ;;  %v3608_v60 = vadd.f32 0.001143296, %v3607_v13 }
 0x64f   : > { %v3540_v11 = vmul.f32 %v4637_v26, %v3539_v55  ;;  %v4267_v57 = vclamps-f32 %v3511_v31, 1.0  ;;  %v3561_v21 = vadd.f32 0.05243302, %v3560_v1  ;;  %vm3770_vm6 = vcmask 1043459  }
 0x650   : > { %v3573_v29 = vmul.f32 %v3572_v17, %v6814_v33  ;;  %v3598_v4 = vmul.f32 %v3597_v48, %v6828_v63  ;;  %v3609_v15 = vmul.f32 %v3608_v60, %v6828_v63  ;;  %vm3773_vm7 = vcmask 1044484  }
 0x651   : > { %v3541_v18 = vadd.f32 %v4637_v26, %v3540_v11  ;;  %v3638_v45 = vadd.f32 1.0, %v4267_v57  ;;  %v3562_v61 = vmul.f32 %v3561_v21, %v6814_v33  ;;  %v3305_v21 = vmul.f32 0.5, %v6817_v41 }
 0x652   : > { %v3574_v51 = vadd.f32 0.4994258, %v3573_v29  ;;  %v3599_v5 = vadd.f32 0.0036580483, %v3598_v4  ;;  %v3610_v32 = vadd.f32 0.014752088, %v3609_v15 }
 0x653   : > { %v3545_v6 = vsel %vm3544_vm10, %v4637_v26, %v3541_v18  ;;  %v3646_v53 = vmul.f32 %v3638_v45, %v3302_v22  ;;  %v3563_v20 = vadd.f32 0.18741608, %v3562_v61  ;;  %vm3776_vm8 = vcmask 1045509  }
 0x654   : > { %v3550_v34 = vsel %vm3547_vm12, %v3549_v28, %v3545_v6  ;;  %v3575_v54 = vmul.f32 %v3574_v51, %v6814_v33  ;;  %v3611_v8 = vmul.f32 %v3610_v32, %v6828_v63  ;;  %v3600_v40 = vmul.f32 %v3599_v5, %v6828_v63 }
 0x655   : > { %v3551_v3 = vmul.f32 %v3550_v34, %v3526_v27  ;;  %v3564_v13 = vmul.f32 %v3563_v20, %v6814_v33  ;;  %vm3779_vm10 = vcmask 1046534   ;;  %vm3782_vm12 = vcmask 1047559  }
 0x656   : > { %v3576_v23 = vadd.f32 1.0, %v3575_v54  ;;  %v3612_v35 = vadd.f32 0.112945676, %v3611_v8  ;;  %v3601_v43 = vadd.f32 0.05243302, %v3600_v40  ;;  %v3304_v8 = vmul.f32 0.5, %v6807_v30 }
 0x657   : > { %v4268_v39 = vclamps-f32 %v3551_v3, 1.0  ;;  %v3565_v17 = vadd.f32 1.1283791, %v3564_v13 }
 0x658   : > { %4638 = vrcp.f32 %v3576_v23  ;;  %v3613_v49 = vmul.f32 %v3612_v35, %v6828_v63  ;;  %v3602_v47 = vmul.f32 %v3601_v43, %v6828_v63  ;;  %v3588_v55 = vand.u32 2147483648, %v3576_v23  ;;  %v3711_v35 = vpop.f32.mrf.mxu3 }
 0x659   : > { %v3639_v2 = vadd.f32 1.0, %v4268_v39  ;;  %v3586_v16 = vand.u32 2147483647, %v3576_v23  ;;  %vm3582_vm13 = vweird.f32 %v3576_v23  ;;  %v3566_v27 = vmul.f32 %v3565_v17, %v6810_v42 }
 0x65a   : > { %v3614_v37 = vadd.f32 0.4994258, %v3613_v49  ;;  %v3603_v59 = vadd.f32 0.18741608, %v3602_v47  ;;  %v3589_v11 = vor.u32 1.1754944e-38, %v3588_v55 }
 0x65b   : > { %v3647_v26 = vmul.f32 %v3639_v2, %v3303_v38  ;;  %vm3587_vm15 = vcmp.eq.f32.partialorder %v3586_v16, 8.507059e+37 }
 0x65c   : > { %v3615_v0 = vmul.f32 %v3614_v37, %v6828_v63  ;;  %v3604_v60 = vmul.f32 %v3603_v59, %v6828_v63 }
 0x65d   : > { %v3652_v56 = vpack.c.bf16 %v3647_v26, %v3646_v53 }
 0x65e   : > { %v4639_v19 = vpop.eup %4638  ;;  %v3616_v7 = vadd.f32 1.0, %v3615_v0  ;;  %v3605_v18 = vadd.f32 1.1283791, %v3604_v60 }
 0x65f   : > { %v3578_v58 = vmul.f32 %v4639_v19, %v3576_v23  ;;  %4289 = vmatmul.msk.bf16.gmra.mxu3 %vm2615_vm11, %v3652_v56  ;;  %vm3583_vm9 = vweird.f32 %v4639_v19 }
 0x660   : > { %4640 = vrcp.f32 %v3616_v7  ;;  %vm3584_vm14 = vmor %vm3582_vm13, %vm3583_vm9  ;;  %v3628_v15 = vand.u32 2147483648, %v3616_v7  ;;  %v3626_v51 = vand.u32 2147483647, %v3616_v7  ;;  %vm3622_vm2 = vweird.f32 %v3616_v7  ;;  %v3713_v22 = vpop.f32.mrf.mxu3 }
 0x661   : > { %v3579_v62 = vsub.f32 1.0, %v3578_v58  ;;  %v3606_v32 = vmul.f32 %v3605_v18, %v6822_v52  ;;  %v6859_v52 = vld [vmem:[%s7121_s12] ss:$0 sm:$0xff]  ;;  %vm3786_vm9 = vcmask 257024   ;;  %vm3806_vm13 = vcmask 519424  }
 0x662   : > { %v3629_v6 = vor.u32 1.1754944e-38, %v3628_v15  ;;  %vm3627_vm4 = vcmp.eq.f32.partialorder %v3626_v51, 8.507059e+37  ;;  %v3712_v49 = vadd.f32 %v6859_v52, %v3711_v35  ;;  %v3714_v30 = vadd.f32 %v6859_v52, %v3713_v22 }
 0x663   : > { %v3580_v9 = vmul.f32 %v4639_v19, %v3579_v62 }
 0x664   : > { %v3731_v41 = vadd.f32 %v3712_v49, %v6433_v24  ;;  %v3732_v53 = vadd.f32 %v3714_v30, %v6450_v46 }
 0x665   : > { %v3581_v25 = vadd.f32 %v4639_v19, %v3580_v9 }
 0x666   : > { %v4641_v48 = vpop.eup %4640  ;;  %v3739_v43 = vpack.c.bf16 %v3731_v41, %v3731_v41  ;;  %v3740_v0 = vpack.c.bf16 %v3732_v53, %v3732_v53 }
 0x667   : > { %v3585_v31 = vsel %vm3584_vm14, %v4639_v19, %v3581_v25  ;;  %v3618_v29 = vmul.f32 %v4641_v48, %v3616_v7  ;;  %vm3623_vm1 = vweird.f32 %v4641_v48  ;;  %vm3826_vm14 = vcmask 781824  }
 0x668   : > { %v3590_v4 = vsel %vm3587_vm15, %v3589_v11, %v3585_v31  ;;  %vm3624_vm3 = vmor %vm3622_vm2, %vm3623_vm1  ;;  %v3716_v38 = vpop.f32.mrf.mxu3  ;;  %v6868_v19 = vunpack.c.l.b16 %v3739_v43  ;;  %v6870_v58 = vunpack.c.l.b16 %v3740_v0  ;;  %vm3846_vm15 = vcmask 1044224  }
 0x669   : > { %v3619_v33 = vsub.f32 1.0, %v3618_v29  ;;  %v3591_v28 = vmul.f32 %v3590_v4, %v3566_v27  ;;  %v3717_v61 = vadd.f32 %v6859_v52, %v3716_v38 }
 0x66a   : > { %v3884_v46 = vrot.slane %v6868_v19, 6  ;;  %v3865_v9 = vrot.slane %v6868_v19, 5  ;;  %v3866_v55 = vrot.slane %v6870_v58, 4  ;;  %v3788_v25 = vrot.slane %v6868_v19, 1 }
 0x66b   : > { %v3620_v1 = vmul.f32 %v4641_v48, %v3619_v33  ;;  %v4269_v5 = vclamps-f32 %v3591_v28, 1.0  ;;  %v3733_v37 = vadd.f32 %v3717_v61, %v6507_v10  ;;  %v3885_v10 = vrot.slane %v6870_v58, 5 }
 0x66c   : > { %v3809_v17 = vrot.slane %v6870_v58, 1  ;;  %v3763_v31 = vrot.slane %v6870_v58, 7  ;;  %v3828_v60 = vrot.slane %v6868_v19, 3  ;;  %v3808_v29 = vrot.slane %v6868_v19, 2 }
 0x66d   : > { %v3621_v57 = vadd.f32 %v4641_v48, %v3620_v1  ;;  %v3640_v3 = vadd.f32 1.0, %v4269_v5  ;;  %v3741_v20 = vpack.c.bf16 %v3733_v37, %v3733_v37 }
 0x66f   : > { %v3625_v63 = vsel %vm3624_vm3, %v4641_v48, %v3621_v57  ;;  %v3648_v45 = vmul.f32 %v3640_v3, %v3304_v8  ;;  %v6874_v62 = vunpack.c.l.b16 %v3741_v20  ;;  %v3849_v48 = vrot.slane %v6870_v58, 3 }
 0x670   : > { %v3630_v34 = vsel %vm3627_vm4, %v3629_v6, %v3625_v63  ;;  %v3718_v2 = vpop.f32.mrf.mxu3 }
 0x671   : > { %v3631_v54 = vmul.f32 %v3630_v34, %v3606_v32  ;;  %v3719_v56 = vadd.f32 %v6859_v52, %v3718_v2  ;;  %v3887_v11 = vrot.slane %v6874_v62, 4  ;;  %v3868_v1 = vrot.slane %v6874_v62, 3 }
 0x672   : > { %v3790_v34 = vrot.slane %v6874_v62, 7  ;;  %v3851_v22 = vrot.slane %v6874_v62, 2  ;;  %v3766_v38 = vrot.slane %v6874_v62, 6 }
 0x673   : > { %v4270_v42 = vclamps-f32 %v3631_v54, 1.0  ;;  %v3734_v47 = vadd.f32 %v3719_v56, %v6525_v12  ;;  %v3829_v12 = vrot.slane %v6870_v58, 2 }
 0x675   : > { %v3641_v23 = vadd.f32 1.0, %v4270_v42  ;;  %v3742_v13 = vpack.c.bf16 %v3734_v47, %v3734_v47  ;;  %v4376_v47 = vld [vmem:[%s7122_s13 + $0x38] sm:$0xff] }
 0x676   : > { %4062 = vmatpush.bf16.msra.mxu2 %v4376_v47 }
 0x677   : > { %v3649_v39 = vmul.f32 %v3641_v23, %v3305_v21  ;;  %v6891_v4 = vunpack.c.l.b16 %v3742_v13 }
 0x679   : > { %v3653_v40 = vpack.c.bf16 %v3649_v39, %v3648_v45  ;;  %v3889_v3 = vrot.slane %v6891_v4, 3  ;;  %v3870_v42 = vrot.slane %v6891_v4, 2  ;;  %v3792_v8 = vrot.slane %v6891_v4, 6 }
 0x67a   : > { %v3812_v39 = vrot.slane %v6891_v4, 7  ;;  %v3853_v30 = vrot.slane %v6891_v4, 1  ;;  %v3769_v41 = vrot.slane %v6891_v4, 5 }
 0x67b   : > { %4290 = vmatmul.msk.bf16.gmra.mxu3 %vm2615_vm11, %v3653_v40  ;;  %vm3764_vm11 = vcmask 1041409  }
 0x67c   : > { %v3886_v27 = vsel %vm3764_vm11, %v3885_v10, %v3884_v46  ;;  %v3867_v33 = vsel %vm3764_vm11, %v3866_v55, %v3865_v9  ;;  %v3789_v18 = vsel %vm3764_vm11, %v6870_v58, %v3788_v25  ;;  %v3830_v51 = vsel %vm3764_vm11, %v3829_v12, %v3828_v60  ;;  %v4375_v25 = vld [vmem:[%s7122_s13 + $0x30] sm:$0xff] }
 0x67d   : > { %v3810_v57 = vsel %vm3764_vm11, %v3809_v17, %v3808_v29  ;;  %v3765_v5 = vsel %vm3764_vm11, %v3763_v31, %v6868_v19  ;;  %v3888_v63 = vsel %vm3767_vm5, %v3887_v11, %v3886_v27  ;;  %v3869_v45 = vsel %vm3767_vm5, %v3868_v1, %v3867_v33  ;;  %v4383_v17 = vld [vmem:[%s7122_s13 + $0x70] sm:$0xff]  ;;  %4063 = vmatpush.bf16.msra.mxu2 %v4375_v25 }
 0x67e   : > { %v3811_v35 = vsel %vm3767_vm5, %v6874_v62, %v3810_v57  ;;  %v3791_v2 = vsel %vm3767_vm5, %v3790_v34, %v3789_v18  ;;  %v3890_v61 = vsel %vm3770_vm6, %v3889_v3, %v3888_v63  ;;  %v3871_v53 = vsel %vm3770_vm6, %v3870_v42, %v3869_v45 }
 0x67f   : > { %v6935_v56 = vsel %vm3770_vm6, %v3812_v39, %v3811_v35  ;;  %v3768_v46 = vsel %vm3767_vm5, %v3766_v38, %v3765_v5 }
 0x680   : > { %v3771_v55 = vsel %vm3770_vm6, %v3769_v41, %v3768_v46 }
 0x6e2   : > { %v3721_v26 = vpop.f32.mrf.mxu3 }
 0x6e3   : > { %v3722_v24 = vadd.f32 %v6859_v52, %v3721_v26 }
 0x6e5   : > { %v3735_v59 = vadd.f32 %v3722_v24, %v6535_v44  ;;  %v3848_v44 = vrot.slane %v6868_v19, 4  ;;  %v4384_v24 = vld [vmem:[%s7122_s13 + $0x78] sm:$0xff] }
 0x6e6   : > { %4075 = vmatpush.bf16.msra.mxu3 %v4384_v24 }
 0x6e7   : > { %v3743_v15 = vpack.c.bf16 %v3735_v59, %v3735_v59  ;;  %v3850_v6 = vsel %vm3764_vm11, %v3849_v48, %v3848_v44 }
 0x6e9   : > { %v6911_v21 = vunpack.c.l.b16 %v3743_v15 }
 0x6ea   : > { %v3723_v7 = vpop.f32.mrf.mxu3  ;;  %4076 = vmatpush.bf16.msra.mxu3 %v4383_v17 }
 0x6eb   : > { %v3724_v16 = vadd.f32 %v6859_v52, %v3723_v7  ;;  %v3891_v0 = vrot.slane %v6911_v21, 2  ;;  %v3872_v20 = vrot.slane %v6911_v21, 1  ;;  %v3852_v7 = vsel %vm3767_vm5, %v3851_v22, %v3850_v6 }
 0x6ec   : > { %v3794_v10 = vrot.slane %v6911_v21, 5  ;;  %v3854_v9 = vsel %vm3770_vm6, %v3853_v30, %v3852_v7  ;;  %v3814_v12 = vrot.slane %v6911_v21, 6  ;;  %v3772_v48 = vrot.slane %v6911_v21, 4 }
 0x6ed   : > { %v3736_v28 = vadd.f32 %v3724_v16, %v6538_v14  ;;  %v3831_v14 = vrot.slane %v6874_v62, 1  ;;  %v3834_v16 = vrot.slane %v6911_v21, 7  ;;  %v3855_v60 = vsel %vm3773_vm7, %v6911_v21, %v3854_v9 }
 0x6ee   : > { %v3873_v44 = vsel %vm3773_vm7, %v3872_v20, %v3871_v53 }
 0x6ef   : > { %v3744_v23 = vpack.c.bf16 %v3736_v28, %v3736_v28  ;;  %v3832_v49 = vsel %vm3767_vm5, %v3831_v14, %v3830_v51 }
 0x6f0   : > { %v6929_v26 = vsel %vm3770_vm6, %v6891_v4, %v3832_v49 }
 0x6f1   : > { %v6931_v43 = vunpack.c.l.b16 %v3744_v23  ;;  %v3835_v46 = vsel %vm3773_vm7, %v3834_v16, %v6929_v26 }
 0x6f3   : > { %v3893_v11 = vrot.slane %v6931_v43, 1  ;;  %v3796_v27 = vrot.slane %v6931_v43, 4  ;;  %v3856_v33 = vrot.slane %v6931_v43, 7  ;;  %v3775_v15 = vrot.slane %v6931_v43, 3 }
 0x6f4   : > { %v3874_v1 = vsel %vm3776_vm8, %v6931_v43, %v3873_v44  ;;  %v3836_v51 = vrot.slane %v6931_v43, 6  ;;  %v3912_v44 = vrot.slane %v6931_v43, 2 }
 0x6f5   : > { %v3857_v14 = vsel %vm3776_vm8, %v3856_v33, %v3855_v60  ;;  %v3910_v60 = vrot.slane %v6911_v21, 3 }
 0x6fe   : > { %v3726_v32 = vpop.f32.mrf.mxu3 }
 0x6ff   : > { %v3727_v54 = vadd.f32 %v6859_v52, %v3726_v32  ;;  %v3816_v32 = vrot.slane %v6931_v43, 5 }
 0x701   : > { %v3737_v40 = vadd.f32 %v3727_v54, %v6660_v36  ;;  %v3793_v36 = vsel %vm3770_vm6, %v3792_v8, %v3791_v2 }
 0x702   : > { %v3795_v18 = vsel %vm3773_vm7, %v3794_v10, %v3793_v36 }
 0x703   : > { %v3745_v37 = vpack.c.bf16 %v3737_v40, %v3737_v40  ;;  %v3797_v34 = vsel %vm3776_vm8, %v3796_v27, %v3795_v18 }
 0x705   : > { %v6959_v31 = vunpack.c.l.b16 %v3745_v37 }
 0x706   : > { %v3728_v13 = vpop.f32.mrf.mxu3 }
 0x707   : > { %v3729_v59 = vadd.f32 %v6859_v52, %v3728_v13  ;;  %v3892_v52 = vsel %vm3773_vm7, %v3891_v0, %v3890_v61  ;;  %v3875_v6 = vrot.slane %v6959_v31, 7  ;;  %v3798_v5 = vrot.slane %v6959_v31, 3 }
 0x708   : > { %v3894_v57 = vsel %vm3776_vm8, %v3893_v11, %v3892_v52  ;;  %v3858_v54 = vrot.slane %v6959_v31, 6  ;;  %v3778_v8 = vrot.slane %v6959_v31, 2  ;;  %v3838_v40 = vrot.slane %v6959_v31, 5 }
 0x709   : > { %v3738_v29 = vadd.f32 %v3729_v59, %v6567_v50  ;;  %v3774_v50 = vsel %vm3773_vm7, %v3772_v48, %v3771_v55  ;;  %v3895_v3 = vsel %vm3779_vm10, %v6959_v31, %v3894_v57  ;;  %v3876_v35 = vsel %vm3779_vm10, %v3875_v6, %v3874_v1  ;;  %v4373_v1 = vld [vmem:[%s7122_s13 + $0x20] sm:$0xff]  ;;  %v4380_v57 = vld [vmem:[%s7122_s13 + $0x58] sm:$0xff]  ;;  %v4371_v6 = vld [vmem:[%s7122_s13 + $0x10] sm:$0xff] }
 0x70a   : > { %v3777_v42 = vsel %vm3776_vm8, %v3775_v15, %v3774_v50  ;;  %v3799_v22 = vsel %vm3779_vm10, %v3798_v5, %v3797_v34  ;;  %v3859_v61 = vsel %vm3779_vm10, %v3858_v54, %v3857_v14  ;;  %v3818_v47 = vrot.slane %v6959_v31, 4  ;;  %v4372_v50 = vld [vmem:[%s7122_s13 + $0x18] sm:$0xff]  ;;  %v4379_v5 = vld [vmem:[%s7122_s13 + $0x50] sm:$0xff]  ;;  %v4369_v34 = vld [vmem:[%s7122_s13] sm:$0xff] }
 0x70b   : > { %v3746_v28 = vpack.c.bf16 %v3738_v29, %v3738_v29  ;;  %v3780_v0 = vsel %vm3779_vm10, %v3778_v8, %v3777_v42  ;;  %v3837_v55 = vsel %vm3776_vm8, %v3836_v51, %v3835_v46  ;;  %v3815_v59 = vsel %vm3773_vm7, %v3814_v12, %v6935_v56  ;;  %v4381_v51 = vld [vmem:[%s7122_s13 + $0x60] sm:$0xff] }
 0x70c   : > { %v3839_v25 = vsel %vm3779_vm10, %v3838_v40, %v3837_v55  ;;  %v3817_v17 = vsel %vm3776_vm8, %v3816_v32, %v3815_v59  ;;  %v3904_v48 = vrot.slane %v6870_v58, 6  ;;  %v3906_v52 = vrot.slane %v6874_v62, 5  ;;  %v4370_v32 = vld [vmem:[%s7122_s13 + $0x8] sm:$0xff]  ;;  %v4377_v14 = vld [vmem:[%s7122_s13 + $0x40] sm:$0xff] }
 0x70d   : > { %v6979_v63 = vunpack.c.l.b16 %v3746_v28  ;;  %v3819_v16 = vsel %vm3779_vm10, %v3818_v47, %v3817_v17  ;;  %v3903_v56 = vrot.slane %v6868_v19, 7  ;;  %v3908_v12 = vrot.slane %v6891_v4, 4  ;;  %v4382_v28 = vld [vmem:[%s7122_s13 + $0x68] sm:$0xff] }
 0x70e   : > { %v3914_v62 = vrot.slane %v6959_v31, 1  ;;  %v4374_v31 = vld [vmem:[%s7122_s13 + $0x28] sm:$0xff]  ;;  %4077 = vmatpush.bf16.msra.mxu3 %v4382_v28 }
 0x70f   : > { %v3896_v23 = vrot.slane %v6979_v63, 7  ;;  %v3877_v45 = vrot.slane %v6979_v63, 6  ;;  %v3800_v39 = vrot.slane %v6979_v63, 2  ;;  %v3860_v38 = vrot.slane %v6979_v63, 5  ;;  %4064 = vmatpush.bf16.msra.mxu2 %v4374_v31 }
 0x710   : > { %v3781_v2 = vrot.slane %v6979_v63, 1  ;;  %v3840_v20 = vrot.slane %v6979_v63, 4  ;;  %v3820_v13 = vrot.slane %v6979_v63, 3  ;;  %v3905_v58 = vsel %vm3764_vm11, %v3904_v48, %v3903_v56 }
 0x711   : > { %v3897_v49 = vsel %vm3782_vm12, %v3896_v23, %v3895_v3  ;;  %v3878_v30 = vsel %vm3782_vm12, %v3877_v45, %v3876_v35  ;;  %v3801_v41 = vsel %vm3782_vm12, %v3800_v39, %v3799_v22  ;;  %v3861_v24 = vsel %vm3782_vm12, %v3860_v38, %v3859_v61 }
 0x712   : > { %v3898_v53 = vpack.c.b16 %v3897_v49, %v3897_v49  ;;  %v3879_v36 = vpack.c.b16 %v3878_v30, %v3878_v30  ;;  %v3802_v37 = vpack.c.b16 %v3801_v41, %v3801_v41  ;;  %v3783_v7 = vsel %vm3782_vm12, %v3781_v2, %v3780_v0  ;;  %4078 = vmatpush.bf16.msra.mxu3 %v4381_v51  ;;  %v4527_v2 = vld [vmem:[%s7123_s14] ss:$0 sm:$0xff] }
 0x713   : > { %v3862_v10 = vpack.c.b16 %v3861_v24, %v3861_v24  ;;  %v3784_v9 = vpack.c.b16 %v3783_v7, %v3783_v7  ;;  %v3841_v26 = vsel %vm3782_vm12, %v3840_v20, %v3839_v25  ;;  %v3821_v11 = vsel %vm3782_vm12, %v3820_v13, %v3819_v16  ;;  %4065 = vmatpush.bf16.msra.mxu2 %v4373_v1 }
 0x714   : > { %3899 = vrot.lane.b32.xlu2 %v3898_v53, %s4710_s25  ;;  %3880 = vrot.lane.b32.xlu1 %v3879_v36, %s4711_s26  ;;  %v3842_v29 = vpack.c.b16 %v3841_v26, %v3841_v26  ;;  %v3822_v27 = vpack.c.b16 %v3821_v11, %v3821_v11  ;;  %v3907_v33 = vsel %vm3767_vm5, %v3906_v52, %v3905_v58 }
 0x715   : > { %3803 = vrot.lane.b32.xlu0 %v3802_v37, %s4711_s26  ;;  %3864 = vst.msk [vmem:[#allocation2 + $0x4] sm:$0xf] %vm3786_vm9, %v3862_v10  ;;  %v3909_v18 = vsel %vm3770_vm6, %v3908_v12, %v3907_v33  ;;  %s4104_s26 = sshll.u32 %s4100_s16, 4  ;;  %s4105_s26 = int_to_ptr.hbm [resolvable:$true] %s4104_s26 }
 0x716   : > { %3787 = vst.msk [vmem:[#allocation2] sm:$0xf] %vm3786_vm9, %v3784_v9  ;;  %v3911_v19 = vsel %vm3773_vm7, %v3910_v60, %v3909_v18  ;;  %4079 = vmatpush.bf16.msra.mxu3 %v4380_v57  ;;  %s4659_s5 = sshra.s32 %s4105_s26, 4  ;;  %s4660_s5 = int_to_ptr.hbm [resolvable:$true] %s4659_s5 }
 0x717   : > { %v3913_v4 = vsel %vm3776_vm8, %v3912_v44, %v3911_v19  ;;  %4066 = vmatpush.bf16.msra.mxu2 %v4372_v50  ;;  %s4661_s1 = scalar_lea.hbm %s4660_s5, 8  ;;  %p4666_p0 = scmp.lt.s32.totalorder %s4660_s5, %s7124_s15 }
 0x718   : > { %v3915_v21 = vsel %vm3779_vm10, %v3914_v62, %v3913_v4  ;;  %p4662_p11 = scmp.ne.s32.totalorder %s4660_s5, %s4661_s1 }
 0x719   : > { %v3916_v43 = vsel %vm3782_vm12, %v6979_v63, %v3915_v21  ;;  %v4378_v63 = vld [vmem:[%s7122_s13 + $0x48] sm:$0xff] }
 0x71a   : > { %v3917_v15 = vpack.c.b16 %v3916_v43, %v3916_v43  ;;  %4080 = vmatpush.bf16.msra.mxu3 %v4379_v5  ;;  %p4663_p12 = pnand %p4662_p11, %p4828_p5 }
 0x71b   : > { %4067 = vmatpush.bf16.msra.mxu2 %v4371_v6 }
 0x71c   : > { %3843 = vrot.lane.b32.xlu1 %v3842_v29, %s4712_s22  ;;  %p4664_p13 = pneg %p4663_p12 }
 0x71d   : > { %3823 = vrot.lane.b32.xlu0 %v3822_v27, %s4710_s25  ;;  %s4168_s25 = sshll.u32 %s486_s0, 3 }
 0x71e   : > { %4081 = vmatpush.bf16.msra.mxu3 %v4378_v63  ;;  %s488_s17 = scalar_lea.vmem [#allocation3], %s4168_s25  ;;  %s4665_s25 = scalar_lea.hbm %s7124_s15, 16 }
 0x71f   : > { %4068 = vmatpush.bf16.msra.mxu2 %v4370_v32  ;;  %s4102_s23 = sshll.u32 %s488_s17, 4  ;;  %p4667_p1 = scmp.lt.s32.totalorder %s4665_s25, %s4661_s1  ;;  %s4103_s23 = int_to_ptr.vmem [resolvable:$true] %s4102_s23 }
 0x721   : > { %p4668_p2 = por %p4667_p1, %p4666_p0 }
 0x722   : > { %4082 = vmatpush.bf16.msra.mxu3 %v4377_v14 }
 0x723   : > { %4069 = vmatpush.bf16.msra.mxu2 %v4369_v34  ;;  %p4669_p3 = pnand %p4668_p2, %p4664_p13 }
 0x725   : > { %3918 = vrot.lane.b32.xlu0 %v3917_v15, %s4712_s22 }
 0x76e   : > { %v3900_v42 = vpop.permute.xlu2 %3899 }
 0x786   : > { %v3881_v54 = vpop.permute.xlu1 %3880 }
 0x787   : > { %3883 = vst.msk [vmem:[#allocation2 + $0x4] sm:$0xf] %vm3806_vm13, %v3881_v54  ;;  %v3804_v3 = vpop.permute.xlu0 %3803 }
 0x788   : > { %3807 = vst.msk [vmem:[#allocation2] sm:$0xf] %vm3806_vm13, %v3804_v3 }
 0x789   : > { %3902 = vst.msk [vmem:[#allocation2 + $0x4] sm:$0xf] %vm3826_vm14, %v3900_v42 }
 0x78e   : > { %v3844_v8 = vpop.permute.xlu1 %3843 }
 0x78f   : > { %v3824_v23 = vpop.permute.xlu0 %3823 }
 0x790   : > { %3827 = vst.msk [vmem:[#allocation2] sm:$0xf] %vm3826_vm14, %v3824_v23 }
 0x791   : > { %3847 = vst.msk [vmem:[#allocation2] sm:$0xf] %vm3846_vm15, %v3844_v8 }
 0x797   : > { %v3919_v45 = vpop.permute.xlu0 %3918 }
 0x798   : > { %3921 = vst.msk [vmem:[#allocation2 + $0x4] sm:$0xf] %vm3846_vm15, %v3919_v45 }
 0x79f   : > { %v3922_v39 = vld [vmem:[#allocation2] sm:$0xff] }
 0x7a0   : > { %v3960_v40 = vunpack.c.l.b16 %v3922_v39  ;;  %v3961_v35 = vunpack.c.h.b16 %v3922_v39 }
 0x7a2   : > { %v3962_v22 = vpack.c.b16 %v3960_v40, %v3960_v40  ;;  %v3963_v38 = vpack.c.b16 %v3961_v35, %v3961_v35 }
 0x7a4   : > { %4070 = vmatmul.bf16.vlgmr.msra.gmra.mxu2 %v3962_v22  ;;  %4083 = vmatmul.bf16.vlgmr.msra.gmra.mxu3 %v3963_v38 }
 0x827   : > { %v4071_v49 = vpop.f32.mrf.mxu2  ;;  %v4084_v30 = vpop.f32.mrf.mxu3 }
 0x828   : > { %v4072_v41 = vadd.f32 %v4527_v2, %v4071_v49 }
 0x82a   : > { %v4085_v61 = vadd.f32 %v4084_v30, %v4072_v41 }
 0x82c   : > { %4088 = vst.msk [vmem:[%s488_s17] sm:$0xff] %vm512_vm0, %v4085_v61 }
 0x82d   : > { %4672 = shalt.err (!%p4669_p3)
}
 0x82e   : > { %4409 = dma.vmem_to_hbm [thread:$0]  (%p4828_p5), %s4103_s23, 128, %s4105_s26, %s4090_s4  }
 0x82f   : > { %v4073_v53 = vpop.f32.mrf.mxu2  ;;  %v4086_v36 = vpop.f32.mrf.mxu3 }
 0x830 PF: > { %p4415_p4 = scmp.ge.s32.totalorder %s4707_s21, 2  ;;  %s4116_s0 = sand.u32 1, %s4695_s18  }
 0x831   : > { %s4117_s16 = scalar_lea.sflag [#allocation4], %s4116_s0 }
 0x832   : > { %p4412_p7 = pnand %p4415_p4, %p4832_p6 }
 0x834   : > { %p4413_p8 = pneg %p4412_p7 }
 0x836   : > { %4690 = dma.done.wait (%p4413_p8), %s4117_s16, 128  }
 0x837   : > { %4692 = vsyncadd (%p4413_p8), %s4117_s16, 4294967168  ;;  %p25_p5 = scmp.ge.s32.totalorder %s4816_s24, 4   ;;  %s7223_s18 = smov %s4699_s19 }
 0x838   : > { %s7224_s19 = smov %s4703_s20  ;;  %s7225_s20 = smov %s4826_s27 }
 0x839   : > { %s7226_s21 = smov %s4816_s24  ;;  %27 = sbr.rel (!%p25_p5) target bundleno = 10 (0xa), region = 115 }
 0x83e   :  { %4123 = vsyncpa [#allocation4], 1 }
 0x83f   :  { %4125 = vsyncpa [#allocation4 + $0x1], 1 }

// kernel: tpu_custom_call.1
= control target key start
LH: loop header
LB: loop body
LE: loop exit
PB: predicated region body
PF: predicated region fallthrough
CT: control target
= control target key end

     0   :  { %s7109_s0 = inlined_call_operand.vmem [shape: bf16[16,8,32], index: 0, kind: input, shape index: {}]   ;;  %s7110_s1 = inlined_call_operand.vmem [shape: f32[1,32], index: 1, kind: input, shape index: {}]   ;;  %s7111_s2 = inlined_call_operand.vmem [shape: f32[1,32], index: 2, kind: input, shape index: {}]   ;;  %s7112_s3 = inlined_call_operand.vmem [shape: bf16[8,64], index: 3, kind: input, shape index: {}]   ;;  %s7113_s4 = inlined_call_operand.vmem [shape: f32[1,64], index: 4, kind: input, shape index: {}]   ;;  %s7114_s5 = inlined_call_operand.vmem [shape: bf16[64,8], index: 5, kind: input, shape index: {}]   ;;  %s7115_s6 = inlined_call_operand.vmem [shape: f32[1,8], index: 6, kind: input, shape index: {}]   ;;  %s7116_s7 = inlined_call_operand.vmem [shape: f32[1,32], index: 7, kind: input, shape index: {}]   ;;  %s7117_s8 = inlined_call_operand.vmem [shape: f32[1,32], index: 8, kind: input, shape index: {}]   ;;  %s7118_s9 = inlined_call_operand.vmem [shape: bf16[32,64], index: 9, kind: input, shape index: {}]   ;;  %s7119_s10 = inlined_call_operand.vmem [shape: f32[1,64], index: 10, kind: input, shape index: {}]   ;;  %s7120_s11 = inlined_call_operand.vmem [shape: bf16[64,32], index: 11, kind: input, shape index: {}]   ;;  %s7121_s12 = inlined_call_operand.vmem [shape: f32[1,32], index: 12, kind: input, shape index: {}]   ;;  %s7122_s13 = inlined_call_operand.vmem [shape: bf16[256,32], index: 13, kind: input, shape index: {}]   ;;  %s7123_s14 = inlined_call_operand.vmem [shape: f32[1,32], index: 14, kind: input, shape index: {}]   ;;  %s7124_s15 = inlined_call_operand.hbm [shape: f32[16,32], index: 15, kind: output, shape index: {}]  }
   0x1   :  { %7125 = sst [smem:[#allocation6_spill]] %s7109_s0 }
   0x2   :  { %7126 = sst [smem:[#allocation7_spill]] %s7110_s1 }
   0x3   :  { %7127 = sst [smem:[#allocation8_spill]] %s7111_s2 }
   0x4   :  { %7128 = sst [smem:[#allocation9_spill]] %s7112_s3 }
   0x5   :  { %7129 = sst [smem:[#allocation10_spill]] %s7113_s4 }
   0x6   :  { %7130 = sst [smem:[#allocation11_spill]] %s7114_s5 }
   0x7   :  { %20 = vsyncpa [#allocation4], 0 }
   0x8   :  { %22 = vsyncpa [#allocation4 + $0x1], 0  ;;  %s4793_s18 = smov 0   ;;  %s4795_s19 = smov 0  }
   0x9   :  { %s4797_s20 = smov 0   ;;  %s4799_s21 = smov 0  }
   0xa LB: > { %s4163_s22 = sadd.s32 4294967295, %s4707_s21   ;;  %s4164_s23 = sadd.s32 4294967294, %s4707_s21   ;;  %s4707_s21 = sphi %s4799_s21, %s7226_s21   ;;  %s4703_s20 = sphi %s4797_s20, %s7225_s20   ;;  %s4699_s19 = sphi %s4795_s19, %s7224_s19   ;;  %s4695_s18 = sphi %s4793_s18, %s7223_s18  }
   0xb   : > { %s4816_s24 = sadd.s32 1, %s4707_s21   ;;  %s355_s25 = sadd.s32 1, %s4703_s20 }
   0xc   : > { %s352_s26 = ssub.s32 %s4707_s21, %s4816_s24  ;;  %p365_p0 = scmp.ne.s32.totalorder %s4703_s20, %s4699_s19 }
   0xd   : > { %p353_p1 = scmp.eq.s32.totalorder %s352_s26, 0  ;;  %p366_p2 = scmp.eq.s32.totalorder %s4163_s22, 1 }
   0xe   : > { %p371_p3 = scmp.ne.s32.totalorder %s4699_s19, %s4695_s18  ;;  %p372_p4 = scmp.eq.s32.totalorder %s4164_s23, 1 }
   0xf   : > { %s4826_s27 = scalar_select %p353_p1, %s4703_s20, %s355_s25  }
  0x10   : > { %p4828_p5 = por %p366_p2, %p365_p0  ;;  %p4832_p6 = por %p372_p4, %p371_p3 }
  0x11   : > { %p4167_p7 = scmp.ge.s32.totalorder %s4707_s21, 1  ;;  %p441_p8 = scmp.lt.s32.totalorder %s4707_s21, 3 }
  0x13   : > { %p442_p9 = pnand %p4167_p7, %p441_p8 }
  0x14   : > { %s4838_s30 = sshll.u32 (!%p442_p9), %s4163_s22, 3  ;;  %s7133_s0 = sld [smem:[#allocation6_spill]] (!%p442_p9) }
  0x15   : > { %445 = sbr.rel (%p442_p9) target bundleno = 2096 (0x830), region = 80  ;;  %p490_p10 = scmp.lt.s32.totalorder (!%p442_p9), %s4838_s30, 15 }
  0x16   : > { %s7134_s1 = sld [smem:[#allocation7_spill]] (!%p442_p9)  ;;  %s4710_s25 = smov (!%p442_p9), 64  }
  0x17   : > { %s7135_s2 = sld [smem:[#allocation8_spill]] (!%p442_p9)  ;;  %s4712_s22 = smov (!%p442_p9), 96  }
  0x18   : > { %s7136_s3 = sld [smem:[#allocation9_spill]] (!%p442_p9) }
  0x19   : > { %s7137_s4 = sld [smem:[#allocation10_spill]] (!%p442_p9) }
  0x1a   : > { %s491_s16 = scalar_select %p490_p10, %s4838_s30, 15  ;;  %vm512_vm0 = vcmask 261120   ;;  %v4709_v23 = vmov 32.0  }
  0x1b   : > { %4528 = vrcp.f32 %v4709_v23  ;;  %s7138_s5 = sld [smem:[#allocation11_spill]] }
  0x1c   : > { %s4170_s17 = sshll.u32 %s491_s16, 2  ;;  %s4100_s16 = scalar_lea.hbm %s7124_s15, %s4838_s30 }
  0x1d   : > { %s4845_s26 = scalar_lea.vmem %s7133_s0, %s4170_s17  ;;  %s486_s0 = sand.u32 1, %s4699_s19  }
  0x1e   : > { %v4386_v0 = vld [vmem:[%s4845_s26] sm:$0xff]   ;;  %v4401_v1 = vld [vmem:[%s4845_s26 + $0x8] sm:$0xff]   ;;  %v4402_v16 = vld [vmem:[%s4845_s26 + $0x10] sm:$0xff]  }
  0x1f   : > { %v4849_v2 = vunpack.c.h.bf16 %v4386_v0  ;;  %v4851_v3 = vunpack.c.l.bf16 %v4386_v0  ;;  %v4853_v4 = vunpack.c.l.bf16 %v4401_v1  ;;  %v4870_v14 = vunpack.c.h.bf16 %v4401_v1  ;;  %v4403_v26 = vld [vmem:[%s4845_s26 + $0x18] sm:$0xff]   ;;  %s4711_s26 = smov 32  }
  0x20   : > { %v4878_v19 = vunpack.c.h.bf16 %v4402_v16  ;;  %v4886_v27 = vunpack.c.l.bf16 %v4403_v26  ;;  %v4893_v33 = vunpack.c.l.bf16 %v4402_v16 }
  0x21   : > { %v516_v5 = vsel %vm512_vm0, %v4849_v2, 0.0  ;;  %v513_v6 = vsel %vm512_vm0, %v4851_v3, 0.0  ;;  %v519_v7 = vsel %vm512_vm0, %v4853_v4, 0.0  ;;  %v553_v8 = vmul.f32 %v4849_v2, %v4849_v2  ;;  %v4529_v24 = vpop.eup %4528 }
  0x22   : > { %517 = vadd.xlane.f32.xlu1 %v516_v5  ;;  %514 = vadd.xlane.f32.xlu0 %v513_v6  ;;  %v552_v9 = vmul.f32 %v4851_v3, %v4851_v3  ;;  %v554_v10 = vmul.f32 %v4853_v4, %v4853_v4  ;;  %v555_v15 = vmul.f32 %v4870_v14, %v4870_v14  ;;  %v522_v17 = vsel %vm512_vm0, %v4870_v14, 0.0 }
  0x23   : > { %520 = vadd.xlane.f32.xlu2 %v519_v7  ;;  %v563_v11 = vsel %vm512_vm0, %v553_v8, 0.0  ;;  %v557_v20 = vmul.f32 %v4878_v19, %v4878_v19  ;;  %v528_v21 = vsel %vm512_vm0, %v4878_v19, 0.0  ;;  %v538_v25 = vmul.f32 32.0, %v4529_v24 }
  0x24   : > { %v560_v12 = vsel %vm512_vm0, %v552_v9, 0.0  ;;  %v566_v13 = vsel %vm512_vm0, %v554_v10, 0.0  ;;  %v569_v18 = vsel %vm512_vm0, %v555_v15, 0.0  ;;  %v531_v29 = vsel %vm512_vm0, %v4886_v27, 0.0 }
  0x25   : > { %v575_v22 = vsel %vm512_vm0, %v557_v20, 0.0  ;;  %v539_v28 = vsub.f32 1.0, %v538_v25  ;;  %v558_v30 = vmul.f32 %v4886_v27, %v4886_v27  ;;  %v525_v35 = vsel %vm512_vm0, %v4893_v33, 0.0 }
  0x26   : > { %v556_v36 = vmul.f32 %v4893_v33, %v4893_v33  ;;  %vm542_vm1 = vweird.f32 %v4529_v24  ;;  %v4912_v8 = vunpack.c.h.bf16 %v4403_v26 }
  0x27   : > { %v578_v31 = vsel %vm512_vm0, %v558_v30, 0.0  ;;  %v540_v32 = vmul.f32 %v4529_v24, %v539_v28 }
  0x28   : > { %v572_v39 = vsel %vm512_vm0, %v556_v36, 0.0 }
  0x29   : > { %v541_v34 = vadd.f32 %v4529_v24, %v540_v32 }
  0x2a   : > { %564 = vadd.xlane.f32.xlu1 %v563_v11  ;;  %561 = vadd.xlane.f32.xlu0 %v560_v12  ;;  %v534_v12 = vsel %vm512_vm0, %v4912_v8, 0.0 }
  0x2b   : > { %567 = vadd.xlane.f32.xlu2 %v566_v13  ;;  %v4900_v40 = vsel %vm542_vm1, %v4529_v24, %v541_v34 }
  0x32   : > { %523 = vadd.xlane.f32.xlu1 %v522_v17 }
  0x33   : > { %570 = vadd.xlane.f32.xlu2 %v569_v18 }
  0x3a   : > { %529 = vadd.xlane.f32.xlu1 %v528_v21  ;;  %v4923_v21 = vld [vmem:[%s7134_s1] ss:$0 sm:$0xff] }
  0x3b   : > { %576 = vadd.xlane.f32.xlu2 %v575_v22 }
  0x42   : > { %532 = vadd.xlane.f32.xlu1 %v531_v29  ;;  %v4932_v29 = vld [vmem:[%s7135_s2] ss:$0 sm:$0xff] }
  0x43   : > { %579 = vadd.xlane.f32.xlu2 %v578_v31 }
  0x4a   : > { %526 = vadd.xlane.f32.xlu1 %v525_v35 }
  0x4b   : > { %573 = vadd.xlane.f32.xlu2 %v572_v39 }
  0x53   : > { %535 = vadd.xlane.f32.xlu2 %v534_v12  ;;  %v559_v12 = vmul.f32 %v4912_v8, %v4912_v8 }
  0x95   : > { %v518_v37 = vpop.xlane.xlu1 %517  ;;  %v515_v38 = vpop.xlane.xlu0 %514 }
  0x96   : > { %v545_v41 = vmul.f32 %v4900_v40, %v518_v37  ;;  %v544_v42 = vmul.f32 %v4900_v40, %v515_v38  ;;  %v521_v49 = vpop.xlane.xlu2 %520 }
  0x97   : > { %v4907_v54 = vmul.f32 %v4900_v40, %v521_v49 }
  0x98   : > { %v593_v45 = vmul.f32 %v545_v41, %v545_v41  ;;  %v592_v46 = vmul.f32 %v544_v42, %v544_v42  ;;  %v609_v18 = vsub.f32 %v4849_v2, %v545_v41  ;;  %v608_v23 = vsub.f32 %v4851_v3, %v544_v42 }
  0x99   : > { %v594_v55 = vmul.f32 %v4907_v54, %v4907_v54  ;;  %v610_v49 = vsub.f32 %v4853_v4, %v4907_v54 }
  0x9d   : > { %v565_v43 = vpop.xlane.xlu1 %564  ;;  %v562_v44 = vpop.xlane.xlu0 %561 }
  0x9e   : > { %v585_v47 = vmul.f32 %v565_v43, %v4900_v40  ;;  %v584_v48 = vmul.f32 %v562_v44, %v4900_v40  ;;  %v568_v56 = vpop.xlane.xlu2 %567 }
  0x9f   : > { %v586_v58 = vmul.f32 %v568_v56, %v4900_v40 }
  0xa0   : > { %v601_v50 = vsub.f32 %v585_v47, %v593_v45  ;;  %v600_v51 = vsub.f32 %v584_v48, %v592_v46 }
  0xa1   : > { %v602_v60 = vsub.f32 %v586_v58, %v594_v55 }
  0xa2   : > { %v617_v52 = vadd.f32 1e-05, %v601_v50  ;;  %v616_v53 = vadd.f32 1e-05, %v600_v51 }
  0xa3   : > { %v618_v0 = vadd.f32 1e-05, %v602_v60 }
  0xa4   : > { %4530 = vrsqrt.f32 %v617_v52  ;;  %vm640_vm4 = vweird.f32 %v617_v52  ;;  %vm630_vm6 = vweird.f32 %v616_v53 }
  0xa5   : > { %4532 = vrsqrt.f32 %v616_v53  ;;  %v524_v57 = vpop.xlane.xlu1 %523  ;;  %vm650_vm8 = vweird.f32 %v618_v0 }
  0xa6   : > { %4534 = vrsqrt.f32 %v618_v0  ;;  %v571_v7 = vpop.xlane.xlu2 %570  ;;  %v4917_v16 = vmul.f32 %v4900_v40, %v524_v57 }
  0xa7   : > { %v587_v36 = vmul.f32 %v571_v7, %v4900_v40 }
  0xa8   : > { %v595_v32 = vmul.f32 %v4917_v16, %v4917_v16  ;;  %v611_v7 = vsub.f32 %v4870_v14, %v4917_v16 }
  0xaa   : > { %v4531_v59 = vpop.eup %4530  ;;  %v603_v45 = vsub.f32 %v587_v36, %v595_v32 }
  0xab   : > { %v4533_v61 = vpop.eup %4532  ;;  %v635_v62 = vmul.f32 %v4531_v59, %v617_v52  ;;  %vm641_vm2 = vweird.f32 %v4531_v59 }
  0xac   : > { %v625_v63 = vmul.f32 %v4533_v61, %v616_v53  ;;  %vm631_vm3 = vweird.f32 %v4533_v61  ;;  %v4535_v17 = vpop.eup %4534  ;;  %vm642_vm5 = vmor %vm640_vm4, %vm641_vm2  ;;  %v619_v51 = vadd.f32 1e-05, %v603_v45 }
  0xad   : > { %v636_v1 = vmul.f32 %v4531_v59, %v635_v62  ;;  %v530_v11 = vpop.xlane.xlu1 %529  ;;  %vm632_vm7 = vmor %vm630_vm6, %vm631_vm3  ;;  %v645_v25 = vmul.f32 %v4535_v17, %v618_v0  ;;  %vm651_vm9 = vweird.f32 %v4535_v17 }
  0xae   : > { %v626_v5 = vmul.f32 %v4533_v61, %v625_v63  ;;  %v4926_v22 = vmul.f32 %v4900_v40, %v530_v11  ;;  %v577_v34 = vpop.xlane.xlu2 %576  ;;  %vm652_vm10 = vmor %vm650_vm8, %vm651_vm9  ;;  %4536 = vrsqrt.f32 %v619_v51  ;;  %vm660_vm11 = vweird.f32 %v619_v51 }
  0xaf   : > { %v637_v6 = vmul.f32 0.5, %v636_v1  ;;  %v646_v31 = vmul.f32 %v4535_v17, %v645_v25  ;;  %v589_v41 = vmul.f32 %v577_v34, %v4900_v40  ;;  %vm1062_vm8 = vcmask 1043456  }
  0xb0   : > { %v627_v9 = vmul.f32 0.5, %v626_v5  ;;  %v597_v37 = vmul.f32 %v4926_v22, %v4926_v22  ;;  %vm1013_vm9 = vcmask 64512  }
  0xb1   : > { %v638_v10 = vsub.f32 1.5, %v637_v6  ;;  %v647_v39 = vmul.f32 0.5, %v646_v31 }
  0xb2   : > { %v628_v13 = vsub.f32 1.5, %v627_v9  ;;  %v605_v47 = vsub.f32 %v589_v41, %v597_v37  ;;  %v613_v9 = vsub.f32 %v4878_v19, %v4926_v22 }
  0xb3   : > { %v639_v15 = vmul.f32 %v4531_v59, %v638_v10  ;;  %v648_v44 = vsub.f32 1.5, %v647_v39 }
  0xb4   : > { %v629_v20 = vmul.f32 %v4533_v61, %v628_v13  ;;  %v621_v52 = vadd.f32 1e-05, %v605_v47  ;;  %v4537_v56 = vpop.eup %4536 }
  0xb5   : > { %v643_v24 = vsel %vm642_vm5, %v4531_v59, %v639_v15  ;;  %v649_v48 = vmul.f32 %v4535_v17, %v648_v44  ;;  %v655_v59 = vmul.f32 %v4537_v56, %v619_v51  ;;  %vm661_vm12 = vweird.f32 %v4537_v56 }
  0xb6   : > { %v633_v26 = vsel %vm632_vm7, %v4533_v61, %v629_v20  ;;  %v705_v28 = vmul.f32 %v643_v24, %v609_v18  ;;  %4538 = vrsqrt.f32 %v621_v52  ;;  %vm680_vm13 = vweird.f32 %v621_v52  ;;  %vm662_vm15 = vmor %vm660_vm11, %vm661_vm12  ;;  %v533_v24 = vpop.xlane.xlu1 %532 }
  0xb7   : > { %v704_v30 = vmul.f32 %v633_v26, %v608_v23  ;;  %v653_v50 = vsel %vm652_vm10, %v4535_v17, %v649_v48  ;;  %v656_v61 = vmul.f32 %v4537_v56, %v655_v59  ;;  %v581_v17 = vsel %vm512_vm0, %v559_v12, 0.0  ;;  %v580_v26 = vpop.xlane.xlu2 %579 }
  0xb8   : > { %v717_v35 = vmul.f32 %v4923_v21, %v705_v28  ;;  %v706_v53 = vmul.f32 %v653_v50, %v610_v49  ;;  %582 = vadd.xlane.f32.xlu2 %v581_v17  ;;  %v550_v25 = vmul.f32 %v4900_v40, %v533_v24 }
  0xb9   : > { %v716_v38 = vmul.f32 %v4923_v21, %v704_v30  ;;  %v657_v63 = vmul.f32 0.5, %v656_v61  ;;  %v590_v30 = vmul.f32 %v580_v26, %v4900_v40 }
  0xba   : > { %v729_v42 = vadd.f32 %v4932_v29, %v717_v35  ;;  %v718_v55 = vmul.f32 %v4923_v21, %v706_v53  ;;  %v598_v28 = vmul.f32 %v550_v25, %v550_v25  ;;  %v614_v50 = vsub.f32 %v4886_v27, %v550_v25 }
  0xbb   : > { %v728_v43 = vadd.f32 %v4932_v29, %v716_v38  ;;  %v658_v0 = vsub.f32 1.5, %v657_v63 }
  0xbc   : > { %v730_v57 = vadd.f32 %v4932_v29, %v718_v55  ;;  %v4539_v58 = vpop.eup %4538  ;;  %v606_v31 = vsub.f32 %v590_v30, %v598_v28 }
  0xbd   : > { %v4453_v46 = vpack.i.bf16 %v729_v42, %v728_v43  ;;  %v675_v60 = vmul.f32 %v4539_v58, %v621_v52  ;;  %vm681_vm14 = vweird.f32 %v4539_v58  ;;  %v659_v5 = vmul.f32 %v4537_v56, %v658_v0 }
  0xbe   : > { %800 = vxpose.xlu1.b32.start.end [1/1] (short) (narrow) %v730_v57, 32  ;;  %vm682_vm1 = vmor %vm680_vm13, %vm681_vm14  ;;  %v622_v32 = vadd.f32 1e-05, %v606_v31  ;;  %v527_v34 = vpop.xlane.xlu1 %526 }
  0xbf   : > { %4454 = vxpose.xlu0.b32.start.end [1/1] (short) (narrow) %v4453_v46, 32  ;;  %v676_v62 = vmul.f32 %v4539_v58, %v675_v60  ;;  %v663_v10 = vsel %vm662_vm15, %v4537_v56, %v659_v5  ;;  %v548_v35 = vmul.f32 %v4900_v40, %v527_v34  ;;  %v574_v36 = vpop.xlane.xlu2 %573 }
  0xc0   : > { %v707_v13 = vmul.f32 %v663_v10, %v611_v7  ;;  %4540 = vrsqrt.f32 %v622_v32  ;;  %v588_v38 = vmul.f32 %v574_v36, %v4900_v40  ;;  %vm690_vm2 = vweird.f32 %v622_v32 }
  0xc1   : > { %v677_v54 = vmul.f32 0.5, %v676_v62  ;;  %v596_v37 = vmul.f32 %v548_v35, %v548_v35  ;;  %v612_v57 = vsub.f32 %v4893_v33, %v548_v35 }
  0xc2   : > { %v719_v18 = vmul.f32 %v4923_v21, %v707_v13 }
  0xc3   : > { %v678_v1 = vsub.f32 1.5, %v677_v54  ;;  %v604_v39 = vsub.f32 %v588_v38, %v596_v37 }
  0xc4   : > { %v731_v16 = vadd.f32 %v4932_v29, %v719_v18 }
  0xc5   : > { %v679_v6 = vmul.f32 %v4539_v58, %v678_v1  ;;  %v620_v42 = vadd.f32 1e-05, %v604_v39  ;;  %v1008_v1 = vld [vmem:[%s7136_s3] sm:$0xf] }
  0xc6   : > { %v4541_v41 = vpop.eup %4540  ;;  %v1064_v5 = vsel %vm1062_vm8, %v1008_v1, 0 }
  0xc7   : > { %v683_v11 = vsel %vm682_vm1, %v4539_v58, %v679_v6  ;;  %v685_v43 = vmul.f32 %v4541_v41, %v622_v32  ;;  %4542 = vrsqrt.f32 %v620_v42  ;;  %vm691_vm3 = vweird.f32 %v4541_v41  ;;  %1073 = vmatpush.bf16.msra.mxu0 %v1064_v5  ;;  %4404 = vmatpush.bf16.msra.mxu3 %v1064_v5 }
  0xc8   : > { %v709_v15 = vmul.f32 %v683_v11, %v613_v9  ;;  %vm692_vm4 = vmor %vm690_vm2, %vm691_vm3  ;;  %vm670_vm5 = vweird.f32 %v620_v42 }
  0xc9   : > { %v686_v44 = vmul.f32 %v4541_v41, %v685_v43 }
  0xca   : > { %v721_v20 = vmul.f32 %v4923_v21, %v709_v15 }
  0xcb   : > { %v687_v45 = vmul.f32 0.5, %v686_v44 }
  0xcc   : > { %v733_v23 = vadd.f32 %v4932_v29, %v721_v20 }
  0xcd   : > { %v688_v46 = vsub.f32 1.5, %v687_v45  ;;  %v4543_v47 = vpop.eup %4542 }
  0xce   : > { %v4475_v22 = vpack.i.bf16 %v733_v23, %v731_v16  ;;  %v665_v49 = vmul.f32 %v4543_v47, %v620_v42  ;;  %vm671_vm6 = vweird.f32 %v4543_v47 }
  0xcf   : > { %v689_v48 = vmul.f32 %v4541_v41, %v688_v46  ;;  %vm672_vm7 = vmor %vm670_vm5, %vm671_vm6 }
  0xd0   : > { %v666_v51 = vmul.f32 %v4543_v47, %v665_v49 }
  0xd1   : > { %v693_v52 = vsel %vm692_vm4, %v4541_v41, %v689_v48 }
  0xd2   : > { %v667_v53 = vmul.f32 0.5, %v666_v51  ;;  %v710_v55 = vmul.f32 %v693_v52, %v614_v50 }
  0xd4   : > { %v668_v56 = vsub.f32 1.5, %v667_v53  ;;  %v722_v59 = vmul.f32 %v4923_v21, %v710_v55 }
  0xd6   : > { %v669_v58 = vmul.f32 %v4543_v47, %v668_v56  ;;  %v734_v63 = vadd.f32 %v4932_v29, %v722_v59 }
  0xd8   : > { %v673_v60 = vsel %vm672_vm7, %v4543_v47, %v669_v58 }
  0xd9   : > { %v708_v61 = vmul.f32 %v673_v60, %v612_v57 }
  0xdb   : > { %v720_v62 = vmul.f32 %v4923_v21, %v708_v61 }
  0xdd   : > { %v732_v54 = vadd.f32 %v4932_v29, %v720_v62 }
  0xdf   : > { %4476 = vxpose.xlu0.b32.start.end [1/1] (short) (narrow) %v4475_v22, 32  ;;  %v4497_v0 = vpack.i.bf16 %v732_v54, %v734_v63  ;;  %v536_v22 = vpop.xlane.xlu2 %535 }
  0xe0   : > { %v551_v24 = vmul.f32 %v4900_v40, %v536_v22 }
  0xe1   : > { %4498 = vxpose.xlu2.b32.start.end [1/1] (short) (narrow) %v4497_v0, 32 }
  0xe2   : > { %v599_v25 = vmul.f32 %v551_v24, %v551_v24  ;;  %v615_v47 = vsub.f32 %v4912_v8, %v551_v24 }
 0x12b   : > { %v583_v26 = vpop.xlane.xlu2 %582 }
 0x12c   : > { %v591_v28 = vmul.f32 %v583_v26, %v4900_v40 }
 0x12e   : > { %v607_v32 = vsub.f32 %v591_v28, %v599_v25 }
 0x130   : > { %v623_v35 = vadd.f32 1e-05, %v607_v32 }
 0x132   : > { %4544 = vrsqrt.f32 %v623_v35  ;;  %vm700_vm10 = vweird.f32 %v623_v35 }
 0x138   : > { %v4545_v38 = vpop.eup %4544 }
 0x139   : > { %v695_v41 = vmul.f32 %v4545_v38, %v623_v35  ;;  %vm701_vm11 = vweird.f32 %v4545_v38 }
 0x13a   : > { %vm702_vm12 = vmor %vm700_vm10, %vm701_vm11  ;;  %vm2615_vm11 = vcmask 523264  }
 0x13b   : > { %v696_v42 = vmul.f32 %v4545_v38, %v695_v41 }
 0x13d   : > { %v697_v44 = vmul.f32 0.5, %v696_v42 }
 0x13f   : > { %v698_v46 = vsub.f32 1.5, %v697_v44 }
 0x141   : > { %v699_v50 = vmul.f32 %v4545_v38, %v698_v46 }
 0x143   : > { %v703_v51 = vsel %vm702_vm12, %v4545_v38, %v699_v50 }
 0x144   : > { %v711_v52 = vmul.f32 %v703_v51, %v615_v47 }
 0x146   : > { %v723_v53 = vmul.f32 %v4923_v21, %v711_v52 }
 0x148   : > { %v735_v55 = vadd.f32 %v4932_v29, %v723_v53 }
 0x14a   : > { %960 = vxpose.xlu0.b32.start.end [1/1] (short) (narrow) %v735_v55, 32 }
 0x162   : > { %v816_v31 = vpop.trf.xlu1 }
 0x163   : > { %v4455_v6 = vpop.trf.xlu0 }
 0x164   : > { %v4456_v9 = vunpack.i.l.bf16 %v4455_v6  ;;  %v4459_v16 = vunpack.i.h.bf16 %v4455_v6 }
 0x16a   : > { %v817_v39 = vpop.trf.xlu1 }
 0x16b   : > { %v4460_v7 = vpop.trf.xlu0  ;;  %v996_v45 = vpack.c.bf16 %v817_v39, %v816_v31 }
 0x16c   : > { %v4461_v10 = vunpack.i.l.bf16 %v4460_v7  ;;  %v4464_v20 = vunpack.i.h.bf16 %v4460_v7 }
 0x16e   : > { %v992_v11 = vpack.c.bf16 %v4461_v10, %v4456_v9  ;;  %v994_v23 = vpack.c.bf16 %v4464_v20, %v4459_v16 }
 0x170   : > { %4171 = vmatmul.msk.bf16.vlgmr.msra.gmra.mxu0 %vm1013_vm9, %v992_v11  ;;  %v5002_v11 = vld [vmem:[%s7137_s4] ss:$0 sm:$0xff] }
 0x172   : > { %v818_v48 = vpop.trf.xlu1 }
 0x173   : > { %v4465_v12 = vpop.trf.xlu0 }
 0x174   : > { %v4466_v15 = vunpack.i.l.bf16 %v4465_v12  ;;  %v4469_v34 = vunpack.i.h.bf16 %v4465_v12 }
 0x17a   : > { %v819_v57 = vpop.trf.xlu1  ;;  %v4985_v59 = vpop.trf.xlu2 }
 0x17b   : > { %v4470_v13 = vpop.trf.xlu0  ;;  %v997_v58 = vpack.c.bf16 %v819_v57, %v818_v48  ;;  %v4503_v9 = vunpack.i.h.bf16 %v4985_v59 }
 0x17c   : > { %v4471_v17 = vunpack.i.l.bf16 %v4470_v13  ;;  %v4474_v30 = vunpack.i.h.bf16 %v4470_v13 }
 0x17e   : > { %v993_v18 = vpack.c.bf16 %v4471_v17, %v4466_v15  ;;  %v995_v36 = vpack.c.bf16 %v4474_v30, %v4469_v34 }
 0x180   : > { %4172 = vmatmul.msk.bf16.gmra.mxu0 %vm1013_vm9, %v993_v18 }
 0x182   : > { %v4988_v62 = vpop.trf.xlu2 }
 0x183   : > { %v4978_v37 = vpop.trf.xlu0  ;;  %v4508_v10 = vunpack.i.h.bf16 %v4988_v62 }
 0x184   : > { %v4478_v60 = vunpack.i.l.bf16 %v4978_v37  ;;  %v4481_v16 = vunpack.i.h.bf16 %v4978_v37 }
 0x185   : > { %v1000_v12 = vpack.c.bf16 %v4508_v10, %v4503_v9 }
 0x18a   : > { %v4991_v54 = vpop.trf.xlu2 }
 0x18b   : > { %v4482_v43 = vpop.trf.xlu0  ;;  %v4513_v31 = vunpack.i.h.bf16 %v4991_v54 }
 0x18c   : > { %v4483_v61 = vunpack.i.l.bf16 %v4482_v43 }
 0x18e   : > { %v998_v63 = vpack.c.bf16 %v4483_v61, %v4478_v60 }
 0x190   : > { %4173 = vmatmul.msk.bf16.gmra.mxu0 %vm1013_vm9, %v994_v23  ;;  %v4486_v23 = vunpack.i.h.bf16 %v4482_v43 }
 0x192   : > { %v4993_v1 = vpop.trf.xlu2  ;;  %v1002_v35 = vpack.c.bf16 %v4486_v23, %v4481_v16 }
 0x193   : > { %v4487_v49 = vpop.trf.xlu0  ;;  %v4518_v32 = vunpack.i.h.bf16 %v4993_v1 }
 0x194   : > { %v4488_v21 = vunpack.i.l.bf16 %v4487_v49  ;;  %v4491_v5 = vunpack.i.h.bf16 %v4487_v49 }
 0x195   : > { %v1001_v41 = vpack.c.bf16 %v4518_v32, %v4513_v31 }
 0x19b   : > { %v4492_v56 = vpop.trf.xlu0 }
 0x19c   : > { %v4493_v29 = vunpack.i.l.bf16 %v4492_v56  ;;  %v4496_v6 = vunpack.i.h.bf16 %v4492_v56 }
 0x19e   : > { %v999_v0 = vpack.c.bf16 %v4493_v29, %v4488_v21  ;;  %v1003_v7 = vpack.c.bf16 %v4496_v6, %v4491_v5 }
 0x1a0   : > { %4174 = vmatmul.msk.bf16.gmra.mxu0 %vm1013_vm9, %v995_v36  ;;  %4182 = vmatmul.msk.bf16.vlgmr.msra.gmra.mxu3 %vm1013_vm9, %v1003_v7 }
 0x1b0   : > { %4175 = vmatmul.msk.bf16.gmra.mxu0 %vm1013_vm9, %v996_v45 }
 0x1c0   : > { %4176 = vmatmul.msk.bf16.gmra.mxu0 %vm1013_vm9, %v997_v58 }
 0x1d0   : > { %4177 = vmatmul.msk.bf16.gmra.mxu0 %vm1013_vm9, %v998_v63 }
 0x1e0   : > { %4178 = vmatmul.msk.bf16.gmra.mxu0 %vm1013_vm9, %v999_v0 }
 0x1ed   : > { %v1075_v13 = vpop.f32.mrf.mxu0 }
 0x1ee   : > { %v5005_v15 = vadd.f32 %v5002_v11, %v1075_v13 }
 0x1f0   : > { %v5008_v17 = vmul.f32 0.70710677, %v5005_v15  ;;  %4179 = vmatmul.msk.bf16.gmra.mxu0 %vm1013_vm9, %v1000_v12 }
 0x1f2   : > { %v1219_v18 = vmul.f32 %v5008_v17, %v5008_v17 }
 0x1f4   : > { %v5013_v20 = vmin.f32 %v1219_v18, 16.0 }
 0x1f5   : > { %v1077_v22 = vpop.f32.mrf.mxu0 }
 0x1f6   : > { %v1221_v24 = vmul.f32 2.1237322e-06, %v5013_v20  ;;  %v1232_v25 = vmul.f32 3.8918573e-05, %v5013_v20  ;;  %v5019_v26 = vadd.f32 %v5002_v11, %v1077_v22 }
 0x1f8   : > { %v1222_v28 = vadd.f32 0.00028619796, %v1221_v24  ;;  %v1233_v30 = vadd.f32 0.001143296, %v1232_v25  ;;  %v5024_v34 = vmul.f32 0.70710677, %v5019_v26 }
 0x1fa   : > { %v1234_v36 = vmul.f32 %v1233_v30, %v5013_v20  ;;  %v1223_v37 = vmul.f32 %v1222_v28, %v5013_v20  ;;  %v1259_v38 = vmul.f32 %v5024_v34, %v5024_v34 }
 0x1fc   : > { %v1235_v39 = vadd.f32 0.014752088, %v1234_v36  ;;  %v5030_v42 = vmin.f32 %v1259_v38, 16.0  ;;  %v1224_v46 = vadd.f32 0.0036580483, %v1223_v37 }
 0x1fd   : > { %v1080_v43 = vpop.f32.mrf.mxu0 }
 0x1fe   : > { %v1236_v44 = vmul.f32 %v1235_v39, %v5013_v20  ;;  %v5034_v45 = vadd.f32 %v5002_v11, %v1080_v43  ;;  %v1261_v47 = vmul.f32 2.1237322e-06, %v5030_v42  ;;  %v1272_v48 = vmul.f32 3.8918573e-05, %v5030_v42 }
 0x1ff   : > { %v1225_v55 = vmul.f32 %v1224_v46, %v5013_v20 }
 0x200   : > { %v1237_v49 = vadd.f32 0.112945676, %v1236_v44  ;;  %4180 = vmatmul.msk.bf16.gmra.mxu0 %vm1013_vm9, %v1001_v41  ;;  %v1262_v50 = vadd.f32 0.00028619796, %v1261_v47  ;;  %v1273_v51 = vadd.f32 0.001143296, %v1272_v48 }
 0x201   : > { %v5040_v52 = vmul.f32 0.70710677, %v5034_v45  ;;  %v1226_v5 = vadd.f32 0.05243302, %v1225_v55 }
 0x202   : > { %v1238_v53 = vmul.f32 %v1237_v49, %v5013_v20  ;;  %v1263_v56 = vmul.f32 %v1262_v50, %v5030_v42  ;;  %v1274_v57 = vmul.f32 %v1273_v51, %v5030_v42 }
 0x203   : > { %v1299_v58 = vmul.f32 %v5040_v52, %v5040_v52  ;;  %v1227_v23 = vmul.f32 %v1226_v5, %v5013_v20 }
 0x204   : > { %v1239_v60 = vadd.f32 0.4994258, %v1238_v53  ;;  %v1275_v61 = vadd.f32 0.014752088, %v1274_v57  ;;  %v1264_v6 = vadd.f32 0.0036580483, %v1263_v56 }
 0x205   : > { %v5048_v63 = vmin.f32 %v1299_v58, 16.0  ;;  %v1082_v21 = vpop.f32.mrf.mxu0  ;;  %v1228_v39 = vadd.f32 0.18741608, %v1227_v23 }
 0x206   : > { %v1240_v29 = vmul.f32 %v1239_v60, %v5013_v20  ;;  %v5052_v0 = vadd.f32 %v5002_v11, %v1082_v21  ;;  %v1276_v7 = vmul.f32 %v1275_v61, %v5030_v42  ;;  %v1265_v22 = vmul.f32 %v1264_v6, %v5030_v42 }
 0x207   : > { %v1301_v9 = vmul.f32 2.1237322e-06, %v5048_v63  ;;  %v1312_v12 = vmul.f32 3.8918573e-05, %v5048_v63  ;;  %v1229_v61 = vmul.f32 %v1228_v39, %v5013_v20  ;;  %v4361_v20 = vld [vmem:[%s7138_s5 + $0x10] sm:$0xff] }
 0x208   : > { %v5056_v10 = vadd.f32 1.0, %v1240_v29  ;;  %v5060_v13 = vmul.f32 0.70710677, %v5052_v0  ;;  %v1277_v18 = vadd.f32 0.112945676, %v1276_v7 }
 0x209   : > { %v1302_v16 = vadd.f32 0.00028619796, %v1301_v9  ;;  %v1313_v28 = vadd.f32 0.001143296, %v1312_v12  ;;  %v1266_v41 = vadd.f32 0.05243302, %v1265_v22 }
 0x20a   : > { %4546 = vrcp.f32 %v5056_v10  ;;  %v1278_v24 = vmul.f32 %v1277_v18, %v5030_v42  ;;  %v1339_v30 = vmul.f32 %v5060_v13, %v5060_v13  ;;  %vm1247_vm14 = vweird.f32 %v5056_v10 }
 0x20b   : > { %v1303_v25 = vmul.f32 %v1302_v16, %v5048_v63  ;;  %v1314_v37 = vmul.f32 %v1313_v28, %v5048_v63  ;;  %v1267_v58 = vmul.f32 %v1266_v41, %v5030_v42  ;;  %v1251_v12 = vand.u32 2147483647, %v5056_v10 }
 0x20c   : > { %v1279_v31 = vadd.f32 0.4994258, %v1278_v24  ;;  %v5070_v38 = vmin.f32 %v1339_v30, 16.0  ;;  %v1253_v18 = vand.u32 2147483648, %v5056_v10  ;;  %v1230_v28 = vadd.f32 1.1283791, %v1229_v61 }
 0x20d   : > { %v1085_v32 = vpop.f32.mrf.mxu0  ;;  %v1304_v36 = vadd.f32 0.0036580483, %v1303_v25  ;;  %v1315_v47 = vadd.f32 0.014752088, %v1314_v37  ;;  %v1268_v22 = vadd.f32 0.18741608, %v1267_v58 }
 0x20e   : > { %v1280_v43 = vmul.f32 %v1279_v31, %v5030_v42  ;;  %v1341_v48 = vmul.f32 2.1237322e-06, %v5070_v38  ;;  %v1352_v49 = vmul.f32 3.8918573e-05, %v5070_v38  ;;  %v5084_v60 = vadd.f32 %v5002_v11, %v1085_v32 }
 0x20f   : > { %v1305_v46 = vmul.f32 %v1304_v36, %v5048_v63  ;;  %v1316_v53 = vmul.f32 %v1315_v47, %v5048_v63  ;;  %vm1252_vm1 = vcmp.eq.f32.partialorder %v1251_v12, 8.507059e+37  ;;  %v1231_v58 = vmul.f32 %v1230_v28, %v5008_v17 }
 0x210   : > { %v4547_v44 = vpop.eup %4546  ;;  %4181 = vmatmul.msk.bf16.gmra.mxu0 %vm1013_vm9, %v1002_v35  ;;  %v5078_v51 = vadd.f32 1.0, %v1280_v43  ;;  %v1342_v55 = vadd.f32 0.00028619796, %v1341_v48  ;;  %v1353_v56 = vadd.f32 0.001143296, %v1352_v49  ;;  %v4362_v35 = vld [vmem:[%s7138_s5 + $0x18] sm:$0xff] }
 0x211   : > { %v1243_v50 = vmul.f32 %v4547_v44, %v5056_v10  ;;  %v1306_v21 = vadd.f32 0.05243302, %v1305_v46  ;;  %v1317_v29 = vadd.f32 0.112945676, %v1316_v53  ;;  %vm1248_vm13 = vweird.f32 %v4547_v44  ;;  %2668 = vmatpush.bf16.msra.mxu1 %v4362_v35  ;;  %4405 = vmatpush.bf16.msra.mxu2 %v4362_v35  ;;  %v4360_v48 = vld [vmem:[%s7138_s5 + $0x8] sm:$0xff] }
 0x212   : > { %4548 = vrcp.f32 %v5078_v51  ;;  %v1343_v6 = vmul.f32 %v1342_v55, %v5070_v38  ;;  %v1354_v7 = vmul.f32 %v1353_v56, %v5070_v38  ;;  %v5100_v25 = vmul.f32 0.70710677, %v5084_v60  ;;  %vm5103_vm15 = vmor %vm1247_vm14, %vm1248_vm13 }
 0x213   : > { %v1244_v57 = vsub.f32 1.0, %v1243_v50  ;;  %v1318_v16 = vmul.f32 %v1317_v29, %v5048_v63  ;;  %v1307_v10 = vmul.f32 %v1306_v21, %v5048_v63  ;;  %v5116_v43 = vmul.f32 0.5, %v5005_v15 }
 0x214   : > { %v1355_v24 = vadd.f32 0.014752088, %v1354_v7  ;;  %v1344_v37 = vadd.f32 0.0036580483, %v1343_v6  ;;  %v1379_v41 = vmul.f32 %v5100_v25, %v5100_v25  ;;  %v1254_v46 = vor.u32 1.1754944e-38, %v1253_v18 }
 0x215   : > { %v1245_v5 = vmul.f32 %v4547_v44, %v1244_v57  ;;  %v1087_v9 = vpop.f32.mrf.mxu0  ;;  %v1319_v31 = vadd.f32 0.4994258, %v1318_v16  ;;  %2669 = vmatpush.bf16.msra.mxu1 %v4361_v20  ;;  %4406 = vmatpush.bf16.msra.mxu2 %v4361_v20  ;;  %v1308_v56 = vadd.f32 0.18741608, %v1307_v10  ;;  %v5140_v17 = vmul.f32 0.5, %v5034_v45 }
 0x216   : > { %v1356_v39 = vmul.f32 %v1355_v24, %v5070_v38  ;;  %v1088_v53 = vadd.f32 %v5002_v11, %v1087_v9  ;;  %v5126_v57 = vmin.f32 %v1379_v41, 16.0  ;;  %v1345_v61 = vmul.f32 %v1344_v37, %v5070_v38 }
 0x217   : > { %v1246_v23 = vadd.f32 %v4547_v44, %v1245_v5  ;;  %v1320_v49 = vmul.f32 %v1319_v31, %v5048_v63  ;;  %v1309_v16 = vmul.f32 %v1308_v56, %v5048_v63  ;;  %vm1287_vm3 = vweird.f32 %v5078_v51 }
 0x218   : > { %v5108_v32 = vpop.eup %4548  ;;  %v1357_v50 = vadd.f32 0.112945676, %v1356_v39  ;;  %v1381_v5 = vmul.f32 2.1237322e-06, %v5126_v57  ;;  %v1392_v6 = vmul.f32 3.8918573e-05, %v5126_v57 }
 0x219   : > { %v1250_v36 = vsel %vm5103_vm15, %v4547_v44, %v1246_v23  ;;  %v1283_v47 = vmul.f32 %v5108_v32, %v5078_v51  ;;  %v1269_v44 = vmul.f32 %v1268_v22, %v5030_v42  ;;  %v5129_v35 = vadd.f32 1.0, %v1320_v49  ;;  %2670 = vmatpush.bf16.msra.mxu1 %v4360_v48  ;;  %4407 = vmatpush.bf16.msra.mxu2 %v4360_v48 }
 0x21a   : > { %v1255_v55 = vsel %vm1252_vm1, %v1254_v46, %v1250_v36  ;;  %v1358_v21 = vmul.f32 %v1357_v50, %v5070_v38  ;;  %v5134_v42 = vmul.f32 0.5, %v5019_v26  ;;  %v5143_v12 = vmul.f32 0.70710677, %v1088_v53  ;;  %v4359_v26 = vld [vmem:[%s7138_s5] sm:$0xff] }
 0x21b   : > { %v1284_v15 = vsub.f32 1.0, %v1283_v47  ;;  %v1256_v9 = vmul.f32 %v1255_v55, %v1231_v58  ;;  %4550 = vrcp.f32 %v5129_v35  ;;  %v1270_v18 = vadd.f32 1.1283791, %v1269_v44 }
 0x21c   : > { %vm1288_vm2 = vweird.f32 %v5108_v32  ;;  %v1359_v20 = vadd.f32 0.4994258, %v1358_v21  ;;  %v1346_v22 = vadd.f32 0.05243302, %v1345_v61  ;;  %v1382_v24 = vadd.f32 0.00028619796, %v1381_v5 }
 0x21d   : > { %v1285_v29 = vmul.f32 %v5108_v32, %v1284_v15  ;;  %v1090_v7 = vpop.f32.mrf.mxu0  ;;  %v1393_v45 = vadd.f32 0.001143296, %v1392_v6  ;;  %2671 = vmatpush.bf16.msra.mxu1 %v4359_v26  ;;  %v1291_v28 = vand.u32 2147483647, %v5078_v51  ;;  %v1293_v30 = vand.u32 2147483648, %v5078_v51  ;;  %4408 = vmatpush.bf16.msra.mxu2 %v4359_v26  ;;  %vm5162_vm4 = vmor %vm1287_vm3, %vm1288_vm2 }
 0x21e   : > { %v1360_v10 = vmul.f32 %v1359_v20, %v5070_v38  ;;  %v4187_v31 = vclamps-f32 %v1256_v9, 1.0  ;;  %v1383_v36 = vmul.f32 %v1382_v24, %v5126_v57  ;;  %v1419_v37 = vmul.f32 %v5143_v12, %v5143_v12 }
 0x21f   : > { %v1286_v23 = vadd.f32 %v5108_v32, %v1285_v29  ;;  %v1394_v63 = vmul.f32 %v1393_v45, %v5126_v57  ;;  %v1271_v39 = vmul.f32 %v1270_v18, %v5024_v34  ;;  %v1310_v51 = vadd.f32 1.1283791, %v1309_v16 }
 0x220   : > { %v5167_v46 = vmul.f32 0.5, %v5052_v0  ;;  %v5169_v47 = vadd.f32 1.0, %v1360_v10  ;;  %v1347_v34 = vmul.f32 %v1346_v22, %v5070_v38  ;;  %v5177_v50 = vmin.f32 %v1419_v37, 16.0 }
 0x221   : > { %v5171_v48 = vpop.eup %4550  ;;  %v1290_v44 = vsel %vm5162_vm4, %v5108_v32, %v1286_v23  ;;  %v1395_v49 = vadd.f32 0.014752088, %v1394_v63  ;;  %v1294_v55 = vor.u32 1.1754944e-38, %v1293_v30  ;;  %v5182_v0 = vmul.f32 0.5, %v5084_v60 }
 0x222   : > { %v1323_v15 = vmul.f32 %v5171_v48, %v5129_v35  ;;  %v1384_v56 = vadd.f32 0.0036580483, %v1383_v36  ;;  %v5184_v58 = vadd.f32 1.0, %v4187_v31  ;;  %vm1292_vm5 = vcmp.eq.f32.partialorder %v1291_v28, 8.507059e+37 }
 0x223   : > { %4552 = vrcp.f32 %v5169_v47  ;;  %v5187_v61 = vmul.f32 0.5, %v1088_v53  ;;  %v1295_v32 = vsel %vm1292_vm5, %v1294_v55, %v1290_v44  ;;  %v1396_v29 = vmul.f32 %v1395_v49, %v5126_v57 }
 0x224   : > { %v1324_v21 = vsub.f32 1.0, %v1323_v15  ;;  %v5191_v5 = vadd.f32 %v5002_v11, %v1090_v7  ;;  %v5194_v9 = vmul.f32 %v1310_v51, %v5040_v52  ;;  %v1348_v60 = vadd.f32 0.18741608, %v1347_v34 }
 0x225   : > { %v1092_v6 = vpop.f32.mrf.mxu0  ;;  %v1421_v26 = vmul.f32 2.1237322e-06, %v5177_v50  ;;  %v1432_v18 = vmul.f32 3.8918573e-05, %v5177_v50  ;;  %v1331_v16 = vand.u32 2147483647, %v5129_v35  ;;  %v1385_v20 = vmul.f32 %v1384_v56, %v5126_v57 }
 0x226   : > { %v1333_v53 = vand.u32 2147483648, %v5129_v35  ;;  %v1397_v23 = vadd.f32 0.112945676, %v1396_v29  ;;  %v1296_v22 = vmul.f32 %v1295_v32, %v1271_v39  ;;  %v5202_v45 = vadd.f32 %v5002_v11, %v1092_v6 }
 0x227   : > { %v1422_v24 = vadd.f32 0.00028619796, %v1421_v26  ;;  %v1433_v7 = vadd.f32 0.001143296, %v1432_v18  ;;  %v1325_v52 = vmul.f32 %v5171_v48, %v1324_v21  ;;  %vm1327_vm6 = vweird.f32 %v5129_v35 }
 0x228   : > { %v1398_v28 = vmul.f32 %v1397_v23, %v5126_v57  ;;  %v5208_v30 = vmul.f32 0.70710677, %v5191_v5  ;;  %v1349_v31 = vmul.f32 %v1348_v60, %v5070_v38  ;;  %v5216_v37 = vmul.f32 0.70710677, %v5202_v45 }
 0x229   : > { %v5210_v10 = vpop.eup %4552  ;;  %v1423_v36 = vmul.f32 %v1422_v24, %v5177_v50  ;;  %v1434_v63 = vmul.f32 %v1433_v7, %v5177_v50  ;;  %vm5218_vm7 = vcmp.eq.f32.partialorder %v1331_v16, 8.507059e+37  ;;  %v1334_v41 = vor.u32 1.1754944e-38, %v1333_v53 }
 0x22a   : > { %v1363_v51 = vmul.f32 %v5210_v10, %v5169_v47  ;;  %v1386_v44 = vadd.f32 0.05243302, %v1385_v20  ;;  %v4188_v34 = vclamps-f32 %v1296_v22, 1.0  ;;  %vm1328_vm8 = vweird.f32 %v5171_v48 }
 0x22b   : > { %v1399_v38 = vadd.f32 0.4994258, %v1398_v28  ;;  %v1435_v49 = vadd.f32 0.014752088, %v1434_v63  ;;  %v1326_v55 = vadd.f32 %v5171_v48, %v1325_v52  ;;  %v1424_v56 = vadd.f32 0.0036580483, %v1423_v36  ;;  %vm5241_vm10 = vmor %vm1327_vm6, %vm1328_vm8 }
 0x22c   : > { %v1364_v15 = vsub.f32 1.0, %v1363_v51  ;;  %v1459_v32 = vmul.f32 %v5208_v30, %v5208_v30  ;;  %v1350_v21 = vadd.f32 1.1283791, %v1349_v31  ;;  %v1499_v60 = vmul.f32 %v5216_v37, %v5216_v37 }
 0x22d   : > { %v1400_v29 = vmul.f32 %v1399_v38, %v5126_v57  ;;  %v1436_v6 = vmul.f32 %v1435_v49, %v5177_v50  ;;  %v1371_v18 = vand.u32 2147483647, %v5169_v47  ;;  %v1387_v16 = vmul.f32 %v1386_v44, %v5126_v57  ;;  %v1095_v44 = vpop.f32.mrf.mxu0 }
 0x22e   : > { %v1365_v26 = vmul.f32 %v5210_v10, %v1364_v15  ;;  %v5235_v53 = vmin.f32 %v1459_v32, 16.0  ;;  %v2500_v20 = vadd.f32 1.0, %v4188_v34  ;;  %v1373_v22 = vand.u32 2147483648, %v5169_v47 }
 0x22f   : > { %v5246_v24 = vadd.f32 1.0, %v1400_v29  ;;  %v1437_v7 = vadd.f32 0.112945676, %v1436_v6  ;;  %v1330_v52 = vsel %vm5241_vm10, %v5171_v48, %v1326_v55  ;;  %v1425_v28 = vmul.f32 %v1424_v56, %v5177_v50 }
 0x230   : > { %v1461_v31 = vmul.f32 2.1237322e-06, %v5235_v53  ;;  %v1366_v35 = vadd.f32 %v5210_v10, %v1365_v26  ;;  %vm1368_vm12 = vweird.f32 %v5210_v10  ;;  %v5256_v36 = vmin.f32 %v1499_v60, 16.0 }
 0x231   : > { %4554 = vrcp.f32 %v5246_v24  ;;  %vm1367_vm13 = vweird.f32 %v5169_v47  ;;  %vm5259_vm14 = vcmp.eq.f32.partialorder %v1371_v18, 8.507059e+37  ;;  %v1388_v48 = vadd.f32 0.18741608, %v1387_v16 }
 0x232   : > { %v1438_v51 = vmul.f32 %v1437_v7, %v5177_v50  ;;  %v2532_v34 = vmul.f32 %v2500_v20, %v5134_v42  ;;  %v1335_v38 = vsel %vm5218_vm7, %v1334_v41, %v1330_v52  ;;  %v1374_v49 = vor.u32 1.1754944e-38, %v1373_v22  ;;  %vm5269_vm15 = vmor %vm1367_vm13, %vm1368_vm12 }
 0x233   : > { %v1462_v55 = vadd.f32 0.00028619796, %v1461_v31  ;;  %v2531_v15 = vmul.f32 %v5184_v58, %v5116_v43  ;;  %v1426_v56 = vadd.f32 0.05243302, %v1425_v28  ;;  %v1472_v29 = vmul.f32 3.8918573e-05, %v5235_v53 }
 0x234   : > { %v1439_v32 = vadd.f32 0.4994258, %v1438_v51  ;;  %v1370_v42 = vsel %vm5269_vm15, %v5210_v10, %v1366_v35  ;;  %v1501_v41 = vmul.f32 2.1237322e-06, %v5256_v36  ;;  %v1512_v6 = vmul.f32 3.8918573e-05, %v5256_v36 }
 0x235   : > { %v1463_v39 = vmul.f32 %v1462_v55, %v5235_v53  ;;  %v1336_v43 = vmul.f32 %v1335_v38, %v5194_v9  ;;  %v1389_v58 = vmul.f32 %v1388_v48, %v5126_v57  ;;  %v1473_v26 = vadd.f32 0.001143296, %v1472_v29 }
 0x236   : > { %v1440_v60 = vmul.f32 %v1439_v32, %v5177_v50  ;;  %v1502_v20 = vadd.f32 0.00028619796, %v1501_v41  ;;  %v1513_v23 = vadd.f32 0.001143296, %v1512_v6  ;;  %v2563_v22 = vpack.c.bf16 %v2532_v34, %v2531_v15  ;;  %v1097_v15 = vpop.f32.mrf.mxu0 }
 0x237   : > { %v4555_v18 = vpop.eup %4554  ;;  %v1464_v16 = vadd.f32 0.0036580483, %v1463_v39  ;;  %v1351_v10 = vmul.f32 %v1350_v21, %v5060_v13  ;;  %v1375_v7 = vsel %vm5259_vm14, %v1374_v49, %v1370_v42  ;;  %v1427_v28 = vmul.f32 %v1426_v56, %v5177_v50 }
 0x238   : > { %v1403_v52 = vmul.f32 %v4555_v18, %v5246_v24  ;;  %v5288_v9 = vadd.f32 1.0, %v1440_v60  ;;  %v1474_v57 = vmul.f32 %v1473_v26, %v5235_v53  ;;  %v1503_v31 = vmul.f32 %v1502_v20, %v5256_v36  ;;  %4235 = vmatmul.msk.bf16.vlgmr.msra.gmra.mxu1 %vm2615_vm11, %v2563_v22 }
 0x239   : > { %v5293_v35 = vadd.f32 %v5002_v11, %v1095_v44  ;;  %v4189_v48 = vclamps-f32 %v1336_v43, 1.0  ;;  %v1465_v21 = vmul.f32 %v1464_v16, %v5235_v53  ;;  %v1514_v63 = vmul.f32 %v1513_v23, %v5256_v36 }
 0x23a   : > { %v1404_v13 = vsub.f32 1.0, %v1403_v52  ;;  %v1390_v51 = vadd.f32 1.1283791, %v1389_v58  ;;  %vm1407_vm1 = vweird.f32 %v5246_v24  ;;  %v1413_v34 = vand.u32 2147483648, %v5246_v24 }
 0x23b   : > { %4556 = vrcp.f32 %v5288_v9  ;;  %v1376_v38 = vmul.f32 %v1375_v7, %v1351_v10  ;;  %v1475_v55 = vadd.f32 0.014752088, %v1474_v57  ;;  %v1504_v44 = vadd.f32 0.0036580483, %v1503_v31 }
 0x23c   : > { %v1405_v49 = vmul.f32 %v4555_v18, %v1404_v13  ;;  %vm1408_vm2 = vweird.f32 %v4555_v18  ;;  %v1428_v47 = vadd.f32 0.18741608, %v1427_v28  ;;  %v1515_v56 = vadd.f32 0.014752088, %v1514_v63 }
 0x23d   : > { %v5302_v32 = vmul.f32 0.70710677, %v5293_v35  ;;  %v1466_v42 = vadd.f32 0.05243302, %v1465_v21  ;;  %v1476_v39 = vmul.f32 %v1475_v55, %v5235_v53  ;;  %v1505_v41 = vmul.f32 %v1504_v44, %v5256_v36  ;;  %vm5315_vm3 = vmor %vm1407_vm1, %vm1408_vm2 }
 0x23e   : > { %v1406_v29 = vadd.f32 %v4555_v18, %v1405_v49  ;;  %v1411_v6 = vand.u32 2147483647, %v5246_v24  ;;  %v1516_v43 = vmul.f32 %v1515_v56, %v5256_v36  ;;  %v5311_v60 = vadd.f32 %v5002_v11, %v1097_v15 }
 0x23f   : > { %v1539_v58 = vmul.f32 %v5302_v32, %v5302_v32  ;;  %v2501_v26 = vadd.f32 1.0, %v4189_v48  ;;  %v4190_v16 = vclamps-f32 %v1376_v38, 1.0  ;;  %v1414_v23 = vor.u32 1.1754944e-38, %v1413_v34 }
 0x240   : > { %v1477_v22 = vadd.f32 0.112945676, %v1476_v39  ;;  %v1410_v7 = vsel %vm5315_vm3, %v4555_v18, %v1406_v29  ;;  %v1429_v52 = vmul.f32 %v1428_v47, %v5177_v50  ;;  %v1517_v28 = vadd.f32 0.112945676, %v1516_v43  ;;  %v1100_v43 = vpop.f32.mrf.mxu0 }
 0x241   : > { %v4557_v10 = vpop.eup %4556  ;;  %v5323_v57 = vmul.f32 0.70710677, %v5311_v60  ;;  %v1467_v24 = vmul.f32 %v1466_v42, %v5235_v53  ;;  %v1506_v48 = vadd.f32 0.05243302, %v1505_v41  ;;  %v5327_v13 = vmin.f32 %v1539_v58, 16.0 }
 0x242   : > { %v1443_v31 = vmul.f32 %v4557_v10, %v5288_v9  ;;  %v1391_v21 = vmul.f32 %v1390_v51, %v5100_v25  ;;  %vm1412_vm4 = vcmp.eq.f32.partialorder %v1411_v6, 8.507059e+37  ;;  %v1478_v63 = vmul.f32 %v1477_v22, %v5235_v53 }
 0x243   : > { %v1518_v18 = vmul.f32 %v1517_v28, %v5256_v36  ;;  %v2502_v34 = vadd.f32 1.0, %v4190_v16  ;;  %v1415_v50 = vsel %vm1412_vm4, %v1414_v23, %v1410_v7  ;;  %v1541_v49 = vmul.f32 2.1237322e-06, %v5327_v13 }
 0x244   : > { %v1444_v38 = vsub.f32 1.0, %v1443_v31  ;;  %v1430_v55 = vadd.f32 1.1283791, %v1429_v52  ;;  %v1479_v44 = vadd.f32 0.4994258, %v1478_v63  ;;  %v1579_v47 = vmul.f32 %v5323_v57, %v5323_v57 }
 0x245   : > { %v1519_v15 = vadd.f32 0.4994258, %v1518_v18  ;;  %v1468_v29 = vadd.f32 0.18741608, %v1467_v24  ;;  %v1507_v25 = vmul.f32 %v1506_v48, %v5256_v36  ;;  %v1542_v51 = vadd.f32 0.00028619796, %v1541_v49 }
 0x246   : > { %v1445_v56 = vmul.f32 %v4557_v10, %v1444_v38  ;;  %v1416_v42 = vmul.f32 %v1415_v50, %v1391_v21  ;;  %v1480_v39 = vmul.f32 %v1479_v44, %v5235_v53  ;;  %v1552_v6 = vmul.f32 3.8918573e-05, %v5327_v13 }
 0x247   : > { %v1520_v41 = vmul.f32 %v1519_v15, %v5256_v36  ;;  %vm1448_vm5 = vweird.f32 %v4557_v10  ;;  %v1543_v16 = vmul.f32 %v1542_v51, %v5327_v13  ;;  %v5340_v20 = vmin.f32 %v1579_v47, 16.0 }
 0x248   : > { %v1446_v58 = vadd.f32 %v4557_v10, %v1445_v56  ;;  %v1451_v23 = vand.u32 2147483647, %v5288_v9  ;;  %v1453_v22 = vand.u32 2147483648, %v5288_v9  ;;  %v5344_v7 = vadd.f32 1.0, %v1480_v39 }
 0x249   : > { %v5346_v52 = vadd.f32 1.0, %v1520_v41  ;;  %vm1447_vm6 = vweird.f32 %v5288_v9  ;;  %v1508_v28 = vadd.f32 0.18741608, %v1507_v25  ;;  %v1544_v31 = vadd.f32 0.0036580483, %v1543_v16 }
 0x24a   : > { %v1553_v24 = vadd.f32 0.001143296, %v1552_v6  ;;  %vm5349_vm7 = vmor %vm1447_vm6, %vm1448_vm5  ;;  %v1469_v21 = vmul.f32 %v1468_v29, %v5235_v53  ;;  %4558 = vrcp.f32 %v5344_v7  ;;  %v1581_v63 = vmul.f32 2.1237322e-06, %v5340_v20  ;;  %v1102_v6 = vpop.f32.mrf.mxu0 }
 0x24b   : > { %v1592_v18 = vmul.f32 3.8918573e-05, %v5340_v20  ;;  %v2534_v50 = vmul.f32 %v2502_v34, %v5167_v46  ;;  %v4191_v38 = vclamps-f32 %v1416_v42, 1.0  ;;  %v1450_v9 = vsel %vm5349_vm7, %v4557_v10, %v1446_v58 }
 0x24c   : > { %4560 = vrcp.f32 %v5346_v52  ;;  %v2533_v49 = vmul.f32 %v2501_v26, %v5140_v17  ;;  %v1431_v44 = vmul.f32 %v1430_v55, %v5143_v12  ;;  %v1454_v15 = vor.u32 1.1754944e-38, %v1453_v22 }
 0x24d   : > { %v5364_v53 = vadd.f32 %v5002_v11, %v1100_v43  ;;  %vm1452_vm8 = vcmp.eq.f32.partialorder %v1451_v23, 8.507059e+37  ;;  %v1509_v47 = vmul.f32 %v1508_v28, %v5256_v36  ;;  %v1545_v56 = vmul.f32 %v1544_v31, %v5327_v13 }
 0x24e   : > { %v1554_v46 = vmul.f32 %v1553_v24, %v5327_v13  ;;  %v1455_v34 = vsel %vm1452_vm8, %v1454_v15, %v1450_v9  ;;  %v5369_v29 = vadd.f32 1.1283791, %v1469_v21  ;;  %v1582_v10 = vadd.f32 0.00028619796, %v1581_v63 }
 0x24f   : > { %v1593_v25 = vadd.f32 0.001143296, %v1592_v18  ;;  %v5371_v51 = vadd.f32 1.0, %v4191_v38  ;;  %v1491_v17 = vand.u32 2147483647, %v5344_v7  ;;  %v2564_v26 = vpack.c.bf16 %v2534_v50, %v2533_v49 }
 0x250   : > { %v1555_v12 = vadd.f32 0.014752088, %v1554_v46  ;;  %v4559_v55 = vpop.eup %4558  ;;  %v1546_v42 = vadd.f32 0.05243302, %v1545_v56  ;;  %v1583_v39 = vmul.f32 %v1582_v10, %v5340_v20  ;;  %v5377_v41 = vmul.f32 0.70710677, %v5364_v53 }
 0x251   : > { %v1594_v36 = vmul.f32 %v1593_v25, %v5340_v20  ;;  %v1456_v58 = vmul.f32 %v1455_v34, %v1431_v44  ;;  %v1483_v16 = vmul.f32 %v4559_v55, %v5344_v7  ;;  %vm1487_vm10 = vweird.f32 %v5344_v7  ;;  %4236 = vmatmul.msk.bf16.gmra.mxu1 %vm2615_vm11, %v2564_v26 }
 0x252   : > { %v4561_v43 = vpop.eup %4560  ;;  %v1510_v23 = vadd.f32 1.1283791, %v1509_v47  ;;  %v1493_v22 = vand.u32 2147483648, %v5344_v7  ;;  %v1556_v31 = vmul.f32 %v1555_v12, %v5327_v13  ;;  %v1584_v24 = vadd.f32 0.0036580483, %v1583_v39 }
 0x253   : > { %v1523_v28 = vmul.f32 %v4561_v43, %v5346_v52  ;;  %v1484_v48 = vsub.f32 1.0, %v1483_v16  ;;  %v1595_v21 = vadd.f32 0.014752088, %v1594_v36  ;;  %v1619_v63 = vmul.f32 %v5377_v41, %v5377_v41 }
 0x254   : > { %v5388_v18 = vadd.f32 %v5002_v11, %v1102_v6  ;;  %vm5390_vm12 = vcmp.eq.f32.partialorder %v1491_v17, 8.507059e+37  ;;  %vm1527_vm13 = vweird.f32 %v5346_v52  ;;  %v1547_v9 = vmul.f32 %v1546_v42, %v5327_v13 }
 0x255   : > { %v1524_v38 = vsub.f32 1.0, %v1523_v28  ;;  %v1557_v49 = vadd.f32 0.112945676, %v1556_v31  ;;  %v4192_v44 = vclamps-f32 %v1456_v58, 1.0  ;;  %v1485_v15 = vmul.f32 %v4559_v55, %v1484_v48 }
 0x256   : > { %vm1488_vm14 = vweird.f32 %v4559_v55  ;;  %v1596_v47 = vmul.f32 %v1595_v21, %v5340_v20  ;;  %vm1528_vm15 = vweird.f32 %v4561_v43  ;;  %v1585_v34 = vmul.f32 %v1584_v24, %v5340_v20 }
 0x257   : > { %v1525_v56 = vmul.f32 %v4561_v43, %v1524_v38  ;;  %v1558_v46 = vmul.f32 %v1557_v49, %v5327_v13  ;;  %v1486_v10 = vadd.f32 %v4559_v55, %v1485_v15  ;;  %v5399_v17 = vmin.f32 %v1619_v63, 16.0  ;;  %vm5407_vm1 = vmor %vm1487_vm10, %vm1488_vm14 }
 0x258   : > { %v1597_v25 = vadd.f32 0.112945676, %v1596_v47  ;;  %v5402_v12 = vmul.f32 0.70710677, %v5388_v18  ;;  %v1533_v42 = vand.u32 2147483648, %v5346_v52  ;;  %v1494_v58 = vor.u32 1.1754944e-38, %v1493_v22  ;;  %vm5419_vm2 = vmor %vm1527_vm13, %vm1528_vm15 }
 0x259   : > { %v1526_v26 = vadd.f32 %v4561_v43, %v1525_v56  ;;  %v1548_v39 = vadd.f32 0.18741608, %v1547_v9  ;;  %v1559_v36 = vadd.f32 0.4994258, %v1558_v46  ;;  %v1531_v16 = vand.u32 2147483647, %v5346_v52  ;;  %v1105_v46 = vpop.f32.mrf.mxu0 }
 0x25a   : > { %v1598_v28 = vmul.f32 %v1597_v25, %v5340_v20  ;;  %v1621_v31 = vmul.f32 2.1237322e-06, %v5399_v17  ;;  %v2504_v24 = vadd.f32 1.0, %v4192_v44  ;;  %v1490_v48 = vsel %vm5407_vm1, %v4559_v55, %v1486_v10 }
 0x25b   : > { %v1560_v21 = vmul.f32 %v1559_v36, %v5327_v13  ;;  %v1586_v22 = vadd.f32 0.05243302, %v1585_v34  ;;  %v1530_v63 = vsel %vm5419_vm2, %v4561_v43, %v1526_v26  ;;  %v1659_v49 = vmul.f32 %v5402_v12, %v5402_v12 }
 0x25c   : > { %v1599_v38 = vadd.f32 0.4994258, %v1598_v28  ;;  %v1622_v9 = vadd.f32 0.00028619796, %v1621_v31  ;;  %v1534_v44 = vor.u32 1.1754944e-38, %v1533_v42  ;;  %v1549_v55 = vmul.f32 %v1548_v39, %v5327_v13 }
 0x25d   : > { %v5429_v15 = vadd.f32 1.0, %v1560_v21  ;;  %v1632_v52 = vmul.f32 3.8918573e-05, %v5399_v17  ;;  %v1495_v47 = vsel %vm5390_vm12, %v1494_v58, %v1490_v48  ;;  %vm1532_vm3 = vcmp.eq.f32.partialorder %v1531_v16, 8.507059e+37 }
 0x25e   : > { %v1600_v56 = vmul.f32 %v1599_v38, %v5340_v20  ;;  %v1623_v43 = vmul.f32 %v1622_v9, %v5399_v17  ;;  %v1471_v34 = vmul.f32 %v5369_v29, %v5208_v30  ;;  %v1535_v10 = vsel %vm1532_vm3, %v1534_v44, %v1530_v63 }
 0x25f   : > { %4562 = vrcp.f32 %v5429_v15  ;;  %v1587_v13 = vmul.f32 %v1586_v22, %v5340_v20  ;;  %v2536_v25 = vmul.f32 %v2504_v24, %v5187_v61  ;;  %v1511_v26 = vmul.f32 %v1510_v23, %v5216_v37 }
 0x260   : > { %v5442_v50 = vadd.f32 1.0, %v1600_v56  ;;  %v5444_v42 = vmin.f32 %v1659_v49, 16.0  ;;  %v5446_v39 = vmul.f32 %v1495_v47, %v1471_v34  ;;  %v1550_v36 = vadd.f32 1.1283791, %v1549_v55 }
 0x261   : > { %v1624_v6 = vadd.f32 0.0036580483, %v1623_v43  ;;  %v1633_v58 = vadd.f32 0.001143296, %v1632_v52  ;;  %v5448_v16 = vmul.f32 %v1535_v10, %v1511_v26  ;;  %v4500_v30 = vunpack.i.l.bf16 %v4985_v59  ;;  %v1107_v43 = vpop.f32.mrf.mxu0 }
 0x262   : > { %4564 = vrcp.f32 %v5442_v50  ;;  %v2535_v61 = vmul.f32 %v5371_v51, %v5182_v0  ;;  %v1588_v29 = vadd.f32 0.18741608, %v1587_v13  ;;  %v1661_v28 = vmul.f32 2.1237322e-06, %v5444_v42 }
 0x263   : > { %v1625_v37 = vmul.f32 %v1624_v6, %v5399_v17  ;;  %v1634_v23 = vmul.f32 %v1633_v58, %v5399_v17  ;;  %v1672_v31 = vmul.f32 3.8918573e-05, %v5444_v42  ;;  %v4193_v48 = vclamps-f32 %v5446_v39, 1.0 }
 0x264   : > { %v5462_v7 = vmul.f32 %v1550_v36, %v5302_v32  ;;  %v5465_v21 = vadd.f32 %v5002_v11, %v1105_v46  ;;  %v2565_v0 = vpack.c.bf16 %v2536_v25, %v2535_v61  ;;  %v4194_v51 = vclamps-f32 %v5448_v16, 1.0 }
 0x265   : > { %v5458_v24 = vpop.eup %4562  ;;  %v1626_v63 = vadd.f32 0.05243302, %v1625_v37  ;;  %v1635_v38 = vadd.f32 0.014752088, %v1634_v23  ;;  %v1589_v9 = vmul.f32 %v1588_v29, %v5340_v20  ;;  %v1662_v49 = vadd.f32 0.00028619796, %v1661_v28 }
 0x266   : > { %v1563_v22 = vmul.f32 %v5458_v24, %v5429_v15  ;;  %v1673_v44 = vadd.f32 0.001143296, %v1672_v31  ;;  %v5472_v55 = vmul.f32 0.70710677, %v5465_v21  ;;  %4237 = vmatmul.msk.bf16.gmra.mxu1 %vm2615_vm11, %v2565_v0  ;;  %vm1567_vm4 = vweird.f32 %v5429_v15 }
 0x267   : > { %v1571_v47 = vand.u32 2147483647, %v5429_v15  ;;  %v1636_v56 = vmul.f32 %v1635_v38, %v5399_v17  ;;  %v1573_v46 = vand.u32 2147483648, %v5429_v15  ;;  %v1663_v34 = vmul.f32 %v1662_v49, %v5444_v42 }
 0x268   : > { %v5475_v32 = vpop.eup %4564  ;;  %v1564_v52 = vsub.f32 1.0, %v1563_v22  ;;  %v1674_v10 = vmul.f32 %v1673_v44, %v5444_v42  ;;  %v1627_v25 = vmul.f32 %v1626_v63, %v5399_v17  ;;  %v1699_v36 = vmul.f32 %v5472_v55, %v5472_v55 }
 0x269   : > { %v1603_v20 = vmul.f32 %v5475_v32, %v5442_v50  ;;  %v1637_v26 = vadd.f32 0.112945676, %v1636_v56  ;;  %vm1568_vm5 = vweird.f32 %v5458_v24  ;;  %v1664_v58 = vadd.f32 0.0036580483, %v1663_v34 }
 0x26a   : > { %v1565_v13 = vmul.f32 %v5458_v24, %v1564_v52  ;;  %v1675_v61 = vadd.f32 0.014752088, %v1674_v10  ;;  %vm1607_vm6 = vweird.f32 %v5442_v50  ;;  %v1611_v29 = vand.u32 2147483647, %v5442_v50  ;;  %vm5501_vm7 = vmor %vm1567_vm4, %vm1568_vm5 }
 0x26b   : > { %v1604_v6 = vsub.f32 1.0, %v1603_v20  ;;  %v1638_v37 = vmul.f32 %v1637_v26, %v5399_v17  ;;  %v5493_v23 = vmin.f32 %v1699_v36, 16.0  ;;  %v1613_v0 = vand.u32 2147483648, %v5442_v50 }
 0x26c   : > { %v1566_v28 = vadd.f32 %v5458_v24, %v1565_v13  ;;  %v1676_v22 = vmul.f32 %v1675_v61, %v5444_v42  ;;  %vm1608_vm8 = vweird.f32 %v5475_v32  ;;  %v1628_v38 = vadd.f32 0.18741608, %v1627_v25 }
 0x26d   : > { %v1605_v31 = vmul.f32 %v5475_v32, %v1604_v6  ;;  %v1639_v49 = vadd.f32 0.4994258, %v1638_v37  ;;  %v1701_v44 = vmul.f32 2.1237322e-06, %v5493_v23  ;;  %v1590_v52 = vadd.f32 1.1283791, %v1589_v9  ;;  %vm5522_vm12 = vmor %vm1607_vm6, %vm1608_vm8 }
 0x26e   : > { %v1665_v56 = vmul.f32 %v1664_v58, %v5444_v42  ;;  %v1677_v20 = vadd.f32 0.112945676, %v1676_v22  ;;  %v5509_v34 = vadd.f32 %v5002_v11, %v1107_v43  ;;  %vm5511_vm10 = vcmp.eq.f32.partialorder %v1571_v47, 8.507059e+37  ;;  %v1110_v58 = vpop.f32.mrf.mxu0 }
 0x26f   : > { %v1574_v15 = vor.u32 1.1754944e-38, %v1573_v46  ;;  %v1606_v13 = vadd.f32 %v5475_v32, %v1605_v31  ;;  %v1640_v26 = vmul.f32 %v1639_v49, %v5399_v17  ;;  %v1570_v25 = vsel %vm5501_vm7, %v5458_v24, %v1566_v28 }
 0x270   : > { %vm5526_vm13 = vcmp.eq.f32.partialorder %v1611_v29, 8.507059e+37  ;;  %v1678_v47 = vmul.f32 %v1677_v20, %v5444_v42  ;;  %v1702_v43 = vadd.f32 0.00028619796, %v1701_v44  ;;  %v1614_v46 = vor.u32 1.1754944e-38, %v1613_v0  ;;  %v5541_v29 = vld [vmem:[%s7137_s4] ss:$0 sm:$0xff] }
 0x271   : > { %v1629_v36 = vmul.f32 %v1628_v38, %v5399_v17  ;;  %v5532_v6 = vadd.f32 1.0, %v1640_v26  ;;  %v1712_v24 = vmul.f32 3.8918573e-05, %v5493_v23  ;;  %v1666_v50 = vadd.f32 0.05243302, %v1665_v56 }
 0x272   : > { %v1679_v61 = vadd.f32 0.4994258, %v1678_v47  ;;  %v5536_v37 = vmul.f32 0.70710677, %v5509_v34  ;;  %v5544_v28 = vadd.f32 %v5541_v29, %v1110_v58  ;;  %v1575_v17 = vsel %vm5511_vm10, %v1574_v15, %v1570_v25 }
 0x273   : > { %v1610_v31 = vsel %vm5522_vm12, %v5475_v32, %v1606_v13  ;;  %4566 = vrcp.f32 %v5532_v6  ;;  %v1703_v0 = vmul.f32 %v1702_v43, %v5493_v23  ;;  %v1161_v22 = vmul.f32 0.5, %v5191_v5 }
 0x274   : > { %v2505_v63 = vadd.f32 1.0, %v4193_v48  ;;  %v1162_v38 = vmul.f32 0.5, %v5202_v45  ;;  %v1680_v49 = vmul.f32 %v1679_v61, %v5444_v42  ;;  %v2506_v44 = vadd.f32 1.0, %v4194_v51 }
 0x275   : > { %v1591_v56 = vmul.f32 %v1590_v52, %v5323_v57  ;;  %v1630_v20 = vadd.f32 1.1283791, %v1629_v36  ;;  %v1713_v32 = vadd.f32 0.001143296, %v1712_v24  ;;  %v1576_v10 = vmul.f32 %v1575_v17, %v5462_v7 }
 0x276   : > { %v1615_v15 = vsel %vm5526_vm13, %v1614_v46, %v1610_v31  ;;  %v1667_v5 = vmul.f32 %v1666_v50, %v5444_v42  ;;  %v5565_v39 = vadd.f32 1.0, %v1680_v49  ;;  %v1704_v48 = vadd.f32 0.0036580483, %v1703_v0 }
 0x277   : > { %v1714_v45 = vmul.f32 %v1713_v32, %v5493_v23  ;;  %v1739_v16 = vmul.f32 %v5536_v37, %v5536_v37  ;;  %v5571_v51 = vmul.f32 0.70710677, %v5544_v28  ;;  %v4505_v57 = vunpack.i.l.bf16 %v4988_v62 }
 0x278   : > { %v4510_v7 = vunpack.i.l.bf16 %v4991_v54  ;;  %v1163_v52 = vmul.f32 0.5, %v5293_v35  ;;  %4568 = vrcp.f32 %v5565_v39  ;;  %v2537_v26 = vmul.f32 %v2505_v63, %v1161_v22 }
 0x279   : > { %v5577_v13 = vpop.eup %4566  ;;  %v2538_v25 = vmul.f32 %v2506_v44, %v1162_v38  ;;  %v5580_v9 = vmul.f32 0.5, %v5311_v60  ;;  %v5582_v11 = vmin.f32 %v1739_v16, 16.0  ;;  %v1616_v47 = vmul.f32 %v1615_v15, %v1591_v56  ;;  %v1112_v56 = vpop.f32.mrf.mxu0 }
 0x27a   : > { %v1643_v43 = vmul.f32 %v5577_v13, %v5532_v6  ;;  %v1715_v62 = vadd.f32 0.014752088, %v1714_v45  ;;  %v1779_v46 = vmul.f32 %v5571_v51, %v5571_v51  ;;  %v4195_v35 = vclamps-f32 %v1576_v10, 1.0 }
 0x27b   : > { %v5589_v36 = vmul.f32 %v1630_v20, %v5377_v41  ;;  %v1668_v24 = vadd.f32 0.18741608, %v1667_v5  ;;  %v1705_v58 = vmul.f32 %v1704_v48, %v5493_v23  ;;  %v1741_v61 = vmul.f32 2.1237322e-06, %v5582_v11 }
 0x27c   : > { %v1644_v50 = vsub.f32 1.0, %v1643_v43  ;;  %v1716_v60 = vmul.f32 %v1715_v62, %v5493_v23  ;;  %v1752_v17 = vmul.f32 3.8918573e-05, %v5582_v11  ;;  %vm1647_vm14 = vweird.f32 %v5532_v6 }
 0x27d   : > { %v1651_v31 = vand.u32 2147483647, %v5532_v6  ;;  %v5597_v0 = vmin.f32 %v1779_v46, 16.0  ;;  %v2566_v22 = vpack.c.bf16 %v2538_v25, %v2537_v26  ;;  %v4196_v41 = vclamps-f32 %v1616_v47, 1.0 }
 0x27e   : > { %v5599_v63 = vpop.eup %4568  ;;  %v1645_v38 = vmul.f32 %v5577_v13, %v1644_v50  ;;  %v1717_v49 = vadd.f32 0.112945676, %v1716_v60  ;;  %v1753_v44 = vadd.f32 0.001143296, %v1752_v17  ;;  %vm1648_vm15 = vweird.f32 %v5577_v13 }
 0x27f   : > { %v1653_v20 = vand.u32 2147483648, %v5532_v6  ;;  %v1683_v32 = vmul.f32 %v5599_v63, %v5565_v39  ;;  %v1781_v10 = vmul.f32 2.1237322e-06, %v5597_v0  ;;  %4238 = vmatmul.msk.bf16.gmra.mxu1 %vm2615_vm11, %v2566_v22  ;;  %v1706_v15 = vadd.f32 0.05243302, %v1705_v58  ;;  %vm5618_vm1 = vmor %vm1647_vm14, %vm1648_vm15 }
 0x280   : > { %v1718_v5 = vmul.f32 %v1717_v49, %v5493_v23  ;;  %v1742_v48 = vadd.f32 0.00028619796, %v1741_v61  ;;  %v1754_v45 = vmul.f32 %v1753_v44, %v5582_v11  ;;  %v1646_v16 = vadd.f32 %v5577_v13, %v1645_v38 }
 0x281   : > { %v1684_v26 = vsub.f32 1.0, %v1683_v32  ;;  %v5612_v25 = vadd.f32 %v5541_v29, %v1112_v56  ;;  %v1004_v47 = vpack.c.bf16 %v4505_v57, %v4500_v30  ;;  %v2507_v43 = vadd.f32 1.0, %v4195_v35 }
 0x282   : > { %v1669_v46 = vmul.f32 %v1668_v24, %v5444_v42  ;;  %v1719_v58 = vadd.f32 0.4994258, %v1718_v5  ;;  %v1755_v50 = vadd.f32 0.014752088, %v1754_v45  ;;  %v2508_v60 = vadd.f32 1.0, %v4196_v41  ;;  %v1115_v45 = vpop.f32.mrf.mxu0 }
 0x283   : > { %vm5623_vm2 = vcmp.eq.f32.partialorder %v1651_v31, 8.507059e+37  ;;  %v1654_v17 = vor.u32 1.1754944e-38, %v1653_v20  ;;  %v1782_v22 = vadd.f32 0.00028619796, %v1781_v10  ;;  %4183 = vmatmul.msk.bf16.gmra.mxu3 %vm1013_vm9, %v1004_v47  ;;  %v1707_v59 = vmul.f32 %v1706_v15, %v5493_v23 }
 0x284   : > { %v1720_v30 = vmul.f32 %v1719_v58, %v5493_v23  ;;  %v1743_v6 = vmul.f32 %v1742_v48, %v5582_v11  ;;  %v1756_v57 = vmul.f32 %v1755_v50, %v5582_v11  ;;  %v1650_v42 = vsel %vm5618_vm1, %v5577_v13, %v1646_v16 }
 0x285   : > { %v1685_v35 = vmul.f32 %v5599_v63, %v1684_v26  ;;  %v1792_v24 = vmul.f32 3.8918573e-05, %v5597_v0  ;;  %v5638_v31 = vmul.f32 0.70710677, %v5612_v25  ;;  %v2539_v41 = vmul.f32 %v2507_v43, %v1163_v52 }
 0x286   : > { %vm1687_vm3 = vweird.f32 %v5565_v39  ;;  %v5641_v38 = vadd.f32 1.0, %v1720_v30  ;;  %v1757_v49 = vadd.f32 0.112945676, %v1756_v57  ;;  %vm1688_vm4 = vweird.f32 %v5599_v63 }
 0x287   : > { %v1691_v44 = vand.u32 2147483647, %v5565_v39  ;;  %v1693_v56 = vand.u32 2147483648, %v5565_v39  ;;  %v1783_v13 = vmul.f32 %v1782_v22, %v5597_v0  ;;  %v1655_v20 = vsel %vm5623_vm2, %v1654_v17, %v1650_v42  ;;  %vm5665_vm5 = vmor %vm1687_vm3, %vm1688_vm4 }
 0x288   : > { %4570 = vrcp.f32 %v5641_v38  ;;  %v1793_v32 = vadd.f32 0.001143296, %v1792_v24  ;;  %v1819_v52 = vmul.f32 %v5638_v31, %v5638_v31  ;;  %v2540_v10 = vmul.f32 %v2508_v60, %v5580_v9 }
 0x289   : > { %v1686_v15 = vadd.f32 %v5599_v63, %v1685_v35  ;;  %v1708_v5 = vadd.f32 0.18741608, %v1707_v59  ;;  %v1744_v48 = vadd.f32 0.0036580483, %v1743_v6  ;;  %v4515_v16 = vunpack.i.l.bf16 %v4993_v1 }
 0x28a   : > { %v5656_v26 = vmul.f32 0.5, %v5364_v53  ;;  %v5659_v47 = vmul.f32 0.5, %v5388_v18  ;;  %v1758_v9 = vmul.f32 %v1757_v49, %v5582_v11  ;;  %v1656_v62 = vmul.f32 %v1655_v20, %v5589_v36 }
 0x28b   : > { %v1670_v58 = vadd.f32 1.1283791, %v1669_v46  ;;  %vm5671_vm6 = vcmp.eq.f32.partialorder %v1691_v44, 8.507059e+37  ;;  %v1784_v53 = vadd.f32 0.0036580483, %v1783_v13  ;;  %v1694_v18 = vor.u32 1.1754944e-38, %v1693_v56 }
 0x28c   : > { %v1759_v50 = vadd.f32 0.4994258, %v1758_v9  ;;  %v1794_v60 = vmul.f32 %v1793_v32, %v5597_v0  ;;  %v5676_v61 = vmin.f32 %v1819_v52, 16.0  ;;  %v1690_v39 = vsel %vm5665_vm5, %v5599_v63, %v1686_v15 }
 0x28d   : > { %v1709_v17 = vmul.f32 %v1708_v5, %v5493_v23  ;;  %v1745_v36 = vmul.f32 %v1744_v48, %v5582_v11  ;;  %v2567_v46 = vpack.c.bf16 %v2540_v10, %v2539_v41  ;;  %v5688_v57 = vadd.f32 %v5541_v29, %v1115_v45 }
 0x28e   : > { %v5683_v22 = vpop.eup %4570  ;;  %v1760_v59 = vmul.f32 %v1759_v50, %v5582_v11  ;;  %v1795_v30 = vadd.f32 0.014752088, %v1794_v60  ;;  %v1821_v6 = vmul.f32 2.1237322e-06, %v5676_v61  ;;  %v4197_v42 = vclamps-f32 %v1656_v62, 1.0 }
 0x28f   : > { %v1671_v35 = vmul.f32 %v1670_v58, %v5402_v12  ;;  %v1723_v63 = vmul.f32 %v5683_v22, %v5641_v38  ;;  %v1785_v23 = vmul.f32 %v1784_v53, %v5597_v0  ;;  %4239 = vmatmul.msk.bf16.gmra.mxu1 %vm2615_vm11, %v2567_v46  ;;  %v1695_v24 = vsel %vm5671_vm6, %v1694_v18, %v1690_v39 }
 0x290   : > { %v5697_v41 = vadd.f32 1.0, %v1760_v59  ;;  %v1796_v49 = vmul.f32 %v1795_v30, %v5597_v0  ;;  %v1822_v44 = vadd.f32 0.00028619796, %v1821_v6  ;;  %v5701_v56 = vmul.f32 0.5, %v5465_v21  ;;  %v1117_v21 = vpop.f32.mrf.mxu0 }
 0x291   : > { %v1724_v13 = vsub.f32 1.0, %v1723_v63  ;;  %v5704_v12 = vmul.f32 0.5, %v5509_v34  ;;  %v1832_v20 = vmul.f32 3.8918573e-05, %v5676_v61  ;;  %v1710_v32 = vadd.f32 1.1283791, %v1709_v17 }
 0x292   : > { %v1746_v52 = vadd.f32 0.05243302, %v1745_v36  ;;  %4572 = vrcp.f32 %v5697_v41  ;;  %v5709_v10 = vmul.f32 0.70710677, %v5688_v57  ;;  %v2509_v15 = vadd.f32 1.0, %v4197_v42 }
 0x293   : > { %v1696_v5 = vmul.f32 %v1695_v24, %v1671_v35  ;;  %v1725_v48 = vmul.f32 %v5683_v22, %v1724_v13  ;;  %v1797_v45 = vadd.f32 0.112945676, %v1796_v49  ;;  %vm1727_vm7 = vweird.f32 %v5641_v38 }
 0x294   : > { %v1786_v43 = vadd.f32 0.05243302, %v1785_v23  ;;  %v1823_v34 = vmul.f32 %v1822_v44, %v5676_v61  ;;  %v1833_v9 = vadd.f32 0.001143296, %v1832_v20  ;;  %vm1728_vm8 = vweird.f32 %v5683_v22 }
 0x295   : > { %v1731_v62 = vand.u32 2147483647, %v5641_v38  ;;  %v1733_v58 = vand.u32 2147483648, %v5641_v38  ;;  %v1798_v1 = vmul.f32 %v1797_v45, %v5597_v0  ;;  %v1859_v18 = vmul.f32 %v5709_v10, %v5709_v10  ;;  %vm5732_vm10 = vmor %vm1727_vm7, %vm1728_vm8 }
 0x296   : > { %v1834_v53 = vmul.f32 %v1833_v9, %v5676_v61  ;;  %v5722_v50 = vadd.f32 %v5541_v29, %v1117_v21  ;;  %v1005_v60 = vpack.c.bf16 %v4515_v16, %v4510_v7  ;;  %v4198_v39 = vclamps-f32 %v1696_v5, 1.0 }
 0x297   : > { %v1726_v17 = vadd.f32 %v5683_v22, %v1725_v48  ;;  %v1747_v36 = vmul.f32 %v1746_v52, %v5582_v11  ;;  %v1799_v46 = vadd.f32 0.4994258, %v1798_v1  ;;  %v1787_v6 = vmul.f32 %v1786_v43, %v5597_v0 }
 0x298   : > { %v5728_v59 = vpop.eup %4572  ;;  %v1824_v42 = vadd.f32 0.0036580483, %v1823_v34  ;;  %v1835_v35 = vadd.f32 0.014752088, %v1834_v53  ;;  %v5737_v54 = vmin.f32 %v1859_v18, 16.0  ;;  %4184 = vmatmul.msk.bf16.gmra.mxu3 %vm1013_vm9, %v1005_v60  ;;  %vm5740_vm12 = vcmp.eq.f32.partialorder %v1731_v62, 8.507059e+37 }
 0x299   : > { %v1763_v16 = vmul.f32 %v5728_v59, %v5697_v41  ;;  %v1800_v38 = vmul.f32 %v1799_v46, %v5597_v0  ;;  %v5748_v63 = vmul.f32 0.70710677, %v5722_v50  ;;  %v1734_v23 = vor.u32 1.1754944e-38, %v1733_v58 }
 0x29a   : > { %v1836_v24 = vmul.f32 %v1835_v35, %v5676_v61  ;;  %v1861_v49 = vmul.f32 2.1237322e-06, %v5737_v54  ;;  %v1872_v44 = vmul.f32 3.8918573e-05, %v5737_v54  ;;  %v1730_v13 = vsel %vm5732_vm10, %v5683_v22, %v1726_v17 }
 0x29b   : > { %v1748_v20 = vadd.f32 0.18741608, %v1747_v36  ;;  %v1764_v52 = vsub.f32 1.0, %v1763_v16  ;;  %v5756_v5 = vadd.f32 1.0, %v1800_v38  ;;  %v1788_v48 = vadd.f32 0.18741608, %v1787_v6 }
 0x29c   : > { %v1825_v45 = vmul.f32 %v1824_v42, %v5676_v61  ;;  %v1837_v21 = vadd.f32 0.112945676, %v1836_v24  ;;  %v1862_v43 = vadd.f32 0.00028619796, %v1861_v49  ;;  %v1711_v34 = vmul.f32 %v1710_v32, %v5472_v55 }
 0x29d   : > { %4574 = vrcp.f32 %v5756_v5  ;;  %v1873_v9 = vadd.f32 0.001143296, %v1872_v44  ;;  %v1899_v62 = vmul.f32 %v5748_v63, %v5748_v63  ;;  %v5764_v58 = vmul.f32 %v2509_v15, %v5656_v26 }
 0x29e   : > { %v1735_v22 = vsel %vm5740_vm12, %v1734_v23, %v1730_v13  ;;  %v5769_v1 = vmul.f32 0.5, %v5544_v28  ;;  %v1838_v53 = vmul.f32 %v1837_v21, %v5676_v61  ;;  %v2510_v18 = vadd.f32 1.0, %v4198_v39  ;;  %v1120_v39 = vpop.f32.mrf.mxu0 }
 0x29f   : > { %v1749_v55 = vmul.f32 %v1748_v20, %v5582_v11  ;;  %v1765_v32 = vmul.f32 %v5728_v59, %v1764_v52  ;;  %v1863_v60 = vmul.f32 %v1862_v43, %v5737_v54  ;;  %vm1767_vm13 = vweird.f32 %v5697_v41 }
 0x2a0   : > { %v1789_v26 = vmul.f32 %v1788_v48, %v5597_v0  ;;  %v1826_v15 = vadd.f32 0.05243302, %v1825_v45  ;;  %v1839_v17 = vadd.f32 0.4994258, %v1838_v53  ;;  %v1736_v36 = vmul.f32 %v1735_v22, %v1711_v34 }
 0x2a1   : > { %vm1768_vm14 = vweird.f32 %v5728_v59  ;;  %v1874_v28 = vmul.f32 %v1873_v9, %v5737_v54  ;;  %v5779_v46 = vmin.f32 %v1899_v62, 16.0  ;;  %v1771_v11 = vand.u32 2147483647, %v5697_v41 }
 0x2a2   : > { %v1773_v30 = vand.u32 2147483648, %v5697_v41  ;;  %v1840_v6 = vmul.f32 %v1839_v17, %v5676_v61  ;;  %v5785_v42 = vadd.f32 %v5541_v29, %v1120_v39  ;;  %v1766_v35 = vadd.f32 %v5728_v59, %v1765_v32  ;;  %vm5796_vm15 = vmor %vm1767_vm13, %vm1768_vm14 }
 0x2a3   : > { %v5787_v0 = vpop.eup %4574  ;;  %v1864_v7 = vadd.f32 0.0036580483, %v1863_v60  ;;  %v1875_v16 = vadd.f32 0.014752088, %v1874_v28  ;;  %v1901_v38 = vmul.f32 2.1237322e-06, %v5779_v46  ;;  %v2542_v23 = vmul.f32 %v2510_v18, %v5659_v47  ;;  %v5831_v28 = vpop.trf.xlu0 }
 0x2a4   : > { %v1750_v24 = vadd.f32 1.1283791, %v1749_v55  ;;  %v1827_v44 = vmul.f32 %v1826_v15, %v5676_v61  ;;  %v5801_v13 = vadd.f32 1.0, %v1840_v6  ;;  %v4199_v20 = vclamps-f32 %v1736_v36, 1.0 }
 0x2a5   : > { %v1803_v52 = vmul.f32 %v5787_v0, %v5756_v5  ;;  %v1876_v48 = vmul.f32 %v1875_v16, %v5737_v54  ;;  %v1902_v47 = vadd.f32 0.00028619796, %v1901_v38  ;;  %vm5806_vm1 = vcmp.eq.f32.partialorder %v1771_v11, 8.507059e+37 }
 0x2a6   : > { %v1774_v41 = vor.u32 1.1754944e-38, %v1773_v30  ;;  %v1790_v21 = vadd.f32 1.1283791, %v1789_v26  ;;  %4576 = vrcp.f32 %v5801_v13  ;;  %v1770_v43 = vsel %vm5796_vm15, %v5728_v59, %v1766_v35  ;;  %v1130_v30 = vpop.f32.mrf.mxu3 }
 0x2a7   : > { %v1865_v34 = vmul.f32 %v1864_v7, %v5737_v54  ;;  %v1877_v9 = vadd.f32 0.112945676, %v1876_v48  ;;  %v5816_v62 = vmul.f32 0.70710677, %v5785_v42  ;;  %v1751_v22 = vmul.f32 %v1750_v24, %v5536_v37 }
 0x2a8   : > { %v5820_v53 = vmul.f32 0.5, %v5612_v25  ;;  %v1828_v18 = vadd.f32 0.18741608, %v1827_v44  ;;  %v1912_v55 = vmul.f32 3.8918573e-05, %v5779_v46  ;;  %v2511_v32 = vadd.f32 1.0, %v4199_v20 }
 0x2a9   : > { %v1804_v60 = vsub.f32 1.0, %v1803_v52  ;;  %v1878_v26 = vmul.f32 %v1877_v9, %v5737_v54  ;;  %v1903_v59 = vmul.f32 %v1902_v47, %v5779_v46  ;;  %v1775_v15 = vsel %vm5806_vm1, %v1774_v41, %v1770_v43 }
 0x2aa   : > { %v5828_v17 = vmul.f32 %v1790_v21, %v5571_v51  ;;  %vm1807_vm2 = vweird.f32 %v5756_v5  ;;  %v1913_v37 = vadd.f32 0.001143296, %v1912_v55  ;;  %v1866_v25 = vadd.f32 0.05243302, %v1865_v34 }
 0x2ab   : > { %v1879_v36 = vadd.f32 0.4994258, %v1878_v26  ;;  %v1939_v39 = vmul.f32 %v5816_v62, %v5816_v62  ;;  %v2568_v11 = vpack.c.bf16 %v2542_v23, %v5764_v58  ;;  %v1811_v35 = vand.u32 2147483647, %v5756_v5 }
 0x2ac   : > { %v5836_v6 = vpop.eup %4576  ;;  %v1829_v51 = vmul.f32 %v1828_v18, %v5676_v61  ;;  %v1914_v7 = vmul.f32 %v1913_v37, %v5779_v46  ;;  %v5842_v16 = vadd.f32 %v5541_v29, %v1130_v30  ;;  %v5845_v38 = vmul.f32 %v2511_v32, %v5701_v56 }
 0x2ad   : > { %v1805_v24 = vmul.f32 %v5787_v0, %v1804_v60  ;;  %v1813_v49 = vand.u32 2147483648, %v5756_v5  ;;  %v1904_v58 = vadd.f32 0.0036580483, %v1903_v59  ;;  %4240 = vmatmul.msk.bf16.gmra.mxu1 %vm2615_vm11, %v2568_v11  ;;  %v1776_v23 = vmul.f32 %v1775_v15, %v1751_v22 }
 0x2ae   : > { %v1843_v44 = vmul.f32 %v5836_v6, %v5801_v13  ;;  %v1880_v61 = vmul.f32 %v1879_v36, %v5737_v54  ;;  %v1915_v20 = vadd.f32 0.014752088, %v1914_v7  ;;  %vm1808_vm3 = vweird.f32 %v5787_v0 }
 0x2af   : > { %v1867_v52 = vmul.f32 %v1866_v25, %v5737_v54  ;;  %v5855_v56 = vmin.f32 %v1939_v39, 16.0  ;;  %v5858_v48 = vmul.f32 0.70710677, %v5842_v16  ;;  %v1830_v47 = vadd.f32 1.1283791, %v1829_v51  ;;  %vm5872_vm4 = vmor %vm1807_vm2, %vm1808_vm3 }
 0x2b0   : > { %v5861_v45 = vmul.f32 0.5, %v5688_v57  ;;  %v5863_v41 = vadd.f32 1.0, %v1880_v61  ;;  %v1916_v21 = vmul.f32 %v1915_v20, %v5779_v46  ;;  %v1806_v43 = vadd.f32 %v5787_v0, %v1805_v24 }
 0x2b1   : > { %v1905_v34 = vmul.f32 %v1904_v58, %v5779_v46  ;;  %v1941_v9 = vmul.f32 2.1237322e-06, %v5855_v56  ;;  %v1952_v22 = vmul.f32 3.8918573e-05, %v5855_v56  ;;  %v4200_v18 = vclamps-f32 %v1776_v23, 1.0 }
 0x2b2   : > { %vm5876_vm5 = vcmp.eq.f32.partialorder %v1811_v35, 8.507059e+37  ;;  %v1844_v32 = vsub.f32 1.0, %v1843_v44  ;;  %4578 = vrcp.f32 %v5863_v41  ;;  %v1814_v60 = vor.u32 1.1754944e-38, %v1813_v49  ;;  %v977_v35 = vpop.trf.xlu0  ;;  %v1122_v49 = vpop.f32.mrf.mxu0 }
 0x2b3   : > { %v1868_v26 = vadd.f32 0.18741608, %v1867_v52  ;;  %v1917_v59 = vadd.f32 0.112945676, %v1916_v21  ;;  %v2099_v15 = vmul.f32 %v5858_v48, %v5858_v48  ;;  %v5884_v37 = vmul.f32 %v1830_v47, %v5638_v31 }
 0x2b4   : > { %vm1847_vm6 = vweird.f32 %v5801_v13  ;;  %v1942_v5 = vadd.f32 0.00028619796, %v1941_v9  ;;  %v1953_v25 = vadd.f32 0.001143296, %v1952_v22  ;;  %v1810_v36 = vsel %vm5872_vm4, %v5787_v0, %v1806_v43 }
 0x2b5   : > { %v1851_v39 = vand.u32 2147483647, %v5801_v13  ;;  %v1906_v11 = vadd.f32 0.05243302, %v1905_v34  ;;  %v1918_v30 = vmul.f32 %v1917_v59, %v5779_v46  ;;  %v2512_v51 = vadd.f32 1.0, %v4200_v18  ;;  %v1132_v59 = vpop.f32.mrf.mxu3 }
 0x2b6   : > { %v1845_v7 = vmul.f32 %v5836_v6, %v1844_v32  ;;  %v1853_v31 = vand.u32 2147483648, %v5801_v13  ;;  %v1954_v24 = vmul.f32 %v1953_v25, %v5855_v56  ;;  %v1869_v58 = vmul.f32 %v1868_v26, %v5737_v54 }
 0x2b7   : > { %v1919_v23 = vadd.f32 0.4994258, %v1918_v30  ;;  %v1943_v44 = vmul.f32 %v1942_v5, %v5855_v56  ;;  %v5897_v0 = vmin.f32 %v2099_v15, 16.0  ;;  %v1815_v20 = vsel %vm5876_vm5, %v1814_v60, %v1810_v36 }
 0x2b8   : > { %v5899_v61 = vpop.eup %4578  ;;  %vm1848_vm7 = vweird.f32 %v5836_v6  ;;  %v1955_v52 = vadd.f32 0.014752088, %v1954_v24  ;;  %v1006_v47 = vpack.c.bf16 %v977_v35, %v5831_v28  ;;  %vm5905_vm8 = vcmp.eq.f32.partialorder %v1851_v39, 8.507059e+37 }
 0x2b9   : > { %v1883_v54 = vmul.f32 %v5899_v61, %v5863_v41  ;;  %v1907_v43 = vmul.f32 %v1906_v11, %v5779_v46  ;;  %v5913_v34 = vadd.f32 %v5541_v29, %v1122_v49  ;;  %v1846_v9 = vadd.f32 %v5836_v6, %v1845_v7  ;;  %vm5923_vm10 = vmor %vm1847_vm6, %vm1848_vm7 }
 0x2ba   : > { %v1920_v22 = vmul.f32 %v1919_v23, %v5779_v46  ;;  %v1956_v18 = vmul.f32 %v1955_v52, %v5855_v56  ;;  %v2101_v28 = vmul.f32 2.1237322e-06, %v5897_v0  ;;  %4185 = vmatmul.msk.bf16.gmra.mxu3 %vm1013_vm9, %v1006_v47  ;;  %v1816_v55 = vmul.f32 %v1815_v20, %v5828_v17 }
 0x2bb   : > { %v1884_v32 = vsub.f32 1.0, %v1883_v54  ;;  %v1944_v60 = vadd.f32 0.0036580483, %v1943_v44  ;;  %v2112_v26 = vmul.f32 3.8918573e-05, %v5897_v0  ;;  %v1854_v15 = vor.u32 1.1754944e-38, %v1853_v31 }
 0x2bc   : > { %v1870_v5 = vadd.f32 1.1283791, %v1869_v58  ;;  %v5928_v25 = vadd.f32 1.0, %v1920_v22  ;;  %v1957_v36 = vadd.f32 0.112945676, %v1956_v18  ;;  %v5931_v39 = vmul.f32 %v2512_v51, %v5704_v12 }
 0x2bd   : > { %v2102_v17 = vadd.f32 0.00028619796, %v2101_v28  ;;  %v2113_v11 = vadd.f32 0.001143296, %v2112_v26  ;;  %v5934_v13 = vmul.f32 0.70710677, %v5913_v34  ;;  %v1850_v30 = vsel %vm5923_vm10, %v5836_v6, %v1846_v9 }
 0x2be   : > { %v1908_v35 = vadd.f32 0.18741608, %v1907_v43  ;;  %4580 = vrcp.f32 %v5928_v25  ;;  %v5941_v7 = vadd.f32 %v5541_v29, %v1132_v59  ;;  %v4201_v31 = vclamps-f32 %v1816_v55, 1.0 }
 0x2bf   : > { %v1885_v24 = vmul.f32 %v5899_v61, %v1884_v32  ;;  %v1945_v12 = vmul.f32 %v1944_v60, %v5855_v56  ;;  %v1958_v51 = vmul.f32 %v1957_v36, %v5855_v56  ;;  %vm1887_vm12 = vweird.f32 %v5863_v41 }
 0x2c0   : > { %v1891_v49 = vand.u32 2147483647, %v5863_v41  ;;  %v2103_v58 = vmul.f32 %v2102_v17, %v5897_v0  ;;  %v2114_v6 = vmul.f32 %v2113_v11, %v5897_v0  ;;  %v1855_v23 = vsel %vm5905_vm8, %v1854_v15, %v1850_v30 }
 0x2c1   : > { %vm1888_vm13 = vweird.f32 %v5899_v61  ;;  %v1959_v44 = vadd.f32 0.4994258, %v1958_v51  ;;  %v1979_v20 = vmul.f32 %v5934_v13, %v5934_v13  ;;  %v1893_v52 = vand.u32 2147483648, %v5863_v41 }
 0x2c2   : > { %v1909_v47 = vmul.f32 %v1908_v35, %v5779_v46  ;;  %v2115_v54 = vadd.f32 0.014752088, %v2114_v6  ;;  %v5958_v43 = vmul.f32 0.70710677, %v5941_v7  ;;  %v1871_v9 = vmul.f32 %v1870_v5, %v5709_v10  ;;  %vm5968_vm14 = vmor %vm1887_vm12, %vm1888_vm13 }
 0x2c3   : > { %v1886_v22 = vadd.f32 %v5899_v61, %v1885_v24  ;;  %v1946_v21 = vadd.f32 0.05243302, %v1945_v12  ;;  %v1960_v18 = vmul.f32 %v1959_v44, %v5855_v56  ;;  %v1856_v55 = vmul.f32 %v1855_v23, %v5884_v37 }
 0x2c4   : > { %v5963_v28 = vpop.eup %4580  ;;  %v2104_v46 = vadd.f32 0.0036580483, %v2103_v58  ;;  %v2116_v32 = vmul.f32 %v2115_v54, %v5897_v0  ;;  %v2139_v10 = vmul.f32 %v5958_v43, %v5958_v43  ;;  %v2513_v60 = vadd.f32 1.0, %v4201_v31  ;;  %v1125_v54 = vpop.f32.mrf.mxu0 }
 0x2c5   : > { %vm5975_vm15 = vcmp.eq.f32.partialorder %v1891_v49, 8.507059e+37  ;;  %v1923_v37 = vmul.f32 %v5963_v28, %v5928_v25  ;;  %v5981_v59 = vmin.f32 %v1979_v20, 16.0  ;;  %v1894_v41 = vor.u32 1.1754944e-38, %v1893_v52 }
 0x2c6   : > { %v1910_v15 = vadd.f32 1.1283791, %v1909_v47  ;;  %v5983_v5 = vadd.f32 1.0, %v1960_v18  ;;  %v2117_v36 = vadd.f32 0.112945676, %v2116_v32  ;;  %v1890_v17 = vsel %vm5968_vm14, %v5899_v61, %v1886_v22 }
 0x2c7   : > { %v1924_v11 = vsub.f32 1.0, %v1923_v37  ;;  %v1947_v30 = vmul.f32 %v1946_v21, %v5855_v56  ;;  %v1981_v35 = vmul.f32 2.1237322e-06, %v5981_v59  ;;  %v4202_v31 = vclamps-f32 %v1856_v55, 1.0 }
 0x2c8   : > { %vm1927_vm1 = vweird.f32 %v5928_v25  ;;  %v2105_v24 = vmul.f32 %v2104_v46, %v5897_v0  ;;  %v5992_v12 = vmin.f32 %v2139_v10, 16.0  ;;  %vm1928_vm2 = vweird.f32 %v5963_v28 }
 0x2c9   : > { %v1925_v51 = vmul.f32 %v5963_v28, %v1924_v11  ;;  %4582 = vrcp.f32 %v5983_v5  ;;  %v2118_v61 = vmul.f32 %v2117_v36, %v5897_v0  ;;  %v1895_v49 = vsel %vm5975_vm15, %v1894_v41, %v1890_v17  ;;  %vm6006_vm3 = vmor %vm1927_vm1, %vm1928_vm2 }
 0x2ca   : > { %v1931_v58 = vand.u32 2147483647, %v5928_v25  ;;  %v1933_v6 = vand.u32 2147483648, %v5928_v25  ;;  %v1982_v23 = vadd.f32 0.00028619796, %v1981_v35  ;;  %v2514_v46 = vadd.f32 1.0, %v4202_v31 }
 0x2cb   : > { %v1926_v44 = vadd.f32 %v5963_v28, %v1925_v51  ;;  %v1948_v20 = vadd.f32 0.18741608, %v1947_v30  ;;  %v2119_v52 = vadd.f32 0.4994258, %v2118_v61  ;;  %v1992_v47 = vmul.f32 3.8918573e-05, %v5981_v59 }
 0x2cc   : > { %v2106_v21 = vadd.f32 0.05243302, %v2105_v24  ;;  %v1983_v18 = vmul.f32 %v1982_v23, %v5981_v59  ;;  %v2141_v55 = vmul.f32 2.1237322e-06, %v5992_v12  ;;  %v2152_v57 = vmul.f32 3.8918573e-05, %v5992_v12 }
 0x2cd   : > { %v1896_v32 = vmul.f32 %v1895_v49, %v1871_v9  ;;  %v2120_v10 = vmul.f32 %v2119_v52, %v5897_v0  ;;  %v1993_v26 = vadd.f32 0.001143296, %v1992_v47  ;;  %v1934_v37 = vor.u32 1.1754944e-38, %v1933_v6  ;;  %v6023_v9 = vpop.trf.xlu0 }
 0x2ce   : > { %v2142_v41 = vadd.f32 0.00028619796, %v2141_v55  ;;  %v2153_v36 = vadd.f32 0.001143296, %v2152_v57  ;;  %v6015_v25 = vadd.f32 %v5541_v29, %v1125_v54  ;;  %v1930_v11 = vsel %vm6006_vm3, %v5963_v28, %v1926_v44 }
 0x2cf   : > { %v6017_v17 = vpop.eup %4582  ;;  %vm1932_vm4 = vcmp.eq.f32.partialorder %v1931_v58, 8.507059e+37  ;;  %v1949_v30 = vmul.f32 %v1948_v20, %v5855_v56  ;;  %v1984_v35 = vadd.f32 0.0036580483, %v1983_v18  ;;  %v2107_v31 = vmul.f32 %v2106_v21, %v5897_v0 }
 0x2d0   : > { %v6026_v24 = vadd.f32 1.0, %v2120_v10  ;;  %v1994_v51 = vmul.f32 %v1993_v26, %v5981_v59  ;;  %v2143_v61 = vmul.f32 %v2142_v41, %v5992_v12  ;;  %v4203_v49 = vclamps-f32 %v1896_v32, 1.0 }
 0x2d1   : > { %v6031_v6 = vmul.f32 0.5, %v5722_v50  ;;  %v1911_v28 = vmul.f32 %v1910_v15, %v5748_v63  ;;  %v2154_v58 = vmul.f32 %v2153_v36, %v5992_v12  ;;  %v1935_v56 = vsel %vm1932_vm4, %v1934_v37, %v1930_v11  ;;  %v6061_v37 = vpop.f32.mrf.mxu1 }
 0x2d2   : > { %v1963_v23 = vmul.f32 %v6017_v17, %v5983_v5  ;;  %4584 = vrcp.f32 %v6026_v24  ;;  %v6039_v44 = vmul.f32 0.70710677, %v6015_v25  ;;  %v6042_v20 = vmul.f32 %v2513_v60, %v5769_v1 }
 0x2d3   : > { %v6044_v52 = vadd.f32 1.1283791, %v1949_v30  ;;  %v1985_v50 = vmul.f32 %v1984_v35, %v5981_v59  ;;  %v1995_v47 = vadd.f32 0.014752088, %v1994_v51  ;;  %v6048_v63 = vmul.f32 %v2514_v46, %v5820_v53 }
 0x2d4   : > { %v2108_v15 = vadd.f32 0.18741608, %v2107_v31  ;;  %v2144_v54 = vadd.f32 0.0036580483, %v2143_v61  ;;  %v2155_v22 = vadd.f32 0.014752088, %v2154_v58  ;;  %v1936_v18 = vmul.f32 %v1935_v56, %v1911_v28 }
 0x2d5   : > { %v6050_v21 = vadd.f32 1.0, %v4203_v49  ;;  %vm1967_vm5 = vweird.f32 %v5983_v5  ;;  %v1996_v55 = vmul.f32 %v1995_v47, %v5981_v59  ;;  %v1964_v1 = vsub.f32 1.0, %v1963_v23 }
 0x2d6   : > { %v2145_v60 = vmul.f32 %v2144_v54, %v5992_v12  ;;  %v2156_v57 = vmul.f32 %v2155_v22, %v5992_v12  ;;  %v2019_v32 = vmul.f32 %v6039_v44, %v6039_v44  ;;  %v1971_v53 = vand.u32 2147483647, %v5983_v5  ;;  %v1127_v22 = vpop.f32.mrf.mxu0 }
 0x2d7   : > { %v1986_v46 = vadd.f32 0.05243302, %v1985_v50  ;;  %v1997_v10 = vadd.f32 0.112945676, %v1996_v55  ;;  %v2569_v26 = vpack.c.bf16 %v5931_v39, %v5845_v38  ;;  %v1973_v36 = vand.u32 2147483648, %v5983_v5  ;;  %v979_v38 = vpop.trf.xlu0 }
 0x2d8   : > { %v6063_v41 = vpop.eup %4584  ;;  %v2109_v11 = vmul.f32 %v2108_v15, %v5897_v0  ;;  %v2146_v30 = vadd.f32 0.05243302, %v2145_v60  ;;  %v2157_v35 = vadd.f32 0.112945676, %v2156_v57  ;;  %v4204_v31 = vclamps-f32 %v1936_v18, 1.0 }
 0x2d9   : > { %vm1968_vm6 = vweird.f32 %v6017_v17  ;;  %v2123_v51 = vmul.f32 %v6063_v41, %v6026_v24  ;;  %v6070_v61 = vmin.f32 %v2019_v32, 16.0  ;;  %4241 = vmatmul.msk.bf16.gmra.mxu1 %vm2615_vm11, %v2569_v26  ;;  %v1965_v39 = vmul.f32 %v6017_v17, %v1964_v1 }
 0x2da   : > { %v1998_v49 = vmul.f32 %v1997_v10, %v5981_v59  ;;  %v2147_v28 = vmul.f32 %v2146_v30, %v5992_v12  ;;  %v2158_v0 = vmul.f32 %v2157_v35, %v5992_v12  ;;  %vm6077_vm7 = vcmp.eq.f32.partialorder %v1971_v53, 8.507059e+37 }
 0x2db   : > { %v2124_v56 = vsub.f32 1.0, %v2123_v51  ;;  %vm2127_vm8 = vweird.f32 %v6026_v24  ;;  %v1987_v23 = vmul.f32 %v1986_v46, %v5981_v59  ;;  %v2021_v50 = vmul.f32 2.1237322e-06, %v6070_v61  ;;  %v2675_v51 = vpop.f32.mrf.mxu1 }
 0x2dc   : > { %vm2128_vm10 = vweird.f32 %v6063_v41  ;;  %v1999_v47 = vadd.f32 0.4994258, %v1998_v49  ;;  %v2159_v15 = vadd.f32 0.4994258, %v2158_v0  ;;  %v1007_v54 = vpack.c.bf16 %v979_v38, %v6023_v9 }
 0x2dd   : > { %v2125_v18 = vmul.f32 %v6063_v41, %v2124_v56  ;;  %v2131_v55 = vand.u32 2147483647, %v6026_v24  ;;  %v2133_v1 = vand.u32 2147483648, %v6026_v24  ;;  %v2148_v60 = vadd.f32 0.18741608, %v2147_v28  ;;  %vm6099_vm12 = vmor %vm2127_vm8, %vm2128_vm10 }
 0x2de   : > { %v1966_v57 = vadd.f32 %v6017_v17, %v1965_v39  ;;  %v2000_v32 = vmul.f32 %v1999_v47, %v5981_v59  ;;  %v2160_v53 = vmul.f32 %v2159_v15, %v5992_v12  ;;  %v2032_v46 = vmul.f32 3.8918573e-05, %v6070_v61  ;;  %4186 = vmatmul.msk.bf16.gmra.mxu3 %vm1013_vm9, %v1007_v54  ;;  %vm6110_vm9 = vmor %vm1967_vm5, %vm1968_vm6 }
 0x2df   : > { %v2126_v9 = vadd.f32 %v6063_v41, %v2125_v18  ;;  %v1988_v26 = vadd.f32 0.18741608, %v1987_v23  ;;  %v2022_v30 = vadd.f32 0.00028619796, %v2021_v50  ;;  %v6104_v35 = vadd.f32 %v5541_v29, %v1127_v22 }
 0x2e0   : > { %v1974_v39 = vor.u32 1.1754944e-38, %v1973_v36  ;;  %v2110_v24 = vadd.f32 1.1283791, %v2109_v11  ;;  %v2001_v49 = vadd.f32 1.0, %v2000_v32  ;;  %v6114_v28 = vadd.f32 1.0, %v2160_v53 }
 0x2e1   : > { %v2516_v0 = vadd.f32 1.0, %v4204_v31  ;;  %v2134_v56 = vor.u32 1.1754944e-38, %v2133_v1  ;;  %v2149_v23 = vmul.f32 %v2148_v60, %v5992_v12  ;;  %v2033_v29 = vadd.f32 0.001143296, %v2032_v46  ;;  %v6132_v31 = vld [vmem:[%s7115_s6] ss:$0 sm:$0xff] }
 0x2e2   : > { %v2130_v50 = vsel %vm6099_vm12, %v6063_v41, %v2126_v9  ;;  %vm2132_vm13 = vcmp.eq.f32.partialorder %v2131_v55, 8.507059e+37  ;;  %4586 = vrcp.f32 %v2001_v49  ;;  %v6121_v5 = vmul.f32 0.70710677, %v6104_v35 }
 0x2e3   : > { %v1970_v36 = vsel %vm6110_vm9, %v6017_v17, %v1966_v57  ;;  %v1989_v11 = vmul.f32 %v1988_v26, %v5981_v59  ;;  %4588 = vrcp.f32 %v6114_v28  ;;  %v2023_v12 = vmul.f32 %v2022_v30, %v6070_v61  ;;  %v6155_v1 = vpop.f32.mrf.mxu1 }
 0x2e4   : > { %v6136_v41 = vmul.f32 %v6044_v52, %v5816_v62  ;;  %v2111_v47 = vmul.f32 %v2110_v24, %v5858_v48  ;;  %v6141_v17 = vmul.f32 %v6050_v21, %v5861_v45  ;;  %v2135_v59 = vsel %vm2132_vm13, %v2134_v56, %v2130_v50 }
 0x2e5   : > { %v2150_v15 = vadd.f32 1.1283791, %v2149_v23  ;;  %v2034_v54 = vmul.f32 %v2033_v29, %v6070_v61  ;;  %v6145_v22 = vmul.f32 %v2516_v0, %v6031_v6  ;;  %v1975_v18 = vsel %vm6077_vm7, %v1974_v39, %v1970_v36 }
 0x2e6   : > { %v2059_v62 = vmul.f32 %v6121_v5, %v6121_v5  ;;  %v2570_v48 = vpack.c.bf16 %v6048_v63, %v6042_v20  ;;  %v1990_v52 = vadd.f32 1.1283791, %v1989_v11  ;;  %v2024_v55 = vadd.f32 0.0036580483, %v2023_v12 }
 0x2e7   : > { %v2035_v45 = vadd.f32 0.014752088, %v2034_v54  ;;  %v2674_v21 = vadd.f32 %v6132_v31, %v6061_v37  ;;  %v2136_v6 = vmul.f32 %v2135_v59, %v2111_v47  ;;  %vm2007_vm14 = vweird.f32 %v2001_v49 }
 0x2e8   : > { %v4587_v60 = vpop.eup %4586  ;;  %v2011_v57 = vand.u32 2147483647, %v2001_v49  ;;  %v6157_v58 = vmin.f32 %v2059_v62, 16.0  ;;  %v2013_v46 = vand.u32 2147483648, %v2001_v49  ;;  %v2151_v9 = vmul.f32 %v2150_v15, %v5958_v43 }
 0x2e9   : > { %v4589_v32 = vpop.eup %4588  ;;  %v2003_v53 = vmul.f32 %v4587_v60, %v2001_v49  ;;  %vm2167_vm15 = vweird.f32 %v6114_v28  ;;  %4242 = vmatmul.msk.bf16.gmra.mxu1 %vm2615_vm11, %v2570_v48  ;;  %2753 = vxpose.xlu2.b32.start [1/4] (short) (narrow) %v2674_v21, 8  ;;  %v2171_v63 = vand.u32 2147483647, %v6114_v28  ;;  %v2036_v37 = vmul.f32 %v2035_v45, %v6070_v61 }
 0x2ea   : > { %v2163_v20 = vmul.f32 %v4589_v32, %v6114_v28  ;;  %v2061_v10 = vmul.f32 2.1237322e-06, %v6157_v58  ;;  %vm2008_vm1 = vweird.f32 %v4587_v60  ;;  %v2173_v30 = vand.u32 2147483648, %v6114_v28 }
 0x2eb   : > { %v2004_v26 = vsub.f32 1.0, %v2003_v53  ;;  %v2072_v38 = vmul.f32 3.8918573e-05, %v6157_v58  ;;  %vm2168_vm2 = vweird.f32 %v4589_v32  ;;  %v2037_v39 = vadd.f32 0.112945676, %v2036_v37  ;;  %vm6174_vm4 = vmor %vm2007_vm14, %vm2008_vm1  ;;  %v2680_v62 = vpop.f32.mrf.mxu1 }
 0x2ec   : > { %v2164_v43 = vsub.f32 1.0, %v2163_v20  ;;  %v2062_v24 = vadd.f32 0.00028619796, %v2061_v10  ;;  %vm6168_vm3 = vcmp.eq.f32.partialorder %v2011_v57, 8.507059e+37  ;;  %v2676_v29 = vadd.f32 %v6132_v31, %v2675_v51  ;;  %vm6182_vm5 = vmor %vm2167_vm15, %vm2168_vm2 }
 0x2ed   : > { %v2005_v0 = vmul.f32 %v4587_v60, %v2004_v26  ;;  %v2073_v23 = vadd.f32 0.001143296, %v2072_v38  ;;  %v2014_v36 = vor.u32 1.1754944e-38, %v2013_v46  ;;  %v2038_v12 = vmul.f32 %v2037_v39, %v6070_v61 }
 0x2ee   : > { %v2165_v11 = vmul.f32 %v4589_v32, %v2164_v43  ;;  %v2063_v47 = vmul.f32 %v2062_v24, %v6157_v58  ;;  %v4209_v59 = vclamps-f32 %v2136_v6, 1.0  ;;  %v2174_v51 = vor.u32 1.1754944e-38, %v2173_v30 }
 0x2ef   : > { %v2006_v15 = vadd.f32 %v4587_v60, %v2005_v0  ;;  %v2074_v49 = vmul.f32 %v2073_v23, %v6157_v58  ;;  %vm2172_vm6 = vcmp.eq.f32.partialorder %v2171_v63, 8.507059e+37  ;;  %v2025_v45 = vmul.f32 %v2024_v55, %v6070_v61 }
 0x2f0   : > { %v2166_v48 = vadd.f32 %v4589_v32, %v2165_v11  ;;  %v2039_v21 = vadd.f32 0.4994258, %v2038_v12  ;;  %v1991_v57 = vmul.f32 %v1990_v52, %v5934_v13  ;;  %v2064_v53 = vadd.f32 0.0036580483, %v2063_v47 }
 0x2f1   : > { %v2010_v6 = vsel %vm6174_vm4, %v4587_v60, %v2006_v15  ;;  %v2075_v28 = vadd.f32 0.014752088, %v2074_v49  ;;  %2754 = vxpose.xlu2.b32.cont [2/4] (short) (narrow) %v2676_v29, 8  ;;  %v1177_v46 = vmul.f32 0.5, %v5842_v16  ;;  %v1976_v55 = vmul.f32 %v1975_v18, %v6136_v41 }
 0x2f2   : > { %v2015_v20 = vsel %vm6168_vm3, %v2014_v36, %v2010_v6  ;;  %v2170_v37 = vsel %vm6182_vm5, %v4589_v32, %v2166_v48  ;;  %v2040_v63 = vmul.f32 %v2039_v21, %v6070_v61  ;;  %v2521_v10 = vadd.f32 1.0, %v4209_v59 }
 0x2f3   : > { %v2175_v13 = vsel %vm2172_vm6, %v2174_v51, %v2170_v37  ;;  %v2076_v52 = vmul.f32 %v2075_v28, %v6157_v58  ;;  %v2026_v26 = vadd.f32 0.05243302, %v2025_v45  ;;  %v2571_v16 = vpack.c.bf16 %v6145_v22, %v6141_v17 }
 0x2f4   : > { %v2176_v60 = vmul.f32 %v2175_v13, %v2151_v9  ;;  %v2041_v30 = vadd.f32 1.0, %v2040_v63  ;;  %v2016_v38 = vmul.f32 %v2015_v20, %v1991_v57  ;;  %v2065_v43 = vmul.f32 %v2064_v53, %v6157_v58  ;;  %v2683_v9 = vpop.f32.mrf.mxu1 }
 0x2f5   : > { %v2077_v39 = vadd.f32 0.112945676, %v2076_v52  ;;  %v2679_v32 = vadd.f32 %v6132_v31, %v6155_v1  ;;  %v1178_v24 = vmul.f32 0.5, %v5941_v7  ;;  %v4205_v18 = vclamps-f32 %v1976_v55, 1.0 }
 0x2f6   : > { %v4210_v41 = vclamps-f32 %v2176_v60, 1.0  ;;  %4590 = vrcp.f32 %v2041_v30  ;;  %v2553_v56 = vmul.f32 %v2521_v10, %v1177_v46  ;;  %v2027_v29 = vmul.f32 %v2026_v26, %v6070_v61 }
 0x2f7   : > { %v2078_v0 = vmul.f32 %v2077_v39, %v6157_v58  ;;  %v2684_v17 = vadd.f32 %v6132_v31, %v2683_v9  ;;  %v4206_v22 = vclamps-f32 %v2016_v38, 1.0  ;;  %v2066_v50 = vadd.f32 0.05243302, %v2065_v43  ;;  %v6222_v39 = vld [vmem:[%s7137_s4] ss:$0 sm:$0xff]  ;;  %s4090_s4 = scalar_lea.sflag [#allocation4], %s486_s0 }
 0x2f8   : > { %v2522_v23 = vadd.f32 1.0, %v4210_v41  ;;  %v1173_v7 = vmul.f32 0.5, %v5785_v42  ;;  %v1174_v11 = vmul.f32 0.5, %v5913_v34  ;;  %v2517_v59 = vadd.f32 1.0, %v4205_v18 }
 0x2f9   : > { %v2079_v36 = vadd.f32 0.4994258, %v2078_v0  ;;  %4243 = vmatmul.msk.bf16.gmra.mxu1 %vm2615_vm11, %v2571_v16  ;;  %2755 = vxpose.xlu2.b32.cont [3/4] (short) (narrow) %v2679_v32, 8  ;;  %v2028_v15 = vadd.f32 0.18741608, %v2027_v29  ;;  %v2681_v54 = vadd.f32 %v6132_v31, %v2680_v62  ;;  %v2518_v49 = vadd.f32 1.0, %v4206_v22 }
 0x2fa   : > { %v2554_v1 = vmul.f32 %v2522_v23, %v1178_v24  ;;  %2785 = vxpose.xlu1.b32.start [1/4] (short) (narrow) %v2684_v17, 8  ;;  %v2067_v45 = vmul.f32 %v2066_v50, %v6157_v58  ;;  %vm2047_vm7 = vweird.f32 %v2041_v30  ;;  %v2053_v42 = vand.u32 2147483648, %v2041_v30 }
 0x2fb   : > { %v2080_v12 = vmul.f32 %v2079_v36, %v6157_v58  ;;  %v2029_v6 = vmul.f32 %v2028_v15, %v6070_v61  ;;  %v2051_v53 = vand.u32 2147483647, %v2041_v30  ;;  %v2549_v62 = vmul.f32 %v2517_v59, %v1173_v7 }
 0x2fc   : > { %v4591_v47 = vpop.eup %4590  ;;  %v2574_v51 = vpack.c.bf16 %v2554_v1, %v2553_v56  ;;  %v2685_v34 = vpop.f32.mrf.mxu1  ;;  %v2550_v46 = vmul.f32 %v2518_v49, %v1174_v11  ;;  %v2068_v37 = vadd.f32 0.18741608, %v2067_v45  ;;  %v2054_v55 = vor.u32 1.1754944e-38, %v2053_v42 }
 0x2fd   : > { %v2043_v48 = vmul.f32 %v4591_v47, %v2041_v30  ;;  %v2081_v21 = vadd.f32 1.0, %v2080_v12  ;;  %vm2048_vm8 = vweird.f32 %v4591_v47  ;;  %v2686_v28 = vadd.f32 %v6132_v31, %v2685_v34 }
 0x2fe   : > { %4246 = vmatmul.msk.bf16.vlgmr.msra.gmra.mxu2 %vm2615_vm11, %v2574_v51  ;;  %vm2049_vm10 = vmor %vm2047_vm7, %vm2048_vm8  ;;  %v2030_v10 = vadd.f32 1.1283791, %v2029_v6  ;;  %vm2052_vm12 = vcmp.eq.f32.partialorder %v2051_v53, 8.507059e+37  ;;  %v2069_v60 = vmul.f32 %v2068_v37, %v6157_v58  ;;  %v2572_v61 = vpack.c.bf16 %v2550_v46, %v2549_v62 }
 0x2ff   : > { %v2044_v57 = vsub.f32 1.0, %v2043_v48  ;;  %4592 = vrcp.f32 %v2081_v21  ;;  %vm2087_vm9 = vweird.f32 %v2081_v21  ;;  %v2093_v58 = vand.u32 2147483648, %v2081_v21 }
 0x300   : > { %v2031_v32 = vmul.f32 %v2030_v10, %v6039_v44  ;;  %v2070_v18 = vadd.f32 1.1283791, %v2069_v60  ;;  %v2091_v23 = vand.u32 2147483647, %v2081_v21  ;;  %v1175_v48 = vmul.f32 0.5, %v6015_v25 }
 0x301   : > { %v2045_v20 = vmul.f32 %v4591_v47, %v2044_v57  ;;  %2756 = vxpose.xlu2.b32.end [4/4] (short) (narrow) %v2681_v54, 8  ;;  %v2094_v17 = vor.u32 1.1754944e-38, %v2093_v58  ;;  %v1176_v45 = vmul.f32 0.5, %v6104_v35 }
 0x302   : > { %2786 = vxpose.xlu1.b32.cont [2/4] (short) (narrow) %v2686_v28, 8  ;;  %v2071_v36 = vmul.f32 %v2070_v18, %v6121_v5  ;;  %vm2092_vm15 = vcmp.eq.f32.partialorder %v2091_v23, 8.507059e+37 }
 0x303   : > { %v2046_v63 = vadd.f32 %v4591_v47, %v2045_v20 }
 0x304   : > { %v2688_v43 = vpop.f32.mrf.mxu1 }
 0x305   : > { %v4593_v13 = vpop.eup %4592  ;;  %v2050_v52 = vsel %vm2049_vm10, %v4591_v47, %v2046_v63  ;;  %v2689_v41 = vadd.f32 %v6132_v31, %v2688_v43 }
 0x306   : > { %v2083_v26 = vmul.f32 %v4593_v13, %v2081_v21  ;;  %v1135_v16 = vpop.f32.mrf.mxu3  ;;  %v2055_v38 = vsel %vm2052_vm12, %v2054_v55, %v2050_v52  ;;  %vm2088_vm13 = vweird.f32 %v4593_v13 }
 0x307   : > { %v6225_v30 = vadd.f32 %v6222_v39, %v1135_v16  ;;  %v2056_v9 = vmul.f32 %v2055_v38, %v2031_v32  ;;  %vm2089_vm14 = vmor %vm2087_vm9, %vm2088_vm13 }
 0x308   : > { %v2084_v24 = vsub.f32 1.0, %v2083_v26 }
 0x309   : > { %4244 = vmatmul.msk.bf16.gmra.mxu1 %vm2615_vm11, %v2572_v61  ;;  %v6231_v0 = vmul.f32 0.70710677, %v6225_v30  ;;  %v4207_v50 = vclamps-f32 %v2056_v9, 1.0 }
 0x30a   : > { %v2085_v56 = vmul.f32 %v4593_v13, %v2084_v24  ;;  %2787 = vxpose.xlu1.b32.cont [3/4] (short) (narrow) %v2689_v41, 8 }
 0x30b   : > { %v2179_v29 = vmul.f32 %v6231_v0, %v6231_v0  ;;  %v2519_v54 = vadd.f32 1.0, %v4207_v50 }
 0x30c   : > { %v2086_v44 = vadd.f32 %v4593_v13, %v2085_v56  ;;  %v2690_v11 = vpop.f32.mrf.mxu1 }
 0x30d   : > { %v6235_v22 = vmin.f32 %v2179_v29, 16.0  ;;  %v2691_v59 = vadd.f32 %v6132_v31, %v2690_v11  ;;  %v2551_v42 = vmul.f32 %v2519_v54, %v1175_v48 }
 0x30e   : > { %v2090_v1 = vsel %vm2089_vm14, %v4593_v13, %v2086_v44  ;;  %v1137_v25 = vpop.f32.mrf.mxu3 }
 0x30f   : > { %v2095_v7 = vsel %vm2092_vm15, %v2094_v17, %v2090_v1  ;;  %v2192_v12 = vmul.f32 3.8918573e-05, %v6235_v22  ;;  %v2181_v21 = vmul.f32 2.1237322e-06, %v6235_v22  ;;  %v6249_v37 = vadd.f32 %v6222_v39, %v1137_v25 }
 0x310   : > { %v2096_v47 = vmul.f32 %v2095_v7, %v2071_v36 }
 0x311   : > { %v2193_v15 = vadd.f32 0.001143296, %v2192_v12  ;;  %v2182_v46 = vadd.f32 0.00028619796, %v2181_v21  ;;  %v6253_v10 = vmul.f32 0.70710677, %v6249_v37 }
 0x312   : > { %v4208_v51 = vclamps-f32 %v2096_v47, 1.0  ;;  %2788 = vxpose.xlu1.b32.end [4/4] (short) (narrow) %v2691_v59, 8 }
 0x313   : > { %v2194_v49 = vmul.f32 %v2193_v15, %v6235_v22  ;;  %v2183_v63 = vmul.f32 %v2182_v46, %v6235_v22  ;;  %v2219_v26 = vmul.f32 %v6253_v10, %v6253_v10 }
 0x314   : > { %v2520_v5 = vadd.f32 1.0, %v4208_v51  ;;  %v2693_v6 = vpop.f32.mrf.mxu1 }
 0x315   : > { %v2195_v57 = vadd.f32 0.014752088, %v2194_v49  ;;  %v2694_v62 = vadd.f32 %v6132_v31, %v2693_v6  ;;  %v2184_v60 = vadd.f32 0.0036580483, %v2183_v63  ;;  %v2220_v38 = vmin.f32 %v2219_v26, 16.0 }
 0x316   : > { %v2552_v34 = vmul.f32 %v2520_v5, %v1176_v45 }
 0x317   : > { %v2196_v53 = vmul.f32 %v2195_v57, %v6235_v22  ;;  %2817 = vxpose.xlu0.b32.start [1/4] (short) (narrow) %v2694_v62, 8  ;;  %v2185_v43 = vmul.f32 %v2184_v60, %v6235_v22  ;;  %v2221_v32 = vmul.f32 2.1237322e-06, %v2220_v38  ;;  %v2232_v24 = vmul.f32 3.8918573e-05, %v2220_v38 }
 0x318   : > { %v2573_v28 = vpack.c.bf16 %v2552_v34, %v2551_v42 }
 0x319   : > { %v2197_v20 = vadd.f32 0.112945676, %v2196_v53  ;;  %v2222_v41 = vadd.f32 0.00028619796, %v2221_v32  ;;  %v2233_v18 = vadd.f32 0.001143296, %v2232_v24 }
 0x31a   : > { %4245 = vmatmul.msk.bf16.gmra.mxu1 %vm2615_vm11, %v2573_v28  ;;  %v2186_v58 = vadd.f32 0.05243302, %v2185_v43 }
 0x31b   : > { %v2198_v35 = vmul.f32 %v2197_v20, %v6235_v22  ;;  %v2223_v9 = vmul.f32 %v2222_v41, %v2220_v38  ;;  %v2234_v56 = vmul.f32 %v2233_v18, %v2220_v38  ;;  %v1140_v23 = vpop.f32.mrf.mxu3 }
 0x31c   : > { %v2695_v52 = vpop.f32.mrf.mxu1  ;;  %v2187_v7 = vmul.f32 %v2186_v58, %v6235_v22  ;;  %v6267_v54 = vadd.f32 %v6222_v39, %v1140_v23 }
 0x31d   : > { %v2199_v55 = vadd.f32 0.4994258, %v2198_v35  ;;  %v2696_v61 = vadd.f32 %v6132_v31, %v2695_v52  ;;  %v2224_v44 = vadd.f32 0.0036580483, %v2223_v9  ;;  %v2235_v17 = vadd.f32 0.014752088, %v2234_v56 }
 0x31e   : > { %v2188_v51 = vadd.f32 0.18741608, %v2187_v7  ;;  %v6270_v45 = vmul.f32 0.70710677, %v6267_v54 }
 0x31f   : > { %v2200_v13 = vmul.f32 %v2199_v55, %v6235_v22  ;;  %2818 = vxpose.xlu0.b32.cont [2/4] (short) (narrow) %v2696_v61, 8  ;;  %v2225_v11 = vmul.f32 %v2224_v44, %v2220_v38  ;;  %v2236_v12 = vmul.f32 %v2235_v17, %v2220_v38 }
 0x320   : > { %v2259_v6 = vmul.f32 %v6270_v45, %v6270_v45  ;;  %v2189_v62 = vmul.f32 %v2188_v51, %v6235_v22 }
 0x321   : > { %v6259_v16 = vadd.f32 1.0, %v2200_v13  ;;  %v2226_v47 = vadd.f32 0.05243302, %v2225_v11  ;;  %v2237_v59 = vadd.f32 0.112945676, %v2236_v12 }
 0x322   : > { %v6283_v20 = vmin.f32 %v2259_v6, 16.0  ;;  %v2190_v26 = vadd.f32 1.1283791, %v2189_v62 }
 0x323   : > { %4594 = vrcp.f32 %v6259_v16  ;;  %v2238_v49 = vmul.f32 %v2237_v59, %v2220_v38  ;;  %v1142_v48 = vpop.f32.mrf.mxu3  ;;  %v2227_v21 = vmul.f32 %v2226_v47, %v2220_v38  ;;  %vm2207_vm1 = vweird.f32 %v6259_v16 }
 0x324   : > { %v6273_v5 = vadd.f32 %v6222_v39, %v1142_v48  ;;  %v2211_v35 = vand.u32 2147483647, %v6259_v16  ;;  %v2213_v63 = vand.u32 2147483648, %v6259_v16  ;;  %v2261_v52 = vmul.f32 2.1237322e-06, %v6283_v20 }
 0x325   : > { %v2239_v57 = vadd.f32 0.4994258, %v2238_v49  ;;  %v2272_v22 = vmul.f32 3.8918573e-05, %v6283_v20 }
 0x326   : > { %v6279_v28 = vmul.f32 0.70710677, %v6273_v5  ;;  %v2262_v43 = vadd.f32 0.00028619796, %v2261_v52  ;;  %v2214_v32 = vor.u32 1.1754944e-38, %v2213_v63  ;;  %vm2212_vm4 = vcmp.eq.f32.partialorder %v2211_v35, 8.507059e+37 }
 0x327   : > { %v2240_v46 = vmul.f32 %v2239_v57, %v2220_v38  ;;  %v2273_v24 = vadd.f32 0.001143296, %v2272_v22 }
 0x328   : > { %v2299_v25 = vmul.f32 %v6279_v28, %v6279_v28  ;;  %v2263_v58 = vmul.f32 %v2262_v43, %v6283_v20 }
 0x329   : > { %v4595_v29 = vpop.eup %4594  ;;  %v2241_v55 = vadd.f32 1.0, %v2240_v46  ;;  %v2274_v9 = vmul.f32 %v2273_v24, %v6283_v20 }
 0x32a   : > { %v2698_v50 = vpop.f32.mrf.mxu1  ;;  %v2203_v36 = vmul.f32 %v4595_v29, %v6259_v16  ;;  %vm2208_vm2 = vweird.f32 %v4595_v29  ;;  %v6291_v60 = vmin.f32 %v2299_v25, 16.0  ;;  %v2264_v23 = vadd.f32 0.0036580483, %v2263_v58 }
 0x32b   : > { %v2699_v1 = vadd.f32 %v6132_v31, %v2698_v50  ;;  %vm6293_vm3 = vmor %vm2207_vm1, %vm2208_vm2  ;;  %4596 = vrcp.f32 %v2241_v55  ;;  %v2191_v50 = vmul.f32 %v2190_v26, %v6231_v0  ;;  %vm2247_vm5 = vweird.f32 %v2241_v55 }
 0x32c   : > { %v2204_v15 = vsub.f32 1.0, %v2203_v36  ;;  %v2312_v16 = vmul.f32 3.8918573e-05, %v6291_v60  ;;  %v2253_v47 = vand.u32 2147483648, %v2241_v55  ;;  %v2301_v6 = vmul.f32 2.1237322e-06, %v6291_v60 }
 0x32d   : > { %2819 = vxpose.xlu0.b32.cont [3/4] (short) (narrow) %v2699_v1, 8  ;;  %v2275_v1 = vadd.f32 0.014752088, %v2274_v9 }
 0x32e   : > { %v2205_v34 = vmul.f32 %v4595_v29, %v2204_v15  ;;  %v2313_v56 = vadd.f32 0.001143296, %v2312_v16  ;;  %v2254_v62 = vor.u32 1.1754944e-38, %v2253_v47 }
 0x32f   : > { %v2276_v59 = vmul.f32 %v2275_v1, %v6283_v20 }
 0x330   : > { %v2206_v13 = vadd.f32 %v4595_v29, %v2205_v34  ;;  %v2314_v7 = vmul.f32 %v2313_v56, %v6291_v60 }
 0x331   : > { %v4597_v17 = vpop.eup %4596  ;;  %v2277_v0 = vadd.f32 0.112945676, %v2276_v59  ;;  %v1179_v59 = vmul.f32 0.5, %v6225_v30 }
 0x332   : > { %v2700_v42 = vpop.f32.mrf.mxu1  ;;  %v2210_v41 = vsel %vm6293_vm3, %v4595_v29, %v2206_v13  ;;  %v2243_v12 = vmul.f32 %v4597_v17, %v2241_v55  ;;  %v2265_v29 = vmul.f32 %v2264_v23, %v6283_v20  ;;  %v2315_v15 = vadd.f32 0.014752088, %v2314_v7 }
 0x333   : > { %v2701_v53 = vadd.f32 %v6132_v31, %v2700_v42  ;;  %v2228_v31 = vadd.f32 0.18741608, %v2227_v21  ;;  %v2215_v36 = vsel %vm2212_vm4, %v2214_v32, %v2210_v41  ;;  %vm2248_vm6 = vweird.f32 %v4597_v17 }
 0x334   : > { %v2244_v51 = vsub.f32 1.0, %v2243_v12  ;;  %v2266_v49 = vadd.f32 0.05243302, %v2265_v29  ;;  %v2316_v21 = vmul.f32 %v2315_v15, %v6291_v60  ;;  %v2216_v57 = vmul.f32 %v2215_v36, %v2191_v50  ;;  %vm6313_vm7 = vmor %vm2247_vm5, %vm2248_vm6 }
 0x335   : > { %2820 = vxpose.xlu0.b32.end [4/4] (short) (narrow) %v2701_v53, 8  ;;  %v2229_v18 = vmul.f32 %v2228_v31, %v2220_v38  ;;  %v2251_v38 = vand.u32 2147483647, %v2241_v55  ;;  %v2278_v46 = vmul.f32 %v2277_v0, %v6283_v20  ;;  %v2302_v13 = vadd.f32 0.00028619796, %v2301_v6 }
 0x336   : > { %v2245_v42 = vmul.f32 %v4597_v17, %v2244_v51  ;;  %v2267_v34 = vmul.f32 %v2266_v49, %v6283_v20  ;;  %v2317_v25 = vadd.f32 0.112945676, %v2316_v21  ;;  %v4211_v58 = vclamps-f32 %v2216_v57, 1.0 }
 0x337   : > { %v2230_v11 = vadd.f32 1.1283791, %v2229_v18  ;;  %vm2252_vm8 = vcmp.eq.f32.partialorder %v2251_v38, 8.507059e+37  ;;  %v2279_v22 = vadd.f32 0.4994258, %v2278_v46  ;;  %v2303_v32 = vmul.f32 %v2302_v13, %v6291_v60 }
 0x338   : > { %v2246_v31 = vadd.f32 %v4597_v17, %v2245_v42  ;;  %v2318_v55 = vmul.f32 %v2317_v25, %v6291_v60  ;;  %v2268_v43 = vadd.f32 0.18741608, %v2267_v34  ;;  %v2523_v15 = vadd.f32 1.0, %v4211_v58 }
 0x339   : > { %v2231_v63 = vmul.f32 %v2230_v11, %v6253_v10  ;;  %v2280_v16 = vmul.f32 %v2279_v22, %v6283_v20  ;;  %v2304_v56 = vadd.f32 0.0036580483, %v2303_v32  ;;  %v1180_v34 = vmul.f32 0.5, %v6249_v37 }
 0x33a   : > { %v2250_v26 = vsel %vm6313_vm7, %v4597_v17, %v2246_v31  ;;  %v2319_v41 = vadd.f32 0.4994258, %v2318_v55  ;;  %v2269_v1 = vmul.f32 %v2268_v43, %v6283_v20  ;;  %v2555_v46 = vmul.f32 %v2523_v15, %v1179_v59 }
 0x33b   : > { %v2255_v10 = vsel %vm2252_vm8, %v2254_v62, %v2250_v26  ;;  %v2305_v7 = vmul.f32 %v2304_v56, %v6291_v60 }
 0x33c   : > { %v2256_v9 = vmul.f32 %v2255_v10, %v2231_v63  ;;  %v2320_v17 = vmul.f32 %v2319_v41, %v6291_v60  ;;  %v2270_v0 = vadd.f32 1.1283791, %v2269_v1 }
 0x33d   : > { %v1145_v44 = vpop.f32.mrf.mxu3  ;;  %v2306_v29 = vadd.f32 0.05243302, %v2305_v7 }
 0x33e   : > { %v6307_v48 = vadd.f32 %v6222_v39, %v1145_v44  ;;  %v2281_v44 = vadd.f32 1.0, %v2280_v16  ;;  %v4212_v12 = vclamps-f32 %v2256_v9, 1.0  ;;  %v2321_v38 = vadd.f32 1.0, %v2320_v17 }
 0x33f   : > { %v2307_v21 = vmul.f32 %v2306_v29, %v6291_v60  ;;  %v2271_v31 = vmul.f32 %v2270_v0, %v6270_v45 }
 0x340   : > { %v6319_v35 = vmul.f32 0.70710677, %v6307_v48  ;;  %4598 = vrcp.f32 %v2281_v44  ;;  %v2293_v20 = vand.u32 2147483648, %v2281_v44  ;;  %v2524_v6 = vadd.f32 1.0, %v4212_v12 }
 0x341   : > { %4600 = vrcp.f32 %v2321_v38  ;;  %v2308_v53 = vadd.f32 0.18741608, %v2307_v21  ;;  %vm2287_vm10 = vweird.f32 %v2281_v44  ;;  %v2291_v55 = vand.u32 2147483647, %v2281_v44 }
 0x342   : > { %v2339_v61 = vmul.f32 %v6319_v35, %v6319_v35  ;;  %v2556_v43 = vmul.f32 %v2524_v6, %v1180_v34  ;;  %vm2327_vm9 = vweird.f32 %v2321_v38  ;;  %v2333_v56 = vand.u32 2147483648, %v2321_v38 }
 0x343   : > { %vm2292_vm15 = vcmp.eq.f32.partialorder %v2291_v55, 8.507059e+37  ;;  %v1182_v55 = vmul.f32 0.5, %v6273_v5 }
 0x344   : > { %v6332_v18 = vmin.f32 %v2339_v61, 16.0  ;;  %v2294_v61 = vor.u32 1.1754944e-38, %v2293_v20  ;;  %v2575_v12 = vpack.c.bf16 %v2556_v43, %v2555_v46  ;;  %v2334_v0 = vor.u32 1.1754944e-38, %v2333_v56 }
 0x345   : > { %v1147_v52 = vpop.f32.mrf.mxu3 }
 0x346   : > { %v6329_v24 = vadd.f32 %v6222_v39, %v1147_v52  ;;  %v2341_v50 = vmul.f32 2.1237322e-06, %v6332_v18  ;;  %v2352_v36 = vmul.f32 3.8918573e-05, %v6332_v18  ;;  %v4599_v30 = vpop.eup %4598  ;;  %v2309_v52 = vmul.f32 %v2308_v53, %v6291_v60  ;;  %4247 = vmatmul.msk.bf16.gmra.mxu2 %vm2615_vm11, %v2575_v12 }
 0x347   : > { %v2283_v13 = vmul.f32 %v4599_v30, %v2281_v44  ;;  %v4601_v37 = vpop.eup %4600  ;;  %vm2288_vm12 = vweird.f32 %v4599_v30  ;;  %v2331_v60 = vand.u32 2147483647, %v2321_v38 }
 0x348   : > { %v6335_v23 = vmul.f32 0.70710677, %v6329_v24  ;;  %v2342_v47 = vadd.f32 0.00028619796, %v2341_v50  ;;  %v2353_v51 = vadd.f32 0.001143296, %v2352_v36  ;;  %v2323_v16 = vmul.f32 %v4601_v37, %v2321_v38  ;;  %vm6358_vm13 = vmor %vm2287_vm10, %vm2288_vm12 }
 0x349   : > { %v2284_v32 = vsub.f32 1.0, %v2283_v13  ;;  %v2310_v9 = vadd.f32 1.1283791, %v2309_v52  ;;  %vm2328_vm14 = vweird.f32 %v4601_v37  ;;  %vm2332_vm2 = vcmp.eq.f32.partialorder %v2331_v60, 8.507059e+37 }
 0x34a   : > { %v2379_v11 = vmul.f32 %v6335_v23, %v6335_v23  ;;  %v2343_v57 = vmul.f32 %v2342_v47, %v6332_v18  ;;  %v2354_v42 = vmul.f32 %v2353_v51, %v6332_v18  ;;  %v2324_v50 = vsub.f32 1.0, %v2323_v16  ;;  %vm6367_vm1 = vmor %vm2327_vm9, %vm2328_vm14 }
 0x34b   : > { %v2285_v58 = vmul.f32 %v4599_v30, %v2284_v32  ;;  %v1181_v52 = vmul.f32 0.5, %v6267_v54 }
 0x34c   : > { %v6345_v49 = vmin.f32 %v2379_v11, 16.0  ;;  %v2344_v25 = vadd.f32 0.0036580483, %v2343_v57  ;;  %v2355_v63 = vadd.f32 0.014752088, %v2354_v42  ;;  %v2325_v29 = vmul.f32 %v4601_v37, %v2324_v50 }
 0x34d   : > { %v2286_v7 = vadd.f32 %v4599_v30, %v2285_v58  ;;  %v2311_v57 = vmul.f32 %v2310_v9, %v6279_v28 }
 0x34e   : > { %v2392_v62 = vmul.f32 3.8918573e-05, %v6345_v49  ;;  %v2356_v26 = vmul.f32 %v2355_v63, %v6332_v18  ;;  %v2345_v41 = vmul.f32 %v2344_v25, %v6332_v18  ;;  %v2381_v1 = vmul.f32 2.1237322e-06, %v6345_v49 }
 0x34f   : > { %v2290_v44 = vsel %vm6358_vm13, %v4599_v30, %v2286_v7  ;;  %v2326_v42 = vadd.f32 %v4601_v37, %v2325_v29 }
 0x350   : > { %v2393_v22 = vadd.f32 0.001143296, %v2392_v62  ;;  %v2357_v45 = vadd.f32 0.112945676, %v2356_v26  ;;  %v2346_v47 = vadd.f32 0.05243302, %v2345_v41  ;;  %v2295_v20 = vsel %vm2292_vm15, %v2294_v61, %v2290_v44 }
 0x351   : > { %v2382_v15 = vadd.f32 0.00028619796, %v2381_v1  ;;  %v2296_v6 = vmul.f32 %v2295_v20, %v2271_v31  ;;  %v2330_v38 = vsel %vm6367_vm1, %v4601_v37, %v2326_v42 }
 0x352   : > { %v2394_v10 = vmul.f32 %v2393_v22, %v6345_v49  ;;  %v2358_v36 = vmul.f32 %v2357_v45, %v6332_v18  ;;  %v2347_v62 = vmul.f32 %v2346_v47, %v6332_v18  ;;  %v2335_v63 = vsel %vm2332_vm2, %v2334_v0, %v2330_v38 }
 0x353   : > { %v2383_v53 = vmul.f32 %v2382_v15, %v6345_v49  ;;  %v4213_v25 = vclamps-f32 %v2296_v6, 1.0  ;;  %v2336_v22 = vmul.f32 %v2335_v63, %v2311_v57 }
 0x354   : > { %v2395_v11 = vadd.f32 0.014752088, %v2394_v10  ;;  %v2359_v59 = vadd.f32 0.4994258, %v2358_v36  ;;  %v2348_v43 = vadd.f32 0.18741608, %v2347_v62 }
 0x355   : > { %v2384_v13 = vadd.f32 0.0036580483, %v2383_v53  ;;  %v2525_v28 = vadd.f32 1.0, %v4213_v25  ;;  %v4214_v26 = vclamps-f32 %v2336_v22, 1.0 }
 0x356   : > { %v2396_v21 = vmul.f32 %v2395_v11, %v6345_v49  ;;  %v2360_v34 = vmul.f32 %v2359_v59, %v6332_v18  ;;  %v2349_v5 = vmul.f32 %v2348_v43, %v6332_v18 }
 0x357   : > { %v2385_v31 = vmul.f32 %v2384_v13, %v6345_v49  ;;  %v2557_v16 = vmul.f32 %v2525_v28, %v1181_v52  ;;  %v2526_v41 = vadd.f32 1.0, %v4214_v26 }
 0x358   : > { %v2361_v30 = vadd.f32 1.0, %v2360_v34  ;;  %v2397_v46 = vadd.f32 0.112945676, %v2396_v21  ;;  %v2350_v59 = vadd.f32 1.1283791, %v2349_v5 }
 0x359   : > { %v2386_v10 = vadd.f32 0.05243302, %v2385_v31  ;;  %v2558_v9 = vmul.f32 %v2526_v41, %v1182_v55 }
 0x35a   : > { %4602 = vrcp.f32 %v2361_v30  ;;  %v2398_v37 = vmul.f32 %v2397_v46, %v6345_v49  ;;  %v2373_v36 = vand.u32 2147483648, %v2361_v30  ;;  %vm2367_vm3 = vweird.f32 %v2361_v30 }
 0x35b   : > { %v2387_v50 = vmul.f32 %v2386_v10, %v6345_v49  ;;  %v2576_v11 = vpack.c.bf16 %v2558_v9, %v2557_v16  ;;  %v2371_v29 = vand.u32 2147483647, %v2361_v30  ;;  %v2351_v34 = vmul.f32 %v2350_v59, %v6319_v35 }
 0x35c   : > { %v2399_v45 = vadd.f32 0.4994258, %v2398_v37  ;;  %v2374_v0 = vor.u32 1.1754944e-38, %v2373_v36 }
 0x35d   : > { %v2388_v15 = vadd.f32 0.18741608, %v2387_v50  ;;  %4248 = vmatmul.msk.bf16.gmra.mxu2 %vm2615_vm11, %v2576_v11  ;;  %vm2372_vm6 = vcmp.eq.f32.partialorder %v2371_v29, 8.507059e+37 }
 0x35e   : > { %v2400_v60 = vmul.f32 %v2399_v45, %v6345_v49 }
 0x35f   : > { %v2389_v38 = vmul.f32 %v2388_v15, %v6345_v49 }
 0x360   : > { %v4603_v58 = vpop.eup %4602  ;;  %v2401_v1 = vadd.f32 1.0, %v2400_v60 }
 0x361   : > { %v1150_v61 = vpop.f32.mrf.mxu3  ;;  %v2363_v17 = vmul.f32 %v4603_v58, %v2361_v30  ;;  %vm2368_vm4 = vweird.f32 %v4603_v58  ;;  %v2390_v31 = vadd.f32 1.1283791, %v2389_v38 }
 0x362   : > { %v6384_v32 = vadd.f32 %v6222_v39, %v1150_v61  ;;  %4604 = vrcp.f32 %v2401_v1  ;;  %vm2369_vm5 = vmor %vm2367_vm3, %vm2368_vm4  ;;  %v2413_v13 = vand.u32 2147483648, %v2401_v1  ;;  %vm2407_vm7 = vweird.f32 %v2401_v1 }
 0x363   : > { %v2364_v12 = vsub.f32 1.0, %v2363_v17  ;;  %v2411_v35 = vand.u32 2147483647, %v2401_v1  ;;  %v2391_v5 = vmul.f32 %v2390_v31, %v6335_v23 }
 0x364   : > { %v6387_v54 = vmul.f32 0.70710677, %v6384_v32  ;;  %v2414_v10 = vor.u32 1.1754944e-38, %v2413_v13 }
 0x365   : > { %v2365_v18 = vmul.f32 %v4603_v58, %v2364_v12  ;;  %vm2412_vm12 = vcmp.eq.f32.partialorder %v2411_v35, 8.507059e+37 }
 0x366   : > { %v2419_v56 = vmul.f32 %v6387_v54, %v6387_v54 }
 0x367   : > { %v2366_v20 = vadd.f32 %v4603_v58, %v2365_v18  ;;  %v1183_v18 = vmul.f32 0.5, %v6307_v48 }
 0x368   : > { %v6394_v7 = vmin.f32 %v2419_v56, 16.0  ;;  %v4605_v46 = vpop.eup %4604  ;;  %v6418_v56 = vpop.f32.mrf.mxu1 }
 0x369   : > { %v1152_v47 = vpop.f32.mrf.mxu3  ;;  %v2370_v53 = vsel %vm2369_vm5, %v4603_v58, %v2366_v20  ;;  %v2403_v63 = vmul.f32 %v4605_v46, %v2401_v1  ;;  %vm2408_vm8 = vweird.f32 %v4605_v46 }
 0x36a   : > { %v2421_v44 = vmul.f32 2.1237322e-06, %v6394_v7  ;;  %v2432_v51 = vmul.f32 3.8918573e-05, %v6394_v7  ;;  %v6400_v21 = vadd.f32 %v6222_v39, %v1152_v47  ;;  %v2375_v25 = vsel %vm2372_vm6, %v2374_v0, %v2370_v53  ;;  %vm2409_vm10 = vmor %vm2407_vm7, %vm2408_vm8 }
 0x36b   : > { %v2376_v55 = vmul.f32 %v2375_v25, %v2351_v34  ;;  %v2404_v49 = vsub.f32 1.0, %v2403_v63  ;;  %v1184_v0 = vmul.f32 0.5, %v6329_v24 }
 0x36c   : > { %v2422_v57 = vadd.f32 0.00028619796, %v2421_v44  ;;  %v2433_v42 = vadd.f32 0.001143296, %v2432_v51  ;;  %v6404_v6 = vmul.f32 0.70710677, %v6400_v21 }
 0x36d   : > { %v2405_v37 = vmul.f32 %v4605_v46, %v2404_v49  ;;  %v4215_v9 = vclamps-f32 %v2376_v55, 1.0 }
 0x36e   : > { %v2423_v62 = vmul.f32 %v2422_v57, %v6394_v7  ;;  %v2434_v30 = vmul.f32 %v2433_v42, %v6394_v7  ;;  %v2459_v39 = vmul.f32 %v6404_v6, %v6404_v6 }
 0x36f   : > { %v2406_v60 = vadd.f32 %v4605_v46, %v2405_v37  ;;  %v2527_v15 = vadd.f32 1.0, %v4215_v9 }
 0x370   : > { %v2424_v52 = vadd.f32 0.0036580483, %v2423_v62  ;;  %v2435_v22 = vadd.f32 0.014752088, %v2434_v30  ;;  %v6411_v28 = vmin.f32 %v2459_v39, 16.0  ;;  %v6430_v25 = vpop.f32.mrf.mxu1 }
 0x371   : > { %v2410_v1 = vsel %vm2409_vm10, %v4605_v46, %v2406_v60  ;;  %v2559_v38 = vmul.f32 %v2527_v15, %v1183_v18 }
 0x372   : > { %v2436_v61 = vmul.f32 %v2435_v22, %v6394_v7  ;;  %v2461_v26 = vmul.f32 2.1237322e-06, %v6411_v28  ;;  %v2472_v43 = vmul.f32 3.8918573e-05, %v6411_v28  ;;  %v2425_v16 = vmul.f32 %v2424_v52, %v6394_v7 }
 0x373   : > { %v2415_v12 = vsel %vm2412_vm12, %v2414_v10, %v2410_v1 }
 0x374   : > { %v2437_v41 = vadd.f32 0.112945676, %v2436_v61  ;;  %v2462_v45 = vadd.f32 0.00028619796, %v2461_v26  ;;  %v2473_v58 = vadd.f32 0.001143296, %v2472_v43  ;;  %v2416_v23 = vmul.f32 %v2415_v12, %v2391_v5 }
 0x375   : > { %v2426_v11 = vadd.f32 0.05243302, %v2425_v16 }
 0x376   : > { %v2438_v17 = vmul.f32 %v2437_v41, %v6394_v7  ;;  %v2463_v50 = vmul.f32 %v2462_v45, %v6411_v28  ;;  %v2474_v36 = vmul.f32 %v2473_v58, %v6411_v28  ;;  %v4216_v20 = vclamps-f32 %v2416_v23, 1.0 }
 0x377   : > { %v2427_v42 = vmul.f32 %v2426_v11, %v6394_v7 }
 0x378   : > { %v2439_v29 = vadd.f32 0.4994258, %v2438_v17  ;;  %v2464_v47 = vadd.f32 0.0036580483, %v2463_v50  ;;  %v2475_v59 = vadd.f32 0.014752088, %v2474_v36  ;;  %v2708_v9 = vpop.f32.mrf.mxu1 }
 0x379   : > { %v2528_v62 = vadd.f32 1.0, %v4216_v20  ;;  %v2428_v39 = vadd.f32 0.18741608, %v2427_v42 }
 0x37a   : > { %v2440_v44 = vmul.f32 %v2439_v29, %v6394_v7  ;;  %v2476_v51 = vmul.f32 %v2475_v59, %v6411_v28  ;;  %v2465_v57 = vmul.f32 %v2464_v47, %v6411_v28 }
 0x37b   : > { %v2560_v30 = vmul.f32 %v2528_v62, %v1184_v0  ;;  %v2429_v61 = vmul.f32 %v2428_v39, %v6394_v7 }
 0x37c   : > { %v2441_v34 = vadd.f32 1.0, %v2440_v44  ;;  %v2477_v53 = vadd.f32 0.112945676, %v2476_v51  ;;  %v2466_v48 = vadd.f32 0.05243302, %v2465_v57  ;;  %v1185_v57 = vmul.f32 0.5, %v6384_v32 }
 0x37d   : > { %v2577_v52 = vpack.c.bf16 %v2560_v30, %v2559_v38  ;;  %v2430_v45 = vadd.f32 1.1283791, %v2429_v61 }
 0x37e   : > { %4606 = vrcp.f32 %v2441_v34  ;;  %v2478_v46 = vmul.f32 %v2477_v53, %v6411_v28  ;;  %v2467_v35 = vmul.f32 %v2466_v48, %v6411_v28  ;;  %vm2447_vm9 = vweird.f32 %v2441_v34 }
 0x37f   : > { %4249 = vmatmul.msk.bf16.gmra.mxu2 %vm2615_vm11, %v2577_v52  ;;  %v2451_v43 = vand.u32 2147483647, %v2441_v34  ;;  %v2453_v37 = vand.u32 2147483648, %v2441_v34  ;;  %v2431_v17 = vmul.f32 %v2430_v45, %v6387_v54  ;;  %v1186_v53 = vmul.f32 0.5, %v6400_v21 }
 0x380   : > { %v2479_v13 = vadd.f32 0.4994258, %v2478_v46  ;;  %v2468_v41 = vadd.f32 0.18741608, %v2467_v35  ;;  %v2710_v51 = vpop.f32.mrf.mxu1 }
 0x381   : > { %v2454_v5 = vor.u32 1.1754944e-38, %v2453_v37  ;;  %vm2452_vm15 = vcmp.eq.f32.partialorder %v2451_v43, 8.507059e+37  ;;  %v2728_v43 = vpop.f32.mrf.mxu2 }
 0x382   : > { %v2769_v63 = vpop.trf.xlu2  ;;  %v2480_v22 = vmul.f32 %v2479_v13, %v6411_v28  ;;  %v2469_v7 = vmul.f32 %v2468_v41, %v6411_v28 }
 0x383   : > { %v6433_v24 = vadd.f32 %v4851_v3, %v2769_v63 }
 0x384   : > { %v4607_v49 = vpop.eup %4606  ;;  %v2481_v3 = vadd.f32 1.0, %v2480_v22  ;;  %v2470_v12 = vadd.f32 1.1283791, %v2469_v7 }
 0x385   : > { %v3017_v55 = vsel %vm512_vm0, %v6433_v24, 0.0  ;;  %v3049_v31 = vmul.f32 %v6433_v24, %v6433_v24  ;;  %v2443_v26 = vmul.f32 %v4607_v49, %v2441_v34  ;;  %vm2448_vm13 = vweird.f32 %v4607_v49 }
 0x386   : > { %3018 = vadd.xlane.f32.xlu1 %v3017_v55  ;;  %4608 = vrcp.f32 %v2481_v3  ;;  %vm2449_vm14 = vmor %vm2447_vm9, %vm2448_vm13  ;;  %vm2487_vm1 = vweird.f32 %v2481_v3  ;;  %v2493_v29 = vand.u32 2147483648, %v2481_v3  ;;  %v2491_v18 = vand.u32 2147483647, %v2481_v3 }
 0x387   : > { %v3057_v10 = vsel %vm512_vm0, %v3049_v31, 0.0  ;;  %v2444_v16 = vsub.f32 1.0, %v2443_v26  ;;  %v2471_v28 = vmul.f32 %v2470_v12, %v6404_v6 }
 0x388   : > { %3058 = vadd.xlane.f32.xlu2 %v3057_v10  ;;  %v2494_v23 = vor.u32 1.1754944e-38, %v2493_v29  ;;  %vm2492_vm4 = vcmp.eq.f32.partialorder %v2491_v18, 8.507059e+37  ;;  %v2713_v63 = vpop.f32.mrf.mxu1 }
 0x389   : > { %v2445_v58 = vmul.f32 %v4607_v49, %v2444_v16  ;;  %v2730_v10 = vpop.f32.mrf.mxu2 }
 0x38b   : > { %v2446_v60 = vadd.f32 %v4607_v49, %v2445_v58 }
 0x38c   : > { %v4609_v50 = vpop.eup %4608 }
 0x38d   : > { %v2450_v36 = vsel %vm2449_vm14, %v4607_v49, %v2446_v60  ;;  %v2483_v11 = vmul.f32 %v4609_v50, %v2481_v3  ;;  %vm2488_vm2 = vweird.f32 %v4609_v50 }
 0x38e   : > { %v2455_v1 = vsel %vm2452_vm15, %v2454_v5, %v2450_v36  ;;  %vm2489_vm3 = vmor %vm2487_vm1, %vm2488_vm2 }
 0x38f   : > { %v2456_v47 = vmul.f32 %v2455_v1, %v2431_v17  ;;  %v2484_v59 = vsub.f32 1.0, %v2483_v11 }
 0x390   : > { %v2715_v21 = vpop.f32.mrf.mxu1 }
 0x391   : > { %v2485_v15 = vmul.f32 %v4609_v50, %v2484_v59  ;;  %v4217_v44 = vclamps-f32 %v2456_v47, 1.0 }
 0x393   : > { %v2486_v0 = vadd.f32 %v4609_v50, %v2485_v15  ;;  %v2529_v42 = vadd.f32 1.0, %v4217_v44 }
 0x395   : > { %v2490_v54 = vsel %vm2489_vm3, %v4609_v50, %v2486_v0  ;;  %v2561_v62 = vmul.f32 %v2529_v42, %v1185_v57  ;;  %v4364_v42 = vld [vmem:[%s7118_s9 + $0x8] sm:$0xff] }
 0x396   : > { %v2495_v20 = vsel %vm2492_vm4, %v2494_v23, %v2490_v54  ;;  %3275 = vmatpush.bf16.msrb.mxu2 %v4364_v42 }
 0x397   : > { %v2496_v34 = vmul.f32 %v2495_v20, %v2471_v28 }
 0x398   : > { %v2718_v22 = vpop.f32.mrf.mxu1 }
 0x399   : > { %v4218_v38 = vclamps-f32 %v2496_v34, 1.0 }
 0x39b   : > { %v2530_v30 = vadd.f32 1.0, %v4218_v38 }
 0x39d   : > { %v2562_v39 = vmul.f32 %v2530_v30, %v1186_v53 }
 0x39e   : > { %v2801_v48 = vpop.trf.xlu1 }
 0x39f   : > { %v6450_v46 = vadd.f32 %v4849_v2, %v2801_v48  ;;  %v2578_v13 = vpack.c.bf16 %v2562_v39, %v2561_v62  ;;  %v6461_v2 = vld [vmem:[%s7115_s6] ss:$0 sm:$0xff] }
 0x3a0   : > { %v2704_v35 = vadd.f32 %v6461_v2, %v6418_v56  ;;  %v2706_v55 = vadd.f32 %v6461_v2, %v6430_v25  ;;  %v2720_v31 = vpop.f32.mrf.mxu1  ;;  %v2709_v49 = vadd.f32 %v6461_v2, %v2708_v9  ;;  %v2711_v61 = vadd.f32 %v6461_v2, %v2710_v51  ;;  %v4363_v48 = vld [vmem:[%s7118_s9] sm:$0xff] }
 0x3a1   : > { %v3050_v6 = vmul.f32 %v6450_v46, %v6450_v46  ;;  %v3020_v32 = vsel %vm512_vm0, %v6450_v46, 0.0  ;;  %4250 = vmatmul.msk.bf16.gmra.mxu2 %vm2615_vm11, %v2578_v13  ;;  %v2714_v25 = vadd.f32 %v6461_v2, %v2713_v63  ;;  %v2729_v16 = vadd.f32 %v6461_v2, %v2728_v43 }
 0x3a2   : > { %v2716_v45 = vadd.f32 %v6461_v2, %v2715_v21  ;;  %v2731_v58 = vadd.f32 %v6461_v2, %v2730_v10  ;;  %v2719_v9 = vadd.f32 %v6461_v2, %v2718_v22  ;;  %v2721_v60 = vadd.f32 %v6461_v2, %v2720_v31  ;;  %3276 = vmatpush.bf16.msrb.mxu2 %v4363_v48 }
 0x3a3   : > { %v3060_v52 = vsel %vm512_vm0, %v3050_v6, 0.0 }
 0x3a4   : > { %3061 = vadd.xlane.f32.xlu1 %v3060_v52 }
 0x3a6   : > { %3021 = vadd.xlane.f32.xlu0 %v3020_v32 }
 0x3a8   : > { %v2723_v26 = vpop.f32.mrf.mxu1 }
 0x3a9   : > { %v2724_v3 = vadd.f32 %v6461_v2, %v2723_v26 }
 0x3b0   : > { %v2725_v37 = vpop.f32.mrf.mxu1 }
 0x3b1   : > { %2849 = vxpose.xlu2.b32.start [1/4] (short) (narrow) %v2704_v35, 8  ;;  %v2726_v56 = vadd.f32 %v6461_v2, %v2725_v37 }
 0x3b9   : > { %2850 = vxpose.xlu2.b32.cont [2/4] (short) (narrow) %v2706_v55, 8 }
 0x3c1   : > { %2851 = vxpose.xlu2.b32.cont [3/4] (short) (narrow) %v2709_v49, 8  ;;  %v2833_v15 = vpop.trf.xlu0 }
 0x3c2   : > { %v6507_v10 = vadd.f32 %v4853_v4, %v2833_v15 }
 0x3c4   : > { %v3051_v4 = vmul.f32 %v6507_v10, %v6507_v10 }
 0x3c9   : > { %2852 = vxpose.xlu2.b32.end [4/4] (short) (narrow) %v2711_v61, 8  ;;  %v6473_v41 = vpop.f32.mrf.mxu2 }
 0x3cf   : > { %2913 = vxpose.xlu0.b32.start [1/4] (short) (narrow) %v2724_v3, 8  ;;  %v6503_v3 = vld [vmem:[%s7116_s7] ss:$0 sm:$0xff] }
 0x3d1   : > { %v6478_v5 = vpop.f32.mrf.mxu2 }
 0x3d7   : > { %2914 = vxpose.xlu0.b32.cont [2/4] (short) (narrow) %v2726_v56, 8 }
 0x3de   : > { %2881 = vxpose.xlu1.b32.start [1/4] (short) (narrow) %v2714_v25, 8 }
 0x3df   : > { %2915 = vxpose.xlu0.b32.cont [3/4] (short) (narrow) %v2729_v16, 8 }
 0x3e0   : > { %v6481_v7 = vpop.f32.mrf.mxu2 }
 0x3e6   : > { %2882 = vxpose.xlu1.b32.cont [2/4] (short) (narrow) %v2716_v45, 8  ;;  %v6513_v45 = vld [vmem:[%s7117_s8] ss:$0 sm:$0xff] }
 0x3e7   : > { %2916 = vxpose.xlu0.b32.end [4/4] (short) (narrow) %v2731_v58, 8 }
 0x3e8   : > { %v6483_v50 = vpop.f32.mrf.mxu2 }
 0x3ee   : > { %2883 = vxpose.xlu1.b32.cont [3/4] (short) (narrow) %v2719_v9, 8  ;;  %v3023_v9 = vsel %vm512_vm0, %v6507_v10, 0.0 }
 0x3f6   : > { %2884 = vxpose.xlu1.b32.end [4/4] (short) (narrow) %v2721_v60, 8 }
 0x3f9   : > { %v3019_v17 = vpop.xlane.xlu1 %3018 }
 0x3fa   : > { %v3041_v36 = vmul.f32 %v3019_v17, %v4900_v40 }
 0x3fb   : > { %v3059_v1 = vpop.xlane.xlu2 %3058 }
 0x3fc   : > { %v3089_v11 = vmul.f32 %v3041_v36, %v3041_v36  ;;  %v3081_v12 = vmul.f32 %v3059_v1, %v4900_v40  ;;  %v3105_v55 = vsub.f32 %v6433_v24, %v3041_v36  ;;  %v3063_v1 = vsel %vm512_vm0, %v3051_v4, 0.0 }
 0x3fe   : > { %v3097_v29 = vsub.f32 %v3081_v12, %v3089_v11 }
 0x400   : > { %v3113_v18 = vadd.f32 1e-05, %v3097_v29 }
 0x402   : > { %v2743_v47 = vpop.f32.mrf.mxu2  ;;  %4610 = vrsqrt.f32 %v3113_v18  ;;  %vm3127_vm6 = vweird.f32 %v3113_v18 }
 0x403   : > { %v2744_v59 = vadd.f32 %v6461_v2, %v2743_v47 }
 0x405   : > { %2977 = vxpose.xlu1.b32.start [1/4] (short) (narrow) %v2744_v59, 8 }
 0x408   : > { %v4611_v51 = vpop.eup %4610 }
 0x409   : > { %v3122_v0 = vmul.f32 %v4611_v51, %v3113_v18  ;;  %vm3128_vm5 = vweird.f32 %v4611_v51  ;;  %v2734_v18 = vadd.f32 %v6461_v2, %v6473_v41 }
 0x40a   : > { %v2745_v23 = vpop.f32.mrf.mxu2  ;;  %vm3129_vm7 = vmor %vm3127_vm6, %vm3128_vm5 }
 0x40b   : > { %v2746_v44 = vadd.f32 %v6461_v2, %v2745_v23  ;;  %v3123_v53 = vmul.f32 %v4611_v51, %v3122_v0 }
 0x40d   : > { %2978 = vxpose.xlu1.b32.cont [2/4] (short) (narrow) %v2746_v44, 8  ;;  %v3124_v30 = vmul.f32 0.5, %v3123_v53 }
 0x40f   : > { %v3125_v39 = vsub.f32 1.5, %v3124_v30 }
 0x411   : > { %v3126_v32 = vmul.f32 %v4611_v51, %v3125_v39 }
 0x413   : > { %v3130_v35 = vsel %vm3129_vm7, %v4611_v51, %v3126_v32 }
 0x414   : > { %v3201_v61 = vmul.f32 %v3130_v35, %v3105_v55 }
 0x416   : > { %v3213_v16 = vmul.f32 %v6503_v3, %v3201_v61 }
 0x417   : > { %v3062_v28 = vpop.xlane.xlu1 %3061 }
 0x418   : > { %v3082_v57 = vmul.f32 %v3062_v28, %v4900_v40  ;;  %v3225_v60 = vadd.f32 %v6513_v45, %v3213_v16  ;;  %v2736_v28 = vadd.f32 %v6461_v2, %v6478_v5 }
 0x419   : > { %v3022_v54 = vpop.xlane.xlu0 %3021 }
 0x41a   : > { %v3042_v20 = vmul.f32 %v3022_v54, %v4900_v40  ;;  %v2741_v54 = vadd.f32 %v6461_v2, %v6483_v50 }
 0x41c   : > { %v3090_v34 = vmul.f32 %v3042_v20, %v3042_v20  ;;  %v3106_v37 = vsub.f32 %v6450_v46, %v3042_v20 }
 0x41e   : > { %v3098_v38 = vsub.f32 %v3082_v57, %v3090_v34 }
 0x420   : > { %v3114_v62 = vadd.f32 1e-05, %v3098_v38  ;;  %v6564_v38 = vld [vmem:[%s7119_s10] ss:$0 sm:$0xff] }
 0x422   : > { %4612 = vrsqrt.f32 %v3114_v62  ;;  %vm3137_vm8 = vweird.f32 %v3114_v62 }
 0x424   : > { %v2748_v63 = vpop.f32.mrf.mxu2 }
 0x425   : > { %v2749_v13 = vadd.f32 %v6461_v2, %v2748_v63 }
 0x427   : > { %2979 = vxpose.xlu1.b32.cont [3/4] (short) (narrow) %v2749_v13, 8 }
 0x428   : > { %v4613_v6 = vpop.eup %4612 }
 0x429   : > { %v3132_v52 = vmul.f32 %v4613_v6, %v3114_v62  ;;  %vm3138_vm10 = vweird.f32 %v4613_v6 }
 0x42a   : > { %vm3139_vm12 = vmor %vm3137_vm8, %vm3138_vm10 }
 0x42b   : > { %v3133_v21 = vmul.f32 %v4613_v6, %v3132_v52 }
 0x42c   : > { %v2750_v31 = vpop.f32.mrf.mxu2 }
 0x42d   : > { %v3134_v22 = vmul.f32 0.5, %v3133_v21  ;;  %v2751_v26 = vadd.f32 %v6461_v2, %v2750_v31 }
 0x42f   : > { %v3135_v49 = vsub.f32 1.5, %v3134_v22  ;;  %2980 = vxpose.xlu1.b32.end [4/4] (short) (narrow) %v2751_v26, 8 }
 0x431   : > { %v3136_v43 = vmul.f32 %v4613_v6, %v3135_v49 }
 0x433   : > { %v3140_v56 = vsel %vm3139_vm12, %v4613_v6, %v3136_v43 }
 0x434   : > { %v3202_v25 = vmul.f32 %v3140_v56, %v3106_v37 }
 0x436   : > { %v3214_v58 = vmul.f32 %v6503_v3, %v3202_v25 }
 0x438   : > { %v3226_v17 = vadd.f32 %v6513_v45, %v3214_v58 }
 0x43a   : > { %v3233_v36 = vpack.c.bf16 %v3226_v17, %v3225_v60  ;;  %3024 = vadd.xlane.f32.xlu2 %v3023_v9 }
 0x43c   : > { %4259 = vmatmul.msk.bf16.vlgmr.msrb.gmra.mxu2 %vm512_vm0, %v3233_v36 }
 0x442   : > { %3064 = vadd.xlane.f32.xlu2 %v3063_v1 }
 0x44a   : > { %v2865_v11 = vpop.trf.xlu2 }
 0x44b   : > { %v6525_v12 = vadd.f32 %v4870_v14, %v2865_v11 }
 0x44d   : > { %v3026_v29 = vsel %vm512_vm0, %v6525_v12, 0.0  ;;  %v3052_v47 = vmul.f32 %v6525_v12, %v6525_v12 }
 0x44e   : > { %3027 = vadd.xlane.f32.xlu2 %v3026_v29 }
 0x44f   : > { %v3066_v59 = vsel %vm512_vm0, %v3052_v47, 0.0 }
 0x456   : > { %3067 = vadd.xlane.f32.xlu2 %v3066_v59 }
 0x473   : > { %v2929_v15 = vpop.trf.xlu0 }
 0x474   : > { %v6538_v14 = vadd.f32 %v4878_v19, %v2929_v15 }
 0x476   : > { %v3054_v0 = vmul.f32 %v6538_v14, %v6538_v14  ;;  %v3032_v19 = vsel %vm512_vm0, %v6538_v14, 0.0 }
 0x478   : > { %v3072_v41 = vsel %vm512_vm0, %v3054_v0, 0.0 }
 0x47f   : > { %2945 = vxpose.xlu2.b32.start [1/4] (short) (narrow) %v2734_v18, 8 }
 0x482   : > { %v2897_v23 = vpop.trf.xlu1 }
 0x483   : > { %v6535_v44 = vadd.f32 %v4893_v33, %v2897_v23  ;;  %v2739_v33 = vadd.f32 %v6461_v2, %v6481_v7 }
 0x485   : > { %v3029_v51 = vsel %vm512_vm0, %v6535_v44, 0.0 }
 0x486   : > { %3030 = vadd.xlane.f32.xlu0 %v3029_v51 }
 0x487   : > { %2946 = vxpose.xlu2.b32.cont [2/4] (short) (narrow) %v2736_v28, 8 }
 0x48e   : > { %3073 = vadd.xlane.f32.xlu0 %v3072_v41 }
 0x48f   : > { %2947 = vxpose.xlu2.b32.cont [3/4] (short) (narrow) %v2739_v33, 8  ;;  %3033 = vadd.xlane.f32.xlu1 %v3032_v19 }
 0x497   : > { %2948 = vxpose.xlu2.b32.end [4/4] (short) (narrow) %v2741_v54, 8 }
 0x4ad   : > { %v3025_v5 = vpop.xlane.xlu2 %3024 }
 0x4ae   : > { %v6554_v20 = vmul.f32 %v3025_v5, %v4900_v40 }
 0x4b0   : > { %v3091_v42 = vmul.f32 %v6554_v20, %v6554_v20 }
 0x4b5   : > { %v3065_v57 = vpop.xlane.xlu2 %3064 }
 0x4b6   : > { %v3083_v7 = vmul.f32 %v3065_v57, %v4900_v40 }
 0x4b8   : > { %v3099_v34 = vsub.f32 %v3083_v7, %v3091_v42 }
 0x4ba   : > { %v6559_v53 = vadd.f32 1e-05, %v3099_v34 }
 0x4bb   : > { %v2993_v2 = vpop.trf.xlu1 }
 0x4bc   : > { %v6567_v50 = vadd.f32 %v4912_v8, %v2993_v2  ;;  %4614 = vrsqrt.f32 %v6559_v53  ;;  %vm3147_vm13 = vweird.f32 %v6559_v53 }
 0x4be   : > { %v3038_v48 = vsel %vm512_vm0, %v6567_v50, 0.0  ;;  %v3056_v6 = vmul.f32 %v6567_v50, %v6567_v50 }
 0x4bf   : > { %v3278_v62 = vpop.f32.mrf.mxu2  ;;  %3039 = vadd.xlane.f32.xlu1 %v3038_v48 }
 0x4c0   : > { %v6571_v30 = vadd.f32 %v6564_v38, %v3278_v62  ;;  %v3078_v52 = vsel %vm512_vm0, %v3056_v6, 0.0 }
 0x4c1   : > { %v3028_v39 = vpop.xlane.xlu2 %3027 }
 0x4c2   : > { %v6576_v63 = vmul.f32 0.70710677, %v6571_v30  ;;  %v6582_v13 = vpop.eup %4614  ;;  %v6588_v21 = vmul.f32 %v3028_v39, %v4900_v40 }
 0x4c3   : > { %v3142_v49 = vmul.f32 %v6582_v13, %v6559_v53  ;;  %vm3148_vm9 = vweird.f32 %v6582_v13  ;;  %v4368_v53 = vld [vmem:[%s7120_s11 + $0x18] sm:$0xff] }
 0x4c4   : > { %v3314_v8 = vmul.f32 %v6576_v63, %v6576_v63  ;;  %v3092_v37 = vmul.f32 %v6588_v21, %v6588_v21  ;;  %vm3149_vm14 = vmor %vm3147_vm13, %vm3148_vm9  ;;  %3706 = vmatpush.bf16.msrb.mxu3 %v4368_v53 }
 0x4c5   : > { %v3143_v58 = vmul.f32 %v6582_v13, %v3142_v49  ;;  %v3107_v49 = vsub.f32 %v6507_v10, %v6554_v20 }
 0x4c6   : > { %v6584_v32 = vmin.f32 %v3314_v8, 16.0 }
 0x4c7   : > { %v3280_v35 = vpop.f32.mrf.mxu2  ;;  %3079 = vadd.xlane.f32.xlu1 %v3078_v52  ;;  %v3144_v29 = vmul.f32 0.5, %v3143_v58 }
 0x4c8   : > { %v3316_v22 = vmul.f32 2.1237322e-06, %v6584_v32  ;;  %v3327_v55 = vmul.f32 3.8918573e-05, %v6584_v32  ;;  %v6593_v31 = vadd.f32 %v6564_v38, %v3280_v35 }
 0x4c9   : > { %v3068_v61 = vpop.xlane.xlu2 %3067  ;;  %v3145_v0 = vsub.f32 1.5, %v3144_v29 }
 0x4ca   : > { %v3317_v26 = vadd.f32 0.00028619796, %v3316_v22  ;;  %v3328_v43 = vadd.f32 0.001143296, %v3327_v55  ;;  %v3084_v56 = vmul.f32 %v3068_v61, %v4900_v40  ;;  %v6601_v25 = vmul.f32 0.70710677, %v6593_v31 }
 0x4cb   : > { %v3146_v2 = vmul.f32 %v6582_v13, %v3145_v0 }
 0x4cc   : > { %v3329_v16 = vmul.f32 %v3328_v43, %v6584_v32  ;;  %v3100_v9 = vsub.f32 %v3084_v56, %v3092_v37  ;;  %v3354_v60 = vmul.f32 %v6601_v25, %v6601_v25  ;;  %v3318_v17 = vmul.f32 %v3317_v26, %v6584_v32 }
 0x4cd   : > { %v3150_v22 = vsel %vm3149_vm14, %v6582_v13, %v3146_v2  ;;  %v4367_v13 = vld [vmem:[%s7120_s11 + $0x10] sm:$0xff] }
 0x4ce   : > { %v3330_v36 = vadd.f32 0.014752088, %v3329_v16  ;;  %v3116_v4 = vadd.f32 1e-05, %v3100_v9  ;;  %v6608_v1 = vmin.f32 %v3354_v60, 16.0  ;;  %v3203_v16 = vmul.f32 %v3150_v22, %v3107_v49  ;;  %3707 = vmatpush.bf16.msrb.mxu3 %v4367_v13 }
 0x4cf   : > { %v3319_v18 = vadd.f32 0.0036580483, %v3318_v17  ;;  %v3108_v9 = vsub.f32 %v6525_v12, %v6588_v21 }
 0x4d0   : > { %v3331_v11 = vmul.f32 %v3330_v36, %v6584_v32  ;;  %4616 = vrsqrt.f32 %v3116_v4  ;;  %v3356_v47 = vmul.f32 2.1237322e-06, %v6608_v1  ;;  %v3367_v59 = vmul.f32 3.8918573e-05, %v6608_v1 }
 0x4d1   : > { %v3320_v19 = vmul.f32 %v3319_v18, %v6584_v32  ;;  %vm3157_vm1 = vweird.f32 %v3116_v4 }
 0x4d2   : > { %v3332_v15 = vadd.f32 0.112945676, %v3331_v11  ;;  %v3357_v23 = vadd.f32 0.00028619796, %v3356_v47  ;;  %v3368_v51 = vadd.f32 0.001143296, %v3367_v59  ;;  %v3215_v47 = vmul.f32 %v6503_v3, %v3203_v16 }
 0x4d3   : > { %v3321_v39 = vadd.f32 0.05243302, %v3320_v19  ;;  %v4366_v59 = vld [vmem:[%s7120_s11 + $0x8] sm:$0xff]  ;;  %v4365_v19 = vld [vmem:[%s7120_s11] sm:$0xff]  ;;  %v3299_v16 = vmul.f32 0.5, %v6593_v31 }
 0x4d4   : > { %v3333_v28 = vmul.f32 %v3332_v15, %v6584_v32  ;;  %v3358_v41 = vmul.f32 %v3357_v23, %v6608_v1  ;;  %v3369_v33 = vmul.f32 %v3368_v51, %v6608_v1  ;;  %3708 = vmatpush.bf16.msrb.mxu3 %v4366_v59 }
 0x4d5   : > { %v3322_v26 = vmul.f32 %v3321_v39, %v6584_v32 }
 0x4d6   : > { %v3334_v54 = vadd.f32 0.4994258, %v3333_v28  ;;  %v4617_v5 = vpop.eup %4616  ;;  %v3359_v57 = vadd.f32 0.0036580483, %v3358_v41  ;;  %v3370_v42 = vadd.f32 0.014752088, %v3369_v33  ;;  %v3227_v41 = vadd.f32 %v6513_v45, %v3215_v47 }
 0x4d7   : > { %v3152_v7 = vmul.f32 %v4617_v5, %v3116_v4  ;;  %vm3158_vm15 = vweird.f32 %v4617_v5  ;;  %v3323_v17 = vadd.f32 0.18741608, %v3322_v26 }
 0x4d8   : > { %v3335_v34 = vmul.f32 %v3334_v54, %v6584_v32  ;;  %v3371_v62 = vmul.f32 %v3370_v42, %v6608_v1  ;;  %v3360_v8 = vmul.f32 %v3359_v57, %v6608_v1  ;;  %vm3159_vm2 = vmor %vm3157_vm1, %vm3158_vm15  ;;  %3709 = vmatpush.bf16.msrb.mxu3 %v4365_v19 }
 0x4d9   : > { %v3153_v48 = vmul.f32 %v4617_v5, %v3152_v7  ;;  %v3324_v15 = vmul.f32 %v3323_v17, %v6584_v32 }
 0x4da   : > { %v3336_v6 = vadd.f32 1.0, %v3335_v34  ;;  %v3372_v52 = vadd.f32 0.112945676, %v3371_v62  ;;  %v3361_v43 = vadd.f32 0.05243302, %v3360_v8 }
 0x4db   : > { %v3154_v35 = vmul.f32 0.5, %v3153_v48 }
 0x4dc   : > { %4618 = vrcp.f32 %v3336_v6  ;;  %v3373_v55 = vmul.f32 %v3372_v52, %v6608_v1  ;;  %v3362_v11 = vmul.f32 %v3361_v43, %v6608_v1  ;;  %v3348_v51 = vand.u32 2147483648, %v3336_v6 }
 0x4dd   : > { %v3155_v61 = vsub.f32 1.5, %v3154_v35  ;;  %v3346_v0 = vand.u32 2147483647, %v3336_v6  ;;  %vm3342_vm4 = vweird.f32 %v3336_v6 }
 0x4de   : > { %v3374_v37 = vadd.f32 0.4994258, %v3373_v55  ;;  %v3363_v28 = vadd.f32 0.18741608, %v3362_v11  ;;  %v3349_v7 = vor.u32 1.1754944e-38, %v3348_v51 }
 0x4df   : > { %v3156_v56 = vmul.f32 %v4617_v5, %v3155_v61  ;;  %vm3347_vm6 = vcmp.eq.f32.partialorder %v3346_v0, 8.507059e+37 }
 0x4e0   : > { %v3375_v20 = vmul.f32 %v3374_v37, %v6608_v1  ;;  %v3364_v34 = vmul.f32 %v3363_v28, %v6608_v1 }
 0x4e1   : > { %v3160_v60 = vsel %vm3159_vm2, %v4617_v5, %v3156_v56  ;;  %v3325_v5 = vadd.f32 1.1283791, %v3324_v15  ;;  %v3298_v56 = vmul.f32 0.5, %v6571_v30 }
 0x4e2   : > { %v4619_v58 = vpop.eup %4618  ;;  %v3376_v29 = vadd.f32 1.0, %v3375_v20  ;;  %v3204_v4 = vmul.f32 %v3160_v60, %v3108_v9  ;;  %v3365_v8 = vadd.f32 1.1283791, %v3364_v34  ;;  %v3053_v60 = vmul.f32 %v6535_v44, %v6535_v44 }
 0x4e3   : > { %v3338_v36 = vmul.f32 %v4619_v58, %v3336_v6  ;;  %vm3343_vm3 = vweird.f32 %v4619_v58  ;;  %v3326_v48 = vmul.f32 %v3325_v5, %v6576_v63 }
 0x4e4   : > { %4620 = vrcp.f32 %v3376_v29  ;;  %v3216_v21 = vmul.f32 %v6503_v3, %v3204_v4  ;;  %vm3344_vm5 = vmor %vm3342_vm4, %vm3343_vm3  ;;  %v3388_v52 = vand.u32 2147483648, %v3376_v29  ;;  %v3386_v22 = vand.u32 2147483647, %v3376_v29 }
 0x4e5   : > { %v3339_v18 = vsub.f32 1.0, %v3338_v36  ;;  %vm3382_vm8 = vweird.f32 %v3376_v29  ;;  %v3366_v61 = vmul.f32 %v3365_v8, %v6601_v25  ;;  %v3069_v25 = vsel %vm512_vm0, %v3053_v60, 0.0 }
 0x4e6   : > { %v3228_v33 = vadd.f32 %v6513_v45, %v3216_v21  ;;  %v3389_v49 = vor.u32 1.1754944e-38, %v3388_v52  ;;  %vm3387_vm12 = vcmp.eq.f32.partialorder %v3386_v22, 8.507059e+37 }
 0x4e7   : > { %v3340_v23 = vmul.f32 %v4619_v58, %v3339_v18 }
 0x4e8   : > { %v3234_v32 = vpack.c.bf16 %v3228_v33, %v3227_v41 }
 0x4e9   : > { %v3341_v54 = vadd.f32 %v4619_v58, %v3340_v23 }
 0x4ea   : > { %v4621_v57 = vpop.eup %4620  ;;  %4260 = vmatmul.msk.bf16.gmra.mxu2 %vm512_vm0, %v3234_v32 }
 0x4eb   : > { %v3345_v42 = vsel %vm3344_vm5, %v4619_v58, %v3341_v54  ;;  %v3378_v2 = vmul.f32 %v4621_v57, %v3376_v29  ;;  %vm3383_vm7 = vweird.f32 %v4621_v57 }
 0x4ec   : > { %v3350_v62 = vsel %vm3347_vm6, %v3349_v7, %v3345_v42  ;;  %vm3384_vm10 = vmor %vm3382_vm8, %vm3383_vm7 }
 0x4ed   : > { %v3379_v39 = vsub.f32 1.0, %v3378_v2  ;;  %v3351_v6 = vmul.f32 %v3350_v62, %v3326_v48 }
 0x4ef   : > { %v3380_v35 = vmul.f32 %v4621_v57, %v3379_v39  ;;  %v4263_v1 = vclamps-f32 %v3351_v6, 1.0 }
 0x4f1   : > { %v3381_v55 = vadd.f32 %v4621_v57, %v3380_v35  ;;  %v3634_v37 = vadd.f32 1.0, %v4263_v1 }
 0x4f3   : > { %v3385_v26 = vsel %vm3384_vm10, %v4621_v57, %v3381_v55  ;;  %v3642_v20 = vmul.f32 %v3634_v37, %v3298_v56 }
 0x4f4   : > { %v3390_v53 = vsel %vm3387_vm12, %v3389_v49, %v3385_v26 }
 0x4f5   : > { %v3391_v43 = vmul.f32 %v3390_v53, %v3366_v61 }
 0x4f7   : > { %v4264_v63 = vclamps-f32 %v3391_v43, 1.0 }
 0x4f9   : > { %v3635_v13 = vadd.f32 1.0, %v4264_v63  ;;  %v3031_v29 = vpop.xlane.xlu0 %3030 }
 0x4fa   : > { %v6694_v42 = vmul.f32 %v3031_v29, %v4900_v40 }
 0x4fb   : > { %v3643_v58 = vmul.f32 %v3635_v13, %v3299_v16 }
 0x4fc   : > { %v3093_v62 = vmul.f32 %v6694_v42, %v6694_v42 }
 0x4fd   : > { %v3650_v9 = vpack.c.bf16 %v3643_v58, %v3642_v20 }
 0x4ff   : > { %4287 = vmatmul.msk.bf16.vlgmr.msrb.gmra.mxu3 %vm2615_vm11, %v3650_v9 }
 0x501   : > { %v3074_v59 = vpop.xlane.xlu0 %3073 }
 0x502   : > { %v3034_v4 = vpop.xlane.xlu1 %3033  ;;  %v3086_v18 = vmul.f32 %v3074_v59, %v4900_v40 }
 0x503   : > { %v6668_v47 = vmul.f32 %v3034_v4, %v4900_v40 }
 0x508   : > { %3070 = vadd.xlane.f32.xlu2 %v3069_v25 }
 0x518   : > { %v2961_v17 = vpop.trf.xlu2 }
 0x519   : > { %v6660_v36 = vadd.f32 %v4886_v27, %v2961_v17  ;;  %v3094_v27 = vmul.f32 %v6668_v47, %v6668_v47 }
 0x51b   : > { %v3035_v30 = vsel %vm512_vm0, %v6660_v36, 0.0  ;;  %v3055_v31 = vmul.f32 %v6660_v36, %v6660_v36  ;;  %v3102_v15 = vsub.f32 %v3086_v18, %v3094_v27 }
 0x51c   : > { %3036 = vadd.xlane.f32.xlu0 %v3035_v30 }
 0x51d   : > { %v3075_v11 = vsel %vm512_vm0, %v3055_v31, 0.0  ;;  %v6673_v21 = vadd.f32 1e-05, %v3102_v15 }
 0x51f   : > { %4622 = vrsqrt.f32 %v6673_v21  ;;  %vm3177_vm9 = vweird.f32 %v6673_v21 }
 0x524   : > { %3076 = vadd.xlane.f32.xlu0 %v3075_v11 }
 0x525   : > { %v6686_v19 = vpop.eup %4622 }
 0x526   : > { %v3172_v7 = vmul.f32 %v6686_v19, %v6673_v21  ;;  %vm3178_vm13 = vweird.f32 %v6686_v19 }
 0x527   : > { %vm6733_vm14 = vmor %vm3177_vm9, %vm3178_vm13 }
 0x528   : > { %v3173_v55 = vmul.f32 %v6686_v19, %v3172_v7 }
 0x52a   : > { %v3174_v13 = vmul.f32 0.5, %v3173_v55  ;;  %v3110_v55 = vsub.f32 %v6538_v14, %v6668_v47  ;;  %v3109_v47 = vsub.f32 %v6535_v44, %v6694_v42 }
 0x52c   : > { %v3175_v11 = vsub.f32 1.5, %v3174_v13 }
 0x532   : > { %v3040_v28 = vpop.xlane.xlu1 %3039 }
 0x533   : > { %v6705_v6 = vmul.f32 %v3040_v28, %v4900_v40 }
 0x535   : > { %v3096_v61 = vmul.f32 %v6705_v6, %v6705_v6 }
 0x53a   : > { %v3080_v39 = vpop.xlane.xlu1 %3079 }
 0x53b   : > { %v3088_v26 = vmul.f32 %v3080_v39, %v4900_v40 }
 0x53d   : > { %v3104_v9 = vsub.f32 %v3088_v26, %v3096_v61 }
 0x53f   : > { %v6724_v59 = vadd.f32 1e-05, %v3104_v9 }
 0x541   : > { %vm3197_vm10 = vweird.f32 %v6724_v59 }
 0x56d   : > { %v3283_v23 = vpop.f32.mrf.mxu2 }
 0x56e   : > { %v6676_v51 = vadd.f32 %v6564_v38, %v3283_v23 }
 0x570   : > { %v6680_v0 = vmul.f32 0.70710677, %v6676_v51 }
 0x572   : > { %v3394_v41 = vmul.f32 %v6680_v0, %v6680_v0 }
 0x574   : > { %v6684_v33 = vmin.f32 %v3394_v41, 16.0 }
 0x575   : > { %v3285_v54 = vpop.f32.mrf.mxu2 }
 0x576   : > { %v3396_v5 = vmul.f32 2.1237322e-06, %v6684_v33  ;;  %v3407_v32 = vmul.f32 3.8918573e-05, %v6684_v33  ;;  %v6691_v57 = vadd.f32 %v6564_v38, %v3285_v54 }
 0x578   : > { %v3397_v34 = vadd.f32 0.00028619796, %v3396_v5  ;;  %v3408_v2 = vadd.f32 0.001143296, %v3407_v32  ;;  %v6701_v48 = vmul.f32 0.70710677, %v6691_v57  ;;  %v3176_v32 = vmul.f32 %v6686_v19, %v3175_v11 }
 0x57a   : > { %v3409_v8 = vmul.f32 %v3408_v2, %v6684_v33  ;;  %v3434_v35 = vmul.f32 %v6701_v48, %v6701_v48  ;;  %v3398_v49 = vmul.f32 %v3397_v34, %v6684_v33 }
 0x57b   : > { %v3071_v52 = vpop.xlane.xlu2 %3070 }
 0x57c   : > { %v3085_v22 = vmul.f32 %v3071_v52, %v4900_v40  ;;  %v3410_v1 = vadd.f32 0.014752088, %v3409_v8  ;;  %v6715_v53 = vmin.f32 %v3434_v35, 16.0  ;;  %v3399_v20 = vadd.f32 0.0036580483, %v3398_v49 }
 0x57d   : > { %v3180_v8 = vsel %vm6733_vm14, %v6686_v19, %v3176_v32 }
 0x57e   : > { %v3101_v43 = vsub.f32 %v3085_v22, %v3093_v62  ;;  %v3411_v37 = vmul.f32 %v3410_v1, %v6684_v33  ;;  %v3436_v63 = vmul.f32 2.1237322e-06, %v6715_v53  ;;  %v3447_v56 = vmul.f32 3.8918573e-05, %v6715_v53 }
 0x57f   : > { %v3400_v29 = vmul.f32 %v3399_v20, %v6684_v33 }
 0x580   : > { %v3117_v16 = vadd.f32 1e-05, %v3101_v43  ;;  %v3412_v58 = vadd.f32 0.112945676, %v3411_v37  ;;  %v3437_v60 = vadd.f32 0.00028619796, %v3436_v63  ;;  %v3206_v63 = vmul.f32 %v3180_v8, %v3110_v55 }
 0x581   : > { %v3448_v25 = vadd.f32 0.001143296, %v3447_v56  ;;  %v3401_v41 = vadd.f32 0.05243302, %v3400_v29 }
 0x582   : > { %4624 = vrsqrt.f32 %v3117_v16  ;;  %v3413_v17 = vmul.f32 %v3412_v58, %v6684_v33  ;;  %v3438_v30 = vmul.f32 %v3437_v60, %v6715_v53  ;;  %vm3167_vm15 = vweird.f32 %v3117_v16 }
 0x583   : > { %v3449_v31 = vmul.f32 %v3448_v25, %v6715_v53  ;;  %4626 = vrsqrt.f32 %v6724_v59  ;;  %v3402_v39 = vmul.f32 %v3401_v41, %v6684_v33 }
 0x584   : > { %v3414_v4 = vadd.f32 0.4994258, %v3413_v17  ;;  %v3439_v27 = vadd.f32 0.0036580483, %v3438_v30  ;;  %v3218_v30 = vmul.f32 %v6503_v3, %v3206_v63 }
 0x585   : > { %v3450_v18 = vadd.f32 0.014752088, %v3449_v31  ;;  %v3403_v37 = vadd.f32 0.18741608, %v3402_v39 }
 0x586   : > { %v3415_v15 = vmul.f32 %v3414_v4, %v6684_v33  ;;  %v3440_v7 = vmul.f32 %v3439_v27, %v6715_v53 }
 0x587   : > { %v3451_v28 = vmul.f32 %v3450_v18, %v6715_v53 }
 0x588   : > { %v4625_v23 = vpop.eup %4624  ;;  %v3416_v54 = vadd.f32 1.0, %v3415_v15  ;;  %v3441_v52 = vadd.f32 0.05243302, %v3440_v7 }
 0x589   : > { %v3162_v5 = vmul.f32 %v4625_v23, %v3117_v16  ;;  %v3452_v34 = vadd.f32 0.112945676, %v3451_v28  ;;  %v6744_v1 = vpop.eup %4626  ;;  %vm3168_vm1 = vweird.f32 %v4625_v23  ;;  %v3404_v16 = vmul.f32 %v3403_v37, %v6684_v33 }
 0x58a   : > { %4628 = vrcp.f32 %v3416_v54  ;;  %v3442_v19 = vmul.f32 %v3441_v52, %v6715_v53  ;;  %v3192_v20 = vmul.f32 %v6744_v1, %v6724_v59  ;;  %vm3169_vm2 = vmor %vm3167_vm15, %vm3168_vm1  ;;  %v3428_v25 = vand.u32 2147483648, %v3416_v54 }
 0x58b   : > { %v3453_v21 = vmul.f32 %v3452_v34, %v6715_v53  ;;  %v3163_v62 = vmul.f32 %v4625_v23, %v3162_v5  ;;  %vm3422_vm4 = vweird.f32 %v3416_v54  ;;  %v3426_v42 = vand.u32 2147483647, %v3416_v54 }
 0x58c   : > { %v3443_v11 = vadd.f32 0.18741608, %v3442_v19  ;;  %v3193_v4 = vmul.f32 %v6744_v1, %v3192_v20  ;;  %v3429_v41 = vor.u32 1.1754944e-38, %v3428_v25  ;;  %v3230_v5 = vadd.f32 %v6513_v45, %v3218_v30 }
 0x58d   : > { %v3454_v35 = vadd.f32 0.4994258, %v3453_v21  ;;  %v3164_v22 = vmul.f32 0.5, %v3163_v62  ;;  %vm3427_vm6 = vcmp.eq.f32.partialorder %v3426_v42, 8.507059e+37  ;;  %vm3198_vm12 = vweird.f32 %v6744_v1 }
 0x58e   : > { %v3444_v34 = vmul.f32 %v3443_v11, %v6715_v53  ;;  %v3194_v62 = vmul.f32 0.5, %v3193_v4  ;;  %vm6771_vm14 = vmor %vm3197_vm10, %vm3198_vm12  ;;  %v3301_v30 = vmul.f32 0.5, %v6691_v57 }
 0x58f   : > { %v3037_v49 = vpop.xlane.xlu0 %3036  ;;  %v3455_v61 = vmul.f32 %v3454_v35, %v6715_v53  ;;  %v3165_v26 = vsub.f32 1.5, %v3164_v22 }
 0x590   : > { %v4629_v43 = vpop.eup %4628  ;;  %v6753_v60 = vmul.f32 %v3037_v49, %v4900_v40  ;;  %v3445_v22 = vadd.f32 1.1283791, %v3444_v34 }
 0x591   : > { %v3418_v56 = vmul.f32 %v4629_v43, %v3416_v54  ;;  %v3456_v13 = vadd.f32 1.0, %v3455_v61  ;;  %v3166_v58 = vmul.f32 %v4625_v23, %v3165_v26  ;;  %vm3423_vm3 = vweird.f32 %v4629_v43 }
 0x592   : > { %v3095_v15 = vmul.f32 %v6753_v60, %v6753_v60  ;;  %vm3424_vm5 = vmor %vm3422_vm4, %vm3423_vm3  ;;  %v3195_v26 = vsub.f32 1.5, %v3194_v62  ;;  %v3446_v63 = vmul.f32 %v3445_v22, %v6701_v48  ;;  %v3300_v48 = vmul.f32 0.5, %v6676_v51 }
 0x593   : > { %v3419_v9 = vsub.f32 1.0, %v3418_v56  ;;  %4630 = vrcp.f32 %v3456_v13  ;;  %v3170_v17 = vsel %vm3169_vm2, %v4625_v23, %v3166_v58  ;;  %v3405_v23 = vadd.f32 1.1283791, %v3404_v16 }
 0x594   : > { %v3205_v29 = vmul.f32 %v3170_v17, %v3109_v47  ;;  %v3468_v55 = vand.u32 2147483648, %v3456_v13  ;;  %v3466_v53 = vand.u32 2147483647, %v3456_v13  ;;  %vm3462_vm8 = vweird.f32 %v3456_v13 }
 0x595   : > { %v3420_v31 = vmul.f32 %v4629_v43, %v3419_v9  ;;  %v3406_v52 = vmul.f32 %v3405_v23, %v6680_v0  ;;  %v3196_v20 = vmul.f32 %v6744_v1, %v3195_v26 }
 0x596   : > { %v3217_v33 = vmul.f32 %v6503_v3, %v3205_v29  ;;  %v3469_v37 = vor.u32 1.1754944e-38, %v3468_v55  ;;  %vm3467_vm13 = vcmp.eq.f32.partialorder %v3466_v53, 8.507059e+37  ;;  %v3112_v29 = vsub.f32 %v6567_v50, %v6705_v6 }
 0x597   : > { %v3077_v27 = vpop.xlane.xlu0 %3076  ;;  %v3421_v18 = vadd.f32 %v4629_v43, %v3420_v31  ;;  %v3200_v17 = vsel %vm6771_vm14, %v6744_v1, %v3196_v20  ;;  %v3111_v1 = vsub.f32 %v6660_v36, %v6753_v60 }
 0x598   : > { %v3087_v28 = vmul.f32 %v3077_v27, %v4900_v40  ;;  %v3229_v54 = vadd.f32 %v6513_v45, %v3217_v33 }
 0x599   : > { %v4631_v32 = vpop.eup %4630  ;;  %v3425_v7 = vsel %vm3424_vm5, %v4629_v43, %v3421_v18  ;;  %v3208_v18 = vmul.f32 %v3200_v17, %v3112_v29 }
 0x59a   : > { %v3103_v2 = vsub.f32 %v3087_v28, %v3095_v15  ;;  %v3458_v21 = vmul.f32 %v4631_v32, %v3456_v13  ;;  %v3430_v39 = vsel %vm3427_vm6, %v3429_v41, %v3425_v7  ;;  %v3235_v40 = vpack.c.bf16 %v3230_v5, %v3229_v54 }
 0x59b   : > { %v3431_v49 = vmul.f32 %v3430_v39, %v3406_v52  ;;  %vm3463_vm7 = vweird.f32 %v4631_v32  ;;  %v3220_v33 = vmul.f32 %v6503_v3, %v3208_v18 }
 0x59c   : > { %v3119_v8 = vadd.f32 1e-05, %v3103_v2  ;;  %v3459_v35 = vsub.f32 1.0, %v3458_v21  ;;  %4261 = vmatmul.msk.bf16.gmra.mxu2 %vm512_vm0, %v3235_v40  ;;  %vm3464_vm9 = vmor %vm3462_vm8, %vm3463_vm7 }
 0x59d   : > { %v4265_v0 = vclamps-f32 %v3431_v49, 1.0  ;;  %v3232_v41 = vadd.f32 %v6513_v45, %v3220_v33 }
 0x59e   : > { %4632 = vrsqrt.f32 %v3119_v8  ;;  %v3460_v61 = vmul.f32 %v4631_v32, %v3459_v35  ;;  %vm3187_vm1 = vweird.f32 %v3119_v8 }
 0x59f   : > { %v3636_v59 = vadd.f32 1.0, %v4265_v0 }
 0x5a0   : > { %v3461_v43 = vadd.f32 %v4631_v32, %v3460_v61 }
 0x5a1   : > { %v3644_v4 = vmul.f32 %v3636_v59, %v3300_v48 }
 0x5a2   : > { %v3465_v56 = vsel %vm3464_vm9, %v4631_v32, %v3461_v43 }
 0x5a3   : > { %v3470_v58 = vsel %vm3467_vm13, %v3469_v37, %v3465_v56 }
 0x5a4   : > { %v4633_v19 = vpop.eup %4632  ;;  %v3471_v13 = vmul.f32 %v3470_v58, %v3446_v63 }
 0x5a5   : > { %v3182_v9 = vmul.f32 %v4633_v19, %v3119_v8  ;;  %vm3188_vm15 = vweird.f32 %v4633_v19 }
 0x5a6   : > { %v4266_v16 = vclamps-f32 %v3471_v13, 1.0  ;;  %vm3189_vm2 = vmor %vm3187_vm1, %vm3188_vm15 }
 0x5a7   : > { %v3183_v25 = vmul.f32 %v4633_v19, %v3182_v9 }
 0x5a8   : > { %v3637_v31 = vadd.f32 1.0, %v4266_v16 }
 0x5a9   : > { %v3184_v11 = vmul.f32 0.5, %v3183_v25 }
 0x5aa   : > { %v3645_v42 = vmul.f32 %v3637_v31, %v3301_v30 }
 0x5ab   : > { %v3185_v27 = vsub.f32 1.5, %v3184_v11 }
 0x5ac   : > { %v3651_v28 = vpack.c.bf16 %v3645_v42, %v3644_v4 }
 0x5ad   : > { %v3186_v15 = vmul.f32 %v4633_v19, %v3185_v27 }
 0x5ae   : > { %4288 = vmatmul.msk.bf16.gmra.mxu3 %vm2615_vm11, %v3651_v28 }
 0x5af   : > { %v3190_v51 = vsel %vm3189_vm2, %v4633_v19, %v3186_v15 }
 0x5b0   : > { %v3207_v57 = vmul.f32 %v3190_v51, %v3111_v1 }
 0x5b2   : > { %v3219_v6 = vmul.f32 %v6503_v3, %v3207_v57 }
 0x5b4   : > { %v3231_v23 = vadd.f32 %v6513_v45, %v3219_v6 }
 0x5b6   : > { %v3236_v5 = vpack.c.bf16 %v3232_v41, %v3231_v23 }
 0x5b8   : > { %4262 = vmatmul.msk.bf16.gmra.mxu2 %vm512_vm0, %v3236_v5 }
 0x61f   : > { %v3288_v32 = vpop.f32.mrf.mxu2 }
 0x620   : > { %v6791_v7 = vadd.f32 %v6564_v38, %v3288_v32 }
 0x622   : > { %v6794_v60 = vmul.f32 0.70710677, %v6791_v7 }
 0x624   : > { %v3474_v34 = vmul.f32 %v6794_v60, %v6794_v60 }
 0x626   : > { %v3475_v2 = vmin.f32 %v3474_v34, 16.0 }
 0x627   : > { %v3290_v54 = vpop.f32.mrf.mxu2 }
 0x628   : > { %v3476_v3 = vmul.f32 2.1237322e-06, %v3475_v2  ;;  %v3487_v21 = vmul.f32 3.8918573e-05, %v3475_v2  ;;  %v6799_v62 = vadd.f32 %v6564_v38, %v3290_v54 }
 0x62a   : > { %v3477_v45 = vadd.f32 0.00028619796, %v3476_v3  ;;  %v3488_v39 = vadd.f32 0.001143296, %v3487_v21  ;;  %v6802_v8 = vmul.f32 0.70710677, %v6799_v62 }
 0x62c   : > { %v3478_v40 = vmul.f32 %v3477_v45, %v3475_v2  ;;  %v3489_v52 = vmul.f32 %v3488_v39, %v3475_v2  ;;  %v3514_v35 = vmul.f32 %v6802_v8, %v6802_v8 }
 0x62e   : > { %v3490_v22 = vadd.f32 0.014752088, %v3489_v52  ;;  %v3515_v55 = vmin.f32 %v3514_v35, 16.0  ;;  %v3479_v49 = vadd.f32 0.0036580483, %v3478_v40 }
 0x630   : > { %v3491_v61 = vmul.f32 %v3490_v22, %v3475_v2  ;;  %v3516_v53 = vmul.f32 2.1237322e-06, %v3515_v55  ;;  %v3527_v26 = vmul.f32 3.8918573e-05, %v3515_v55  ;;  %v3480_v63 = vmul.f32 %v3479_v49, %v3475_v2 }
 0x632   : > { %v3492_v43 = vadd.f32 0.112945676, %v3491_v61  ;;  %v3517_v37 = vadd.f32 0.00028619796, %v3516_v53  ;;  %v3528_v0 = vadd.f32 0.001143296, %v3527_v26 }
 0x633   : > { %v3481_v9 = vadd.f32 0.05243302, %v3480_v63 }
 0x634   : > { %v3493_v56 = vmul.f32 %v3492_v43, %v3475_v2  ;;  %v3518_v19 = vmul.f32 %v3517_v37, %v3515_v55  ;;  %v3529_v20 = vmul.f32 %v3528_v0, %v3515_v55 }
 0x635   : > { %v3482_v11 = vmul.f32 %v3481_v9, %v3475_v2 }
 0x636   : > { %v3494_v58 = vadd.f32 0.4994258, %v3493_v56  ;;  %v3519_v47 = vadd.f32 0.0036580483, %v3518_v19  ;;  %v3530_v13 = vadd.f32 0.014752088, %v3529_v20 }
 0x637   : > { %v3483_v18 = vadd.f32 0.18741608, %v3482_v11 }
 0x638   : > { %v3495_v59 = vmul.f32 %v3494_v58, %v3475_v2  ;;  %v3531_v16 = vmul.f32 %v3530_v13, %v3515_v55  ;;  %v3520_v48 = vmul.f32 %v3519_v47, %v3515_v55 }
 0x639   : > { %v3484_v5 = vmul.f32 %v3483_v18, %v3475_v2 }
 0x63a   : > { %v3496_v17 = vadd.f32 1.0, %v3495_v59  ;;  %v3532_v31 = vadd.f32 0.112945676, %v3531_v16  ;;  %v3521_v4 = vadd.f32 0.05243302, %v3520_v48 }
 0x63b   : > { %v3293_v25 = vpop.f32.mrf.mxu2  ;;  %v3485_v35 = vadd.f32 1.1283791, %v3484_v5 }
 0x63c   : > { %v6807_v30 = vadd.f32 %v6564_v38, %v3293_v25  ;;  %4634 = vrcp.f32 %v3496_v17  ;;  %v3533_v29 = vmul.f32 %v3532_v31, %v3515_v55  ;;  %v3522_v57 = vmul.f32 %v3521_v4, %v3515_v55 }
 0x63d   : > { %v3508_v3 = vand.u32 2147483648, %v3496_v17  ;;  %v3506_v22 = vand.u32 2147483647, %v3496_v17  ;;  %vm3502_vm4 = vweird.f32 %v3496_v17  ;;  %v3486_v56 = vmul.f32 %v3485_v35, %v6794_v60 }
 0x63e   : > { %v6810_v42 = vmul.f32 0.70710677, %v6807_v30  ;;  %v3534_v27 = vadd.f32 0.4994258, %v3533_v29  ;;  %v3523_v21 = vadd.f32 0.18741608, %v3522_v57 }
 0x63f   : > { %v3509_v61 = vor.u32 1.1754944e-38, %v3508_v3  ;;  %vm3507_vm6 = vcmp.eq.f32.partialorder %v3506_v22, 8.507059e+37  ;;  %v3302_v22 = vmul.f32 0.5, %v6791_v7 }
 0x640   : > { %v3554_v15 = vmul.f32 %v6810_v42, %v6810_v42  ;;  %v3535_v28 = vmul.f32 %v3534_v27, %v3515_v55  ;;  %v3524_v53 = vmul.f32 %v3523_v21, %v3515_v55 }
 0x642   : > { %v4635_v51 = vpop.eup %4634  ;;  %v6814_v33 = vmin.f32 %v3554_v15, 16.0  ;;  %v3536_v23 = vadd.f32 1.0, %v3535_v28  ;;  %v3525_v9 = vadd.f32 1.1283791, %v3524_v53 }
 0x643   : > { %v3295_v1 = vpop.f32.mrf.mxu2  ;;  %v3498_v6 = vmul.f32 %v4635_v51, %v3496_v17  ;;  %vm3503_vm3 = vweird.f32 %v4635_v51 }
 0x644   : > { %v6817_v41 = vadd.f32 %v6564_v38, %v3295_v1  ;;  %v3556_v32 = vmul.f32 2.1237322e-06, %v6814_v33  ;;  %v3567_v34 = vmul.f32 3.8918573e-05, %v6814_v33  ;;  %4636 = vrcp.f32 %v3536_v23  ;;  %vm3504_vm5 = vmor %vm3502_vm4, %vm3503_vm3 }
 0x645   : > { %v3499_v54 = vsub.f32 1.0, %v3498_v6  ;;  %v3546_v59 = vand.u32 2147483647, %v3536_v23  ;;  %v3548_v16 = vand.u32 2147483648, %v3536_v23  ;;  %v3526_v27 = vmul.f32 %v3525_v9, %v6802_v8 }
 0x646   : > { %v3557_v39 = vadd.f32 0.00028619796, %v3556_v32  ;;  %v3568_v40 = vadd.f32 0.001143296, %v3567_v34  ;;  %v6822_v52 = vmul.f32 0.70710677, %v6817_v41  ;;  %vm3542_vm8 = vweird.f32 %v3536_v23 }
 0x647   : > { %v3500_v45 = vmul.f32 %v4635_v51, %v3499_v54  ;;  %vm3547_vm12 = vcmp.eq.f32.partialorder %v3546_v59, 8.507059e+37  ;;  %v3549_v28 = vor.u32 1.1754944e-38, %v3548_v16 }
 0x648   : > { %v3569_v2 = vmul.f32 %v3568_v40, %v6814_v33  ;;  %v3594_v49 = vmul.f32 %v6822_v52, %v6822_v52  ;;  %v3558_v37 = vmul.f32 %v3557_v39, %v6814_v33 }
 0x649   : > { %v3501_v38 = vadd.f32 %v4635_v51, %v3500_v45 }
 0x64a   : > { %v4637_v26 = vpop.eup %4636  ;;  %v3570_v0 = vadd.f32 0.014752088, %v3569_v2  ;;  %v6828_v63 = vmin.f32 %v3594_v49, 16.0  ;;  %v3559_v25 = vadd.f32 0.0036580483, %v3558_v37 }
 0x64b   : > { %v3505_v43 = vsel %vm3504_vm5, %v4635_v51, %v3501_v38  ;;  %v3538_v19 = vmul.f32 %v4637_v26, %v3536_v23  ;;  %vm3543_vm7 = vweird.f32 %v4637_v26  ;;  %v3303_v38 = vmul.f32 0.5, %v6799_v62 }
 0x64c   : > { %v3510_v20 = vsel %vm3507_vm6, %v3509_v61, %v3505_v43  ;;  %v3571_v58 = vmul.f32 %v3570_v0, %v6814_v33  ;;  %v3596_v47 = vmul.f32 2.1237322e-06, %v6828_v63  ;;  %v3607_v13 = vmul.f32 3.8918573e-05, %v6828_v63  ;;  %vm3544_vm10 = vmor %vm3542_vm8, %vm3543_vm7 }
 0x64d   : > { %v3539_v55 = vsub.f32 1.0, %v3538_v19  ;;  %v3511_v31 = vmul.f32 %v3510_v20, %v3486_v56  ;;  %v3560_v1 = vmul.f32 %v3559_v25, %v6814_v33  ;;  %vm3767_vm5 = vcmask 1042434  }
 0x64e   : > { %v3572_v17 = vadd.f32 0.112945676, %v3571_v58  ;;  %v3597_v48 = vadd.f32 0.00028619796, %v3596_v47  ;;  %v3608_v60 = vadd.f32 0.001143296, %v3607_v13 }
 0x64f   : > { %v3540_v11 = vmul.f32 %v4637_v26, %v3539_v55  ;;  %v4267_v57 = vclamps-f32 %v3511_v31, 1.0  ;;  %v3561_v21 = vadd.f32 0.05243302, %v3560_v1  ;;  %vm3770_vm6 = vcmask 1043459  }
 0x650   : > { %v3573_v29 = vmul.f32 %v3572_v17, %v6814_v33  ;;  %v3598_v4 = vmul.f32 %v3597_v48, %v6828_v63  ;;  %v3609_v15 = vmul.f32 %v3608_v60, %v6828_v63  ;;  %vm3773_vm7 = vcmask 1044484  }
 0x651   : > { %v3541_v18 = vadd.f32 %v4637_v26, %v3540_v11  ;;  %v3638_v45 = vadd.f32 1.0, %v4267_v57  ;;  %v3562_v61 = vmul.f32 %v3561_v21, %v6814_v33  ;;  %v3305_v21 = vmul.f32 0.5, %v6817_v41 }
 0x652   : > { %v3574_v51 = vadd.f32 0.4994258, %v3573_v29  ;;  %v3599_v5 = vadd.f32 0.0036580483, %v3598_v4  ;;  %v3610_v32 = vadd.f32 0.014752088, %v3609_v15 }
 0x653   : > { %v3545_v6 = vsel %vm3544_vm10, %v4637_v26, %v3541_v18  ;;  %v3646_v53 = vmul.f32 %v3638_v45, %v3302_v22  ;;  %v3563_v20 = vadd.f32 0.18741608, %v3562_v61  ;;  %vm3776_vm8 = vcmask 1045509  }
 0x654   : > { %v3550_v34 = vsel %vm3547_vm12, %v3549_v28, %v3545_v6  ;;  %v3575_v54 = vmul.f32 %v3574_v51, %v6814_v33  ;;  %v3611_v8 = vmul.f32 %v3610_v32, %v6828_v63  ;;  %v3600_v40 = vmul.f32 %v3599_v5, %v6828_v63 }
 0x655   : > { %v3551_v3 = vmul.f32 %v3550_v34, %v3526_v27  ;;  %v3564_v13 = vmul.f32 %v3563_v20, %v6814_v33  ;;  %vm3779_vm10 = vcmask 1046534   ;;  %vm3782_vm12 = vcmask 1047559  }
 0x656   : > { %v3576_v23 = vadd.f32 1.0, %v3575_v54  ;;  %v3612_v35 = vadd.f32 0.112945676, %v3611_v8  ;;  %v3601_v43 = vadd.f32 0.05243302, %v3600_v40  ;;  %v3304_v8 = vmul.f32 0.5, %v6807_v30 }
 0x657   : > { %v4268_v39 = vclamps-f32 %v3551_v3, 1.0  ;;  %v3565_v17 = vadd.f32 1.1283791, %v3564_v13 }
 0x658   : > { %4638 = vrcp.f32 %v3576_v23  ;;  %v3613_v49 = vmul.f32 %v3612_v35, %v6828_v63  ;;  %v3602_v47 = vmul.f32 %v3601_v43, %v6828_v63  ;;  %v3588_v55 = vand.u32 2147483648, %v3576_v23  ;;  %v3711_v35 = vpop.f32.mrf.mxu3 }
 0x659   : > { %v3639_v2 = vadd.f32 1.0, %v4268_v39  ;;  %v3586_v16 = vand.u32 2147483647, %v3576_v23  ;;  %vm3582_vm13 = vweird.f32 %v3576_v23  ;;  %v3566_v27 = vmul.f32 %v3565_v17, %v6810_v42 }
 0x65a   : > { %v3614_v37 = vadd.f32 0.4994258, %v3613_v49  ;;  %v3603_v59 = vadd.f32 0.18741608, %v3602_v47  ;;  %v3589_v11 = vor.u32 1.1754944e-38, %v3588_v55 }
 0x65b   : > { %v3647_v26 = vmul.f32 %v3639_v2, %v3303_v38  ;;  %vm3587_vm15 = vcmp.eq.f32.partialorder %v3586_v16, 8.507059e+37 }
 0x65c   : > { %v3615_v0 = vmul.f32 %v3614_v37, %v6828_v63  ;;  %v3604_v60 = vmul.f32 %v3603_v59, %v6828_v63 }
 0x65d   : > { %v3652_v56 = vpack.c.bf16 %v3647_v26, %v3646_v53 }
 0x65e   : > { %v4639_v19 = vpop.eup %4638  ;;  %v3616_v7 = vadd.f32 1.0, %v3615_v0  ;;  %v3605_v18 = vadd.f32 1.1283791, %v3604_v60 }
 0x65f   : > { %v3578_v58 = vmul.f32 %v4639_v19, %v3576_v23  ;;  %4289 = vmatmul.msk.bf16.gmra.mxu3 %vm2615_vm11, %v3652_v56  ;;  %vm3583_vm9 = vweird.f32 %v4639_v19 }
 0x660   : > { %4640 = vrcp.f32 %v3616_v7  ;;  %vm3584_vm14 = vmor %vm3582_vm13, %vm3583_vm9  ;;  %v3628_v15 = vand.u32 2147483648, %v3616_v7  ;;  %v3626_v51 = vand.u32 2147483647, %v3616_v7  ;;  %vm3622_vm2 = vweird.f32 %v3616_v7  ;;  %v3713_v22 = vpop.f32.mrf.mxu3 }
 0x661   : > { %v3579_v62 = vsub.f32 1.0, %v3578_v58  ;;  %v3606_v32 = vmul.f32 %v3605_v18, %v6822_v52  ;;  %v6859_v52 = vld [vmem:[%s7121_s12] ss:$0 sm:$0xff]  ;;  %vm3786_vm9 = vcmask 257024   ;;  %vm3806_vm13 = vcmask 519424  }
 0x662   : > { %v3629_v6 = vor.u32 1.1754944e-38, %v3628_v15  ;;  %vm3627_vm4 = vcmp.eq.f32.partialorder %v3626_v51, 8.507059e+37  ;;  %v3712_v49 = vadd.f32 %v6859_v52, %v3711_v35  ;;  %v3714_v30 = vadd.f32 %v6859_v52, %v3713_v22 }
 0x663   : > { %v3580_v9 = vmul.f32 %v4639_v19, %v3579_v62 }
 0x664   : > { %v3731_v41 = vadd.f32 %v3712_v49, %v6433_v24  ;;  %v3732_v53 = vadd.f32 %v3714_v30, %v6450_v46 }
 0x665   : > { %v3581_v25 = vadd.f32 %v4639_v19, %v3580_v9 }
 0x666   : > { %v4641_v48 = vpop.eup %4640  ;;  %v3739_v43 = vpack.c.bf16 %v3731_v41, %v3731_v41  ;;  %v3740_v0 = vpack.c.bf16 %v3732_v53, %v3732_v53 }
 0x667   : > { %v3585_v31 = vsel %vm3584_vm14, %v4639_v19, %v3581_v25  ;;  %v3618_v29 = vmul.f32 %v4641_v48, %v3616_v7  ;;  %vm3623_vm1 = vweird.f32 %v4641_v48  ;;  %vm3826_vm14 = vcmask 781824  }
 0x668   : > { %v3590_v4 = vsel %vm3587_vm15, %v3589_v11, %v3585_v31  ;;  %vm3624_vm3 = vmor %vm3622_vm2, %vm3623_vm1  ;;  %v3716_v38 = vpop.f32.mrf.mxu3  ;;  %v6868_v19 = vunpack.c.l.b16 %v3739_v43  ;;  %v6870_v58 = vunpack.c.l.b16 %v3740_v0  ;;  %vm3846_vm15 = vcmask 1044224  }
 0x669   : > { %v3619_v33 = vsub.f32 1.0, %v3618_v29  ;;  %v3591_v28 = vmul.f32 %v3590_v4, %v3566_v27  ;;  %v3717_v61 = vadd.f32 %v6859_v52, %v3716_v38 }
 0x66a   : > { %v3884_v46 = vrot.slane %v6868_v19, 6  ;;  %v3865_v9 = vrot.slane %v6868_v19, 5  ;;  %v3866_v55 = vrot.slane %v6870_v58, 4  ;;  %v3788_v25 = vrot.slane %v6868_v19, 1 }
 0x66b   : > { %v3620_v1 = vmul.f32 %v4641_v48, %v3619_v33  ;;  %v4269_v5 = vclamps-f32 %v3591_v28, 1.0  ;;  %v3733_v37 = vadd.f32 %v3717_v61, %v6507_v10  ;;  %v3885_v10 = vrot.slane %v6870_v58, 5 }
 0x66c   : > { %v3809_v17 = vrot.slane %v6870_v58, 1  ;;  %v3763_v31 = vrot.slane %v6870_v58, 7  ;;  %v3828_v60 = vrot.slane %v6868_v19, 3  ;;  %v3808_v29 = vrot.slane %v6868_v19, 2 }
 0x66d   : > { %v3621_v57 = vadd.f32 %v4641_v48, %v3620_v1  ;;  %v3640_v3 = vadd.f32 1.0, %v4269_v5  ;;  %v3741_v20 = vpack.c.bf16 %v3733_v37, %v3733_v37 }
 0x66f   : > { %v3625_v63 = vsel %vm3624_vm3, %v4641_v48, %v3621_v57  ;;  %v3648_v45 = vmul.f32 %v3640_v3, %v3304_v8  ;;  %v6874_v62 = vunpack.c.l.b16 %v3741_v20  ;;  %v3849_v48 = vrot.slane %v6870_v58, 3 }
 0x670   : > { %v3630_v34 = vsel %vm3627_vm4, %v3629_v6, %v3625_v63  ;;  %v3718_v2 = vpop.f32.mrf.mxu3 }
 0x671   : > { %v3631_v54 = vmul.f32 %v3630_v34, %v3606_v32  ;;  %v3719_v56 = vadd.f32 %v6859_v52, %v3718_v2  ;;  %v3887_v11 = vrot.slane %v6874_v62, 4  ;;  %v3868_v1 = vrot.slane %v6874_v62, 3 }
 0x672   : > { %v3790_v34 = vrot.slane %v6874_v62, 7  ;;  %v3851_v22 = vrot.slane %v6874_v62, 2  ;;  %v3766_v38 = vrot.slane %v6874_v62, 6 }
 0x673   : > { %v4270_v42 = vclamps-f32 %v3631_v54, 1.0  ;;  %v3734_v47 = vadd.f32 %v3719_v56, %v6525_v12  ;;  %v3829_v12 = vrot.slane %v6870_v58, 2 }
 0x675   : > { %v3641_v23 = vadd.f32 1.0, %v4270_v42  ;;  %v3742_v13 = vpack.c.bf16 %v3734_v47, %v3734_v47  ;;  %v4376_v47 = vld [vmem:[%s7122_s13 + $0x38] sm:$0xff] }
 0x676   : > { %4062 = vmatpush.bf16.msra.mxu2 %v4376_v47 }
 0x677   : > { %v3649_v39 = vmul.f32 %v3641_v23, %v3305_v21  ;;  %v6891_v4 = vunpack.c.l.b16 %v3742_v13 }
 0x679   : > { %v3653_v40 = vpack.c.bf16 %v3649_v39, %v3648_v45  ;;  %v3889_v3 = vrot.slane %v6891_v4, 3  ;;  %v3870_v42 = vrot.slane %v6891_v4, 2  ;;  %v3792_v8 = vrot.slane %v6891_v4, 6 }
 0x67a   : > { %v3812_v39 = vrot.slane %v6891_v4, 7  ;;  %v3853_v30 = vrot.slane %v6891_v4, 1  ;;  %v3769_v41 = vrot.slane %v6891_v4, 5 }
 0x67b   : > { %4290 = vmatmul.msk.bf16.gmra.mxu3 %vm2615_vm11, %v3653_v40  ;;  %vm3764_vm11 = vcmask 1041409  }
 0x67c   : > { %v3886_v27 = vsel %vm3764_vm11, %v3885_v10, %v3884_v46  ;;  %v3867_v33 = vsel %vm3764_vm11, %v3866_v55, %v3865_v9  ;;  %v3789_v18 = vsel %vm3764_vm11, %v6870_v58, %v3788_v25  ;;  %v3830_v51 = vsel %vm3764_vm11, %v3829_v12, %v3828_v60  ;;  %v4375_v25 = vld [vmem:[%s7122_s13 + $0x30] sm:$0xff] }
 0x67d   : > { %v3810_v57 = vsel %vm3764_vm11, %v3809_v17, %v3808_v29  ;;  %v3765_v5 = vsel %vm3764_vm11, %v3763_v31, %v6868_v19  ;;  %v3888_v63 = vsel %vm3767_vm5, %v3887_v11, %v3886_v27  ;;  %v3869_v45 = vsel %vm3767_vm5, %v3868_v1, %v3867_v33  ;;  %v4383_v17 = vld [vmem:[%s7122_s13 + $0x70] sm:$0xff]  ;;  %4063 = vmatpush.bf16.msra.mxu2 %v4375_v25 }
 0x67e   : > { %v3811_v35 = vsel %vm3767_vm5, %v6874_v62, %v3810_v57  ;;  %v3791_v2 = vsel %vm3767_vm5, %v3790_v34, %v3789_v18  ;;  %v3890_v61 = vsel %vm3770_vm6, %v3889_v3, %v3888_v63  ;;  %v3871_v53 = vsel %vm3770_vm6, %v3870_v42, %v3869_v45 }
 0x67f   : > { %v6935_v56 = vsel %vm3770_vm6, %v3812_v39, %v3811_v35  ;;  %v3768_v46 = vsel %vm3767_vm5, %v3766_v38, %v3765_v5 }
 0x680   : > { %v3771_v55 = vsel %vm3770_vm6, %v3769_v41, %v3768_v46 }
 0x6e2   : > { %v3721_v26 = vpop.f32.mrf.mxu3 }
 0x6e3   : > { %v3722_v24 = vadd.f32 %v6859_v52, %v3721_v26 }
 0x6e5   : > { %v3735_v59 = vadd.f32 %v3722_v24, %v6535_v44  ;;  %v3848_v44 = vrot.slane %v6868_v19, 4  ;;  %v4384_v24 = vld [vmem:[%s7122_s13 + $0x78] sm:$0xff] }
 0x6e6   : > { %4075 = vmatpush.bf16.msra.mxu3 %v4384_v24 }
 0x6e7   : > { %v3743_v15 = vpack.c.bf16 %v3735_v59, %v3735_v59  ;;  %v3850_v6 = vsel %vm3764_vm11, %v3849_v48, %v3848_v44 }
 0x6e9   : > { %v6911_v21 = vunpack.c.l.b16 %v3743_v15 }
 0x6ea   : > { %v3723_v7 = vpop.f32.mrf.mxu3  ;;  %4076 = vmatpush.bf16.msra.mxu3 %v4383_v17 }
 0x6eb   : > { %v3724_v16 = vadd.f32 %v6859_v52, %v3723_v7  ;;  %v3891_v0 = vrot.slane %v6911_v21, 2  ;;  %v3872_v20 = vrot.slane %v6911_v21, 1  ;;  %v3852_v7 = vsel %vm3767_vm5, %v3851_v22, %v3850_v6 }
 0x6ec   : > { %v3794_v10 = vrot.slane %v6911_v21, 5  ;;  %v3854_v9 = vsel %vm3770_vm6, %v3853_v30, %v3852_v7  ;;  %v3814_v12 = vrot.slane %v6911_v21, 6  ;;  %v3772_v48 = vrot.slane %v6911_v21, 4 }
 0x6ed   : > { %v3736_v28 = vadd.f32 %v3724_v16, %v6538_v14  ;;  %v3831_v14 = vrot.slane %v6874_v62, 1  ;;  %v3834_v16 = vrot.slane %v6911_v21, 7  ;;  %v3855_v60 = vsel %vm3773_vm7, %v6911_v21, %v3854_v9 }
 0x6ee   : > { %v3873_v44 = vsel %vm3773_vm7, %v3872_v20, %v3871_v53 }
 0x6ef   : > { %v3744_v23 = vpack.c.bf16 %v3736_v28, %v3736_v28  ;;  %v3832_v49 = vsel %vm3767_vm5, %v3831_v14, %v3830_v51 }
 0x6f0   : > { %v6929_v26 = vsel %vm3770_vm6, %v6891_v4, %v3832_v49 }
 0x6f1   : > { %v6931_v43 = vunpack.c.l.b16 %v3744_v23  ;;  %v3835_v46 = vsel %vm3773_vm7, %v3834_v16, %v6929_v26 }
 0x6f3   : > { %v3893_v11 = vrot.slane %v6931_v43, 1  ;;  %v3796_v27 = vrot.slane %v6931_v43, 4  ;;  %v3856_v33 = vrot.slane %v6931_v43, 7  ;;  %v3775_v15 = vrot.slane %v6931_v43, 3 }
 0x6f4   : > { %v3874_v1 = vsel %vm3776_vm8, %v6931_v43, %v3873_v44  ;;  %v3836_v51 = vrot.slane %v6931_v43, 6  ;;  %v3912_v44 = vrot.slane %v6931_v43, 2 }
 0x6f5   : > { %v3857_v14 = vsel %vm3776_vm8, %v3856_v33, %v3855_v60  ;;  %v3910_v60 = vrot.slane %v6911_v21, 3 }
 0x6fe   : > { %v3726_v32 = vpop.f32.mrf.mxu3 }
 0x6ff   : > { %v3727_v54 = vadd.f32 %v6859_v52, %v3726_v32  ;;  %v3816_v32 = vrot.slane %v6931_v43, 5 }
 0x701   : > { %v3737_v40 = vadd.f32 %v3727_v54, %v6660_v36  ;;  %v3793_v36 = vsel %vm3770_vm6, %v3792_v8, %v3791_v2 }
 0x702   : > { %v3795_v18 = vsel %vm3773_vm7, %v3794_v10, %v3793_v36 }
 0x703   : > { %v3745_v37 = vpack.c.bf16 %v3737_v40, %v3737_v40  ;;  %v3797_v34 = vsel %vm3776_vm8, %v3796_v27, %v3795_v18 }
 0x705   : > { %v6959_v31 = vunpack.c.l.b16 %v3745_v37 }
 0x706   : > { %v3728_v13 = vpop.f32.mrf.mxu3 }
 0x707   : > { %v3729_v59 = vadd.f32 %v6859_v52, %v3728_v13  ;;  %v3892_v52 = vsel %vm3773_vm7, %v3891_v0, %v3890_v61  ;;  %v3875_v6 = vrot.slane %v6959_v31, 7  ;;  %v3798_v5 = vrot.slane %v6959_v31, 3 }
 0x708   : > { %v3894_v57 = vsel %vm3776_vm8, %v3893_v11, %v3892_v52  ;;  %v3858_v54 = vrot.slane %v6959_v31, 6  ;;  %v3778_v8 = vrot.slane %v6959_v31, 2  ;;  %v3838_v40 = vrot.slane %v6959_v31, 5 }
 0x709   : > { %v3738_v29 = vadd.f32 %v3729_v59, %v6567_v50  ;;  %v3774_v50 = vsel %vm3773_vm7, %v3772_v48, %v3771_v55  ;;  %v3895_v3 = vsel %vm3779_vm10, %v6959_v31, %v3894_v57  ;;  %v3876_v35 = vsel %vm3779_vm10, %v3875_v6, %v3874_v1  ;;  %v4373_v1 = vld [vmem:[%s7122_s13 + $0x20] sm:$0xff]  ;;  %v4380_v57 = vld [vmem:[%s7122_s13 + $0x58] sm:$0xff]  ;;  %v4371_v6 = vld [vmem:[%s7122_s13 + $0x10] sm:$0xff] }
 0x70a   : > { %v3777_v42 = vsel %vm3776_vm8, %v3775_v15, %v3774_v50  ;;  %v3799_v22 = vsel %vm3779_vm10, %v3798_v5, %v3797_v34  ;;  %v3859_v61 = vsel %vm3779_vm10, %v3858_v54, %v3857_v14  ;;  %v3818_v47 = vrot.slane %v6959_v31, 4  ;;  %v4372_v50 = vld [vmem:[%s7122_s13 + $0x18] sm:$0xff]  ;;  %v4379_v5 = vld [vmem:[%s7122_s13 + $0x50] sm:$0xff]  ;;  %v4369_v34 = vld [vmem:[%s7122_s13] sm:$0xff] }
 0x70b   : > { %v3746_v28 = vpack.c.bf16 %v3738_v29, %v3738_v29  ;;  %v3780_v0 = vsel %vm3779_vm10, %v3778_v8, %v3777_v42  ;;  %v3837_v55 = vsel %vm3776_vm8, %v3836_v51, %v3835_v46  ;;  %v3815_v59 = vsel %vm3773_vm7, %v3814_v12, %v6935_v56  ;;  %v4381_v51 = vld [vmem:[%s7122_s13 + $0x60] sm:$0xff] }
 0x70c   : > { %v3839_v25 = vsel %vm3779_vm10, %v3838_v40, %v3837_v55  ;;  %v3817_v17 = vsel %vm3776_vm8, %v3816_v32, %v3815_v59  ;;  %v3904_v48 = vrot.slane %v6870_v58, 6  ;;  %v3906_v52 = vrot.slane %v6874_v62, 5  ;;  %v4370_v32 = vld [vmem:[%s7122_s13 + $0x8] sm:$0xff]  ;;  %v4377_v14 = vld [vmem:[%s7122_s13 + $0x40] sm:$0xff] }
 0x70d   : > { %v6979_v63 = vunpack.c.l.b16 %v3746_v28  ;;  %v3819_v16 = vsel %vm3779_vm10, %v3818_v47, %v3817_v17  ;;  %v3903_v56 = vrot.slane %v6868_v19, 7  ;;  %v3908_v12 = vrot.slane %v6891_v4, 4  ;;  %v4382_v28 = vld [vmem:[%s7122_s13 + $0x68] sm:$0xff] }
 0x70e   : > { %v3914_v62 = vrot.slane %v6959_v31, 1  ;;  %v4374_v31 = vld [vmem:[%s7122_s13 + $0x28] sm:$0xff]  ;;  %4077 = vmatpush.bf16.msra.mxu3 %v4382_v28 }
 0x70f   : > { %v3896_v23 = vrot.slane %v6979_v63, 7  ;;  %v3877_v45 = vrot.slane %v6979_v63, 6  ;;  %v3800_v39 = vrot.slane %v6979_v63, 2  ;;  %v3860_v38 = vrot.slane %v6979_v63, 5  ;;  %4064 = vmatpush.bf16.msra.mxu2 %v4374_v31 }
 0x710   : > { %v3781_v2 = vrot.slane %v6979_v63, 1  ;;  %v3840_v20 = vrot.slane %v6979_v63, 4  ;;  %v3820_v13 = vrot.slane %v6979_v63, 3  ;;  %v3905_v58 = vsel %vm3764_vm11, %v3904_v48, %v3903_v56 }
 0x711   : > { %v3897_v49 = vsel %vm3782_vm12, %v3896_v23, %v3895_v3  ;;  %v3878_v30 = vsel %vm3782_vm12, %v3877_v45, %v3876_v35  ;;  %v3801_v41 = vsel %vm3782_vm12, %v3800_v39, %v3799_v22  ;;  %v3861_v24 = vsel %vm3782_vm12, %v3860_v38, %v3859_v61 }
 0x712   : > { %v3898_v53 = vpack.c.b16 %v3897_v49, %v3897_v49  ;;  %v3879_v36 = vpack.c.b16 %v3878_v30, %v3878_v30  ;;  %v3802_v37 = vpack.c.b16 %v3801_v41, %v3801_v41  ;;  %v3783_v7 = vsel %vm3782_vm12, %v3781_v2, %v3780_v0  ;;  %4078 = vmatpush.bf16.msra.mxu3 %v4381_v51  ;;  %v4527_v2 = vld [vmem:[%s7123_s14] ss:$0 sm:$0xff] }
 0x713   : > { %v3862_v10 = vpack.c.b16 %v3861_v24, %v3861_v24  ;;  %v3784_v9 = vpack.c.b16 %v3783_v7, %v3783_v7  ;;  %v3841_v26 = vsel %vm3782_vm12, %v3840_v20, %v3839_v25  ;;  %v3821_v11 = vsel %vm3782_vm12, %v3820_v13, %v3819_v16  ;;  %4065 = vmatpush.bf16.msra.mxu2 %v4373_v1 }
 0x714   : > { %3899 = vrot.lane.b32.xlu2 %v3898_v53, %s4710_s25  ;;  %3880 = vrot.lane.b32.xlu1 %v3879_v36, %s4711_s26  ;;  %v3842_v29 = vpack.c.b16 %v3841_v26, %v3841_v26  ;;  %v3822_v27 = vpack.c.b16 %v3821_v11, %v3821_v11  ;;  %v3907_v33 = vsel %vm3767_vm5, %v3906_v52, %v3905_v58 }
 0x715   : > { %3803 = vrot.lane.b32.xlu0 %v3802_v37, %s4711_s26  ;;  %3864 = vst.msk [vmem:[#allocation2 + $0x4] sm:$0xf] %vm3786_vm9, %v3862_v10  ;;  %v3909_v18 = vsel %vm3770_vm6, %v3908_v12, %v3907_v33  ;;  %s4104_s26 = sshll.u32 %s4100_s16, 4  ;;  %s4105_s26 = int_to_ptr.hbm [resolvable:$true] %s4104_s26 }
 0x716   : > { %3787 = vst.msk [vmem:[#allocation2] sm:$0xf] %vm3786_vm9, %v3784_v9  ;;  %v3911_v19 = vsel %vm3773_vm7, %v3910_v60, %v3909_v18  ;;  %4079 = vmatpush.bf16.msra.mxu3 %v4380_v57  ;;  %s4659_s5 = sshra.s32 %s4105_s26, 4  ;;  %s4660_s5 = int_to_ptr.hbm [resolvable:$true] %s4659_s5 }
 0x717   : > { %v3913_v4 = vsel %vm3776_vm8, %v3912_v44, %v3911_v19  ;;  %4066 = vmatpush.bf16.msra.mxu2 %v4372_v50  ;;  %s4661_s1 = scalar_lea.hbm %s4660_s5, 8  ;;  %p4666_p0 = scmp.lt.s32.totalorder %s4660_s5, %s7124_s15 }
 0x718   : > { %v3915_v21 = vsel %vm3779_vm10, %v3914_v62, %v3913_v4  ;;  %p4662_p11 = scmp.ne.s32.totalorder %s4660_s5, %s4661_s1 }
 0x719   : > { %v3916_v43 = vsel %vm3782_vm12, %v6979_v63, %v3915_v21  ;;  %v4378_v63 = vld [vmem:[%s7122_s13 + $0x48] sm:$0xff] }
 0x71a   : > { %v3917_v15 = vpack.c.b16 %v3916_v43, %v3916_v43  ;;  %4080 = vmatpush.bf16.msra.mxu3 %v4379_v5  ;;  %p4663_p12 = pnand %p4662_p11, %p4828_p5 }
 0x71b   : > { %4067 = vmatpush.bf16.msra.mxu2 %v4371_v6 }
 0x71c   : > { %3843 = vrot.lane.b32.xlu1 %v3842_v29, %s4712_s22  ;;  %p4664_p13 = pneg %p4663_p12 }
 0x71d   : > { %3823 = vrot.lane.b32.xlu0 %v3822_v27, %s4710_s25  ;;  %s4168_s25 = sshll.u32 %s486_s0, 3 }
 0x71e   : > { %4081 = vmatpush.bf16.msra.mxu3 %v4378_v63  ;;  %s488_s17 = scalar_lea.vmem [#allocation3], %s4168_s25  ;;  %s4665_s25 = scalar_lea.hbm %s7124_s15, 16 }
 0x71f   : > { %4068 = vmatpush.bf16.msra.mxu2 %v4370_v32  ;;  %s4102_s23 = sshll.u32 %s488_s17, 4  ;;  %p4667_p1 = scmp.lt.s32.totalorder %s4665_s25, %s4661_s1  ;;  %s4103_s23 = int_to_ptr.vmem [resolvable:$true] %s4102_s23 }
 0x721   : > { %p4668_p2 = por %p4667_p1, %p4666_p0 }
 0x722   : > { %4082 = vmatpush.bf16.msra.mxu3 %v4377_v14 }
 0x723   : > { %4069 = vmatpush.bf16.msra.mxu2 %v4369_v34  ;;  %p4669_p3 = pnand %p4668_p2, %p4664_p13 }
 0x725   : > { %3918 = vrot.lane.b32.xlu0 %v3917_v15, %s4712_s22 }
 0x76e   : > { %v3900_v42 = vpop.permute.xlu2 %3899 }
 0x786   : > { %v3881_v54 = vpop.permute.xlu1 %3880 }
 0x787   : > { %3883 = vst.msk [vmem:[#allocation2 + $0x4] sm:$0xf] %vm3806_vm13, %v3881_v54  ;;  %v3804_v3 = vpop.permute.xlu0 %3803 }
 0x788   : > { %3807 = vst.msk [vmem:[#allocation2] sm:$0xf] %vm3806_vm13, %v3804_v3 }
 0x789   : > { %3902 = vst.msk [vmem:[#allocation2 + $0x4] sm:$0xf] %vm3826_vm14, %v3900_v42 }
 0x78e   : > { %v3844_v8 = vpop.permute.xlu1 %3843 }
 0x78f   : > { %v3824_v23 = vpop.permute.xlu0 %3823 }
 0x790   : > { %3827 = vst.msk [vmem:[#allocation2] sm:$0xf] %vm3826_vm14, %v3824_v23 }
 0x791   : > { %3847 = vst.msk [vmem:[#allocation2] sm:$0xf] %vm3846_vm15, %v3844_v8 }
 0x797   : > { %v3919_v45 = vpop.permute.xlu0 %3918 }
 0x798   : > { %3921 = vst.msk [vmem:[#allocation2 + $0x4] sm:$0xf] %vm3846_vm15, %v3919_v45 }
 0x79f   : > { %v3922_v39 = vld [vmem:[#allocation2] sm:$0xff] }
 0x7a0   : > { %v3960_v40 = vunpack.c.l.b16 %v3922_v39  ;;  %v3961_v35 = vunpack.c.h.b16 %v3922_v39 }
 0x7a2   : > { %v3962_v22 = vpack.c.b16 %v3960_v40, %v3960_v40  ;;  %v3963_v38 = vpack.c.b16 %v3961_v35, %v3961_v35 }
 0x7a4   : > { %4070 = vmatmul.bf16.vlgmr.msra.gmra.mxu2 %v3962_v22  ;;  %4083 = vmatmul.bf16.vlgmr.msra.gmra.mxu3 %v3963_v38 }
 0x827   : > { %v4071_v49 = vpop.f32.mrf.mxu2  ;;  %v4084_v30 = vpop.f32.mrf.mxu3 }
 0x828   : > { %v4072_v41 = vadd.f32 %v4527_v2, %v4071_v49 }
 0x82a   : > { %v4085_v61 = vadd.f32 %v4084_v30, %v4072_v41 }
 0x82c   : > { %4088 = vst.msk [vmem:[%s488_s17] sm:$0xff] %vm512_vm0, %v4085_v61 }
 0x82d   : > { %4672 = shalt.err (!%p4669_p3)
}
 0x82e   : > { %4409 = dma.vmem_to_hbm [thread:$0]  (%p4828_p5), %s4103_s23, 128, %s4105_s26, %s4090_s4  }
 0x82f   : > { %v4073_v53 = vpop.f32.mrf.mxu2  ;;  %v4086_v36 = vpop.f32.mrf.mxu3 }
 0x830 PF: > { %p4415_p4 = scmp.ge.s32.totalorder %s4707_s21, 2  ;;  %s4116_s0 = sand.u32 1, %s4695_s18  }
 0x831   : > { %s4117_s16 = scalar_lea.sflag [#allocation4], %s4116_s0 }
 0x832   : > { %p4412_p7 = pnand %p4415_p4, %p4832_p6 }
 0x834   : > { %p4413_p8 = pneg %p4412_p7 }
 0x836   : > { %4690 = dma.done.wait (%p4413_p8), %s4117_s16, 128  }
 0x837   : > { %4692 = vsyncadd (%p4413_p8), %s4117_s16, 4294967168  ;;  %p25_p5 = scmp.ge.s32.totalorder %s4816_s24, 4   ;;  %s7223_s18 = smov %s4699_s19 }
 0x838   : > { %s7224_s19 = smov %s4703_s20  ;;  %s7225_s20 = smov %s4826_s27 }
 0x839   : > { %s7226_s21 = smov %s4816_s24  ;;  %27 = sbr.rel (!%p25_p5) target bundleno = 10 (0xa), region = 115 }
 0x83e   :  { %4123 = vsyncpa [#allocation4], 1 }
 0x83f   :  { %4125 = vsyncpa [#allocation4 + $0x1], 1 }

</bundles_post_ra>
